<compile_context>
chip_gen: v5e
topology: v5e:2x2
jax: 0.10.0
libtpu: 0.0.40
codegen_flags: <defaults>
</compile_context>

<pallas_src>
import functools

import jax
import jax.numpy as jnp
from jax.experimental import pallas as pl
from jax.experimental.pallas import tpu as pltpu


# ----------------------------------------------------------------------------
# Fused kernel: fc1 + all DAG-GNN layers + output MLP, one batch element per
# grid step (batch axis is fully independent -> "parallel" for megacore).
# ----------------------------------------------------------------------------
def _dagnn_fused_kernel(feat_ref, adj_ref, sm_ref,
                        fc1_w_ref, fc1_b_ref,
                        gat_qk_ref, gat_b_ref, wr01_ref,
                        w_x_ref, w_m_ref, b_x_ref, b_m_ref,
                        mlp_w0_ref, mlp_b0_ref, mlp_wr_ref, mlp_br_ref,
                        out_w_ref, out_b_ref,
                        logits_ref, adjB_ref,
                        *, N, Dh, n_layers, mlp_layers):
    feat = feat_ref[0]            # (N, De)
    adj = adj_ref[0]              # (N, N)
    sm = sm_ref[0]                # (N, N)

    # ---- fc1 + ReLU ---------------------------------------------------------
    h0 = jnp.dot(feat, fc1_w_ref[...], preferred_element_type=jnp.float32)
    h0 = jnp.maximum(h0 + fc1_b_ref[...], 0.0)                     # (N, Dh)

    row_iota = jax.lax.broadcasted_iota(jnp.int32, (N, 1), 0)      # (N, 1)
    lane_iota = jax.lax.broadcasted_iota(jnp.int32, (1, N), 1)     # (1, N)
    adjB_iota = jax.lax.broadcasted_iota(jnp.int32, (2 * N - 1, N), 0)

    def gru_pair(q, m, w_x, w_m, b_x, b_m):
        # Packed PyTorch GRUCell pair: gru_c(x=q, h=m) + gru_p(x=m, h=q).
        #   w_x = [c_wih | p_whh], w_m = [c_whh | p_wih]  (gate order [r, z, n]).
        gx = jnp.dot(q, w_x, preferred_element_type=jnp.float32) + b_x   # (1, 6Dh)
        gm = jnp.dot(m, w_m, preferred_element_type=jnp.float32) + b_m   # (1, 6Dh)
        gi_c, gh_p = gx[:, :3 * Dh], gx[:, 3 * Dh:]
        gh_c, gi_p = gm[:, :3 * Dh], gm[:, 3 * Dh:]

        def gru(gi, gh, h):
            r = jax.nn.sigmoid(gi[:, :Dh] + gh[:, :Dh])
            z = jax.nn.sigmoid(gi[:, Dh:2 * Dh] + gh[:, Dh:2 * Dh])
            n = jnp.tanh(gi[:, 2 * Dh:] + r * gh[:, 2 * Dh:])
            return (1.0 - z) * n + z * h

        return gru(gi_c, gh_c, m) + gru(gi_p, gh_p, q)

    h_layers = []                                   # H1 of each GNN layer
    adjB = jnp.zeros((2 * N - 1, N), jnp.float32)   # [zero row ; attn rows of all layers]

    h_prev = h0
    # TODO(synk): for N > ~16 switch the unrolled recurrence to lax.fori_loop
    # (unroll=True) with pl.ds row indexing to bound vreg live ranges.
    for l in range(n_layers):
        gqk = gat_qk_ref[l]                         # (2, Dh): rows [wq ; wk]
        wq, wk = gqk[0:1, :], gqk[1:2, :]
        gb = gat_b_ref[l]                           # (1, 1)
        wr01 = wr01_ref[l]                          # (Dh, 2Dh) = [wr0 | wr1]
        w_x, w_m = w_x_ref[l], w_m_ref[l]           # (Dh, 6Dh)
        b_x, b_m = b_x_ref[l], b_m_ref[l]           # (1, 6Dh)

        # Carried state (never round-trips VMEM refs inside the loop):
        H1 = jnp.zeros((N, Dh), jnp.float32)        # produced rows, rest exact 0
        V01 = jnp.zeros((N, 2 * Dh), jnp.float32)   # cached [row@wr0 | row@wr1]
        ks = jnp.zeros((1, N), jnp.float32)         # cached sum(row * wk)

        def emit_row(j, h1_row, H1, V01, ks, wr01=wr01, wk=wk):
            sel = row_iota == j
            H1 = jnp.where(sel, h1_row, H1)
            v01_row = jnp.dot(h1_row, wr01, preferred_element_type=jnp.float32)
            V01 = jnp.where(sel, v01_row, V01)
            k_val = jnp.sum(h1_row * wk, axis=-1, keepdims=True)   # (1, 1)
            ks = jnp.where(lane_iota == j, k_val, ks)
            return H1, V01, ks

        # ---- node 0: no predecessors (GRU state defaults to zeros) ----------
        q0 = h_prev[0:1, :]
        zeros_m = jnp.zeros((1, Dh), jnp.float32)
        h1_0 = gru_pair(q0, zeros_m, w_x, w_m, b_x, b_m)
        H1, V01, ks = emit_row(0, h1_0, H1, V01, ks)

        # ---- sequential DAG recurrence --------------------------------------
        for i in range(1, N):
            q = h_prev[i:i + 1, :]                                   # (1, Dh)

            # GAT logits: Linear([Q;K]) split into query/key halves; key half cached.
            q_score = jnp.sum(q * wq, axis=-1, keepdims=True)        # (1, 1)
            alpha = q_score + ks + gb                                # (1, N)
            adj_row = adj[i:i + 1, :]
            alpha = alpha - (1.0 - adj_row) * 1e30                   # mask_logic
            # Columns j >= i do not exist in the torch loop.  -1e38 underflows to
            # exactly 0.0 after exp() in fp32, so padded attn entries and the
            # zero-initialized H1/V01 rows contribute nothing.
            alpha = jnp.where(lane_iota < i, alpha, -1e38)

            mmax = jnp.max(alpha, axis=-1, keepdims=True)
            e = jnp.exp(alpha - mmax)
            denom = jnp.sum(e, axis=-1, keepdims=True)
            attn = e * pl.reciprocal(denom, approx=False)            # (1, N)

            # Speaker-aware value mix folded into the attention weights:
            #   m = (attn*sm) @ V0 + (attn*(1-sm)) @ V1   with V0/V1 cached per row.
            sm_row = sm[i:i + 1, :]                                  # (1, N)
            w0 = attn * sm_row
            w1 = attn - w0
            m_agg = (jnp.dot(w0, V01[:, :Dh], preferred_element_type=jnp.float32)
                     + jnp.dot(w1, V01[:, Dh:], preferred_element_type=jnp.float32))

            h1_i = gru_pair(q, m_agg, w_x, w_m, b_x, b_m)
            H1, V01, ks = emit_row(i, h1_i, H1, V01, ks)

            r_out = 1 + l * (N - 1) + (i - 1)
            adjB = jnp.where(adjB_iota == r_out, attn, adjB)

        h_layers.append(H1)
        h_prev = H1

    # adjB_list[2] = [zero row ; layer-0 attention rows ; layer-1 attention rows]
    adjB_ref[0] = adjB

    # ---- output MLP ----------------------------------------------------------
    # First layer of out_mlp consumes concat([H0, H1_0, H1_1, features], -1); we
    # avoid the lane concat by summing block matmuls against row-slices of W0.
    mlp_w0 = mlp_w0_ref[...]                       # (Dh*(L+1)+De, Dh)
    x = jnp.dot(h0, mlp_w0[0:Dh, :], preferred_element_type=jnp.float32)
    for l in range(n_layers):
        x = x + jnp.dot(h_layers[l], mlp_w0[(l + 1) * Dh:(l + 2) * Dh, :],
                        preferred_element_type=jnp.float32)
    x = x + jnp.dot(feat, mlp_w0[(n_layers + 1) * Dh:, :],
                    preferred_element_type=jnp.float32)
    x = jnp.maximum(x + mlp_b0_ref[...], 0.0)

    for k in range(mlp_layers - 1):                # remaining Linear+ReLU blocks
        x = jnp.dot(x, mlp_wr_ref[k], preferred_element_type=jnp.float32)
        x = jnp.maximum(x + mlp_br_ref[k], 0.0)

    # nn.Dropout -> inference-time identity.
    logits = jnp.dot(x, out_w_ref[...], preferred_element_type=jnp.float32)
    logits_ref[0] = logits + out_b_ref[...]


# ----------------------------------------------------------------------------
# Host-side weight packing (widen MXU N-dim, reduce operand/DMA count)
# ----------------------------------------------------------------------------
def pack_params(params):
    layers = params['layers']
    hid = params['fc1_w'].shape[1]
    packed = {
        'fc1_w': params['fc1_w'], 'fc1_b': params['fc1_b'],
        'gat_qk': jnp.stack([jnp.concatenate([lp['gat_wq'], lp['gat_wk']], axis=0)
                             for lp in layers]),                       # (L, 2, Dh)
        'gat_b': jnp.stack([lp['gat_b'] for lp in layers]),            # (L, 1, 1)
        'wr01': jnp.stack([jnp.concatenate([lp['wr0'], lp['wr1']], axis=1)
                           for lp in layers]),                         # (L, Dh, 2Dh)
        'w_x': jnp.stack([jnp.concatenate([lp['c_wih'], lp['p_whh']], axis=1)
                          for lp in layers]),                          # (L, Dh, 6Dh)
        'w_m': jnp.stack([jnp.concatenate([lp['c_whh'], lp['p_wih']], axis=1)
                          for lp in layers]),                          # (L, Dh, 6Dh)
        'b_x': jnp.stack([jnp.concatenate([lp['c_bih'], lp['p_bhh']], axis=1)
                          for lp in layers]),                          # (L, 1, 6Dh)
        'b_m': jnp.stack([jnp.concatenate([lp['c_bhh'], lp['p_bih']], axis=1)
                          for lp in layers]),                          # (L, 1, 6Dh)
        'mlp_w0': params['mlp'][0][0], 'mlp_b0': params['mlp'][0][1],
        'out_w': params['out_w'], 'out_b': params['out_b'],
    }
    rest = params['mlp'][1:]
    if rest:
        packed['mlp_wr'] = jnp.stack([w for w, _ in rest])             # (K, Dh, Dh)
        packed['mlp_br'] = jnp.stack([b for _, b in rest])             # (K, 1, Dh)
    else:  # keep operand list static even if mlp_layers == 1 (unused in-kernel)
        packed['mlp_wr'] = jnp.zeros((1, hid, hid), jnp.float32)
        packed['mlp_br'] = jnp.zeros((1, 1, hid), jnp.float32)
    return packed


# ----------------------------------------------------------------------------
# Parameter init (deterministic, synthetic, torch-layout)
# ----------------------------------------------------------------------------
def _uniform(key, shape, scale=0.1):
    return jax.random.uniform(key, shape, jnp.float32, -scale, scale)


def init_params(key, emb_dim, hid, n_layers, mlp_layers, feat_dim):
    keys = iter(jax.random.split(key, 256))
    p = {'fc1_w': _uniform(next(keys), (emb_dim, hid)),
         'fc1_b': _uniform(next(keys), (1, hid)),
         'layers': []}
    for _ in range(n_layers):
        p['layers'].append({
            'gat_wq': _uniform(next(keys), (1, hid)),
            'gat_wk': _uniform(next(keys), (1, hid)),
            'gat_b': _uniform(next(keys), (1, 1)),
            'wr0': _uniform(next(keys), (hid, hid)),
            'wr1': _uniform(next(keys), (hid, hid)),
            'c_wih': _uniform(next(keys), (hid, 3 * hid)),
            'c_whh': _uniform(next(keys), (hid, 3 * hid)),
            'c_bih': _uniform(next(keys), (1, 3 * hid)),
            'c_bhh': _uniform(next(keys), (1, 3 * hid)),
            'p_wih': _uniform(next(keys), (hid, 3 * hid)),
            'p_whh': _uniform(next(keys), (hid, 3 * hid)),
            'p_bih': _uniform(next(keys), (1, 3 * hid)),
            'p_bhh': _uniform(next(keys), (1, 3 * hid)),
        })
    in_dim = hid * (n_layers + 1) + emb_dim
    mlp = []
    dims = [in_dim] + [hid] * mlp_layers
    for a, b in zip(dims[:-1], dims[1:]):          # Linear+ReLU blocks of out_mlp
        mlp.append((_uniform(next(keys), (a, b)), _uniform(next(keys), (1, b))))
    p['mlp'] = mlp
    p['out_w'] = _uniform(next(keys), (hid, feat_dim))
    p['out_b'] = _uniform(next(keys), (1, feat_dim))
    return p


# ----------------------------------------------------------------------------
# Forward wrapper: one pallas_call over a batch grid
# ----------------------------------------------------------------------------
def dagnn_forward(params, features, adj, s_mask, s_mask_onehot, lengths,
                  nodal_att_type=None):
    del s_mask_onehot                       # unused in the reference forward
    # attentive_node_features is the identity when nodal_att_type is None.
    # TODO(synk): 'global'/'past' nodal attention variants not implemented.
    assert nodal_att_type is None
    del lengths

    B, N, De = features.shape
    hid = params['fc1_w'].shape[1]
    L = len(params['layers'])
    mlp_layers = len(params['mlp'])
    feat_dim = params['out_w'].shape[1]

    pk = pack_params(params)

    def full_spec(arr):
        rank = arr.ndim
        return pl.BlockSpec(arr.shape, lambda b, _r=rank: (0,) * _r)

    in_arrays = [features, adj, s_mask,
                 pk['fc1_w'], pk['fc1_b'],
                 pk['gat_qk'], pk['gat_b'], pk['wr01'],
                 pk['w_x'], pk['w_m'], pk['b_x'], pk['b_m'],
                 pk['mlp_w0'], pk['mlp_b0'], pk['mlp_wr'], pk['mlp_br'],
                 pk['out_w'], pk['out_b']]
    in_specs = ([pl.BlockSpec((1, N, De), lambda b: (b, 0, 0)),
                 pl.BlockSpec((1, N, N), lambda b: (b, 0, 0)),
                 pl.BlockSpec((1, N, N), lambda b: (b, 0, 0))]
                + [full_spec(a) for a in in_arrays[3:]])
    out_specs = (pl.BlockSpec((1, N, feat_dim), lambda b: (b, 0, 0)),
                 pl.BlockSpec((1, 2 * N - 1, N), lambda b: (b, 0, 0)))

    kernel = functools.partial(_dagnn_fused_kernel, N=N, Dh=hid,
                               n_layers=L, mlp_layers=mlp_layers)
    logits, adjB2 = pl.pallas_call(
        kernel,
        grid=(B,),
        out_shape=(jax.ShapeDtypeStruct((B, N, feat_dim), jnp.float32),
                   jax.ShapeDtypeStruct((B, 2 * N - 1, N), jnp.float32)),
        in_specs=in_specs,
        out_specs=out_specs,
        compiler_params=pltpu.CompilerParams(dimension_semantics=("parallel",)),
    )(*in_arrays)
    return logits, adjB2


# ----------------------------------------------------------------------------
# Pure-JAX reference (mirrors the PyTorch control flow) for validation
# ----------------------------------------------------------------------------
def _gru_ref(x, h, w_ih, w_hh, b_ih, b_hh):
    hid = h.shape[-1]
    gi = x @ w_ih + b_ih
    gh = h @ w_hh + b_hh
    r = jax.nn.sigmoid(gi[:, :hid] + gh[:, :hid])
    z = jax.nn.sigmoid(gi[:, hid:2 * hid] + gh[:, hid:2 * hid])
    n = jnp.tanh(gi[:, 2 * hid:] + r * gh[:, 2 * hid:])
    return (1.0 - z) * n + z * h


def _dag_layer_ref(h_prev, adj, s_mask, lp):
    B, N, hid = h_prev.shape
    x0 = h_prev[:, 0, :]
    z = jnp.zeros((B, hid), jnp.float32)
    c = _gru_ref(x0, z, lp['c_wih'], lp['c_whh'], lp['c_bih'], lp['c_bhh'])
    p = _gru_ref(z, x0, lp['p_wih'], lp['p_whh'], lp['p_bih'], lp['p_bhh'])
    H1 = (c + p)[:, None, :]
    rows = []
    for i in range(1, N):
        q = h_prev[:, i, :]
        K = H1
        alpha = (jnp.sum(q * lp['gat_wq'], axis=-1, keepdims=True)
                 + jnp.sum(K * lp['gat_wk'][:, None, :], axis=-1)
                 + lp['gat_b'][0, 0])
        alpha = alpha - (1.0 - adj[:, i, :i]) * 1e30
        w = jax.nn.softmax(alpha, axis=-1)
        v0 = K @ lp['wr0']
        v1 = K @ lp['wr1']
        sm = s_mask[:, i, :i][:, :, None]
        v = v0 * sm + v1 * (1.0 - sm)
        m_agg = jnp.sum(w[:, :, None] * v, axis=1)
        c = _gru_ref(q, m_agg, lp['c_wih'], lp['c_whh'], lp['c_bih'], lp['c_bhh'])
        p = _gru_ref(m_agg, q, lp['p_wih'], lp['p_whh'], lp['p_bih'], lp['p_bhh'])
        H1 = jnp.concatenate([H1, (c + p)[:, None, :]], axis=1)
        rows.append(jnp.pad(w, ((0, 0), (0, N - i)))[:, None, :])
    return H1, jnp.concatenate(rows, axis=1)


def dagnn_reference(params, features, adj, s_mask, lengths):
    del lengths
    B, N, De = features.shape
    hid = params['fc1_w'].shape[1]
    h0 = jax.nn.relu(features.reshape(B * N, De) @ params['fc1_w']
                     + params['fc1_b']).reshape(B, N, hid)
    h_list = [h0]
    attn_list = []
    h_cur = h0
    for lp in params['layers']:
        h_cur, attn = _dag_layer_ref(h_cur, adj, s_mask, lp)
        h_list.append(h_cur)
        attn_list.append(attn)
    h_list.append(features)
    h = jnp.concatenate(h_list, axis=2)
    x = h.reshape(B * N, -1)
    for w, b in params['mlp']:
        x = jax.nn.relu(x @ w + b)
    logits = (x @ params['out_w'] + params['out_b']).reshape(B, N, -1)
    zero_row = jnp.zeros((B, 1, N), jnp.float32)
    adjB2 = jnp.concatenate([zero_row, attn_list[0], attn_list[1]], axis=1)
    return logits, adjB2


# ----------------------------------------------------------------------------
if __name__ == "__main__":
    B, N = 2, 8
    emb_dim, hid, feat_dim = 48, 32, 6
    gnn_layers, mlp_layers = 2, 2

    key = jax.random.PRNGKey(0)
    kp, kf, ks = jax.random.split(key, 3)
    params = init_params(kp, emb_dim, hid, gnn_layers, mlp_layers, feat_dim)

    features = jax.random.normal(kf, (B, N, emb_dim), jnp.float32)
    # DAG adjacency: each utterance attends to up to 3 preceding utterances.
    i_idx = jnp.arange(N)[:, None]
    j_idx = jnp.arange(N)[None, :]
    adj = ((j_idx < i_idx) & (j_idx >= i_idx - 3)).astype(jnp.float32)
    adj = jnp.broadcast_to(adj, (B, N, N))
    s_mask = (jax.random.uniform(ks, (B, N, N)) > 0.5).astype(jnp.float32)
    s_mask_onehot = jnp.stack([1.0 - s_mask, s_mask], axis=-1)   # unused downstream
    lengths = jnp.array([N, N - 2], jnp.int32)                   # unused (nodal_att_type=None)

    logits, adjB2 = dagnn_forward(params, features, adj, s_mask,
                                  s_mask_onehot, lengths, nodal_att_type=None)
    jax.block_until_ready((logits, adjB2))

    ref_logits, ref_adjB2 = dagnn_reference(params, features, adj, s_mask, lengths)

    assert logits.shape == (B, N, feat_dim)
    assert adjB2.shape == (B, 2 * N - 1, N)
    assert jnp.allclose(logits, ref_logits, atol=2e-2, rtol=2e-2)
    assert jnp.allclose(adjB2, ref_adjB2, atol=2e-2, rtol=2e-2)
    print("KERNEL_OK")
</pallas_src>

<mosaic_0001>
module attributes {stable_mosaic.version = 11 : i64} {
  func.func @_dagnn_fused_kernel(%arg0: i32, %arg1: memref<1x8x48xf32, #tpu.memory_space<vmem>>, %arg2: memref<1x8x8xf32, #tpu.memory_space<vmem>>, %arg3: memref<1x8x8xf32, #tpu.memory_space<vmem>>, %arg4: memref<48x32xf32, #tpu.memory_space<vmem>>, %arg5: memref<1x32xf32, #tpu.memory_space<vmem>>, %arg6: memref<2x2x32xf32, #tpu.memory_space<vmem>>, %arg7: memref<2x1x1xf32, #tpu.memory_space<vmem>>, %arg8: memref<2x32x64xf32, #tpu.memory_space<vmem>>, %arg9: memref<2x32x192xf32, #tpu.memory_space<vmem>>, %arg10: memref<2x32x192xf32, #tpu.memory_space<vmem>>, %arg11: memref<2x1x192xf32, #tpu.memory_space<vmem>>, %arg12: memref<2x1x192xf32, #tpu.memory_space<vmem>>, %arg13: memref<144x32xf32, #tpu.memory_space<vmem>>, %arg14: memref<1x32xf32, #tpu.memory_space<vmem>>, %arg15: memref<1x32x32xf32, #tpu.memory_space<vmem>>, %arg16: memref<1x1x32xf32, #tpu.memory_space<vmem>>, %arg17: memref<32x6xf32, #tpu.memory_space<vmem>>, %arg18: memref<1x6xf32, #tpu.memory_space<vmem>>, %arg19: memref<1x8x6xf32, #tpu.memory_space<vmem>>, %arg20: memref<1x15x8xf32, #tpu.memory_space<vmem>>) attributes {dimension_semantics = [#tpu.dimension_semantics<parallel>], iteration_bounds = array<i64: 2>, scalar_prefetch = 0 : i64, scratch_operands = 0 : i64, tpu.core_type = #tpu.core_type<tc>, window_params = [{transform_indices = @transform_0, window_bounds = array<i64: 1, 8, 48>}, {transform_indices = @transform_1, window_bounds = array<i64: 1, 8, 8>}, {transform_indices = @transform_2, window_bounds = array<i64: 1, 8, 8>}, {pipeline_mode = #tpu.pipeline_mode<synchronous>, transform_indices = @transform_3, window_bounds = array<i64: 48, 32>}, {pipeline_mode = #tpu.pipeline_mode<synchronous>, transform_indices = @transform_4, window_bounds = array<i64: 1, 32>}, {pipeline_mode = #tpu.pipeline_mode<synchronous>, transform_indices = @transform_5, window_bounds = array<i64: 2, 2, 32>}, {pipeline_mode = #tpu.pipeline_mode<synchronous>, transform_indices = @transform_6, window_bounds = array<i64: 2, 1, 1>}, {pipeline_mode = #tpu.pipeline_mode<synchronous>, transform_indices = @transform_7, window_bounds = array<i64: 2, 32, 64>}, {pipeline_mode = #tpu.pipeline_mode<synchronous>, transform_indices = @transform_8, window_bounds = array<i64: 2, 32, 192>}, {pipeline_mode = #tpu.pipeline_mode<synchronous>, transform_indices = @transform_9, window_bounds = array<i64: 2, 32, 192>}, {pipeline_mode = #tpu.pipeline_mode<synchronous>, transform_indices = @transform_10, window_bounds = array<i64: 2, 1, 192>}, {pipeline_mode = #tpu.pipeline_mode<synchronous>, transform_indices = @transform_11, window_bounds = array<i64: 2, 1, 192>}, {pipeline_mode = #tpu.pipeline_mode<synchronous>, transform_indices = @transform_12, window_bounds = array<i64: 144, 32>}, {pipeline_mode = #tpu.pipeline_mode<synchronous>, transform_indices = @transform_13, window_bounds = array<i64: 1, 32>}, {pipeline_mode = #tpu.pipeline_mode<synchronous>, transform_indices = @transform_14, window_bounds = array<i64: 1, 32, 32>}, {pipeline_mode = #tpu.pipeline_mode<synchronous>, transform_indices = @transform_15, window_bounds = array<i64: 1, 1, 32>}, {pipeline_mode = #tpu.pipeline_mode<synchronous>, transform_indices = @transform_16, window_bounds = array<i64: 32, 6>}, {pipeline_mode = #tpu.pipeline_mode<synchronous>, transform_indices = @transform_17, window_bounds = array<i64: 1, 6>}, {transform_indices = @transform_18, window_bounds = array<i64: 1, 8, 6>}, {transform_indices = @transform_19, window_bounds = array<i64: 1, 15, 8>}]} {
    %c0 = arith.constant 0 : index
    %c0_0 = arith.constant 0 : index
    %c0_1 = arith.constant 0 : index
    %0 = vector.load %arg1[%c0, %c0_0, %c0_1] : memref<1x8x48xf32, #tpu.memory_space<vmem>>, vector<1x8x48xf32>
    %1 = vector.shape_cast %0 : vector<1x8x48xf32> to vector<8x48xf32>
    %c0_2 = arith.constant 0 : index
    %c0_3 = arith.constant 0 : index
    %c0_4 = arith.constant 0 : index
    %2 = vector.load %arg2[%c0_2, %c0_3, %c0_4] : memref<1x8x8xf32, #tpu.memory_space<vmem>>, vector<1x8x8xf32>
    %3 = vector.shape_cast %2 : vector<1x8x8xf32> to vector<8x8xf32>
    %c0_5 = arith.constant 0 : index
    %c0_6 = arith.constant 0 : index
    %c0_7 = arith.constant 0 : index
    %4 = vector.load %arg3[%c0_5, %c0_6, %c0_7] : memref<1x8x8xf32, #tpu.memory_space<vmem>>, vector<1x8x8xf32>
    %5 = vector.shape_cast %4 : vector<1x8x8xf32> to vector<8x8xf32>
    %c0_8 = arith.constant 0 : index
    %c0_9 = arith.constant 0 : index
    %6 = vector.load %arg4[%c0_8, %c0_9] : memref<48x32xf32, #tpu.memory_space<vmem>>, vector<48x32xf32>
    %cst = arith.constant dense<0.000000e+00> : vector<8x32xf32>
    %7 = tpu.matmul %1, %6, %cst {dimension_numbers = #tpu.dot_dimension_numbers<[1], [0], [0], [1], [0, 0, 1, 1], [], []>} : vector<8x48xf32>, vector<48x32xf32>, vector<8x32xf32> -> vector<8x32xf32>
    %c0_10 = arith.constant 0 : index
    %c0_11 = arith.constant 0 : index
    %8 = vector.load %arg5[%c0_10, %c0_11] : memref<1x32xf32, #tpu.memory_space<vmem>>, vector<1x32xf32>
    %9 = vector.broadcast %8 : vector<1x32xf32> to vector<8x32xf32>
    %10 = arith.addf %7, %9 : vector<8x32xf32>
    %cst_12 = arith.constant 0.000000e+00 : f32
    %11 = vector.broadcast %cst_12 : f32 to vector<8x32xf32>
    %12 = arith.maximumf %10, %11 : vector<8x32xf32>
    %13 = tpu.iota {dimensions = array<i32: 0>} : vector<8x1xi32>
    %14 = tpu.iota {dimensions = array<i32: 1>} : vector<1x8xi32>
    %15 = tpu.iota {dimensions = array<i32: 0>} : vector<15x8xi32>
    %cst_13 = arith.constant 0.000000e+00 : f32
    %16 = vector.broadcast %cst_13 : f32 to vector<15x8xf32>
    %c0_14 = arith.constant 0 : index
    %c0_15 = arith.constant 0 : index
    %c0_16 = arith.constant 0 : index
    %17 = vector.load %arg6[%c0_14, %c0_15, %c0_16] : memref<2x2x32xf32, #tpu.memory_space<vmem>>, vector<1x2x32xf32>
    %18 = vector.shape_cast %17 : vector<1x2x32xf32> to vector<2x32xf32>
    %19 = vector.extract_strided_slice %18 {offsets = [0, 0], sizes = [1, 32], strides = [1, 1]} : vector<2x32xf32> to vector<1x32xf32>
    %20 = vector.extract_strided_slice %18 {offsets = [1, 0], sizes = [1, 32], strides = [1, 1]} : vector<2x32xf32> to vector<1x32xf32>
    %c0_17 = arith.constant 0 : index
    %c0_18 = arith.constant 0 : index
    %c0_19 = arith.constant 0 : index
    %21 = vector.load %arg7[%c0_17, %c0_18, %c0_19] : memref<2x1x1xf32, #tpu.memory_space<vmem>>, vector<1x1x1xf32>
    %22 = vector.shape_cast %21 : vector<1x1x1xf32> to vector<1x1xf32>
    %c0_20 = arith.constant 0 : index
    %c0_21 = arith.constant 0 : index
    %c0_22 = arith.constant 0 : index
    %23 = vector.load %arg8[%c0_20, %c0_21, %c0_22] : memref<2x32x64xf32, #tpu.memory_space<vmem>>, vector<1x32x64xf32>
    %24 = vector.shape_cast %23 : vector<1x32x64xf32> to vector<32x64xf32>
    %c0_23 = arith.constant 0 : index
    %c0_24 = arith.constant 0 : index
    %c0_25 = arith.constant 0 : index
    %25 = vector.load %arg9[%c0_23, %c0_24, %c0_25] : memref<2x32x192xf32, #tpu.memory_space<vmem>>, vector<1x32x192xf32>
    %26 = vector.shape_cast %25 : vector<1x32x192xf32> to vector<32x192xf32>
    %c0_26 = arith.constant 0 : index
    %c0_27 = arith.constant 0 : index
    %c0_28 = arith.constant 0 : index
    %27 = vector.load %arg10[%c0_26, %c0_27, %c0_28] : memref<2x32x192xf32, #tpu.memory_space<vmem>>, vector<1x32x192xf32>
    %28 = vector.shape_cast %27 : vector<1x32x192xf32> to vector<32x192xf32>
    %c0_29 = arith.constant 0 : index
    %c0_30 = arith.constant 0 : index
    %c0_31 = arith.constant 0 : index
    %29 = vector.load %arg11[%c0_29, %c0_30, %c0_31] : memref<2x1x192xf32, #tpu.memory_space<vmem>>, vector<1x1x192xf32>
    %30 = vector.shape_cast %29 : vector<1x1x192xf32> to vector<1x192xf32>
    %c0_32 = arith.constant 0 : index
    %c0_33 = arith.constant 0 : index
    %c0_34 = arith.constant 0 : index
    %31 = vector.load %arg12[%c0_32, %c0_33, %c0_34] : memref<2x1x192xf32, #tpu.memory_space<vmem>>, vector<1x1x192xf32>
    %32 = vector.shape_cast %31 : vector<1x1x192xf32> to vector<1x192xf32>
    %cst_35 = arith.constant 0.000000e+00 : f32
    %33 = vector.broadcast %cst_35 : f32 to vector<8x32xf32>
    %cst_36 = arith.constant 0.000000e+00 : f32
    %34 = vector.broadcast %cst_36 : f32 to vector<8x64xf32>
    %cst_37 = arith.constant 0.000000e+00 : f32
    %35 = vector.broadcast %cst_37 : f32 to vector<1x8xf32>
    %36 = vector.extract_strided_slice %12 {offsets = [0, 0], sizes = [1, 32], strides = [1, 1]} : vector<8x32xf32> to vector<1x32xf32>
    %cst_38 = arith.constant 0.000000e+00 : f32
    %37 = vector.broadcast %cst_38 : f32 to vector<1x32xf32>
    %cst_39 = arith.constant dense<0.000000e+00> : vector<1x192xf32>
    %38 = tpu.matmul %36, %26, %cst_39 {dimension_numbers = #tpu.dot_dimension_numbers<[1], [0], [0], [1], [0, 0, 1, 1], [], []>} : vector<1x32xf32>, vector<32x192xf32>, vector<1x192xf32> -> vector<1x192xf32>
    %39 = arith.addf %38, %30 : vector<1x192xf32>
    %cst_40 = arith.constant dense<0.000000e+00> : vector<1x192xf32>
    %40 = tpu.matmul %37, %28, %cst_40 {dimension_numbers = #tpu.dot_dimension_numbers<[1], [0], [0], [1], [0, 0, 1, 1], [], []>} : vector<1x32xf32>, vector<32x192xf32>, vector<1x192xf32> -> vector<1x192xf32>
    %41 = arith.addf %40, %32 : vector<1x192xf32>
    %42 = vector.extract_strided_slice %39 {offsets = [0, 0], sizes = [1, 96], strides = [1, 1]} : vector<1x192xf32> to vector<1x96xf32>
    %43 = vector.extract_strided_slice %39 {offsets = [0, 96], sizes = [1, 96], strides = [1, 1]} : vector<1x192xf32> to vector<1x96xf32>
    %44 = vector.extract_strided_slice %41 {offsets = [0, 0], sizes = [1, 96], strides = [1, 1]} : vector<1x192xf32> to vector<1x96xf32>
    %45 = vector.extract_strided_slice %41 {offsets = [0, 96], sizes = [1, 96], strides = [1, 1]} : vector<1x192xf32> to vector<1x96xf32>
    %46 = vector.extract_strided_slice %42 {offsets = [0, 0], sizes = [1, 32], strides = [1, 1]} : vector<1x96xf32> to vector<1x32xf32>
    %47 = vector.extract_strided_slice %44 {offsets = [0, 0], sizes = [1, 32], strides = [1, 1]} : vector<1x96xf32> to vector<1x32xf32>
    %48 = arith.addf %46, %47 : vector<1x32xf32>
    %49 = arith.negf %48 : vector<1x32xf32>
    %50 = math.exp %49 : vector<1x32xf32>
    %cst_41 = arith.constant 1.000000e+00 : f32
    %51 = vector.broadcast %cst_41 : f32 to vector<1x32xf32>
    %52 = arith.addf %51, %50 : vector<1x32xf32>
    %53 = arith.divf %51, %52 : vector<1x32xf32>
    %54 = vector.extract_strided_slice %42 {offsets = [0, 32], sizes = [1, 32], strides = [1, 1]} : vector<1x96xf32> to vector<1x32xf32>
    %55 = vector.extract_strided_slice %44 {offsets = [0, 32], sizes = [1, 32], strides = [1, 1]} : vector<1x96xf32> to vector<1x32xf32>
    %56 = arith.addf %54, %55 : vector<1x32xf32>
    %57 = arith.negf %56 : vector<1x32xf32>
    %58 = math.exp %57 : vector<1x32xf32>
    %cst_42 = arith.constant 1.000000e+00 : f32
    %59 = vector.broadcast %cst_42 : f32 to vector<1x32xf32>
    %60 = arith.addf %59, %58 : vector<1x32xf32>
    %61 = arith.divf %59, %60 : vector<1x32xf32>
    %62 = vector.extract_strided_slice %42 {offsets = [0, 64], sizes = [1, 32], strides = [1, 1]} : vector<1x96xf32> to vector<1x32xf32>
    %63 = vector.extract_strided_slice %44 {offsets = [0, 64], sizes = [1, 32], strides = [1, 1]} : vector<1x96xf32> to vector<1x32xf32>
    %64 = arith.mulf %53, %63 : vector<1x32xf32>
    %65 = arith.addf %62, %64 : vector<1x32xf32>
    %66 = math.tanh %65 : vector<1x32xf32>
    %cst_43 = arith.constant 1.000000e+00 : f32
    %67 = vector.broadcast %cst_43 : f32 to vector<1x32xf32>
    %68 = arith.subf %67, %61 : vector<1x32xf32>
    %69 = arith.mulf %68, %66 : vector<1x32xf32>
    %70 = arith.mulf %61, %37 : vector<1x32xf32>
    %71 = arith.addf %69, %70 : vector<1x32xf32>
    %72 = vector.extract_strided_slice %45 {offsets = [0, 0], sizes = [1, 32], strides = [1, 1]} : vector<1x96xf32> to vector<1x32xf32>
    %73 = vector.extract_strided_slice %43 {offsets = [0, 0], sizes = [1, 32], strides = [1, 1]} : vector<1x96xf32> to vector<1x32xf32>
    %74 = arith.addf %72, %73 : vector<1x32xf32>
    %75 = arith.negf %74 : vector<1x32xf32>
    %76 = math.exp %75 : vector<1x32xf32>
    %cst_44 = arith.constant 1.000000e+00 : f32
    %77 = vector.broadcast %cst_44 : f32 to vector<1x32xf32>
    %78 = arith.addf %77, %76 : vector<1x32xf32>
    %79 = arith.divf %77, %78 : vector<1x32xf32>
    %80 = vector.extract_strided_slice %45 {offsets = [0, 32], sizes = [1, 32], strides = [1, 1]} : vector<1x96xf32> to vector<1x32xf32>
    %81 = vector.extract_strided_slice %43 {offsets = [0, 32], sizes = [1, 32], strides = [1, 1]} : vector<1x96xf32> to vector<1x32xf32>
    %82 = arith.addf %80, %81 : vector<1x32xf32>
    %83 = arith.negf %82 : vector<1x32xf32>
    %84 = math.exp %83 : vector<1x32xf32>
    %cst_45 = arith.constant 1.000000e+00 : f32
    %85 = vector.broadcast %cst_45 : f32 to vector<1x32xf32>
    %86 = arith.addf %85, %84 : vector<1x32xf32>
    %87 = arith.divf %85, %86 : vector<1x32xf32>
    %88 = vector.extract_strided_slice %45 {offsets = [0, 64], sizes = [1, 32], strides = [1, 1]} : vector<1x96xf32> to vector<1x32xf32>
    %89 = vector.extract_strided_slice %43 {offsets = [0, 64], sizes = [1, 32], strides = [1, 1]} : vector<1x96xf32> to vector<1x32xf32>
    %90 = arith.mulf %79, %89 : vector<1x32xf32>
    %91 = arith.addf %88, %90 : vector<1x32xf32>
    %92 = math.tanh %91 : vector<1x32xf32>
    %cst_46 = arith.constant 1.000000e+00 : f32
    %93 = vector.broadcast %cst_46 : f32 to vector<1x32xf32>
    %94 = arith.subf %93, %87 : vector<1x32xf32>
    %95 = arith.mulf %94, %92 : vector<1x32xf32>
    %96 = arith.mulf %87, %36 : vector<1x32xf32>
    %97 = arith.addf %95, %96 : vector<1x32xf32>
    %98 = arith.addf %71, %97 : vector<1x32xf32>
    %c0_i32 = arith.constant 0 : i32
    %99 = vector.broadcast %c0_i32 : i32 to vector<8x1xi32>
    %100 = arith.cmpi eq, %13, %99 : vector<8x1xi32>
    %101 = vector.shape_cast %100 : vector<8x1xi1> to vector<8x1xi1>
    %102 = vector.broadcast %101 : vector<8x1xi1> to vector<8x32xi1>
    %103 = vector.shape_cast %98 : vector<1x32xf32> to vector<1x32xf32>
    %104 = vector.broadcast %103 : vector<1x32xf32> to vector<8x32xf32>
    %105 = arith.select %102, %104, %33 : vector<8x32xi1>, vector<8x32xf32>
    %cst_47 = arith.constant dense<0.000000e+00> : vector<1x64xf32>
    %106 = tpu.matmul %98, %24, %cst_47 {dimension_numbers = #tpu.dot_dimension_numbers<[1], [0], [0], [1], [0, 0, 1, 1], [], []>} : vector<1x32xf32>, vector<32x64xf32>, vector<1x64xf32> -> vector<1x64xf32>
    %107 = vector.shape_cast %100 : vector<8x1xi1> to vector<8x1xi1>
    %108 = vector.broadcast %107 : vector<8x1xi1> to vector<8x64xi1>
    %109 = vector.shape_cast %106 : vector<1x64xf32> to vector<1x64xf32>
    %110 = vector.broadcast %109 : vector<1x64xf32> to vector<8x64xf32>
    %111 = arith.select %108, %110, %34 : vector<8x64xi1>, vector<8x64xf32>
    %112 = arith.mulf %98, %20 : vector<1x32xf32>
    %cst_48 = arith.constant dense<0.000000e+00> : vector<1xf32>
    %113 = vector.multi_reduction <add>, %112, %cst_48 [1] : vector<1x32xf32> to vector<1xf32>
    %114 = vector.shape_cast %113 : vector<1xf32> to vector<1x1xf32>
    %c0_i32_49 = arith.constant 0 : i32
    %115 = vector.broadcast %c0_i32_49 : i32 to vector<1x8xi32>
    %116 = arith.cmpi eq, %14, %115 : vector<1x8xi32>
    %117 = vector.shape_cast %114 : vector<1x1xf32> to vector<1x1xf32>
    %118 = vector.broadcast %117 : vector<1x1xf32> to vector<1x8xf32>
    %119 = arith.select %116, %118, %35 : vector<1x8xi1>, vector<1x8xf32>
    %120 = vector.extract_strided_slice %12 {offsets = [1, 0], sizes = [1, 32], strides = [1, 1]} : vector<8x32xf32> to vector<1x32xf32>
    %121 = arith.mulf %120, %19 : vector<1x32xf32>
    %cst_50 = arith.constant dense<0.000000e+00> : vector<1xf32>
    %122 = vector.multi_reduction <add>, %121, %cst_50 [1] : vector<1x32xf32> to vector<1xf32>
    %123 = vector.shape_cast %122 : vector<1xf32> to vector<1x1xf32>
    %124 = vector.broadcast %123 : vector<1x1xf32> to vector<1x8xf32>
    %125 = arith.addf %124, %119 : vector<1x8xf32>
    %126 = vector.broadcast %22 : vector<1x1xf32> to vector<1x8xf32>
    %127 = arith.addf %125, %126 : vector<1x8xf32>
    %128 = vector.extract_strided_slice %3 {offsets = [1, 0], sizes = [1, 8], strides = [1, 1]} : vector<8x8xf32> to vector<1x8xf32>
    %cst_51 = arith.constant 1.000000e+00 : f32
    %129 = vector.broadcast %cst_51 : f32 to vector<1x8xf32>
    %130 = arith.subf %129, %128 : vector<1x8xf32>
    %cst_52 = arith.constant 1.000000e+30 : f32
    %131 = vector.broadcast %cst_52 : f32 to vector<1x8xf32>
    %132 = arith.mulf %130, %131 : vector<1x8xf32>
    %133 = arith.subf %127, %132 : vector<1x8xf32>
    %c1_i32 = arith.constant 1 : i32
    %134 = vector.broadcast %c1_i32 : i32 to vector<1x8xi32>
    %135 = arith.cmpi slt, %14, %134 : vector<1x8xi32>
    %cst_53 = arith.constant -9.99999968E+37 : f32
    %136 = vector.broadcast %cst_53 : f32 to vector<1x8xf32>
    %137 = arith.select %135, %133, %136 : vector<1x8xi1>, vector<1x8xf32>
    %cst_54 = arith.constant dense<0xFF800000> : vector<1xf32>
    %138 = vector.multi_reduction <maximumf>, %137, %cst_54 [1] : vector<1x8xf32> to vector<1xf32>
    %139 = vector.shape_cast %138 : vector<1xf32> to vector<1x1xf32>
    %140 = vector.broadcast %139 : vector<1x1xf32> to vector<1x8xf32>
    %141 = arith.subf %137, %140 : vector<1x8xf32>
    %142 = math.exp %141 : vector<1x8xf32>
    %cst_55 = arith.constant dense<0.000000e+00> : vector<1xf32>
    %143 = vector.multi_reduction <add>, %142, %cst_55 [1] : vector<1x8xf32> to vector<1xf32>
    %144 = vector.shape_cast %143 : vector<1xf32> to vector<1x1xf32>
    %145 = tpu.reciprocal %144 : vector<1x1xf32> -> vector<1x1xf32>
    %146 = vector.broadcast %145 : vector<1x1xf32> to vector<1x8xf32>
    %147 = arith.mulf %142, %146 : vector<1x8xf32>
    %148 = vector.extract_strided_slice %5 {offsets = [1, 0], sizes = [1, 8], strides = [1, 1]} : vector<8x8xf32> to vector<1x8xf32>
    %149 = arith.mulf %147, %148 : vector<1x8xf32>
    %150 = arith.subf %147, %149 : vector<1x8xf32>
    %151 = vector.extract_strided_slice %111 {offsets = [0, 0], sizes = [8, 32], strides = [1, 1]} : vector<8x64xf32> to vector<8x32xf32>
    %cst_56 = arith.constant dense<0.000000e+00> : vector<1x32xf32>
    %152 = tpu.matmul %149, %151, %cst_56 {dimension_numbers = #tpu.dot_dimension_numbers<[1], [0], [0], [1], [0, 0, 1, 1], [], []>} : vector<1x8xf32>, vector<8x32xf32>, vector<1x32xf32> -> vector<1x32xf32>
    %153 = vector.extract_strided_slice %111 {offsets = [0, 32], sizes = [8, 32], strides = [1, 1]} : vector<8x64xf32> to vector<8x32xf32>
    %cst_57 = arith.constant dense<0.000000e+00> : vector<1x32xf32>
    %154 = tpu.matmul %150, %153, %cst_57 {dimension_numbers = #tpu.dot_dimension_numbers<[1], [0], [0], [1], [0, 0, 1, 1], [], []>} : vector<1x8xf32>, vector<8x32xf32>, vector<1x32xf32> -> vector<1x32xf32>
    %155 = arith.addf %152, %154 : vector<1x32xf32>
    %cst_58 = arith.constant dense<0.000000e+00> : vector<1x192xf32>
    %156 = tpu.matmul %120, %26, %cst_58 {dimension_numbers = #tpu.dot_dimension_numbers<[1], [0], [0], [1], [0, 0, 1, 1], [], []>} : vector<1x32xf32>, vector<32x192xf32>, vector<1x192xf32> -> vector<1x192xf32>
    %157 = arith.addf %156, %30 : vector<1x192xf32>
    %cst_59 = arith.constant dense<0.000000e+00> : vector<1x192xf32>
    %158 = tpu.matmul %155, %28, %cst_59 {dimension_numbers = #tpu.dot_dimension_numbers<[1], [0], [0], [1], [0, 0, 1, 1], [], []>} : vector<1x32xf32>, vector<32x192xf32>, vector<1x192xf32> -> vector<1x192xf32>
    %159 = arith.addf %158, %32 : vector<1x192xf32>
    %160 = vector.extract_strided_slice %157 {offsets = [0, 0], sizes = [1, 96], strides = [1, 1]} : vector<1x192xf32> to vector<1x96xf32>
    %161 = vector.extract_strided_slice %157 {offsets = [0, 96], sizes = [1, 96], strides = [1, 1]} : vector<1x192xf32> to vector<1x96xf32>
    %162 = vector.extract_strided_slice %159 {offsets = [0, 0], sizes = [1, 96], strides = [1, 1]} : vector<1x192xf32> to vector<1x96xf32>
    %163 = vector.extract_strided_slice %159 {offsets = [0, 96], sizes = [1, 96], strides = [1, 1]} : vector<1x192xf32> to vector<1x96xf32>
    %164 = vector.extract_strided_slice %160 {offsets = [0, 0], sizes = [1, 32], strides = [1, 1]} : vector<1x96xf32> to vector<1x32xf32>
    %165 = vector.extract_strided_slice %162 {offsets = [0, 0], sizes = [1, 32], strides = [1, 1]} : vector<1x96xf32> to vector<1x32xf32>
    %166 = arith.addf %164, %165 : vector<1x32xf32>
    %167 = arith.negf %166 : vector<1x32xf32>
    %168 = math.exp %167 : vector<1x32xf32>
    %cst_60 = arith.constant 1.000000e+00 : f32
    %169 = vector.broadcast %cst_60 : f32 to vector<1x32xf32>
    %170 = arith.addf %169, %168 : vector<1x32xf32>
    %171 = arith.divf %169, %170 : vector<1x32xf32>
    %172 = vector.extract_strided_slice %160 {offsets = [0, 32], sizes = [1, 32], strides = [1, 1]} : vector<1x96xf32> to vector<1x32xf32>
    %173 = vector.extract_strided_slice %162 {offsets = [0, 32], sizes = [1, 32], strides = [1, 1]} : vector<1x96xf32> to vector<1x32xf32>
    %174 = arith.addf %172, %173 : vector<1x32xf32>
    %175 = arith.negf %174 : vector<1x32xf32>
    %176 = math.exp %175 : vector<1x32xf32>
    %cst_61 = arith.constant 1.000000e+00 : f32
    %177 = vector.broadcast %cst_61 : f32 to vector<1x32xf32>
    %178 = arith.addf %177, %176 : vector<1x32xf32>
    %179 = arith.divf %177, %178 : vector<1x32xf32>
    %180 = vector.extract_strided_slice %160 {offsets = [0, 64], sizes = [1, 32], strides = [1, 1]} : vector<1x96xf32> to vector<1x32xf32>
    %181 = vector.extract_strided_slice %162 {offsets = [0, 64], sizes = [1, 32], strides = [1, 1]} : vector<1x96xf32> to vector<1x32xf32>
    %182 = arith.mulf %171, %181 : vector<1x32xf32>
    %183 = arith.addf %180, %182 : vector<1x32xf32>
    %184 = math.tanh %183 : vector<1x32xf32>
    %cst_62 = arith.constant 1.000000e+00 : f32
    %185 = vector.broadcast %cst_62 : f32 to vector<1x32xf32>
    %186 = arith.subf %185, %179 : vector<1x32xf32>
    %187 = arith.mulf %186, %184 : vector<1x32xf32>
    %188 = arith.mulf %179, %155 : vector<1x32xf32>
    %189 = arith.addf %187, %188 : vector<1x32xf32>
    %190 = vector.extract_strided_slice %163 {offsets = [0, 0], sizes = [1, 32], strides = [1, 1]} : vector<1x96xf32> to vector<1x32xf32>
    %191 = vector.extract_strided_slice %161 {offsets = [0, 0], sizes = [1, 32], strides = [1, 1]} : vector<1x96xf32> to vector<1x32xf32>
    %192 = arith.addf %190, %191 : vector<1x32xf32>
    %193 = arith.negf %192 : vector<1x32xf32>
    %194 = math.exp %193 : vector<1x32xf32>
    %cst_63 = arith.constant 1.000000e+00 : f32
    %195 = vector.broadcast %cst_63 : f32 to vector<1x32xf32>
    %196 = arith.addf %195, %194 : vector<1x32xf32>
    %197 = arith.divf %195, %196 : vector<1x32xf32>
    %198 = vector.extract_strided_slice %163 {offsets = [0, 32], sizes = [1, 32], strides = [1, 1]} : vector<1x96xf32> to vector<1x32xf32>
    %199 = vector.extract_strided_slice %161 {offsets = [0, 32], sizes = [1, 32], strides = [1, 1]} : vector<1x96xf32> to vector<1x32xf32>
    %200 = arith.addf %198, %199 : vector<1x32xf32>
    %201 = arith.negf %200 : vector<1x32xf32>
    %202 = math.exp %201 : vector<1x32xf32>
    %cst_64 = arith.constant 1.000000e+00 : f32
    %203 = vector.broadcast %cst_64 : f32 to vector<1x32xf32>
    %204 = arith.addf %203, %202 : vector<1x32xf32>
    %205 = arith.divf %203, %204 : vector<1x32xf32>
    %206 = vector.extract_strided_slice %163 {offsets = [0, 64], sizes = [1, 32], strides = [1, 1]} : vector<1x96xf32> to vector<1x32xf32>
    %207 = vector.extract_strided_slice %161 {offsets = [0, 64], sizes = [1, 32], strides = [1, 1]} : vector<1x96xf32> to vector<1x32xf32>
    %208 = arith.mulf %197, %207 : vector<1x32xf32>
    %209 = arith.addf %206, %208 : vector<1x32xf32>
    %210 = math.tanh %209 : vector<1x32xf32>
    %cst_65 = arith.constant 1.000000e+00 : f32
    %211 = vector.broadcast %cst_65 : f32 to vector<1x32xf32>
    %212 = arith.subf %211, %205 : vector<1x32xf32>
    %213 = arith.mulf %212, %210 : vector<1x32xf32>
    %214 = arith.mulf %205, %120 : vector<1x32xf32>
    %215 = arith.addf %213, %214 : vector<1x32xf32>
    %216 = arith.addf %189, %215 : vector<1x32xf32>
    %c1_i32_66 = arith.constant 1 : i32
    %217 = vector.broadcast %c1_i32_66 : i32 to vector<8x1xi32>
    %218 = arith.cmpi eq, %13, %217 : vector<8x1xi32>
    %219 = vector.shape_cast %218 : vector<8x1xi1> to vector<8x1xi1>
    %220 = vector.broadcast %219 : vector<8x1xi1> to vector<8x32xi1>
    %221 = vector.shape_cast %216 : vector<1x32xf32> to vector<1x32xf32>
    %222 = vector.broadcast %221 : vector<1x32xf32> to vector<8x32xf32>
    %223 = arith.select %220, %222, %105 : vector<8x32xi1>, vector<8x32xf32>
    %cst_67 = arith.constant dense<0.000000e+00> : vector<1x64xf32>
    %224 = tpu.matmul %216, %24, %cst_67 {dimension_numbers = #tpu.dot_dimension_numbers<[1], [0], [0], [1], [0, 0, 1, 1], [], []>} : vector<1x32xf32>, vector<32x64xf32>, vector<1x64xf32> -> vector<1x64xf32>
    %225 = vector.shape_cast %218 : vector<8x1xi1> to vector<8x1xi1>
    %226 = vector.broadcast %225 : vector<8x1xi1> to vector<8x64xi1>
    %227 = vector.shape_cast %224 : vector<1x64xf32> to vector<1x64xf32>
    %228 = vector.broadcast %227 : vector<1x64xf32> to vector<8x64xf32>
    %229 = arith.select %226, %228, %111 : vector<8x64xi1>, vector<8x64xf32>
    %230 = arith.mulf %216, %20 : vector<1x32xf32>
    %cst_68 = arith.constant dense<0.000000e+00> : vector<1xf32>
    %231 = vector.multi_reduction <add>, %230, %cst_68 [1] : vector<1x32xf32> to vector<1xf32>
    %232 = vector.shape_cast %231 : vector<1xf32> to vector<1x1xf32>
    %c1_i32_69 = arith.constant 1 : i32
    %233 = vector.broadcast %c1_i32_69 : i32 to vector<1x8xi32>
    %234 = arith.cmpi eq, %14, %233 : vector<1x8xi32>
    %235 = vector.shape_cast %232 : vector<1x1xf32> to vector<1x1xf32>
    %236 = vector.broadcast %235 : vector<1x1xf32> to vector<1x8xf32>
    %237 = arith.select %234, %236, %119 : vector<1x8xi1>, vector<1x8xf32>
    %c1_i32_70 = arith.constant 1 : i32
    %238 = vector.broadcast %c1_i32_70 : i32 to vector<15x8xi32>
    %239 = arith.cmpi eq, %15, %238 : vector<15x8xi32>
    %240 = vector.shape_cast %147 : vector<1x8xf32> to vector<1x8xf32>
    %241 = vector.broadcast %240 : vector<1x8xf32> to vector<15x8xf32>
    %242 = arith.select %239, %241, %16 : vector<15x8xi1>, vector<15x8xf32>
    %243 = vector.extract_strided_slice %12 {offsets = [2, 0], sizes = [1, 32], strides = [1, 1]} : vector<8x32xf32> to vector<1x32xf32>
    %244 = arith.mulf %243, %19 : vector<1x32xf32>
    %cst_71 = arith.constant dense<0.000000e+00> : vector<1xf32>
    %245 = vector.multi_reduction <add>, %244, %cst_71 [1] : vector<1x32xf32> to vector<1xf32>
    %246 = vector.shape_cast %245 : vector<1xf32> to vector<1x1xf32>
    %247 = vector.broadcast %246 : vector<1x1xf32> to vector<1x8xf32>
    %248 = arith.addf %247, %237 : vector<1x8xf32>
    %249 = vector.broadcast %22 : vector<1x1xf32> to vector<1x8xf32>
    %250 = arith.addf %248, %249 : vector<1x8xf32>
    %251 = vector.extract_strided_slice %3 {offsets = [2, 0], sizes = [1, 8], strides = [1, 1]} : vector<8x8xf32> to vector<1x8xf32>
    %cst_72 = arith.constant 1.000000e+00 : f32
    %252 = vector.broadcast %cst_72 : f32 to vector<1x8xf32>
    %253 = arith.subf %252, %251 : vector<1x8xf32>
    %cst_73 = arith.constant 1.000000e+30 : f32
    %254 = vector.broadcast %cst_73 : f32 to vector<1x8xf32>
    %255 = arith.mulf %253, %254 : vector<1x8xf32>
    %256 = arith.subf %250, %255 : vector<1x8xf32>
    %c2_i32 = arith.constant 2 : i32
    %257 = vector.broadcast %c2_i32 : i32 to vector<1x8xi32>
    %258 = arith.cmpi slt, %14, %257 : vector<1x8xi32>
    %cst_74 = arith.constant -9.99999968E+37 : f32
    %259 = vector.broadcast %cst_74 : f32 to vector<1x8xf32>
    %260 = arith.select %258, %256, %259 : vector<1x8xi1>, vector<1x8xf32>
    %cst_75 = arith.constant dense<0xFF800000> : vector<1xf32>
    %261 = vector.multi_reduction <maximumf>, %260, %cst_75 [1] : vector<1x8xf32> to vector<1xf32>
    %262 = vector.shape_cast %261 : vector<1xf32> to vector<1x1xf32>
    %263 = vector.broadcast %262 : vector<1x1xf32> to vector<1x8xf32>
    %264 = arith.subf %260, %263 : vector<1x8xf32>
    %265 = math.exp %264 : vector<1x8xf32>
    %cst_76 = arith.constant dense<0.000000e+00> : vector<1xf32>
    %266 = vector.multi_reduction <add>, %265, %cst_76 [1] : vector<1x8xf32> to vector<1xf32>
    %267 = vector.shape_cast %266 : vector<1xf32> to vector<1x1xf32>
    %268 = tpu.reciprocal %267 : vector<1x1xf32> -> vector<1x1xf32>
    %269 = vector.broadcast %268 : vector<1x1xf32> to vector<1x8xf32>
    %270 = arith.mulf %265, %269 : vector<1x8xf32>
    %271 = vector.extract_strided_slice %5 {offsets = [2, 0], sizes = [1, 8], strides = [1, 1]} : vector<8x8xf32> to vector<1x8xf32>
    %272 = arith.mulf %270, %271 : vector<1x8xf32>
    %273 = arith.subf %270, %272 : vector<1x8xf32>
    %274 = vector.extract_strided_slice %229 {offsets = [0, 0], sizes = [8, 32], strides = [1, 1]} : vector<8x64xf32> to vector<8x32xf32>
    %cst_77 = arith.constant dense<0.000000e+00> : vector<1x32xf32>
    %275 = tpu.matmul %272, %274, %cst_77 {dimension_numbers = #tpu.dot_dimension_numbers<[1], [0], [0], [1], [0, 0, 1, 1], [], []>} : vector<1x8xf32>, vector<8x32xf32>, vector<1x32xf32> -> vector<1x32xf32>
    %276 = vector.extract_strided_slice %229 {offsets = [0, 32], sizes = [8, 32], strides = [1, 1]} : vector<8x64xf32> to vector<8x32xf32>
    %cst_78 = arith.constant dense<0.000000e+00> : vector<1x32xf32>
    %277 = tpu.matmul %273, %276, %cst_78 {dimension_numbers = #tpu.dot_dimension_numbers<[1], [0], [0], [1], [0, 0, 1, 1], [], []>} : vector<1x8xf32>, vector<8x32xf32>, vector<1x32xf32> -> vector<1x32xf32>
    %278 = arith.addf %275, %277 : vector<1x32xf32>
    %cst_79 = arith.constant dense<0.000000e+00> : vector<1x192xf32>
    %279 = tpu.matmul %243, %26, %cst_79 {dimension_numbers = #tpu.dot_dimension_numbers<[1], [0], [0], [1], [0, 0, 1, 1], [], []>} : vector<1x32xf32>, vector<32x192xf32>, vector<1x192xf32> -> vector<1x192xf32>
    %280 = arith.addf %279, %30 : vector<1x192xf32>
    %cst_80 = arith.constant dense<0.000000e+00> : vector<1x192xf32>
    %281 = tpu.matmul %278, %28, %cst_80 {dimension_numbers = #tpu.dot_dimension_numbers<[1], [0], [0], [1], [0, 0, 1, 1], [], []>} : vector<1x32xf32>, vector<32x192xf32>, vector<1x192xf32> -> vector<1x192xf32>
    %282 = arith.addf %281, %32 : vector<1x192xf32>
    %283 = vector.extract_strided_slice %280 {offsets = [0, 0], sizes = [1, 96], strides = [1, 1]} : vector<1x192xf32> to vector<1x96xf32>
    %284 = vector.extract_strided_slice %280 {offsets = [0, 96], sizes = [1, 96], strides = [1, 1]} : vector<1x192xf32> to vector<1x96xf32>
    %285 = vector.extract_strided_slice %282 {offsets = [0, 0], sizes = [1, 96], strides = [1, 1]} : vector<1x192xf32> to vector<1x96xf32>
    %286 = vector.extract_strided_slice %282 {offsets = [0, 96], sizes = [1, 96], strides = [1, 1]} : vector<1x192xf32> to vector<1x96xf32>
    %287 = vector.extract_strided_slice %283 {offsets = [0, 0], sizes = [1, 32], strides = [1, 1]} : vector<1x96xf32> to vector<1x32xf32>
    %288 = vector.extract_strided_slice %285 {offsets = [0, 0], sizes = [1, 32], strides = [1, 1]} : vector<1x96xf32> to vector<1x32xf32>
    %289 = arith.addf %287, %288 : vector<1x32xf32>
    %290 = arith.negf %289 : vector<1x32xf32>
    %291 = math.exp %290 : vector<1x32xf32>
    %cst_81 = arith.constant 1.000000e+00 : f32
    %292 = vector.broadcast %cst_81 : f32 to vector<1x32xf32>
    %293 = arith.addf %292, %291 : vector<1x32xf32>
    %294 = arith.divf %292, %293 : vector<1x32xf32>
    %295 = vector.extract_strided_slice %283 {offsets = [0, 32], sizes = [1, 32], strides = [1, 1]} : vector<1x96xf32> to vector<1x32xf32>
    %296 = vector.extract_strided_slice %285 {offsets = [0, 32], sizes = [1, 32], strides = [1, 1]} : vector<1x96xf32> to vector<1x32xf32>
    %297 = arith.addf %295, %296 : vector<1x32xf32>
    %298 = arith.negf %297 : vector<1x32xf32>
    %299 = math.exp %298 : vector<1x32xf32>
    %cst_82 = arith.constant 1.000000e+00 : f32
    %300 = vector.broadcast %cst_82 : f32 to vector<1x32xf32>
    %301 = arith.addf %300, %299 : vector<1x32xf32>
    %302 = arith.divf %300, %301 : vector<1x32xf32>
    %303 = vector.extract_strided_slice %283 {offsets = [0, 64], sizes = [1, 32], strides = [1, 1]} : vector<1x96xf32> to vector<1x32xf32>
    %304 = vector.extract_strided_slice %285 {offsets = [0, 64], sizes = [1, 32], strides = [1, 1]} : vector<1x96xf32> to vector<1x32xf32>
    %305 = arith.mulf %294, %304 : vector<1x32xf32>
    %306 = arith.addf %303, %305 : vector<1x32xf32>
    %307 = math.tanh %306 : vector<1x32xf32>
    %cst_83 = arith.constant 1.000000e+00 : f32
    %308 = vector.broadcast %cst_83 : f32 to vector<1x32xf32>
    %309 = arith.subf %308, %302 : vector<1x32xf32>
    %310 = arith.mulf %309, %307 : vector<1x32xf32>
    %311 = arith.mulf %302, %278 : vector<1x32xf32>
    %312 = arith.addf %310, %311 : vector<1x32xf32>
    %313 = vector.extract_strided_slice %286 {offsets = [0, 0], sizes = [1, 32], strides = [1, 1]} : vector<1x96xf32> to vector<1x32xf32>
    %314 = vector.extract_strided_slice %284 {offsets = [0, 0], sizes = [1, 32], strides = [1, 1]} : vector<1x96xf32> to vector<1x32xf32>
    %315 = arith.addf %313, %314 : vector<1x32xf32>
    %316 = arith.negf %315 : vector<1x32xf32>
    %317 = math.exp %316 : vector<1x32xf32>
    %cst_84 = arith.constant 1.000000e+00 : f32
    %318 = vector.broadcast %cst_84 : f32 to vector<1x32xf32>
    %319 = arith.addf %318, %317 : vector<1x32xf32>
    %320 = arith.divf %318, %319 : vector<1x32xf32>
    %321 = vector.extract_strided_slice %286 {offsets = [0, 32], sizes = [1, 32], strides = [1, 1]} : vector<1x96xf32> to vector<1x32xf32>
    %322 = vector.extract_strided_slice %284 {offsets = [0, 32], sizes = [1, 32], strides = [1, 1]} : vector<1x96xf32> to vector<1x32xf32>
    %323 = arith.addf %321, %322 : vector<1x32xf32>
    %324 = arith.negf %323 : vector<1x32xf32>
    %325 = math.exp %324 : vector<1x32xf32>
    %cst_85 = arith.constant 1.000000e+00 : f32
    %326 = vector.broadcast %cst_85 : f32 to vector<1x32xf32>
    %327 = arith.addf %326, %325 : vector<1x32xf32>
    %328 = arith.divf %326, %327 : vector<1x32xf32>
    %329 = vector.extract_strided_slice %286 {offsets = [0, 64], sizes = [1, 32], strides = [1, 1]} : vector<1x96xf32> to vector<1x32xf32>
    %330 = vector.extract_strided_slice %284 {offsets = [0, 64], sizes = [1, 32], strides = [1, 1]} : vector<1x96xf32> to vector<1x32xf32>
    %331 = arith.mulf %320, %330 : vector<1x32xf32>
    %332 = arith.addf %329, %331 : vector<1x32xf32>
    %333 = math.tanh %332 : vector<1x32xf32>
    %cst_86 = arith.constant 1.000000e+00 : f32
    %334 = vector.broadcast %cst_86 : f32 to vector<1x32xf32>
    %335 = arith.subf %334, %328 : vector<1x32xf32>
    %336 = arith.mulf %335, %333 : vector<1x32xf32>
    %337 = arith.mulf %328, %243 : vector<1x32xf32>
    %338 = arith.addf %336, %337 : vector<1x32xf32>
    %339 = arith.addf %312, %338 : vector<1x32xf32>
    %c2_i32_87 = arith.constant 2 : i32
    %340 = vector.broadcast %c2_i32_87 : i32 to vector<8x1xi32>
    %341 = arith.cmpi eq, %13, %340 : vector<8x1xi32>
    %342 = vector.shape_cast %341 : vector<8x1xi1> to vector<8x1xi1>
    %343 = vector.broadcast %342 : vector<8x1xi1> to vector<8x32xi1>
    %344 = vector.shape_cast %339 : vector<1x32xf32> to vector<1x32xf32>
    %345 = vector.broadcast %344 : vector<1x32xf32> to vector<8x32xf32>
    %346 = arith.select %343, %345, %223 : vector<8x32xi1>, vector<8x32xf32>
    %cst_88 = arith.constant dense<0.000000e+00> : vector<1x64xf32>
    %347 = tpu.matmul %339, %24, %cst_88 {dimension_numbers = #tpu.dot_dimension_numbers<[1], [0], [0], [1], [0, 0, 1, 1], [], []>} : vector<1x32xf32>, vector<32x64xf32>, vector<1x64xf32> -> vector<1x64xf32>
    %348 = vector.shape_cast %341 : vector<8x1xi1> to vector<8x1xi1>
    %349 = vector.broadcast %348 : vector<8x1xi1> to vector<8x64xi1>
    %350 = vector.shape_cast %347 : vector<1x64xf32> to vector<1x64xf32>
    %351 = vector.broadcast %350 : vector<1x64xf32> to vector<8x64xf32>
    %352 = arith.select %349, %351, %229 : vector<8x64xi1>, vector<8x64xf32>
    %353 = arith.mulf %339, %20 : vector<1x32xf32>
    %cst_89 = arith.constant dense<0.000000e+00> : vector<1xf32>
    %354 = vector.multi_reduction <add>, %353, %cst_89 [1] : vector<1x32xf32> to vector<1xf32>
    %355 = vector.shape_cast %354 : vector<1xf32> to vector<1x1xf32>
    %c2_i32_90 = arith.constant 2 : i32
    %356 = vector.broadcast %c2_i32_90 : i32 to vector<1x8xi32>
    %357 = arith.cmpi eq, %14, %356 : vector<1x8xi32>
    %358 = vector.shape_cast %355 : vector<1x1xf32> to vector<1x1xf32>
    %359 = vector.broadcast %358 : vector<1x1xf32> to vector<1x8xf32>
    %360 = arith.select %357, %359, %237 : vector<1x8xi1>, vector<1x8xf32>
    %c2_i32_91 = arith.constant 2 : i32
    %361 = vector.broadcast %c2_i32_91 : i32 to vector<15x8xi32>
    %362 = arith.cmpi eq, %15, %361 : vector<15x8xi32>
    %363 = vector.shape_cast %270 : vector<1x8xf32> to vector<1x8xf32>
    %364 = vector.broadcast %363 : vector<1x8xf32> to vector<15x8xf32>
    %365 = arith.select %362, %364, %242 : vector<15x8xi1>, vector<15x8xf32>
    %366 = vector.extract_strided_slice %12 {offsets = [3, 0], sizes = [1, 32], strides = [1, 1]} : vector<8x32xf32> to vector<1x32xf32>
    %367 = arith.mulf %366, %19 : vector<1x32xf32>
    %cst_92 = arith.constant dense<0.000000e+00> : vector<1xf32>
    %368 = vector.multi_reduction <add>, %367, %cst_92 [1] : vector<1x32xf32> to vector<1xf32>
    %369 = vector.shape_cast %368 : vector<1xf32> to vector<1x1xf32>
    %370 = vector.broadcast %369 : vector<1x1xf32> to vector<1x8xf32>
    %371 = arith.addf %370, %360 : vector<1x8xf32>
    %372 = vector.broadcast %22 : vector<1x1xf32> to vector<1x8xf32>
    %373 = arith.addf %371, %372 : vector<1x8xf32>
    %374 = vector.extract_strided_slice %3 {offsets = [3, 0], sizes = [1, 8], strides = [1, 1]} : vector<8x8xf32> to vector<1x8xf32>
    %cst_93 = arith.constant 1.000000e+00 : f32
    %375 = vector.broadcast %cst_93 : f32 to vector<1x8xf32>
    %376 = arith.subf %375, %374 : vector<1x8xf32>
    %cst_94 = arith.constant 1.000000e+30 : f32
    %377 = vector.broadcast %cst_94 : f32 to vector<1x8xf32>
    %378 = arith.mulf %376, %377 : vector<1x8xf32>
    %379 = arith.subf %373, %378 : vector<1x8xf32>
    %c3_i32 = arith.constant 3 : i32
    %380 = vector.broadcast %c3_i32 : i32 to vector<1x8xi32>
    %381 = arith.cmpi slt, %14, %380 : vector<1x8xi32>
    %cst_95 = arith.constant -9.99999968E+37 : f32
    %382 = vector.broadcast %cst_95 : f32 to vector<1x8xf32>
    %383 = arith.select %381, %379, %382 : vector<1x8xi1>, vector<1x8xf32>
    %cst_96 = arith.constant dense<0xFF800000> : vector<1xf32>
    %384 = vector.multi_reduction <maximumf>, %383, %cst_96 [1] : vector<1x8xf32> to vector<1xf32>
    %385 = vector.shape_cast %384 : vector<1xf32> to vector<1x1xf32>
    %386 = vector.broadcast %385 : vector<1x1xf32> to vector<1x8xf32>
    %387 = arith.subf %383, %386 : vector<1x8xf32>
    %388 = math.exp %387 : vector<1x8xf32>
    %cst_97 = arith.constant dense<0.000000e+00> : vector<1xf32>
    %389 = vector.multi_reduction <add>, %388, %cst_97 [1] : vector<1x8xf32> to vector<1xf32>
    %390 = vector.shape_cast %389 : vector<1xf32> to vector<1x1xf32>
    %391 = tpu.reciprocal %390 : vector<1x1xf32> -> vector<1x1xf32>
    %392 = vector.broadcast %391 : vector<1x1xf32> to vector<1x8xf32>
    %393 = arith.mulf %388, %392 : vector<1x8xf32>
    %394 = vector.extract_strided_slice %5 {offsets = [3, 0], sizes = [1, 8], strides = [1, 1]} : vector<8x8xf32> to vector<1x8xf32>
    %395 = arith.mulf %393, %394 : vector<1x8xf32>
    %396 = arith.subf %393, %395 : vector<1x8xf32>
    %397 = vector.extract_strided_slice %352 {offsets = [0, 0], sizes = [8, 32], strides = [1, 1]} : vector<8x64xf32> to vector<8x32xf32>
    %cst_98 = arith.constant dense<0.000000e+00> : vector<1x32xf32>
    %398 = tpu.matmul %395, %397, %cst_98 {dimension_numbers = #tpu.dot_dimension_numbers<[1], [0], [0], [1], [0, 0, 1, 1], [], []>} : vector<1x8xf32>, vector<8x32xf32>, vector<1x32xf32> -> vector<1x32xf32>
    %399 = vector.extract_strided_slice %352 {offsets = [0, 32], sizes = [8, 32], strides = [1, 1]} : vector<8x64xf32> to vector<8x32xf32>
    %cst_99 = arith.constant dense<0.000000e+00> : vector<1x32xf32>
    %400 = tpu.matmul %396, %399, %cst_99 {dimension_numbers = #tpu.dot_dimension_numbers<[1], [0], [0], [1], [0, 0, 1, 1], [], []>} : vector<1x8xf32>, vector<8x32xf32>, vector<1x32xf32> -> vector<1x32xf32>
    %401 = arith.addf %398, %400 : vector<1x32xf32>
    %cst_100 = arith.constant dense<0.000000e+00> : vector<1x192xf32>
    %402 = tpu.matmul %366, %26, %cst_100 {dimension_numbers = #tpu.dot_dimension_numbers<[1], [0], [0], [1], [0, 0, 1, 1], [], []>} : vector<1x32xf32>, vector<32x192xf32>, vector<1x192xf32> -> vector<1x192xf32>
    %403 = arith.addf %402, %30 : vector<1x192xf32>
    %cst_101 = arith.constant dense<0.000000e+00> : vector<1x192xf32>
    %404 = tpu.matmul %401, %28, %cst_101 {dimension_numbers = #tpu.dot_dimension_numbers<[1], [0], [0], [1], [0, 0, 1, 1], [], []>} : vector<1x32xf32>, vector<32x192xf32>, vector<1x192xf32> -> vector<1x192xf32>
    %405 = arith.addf %404, %32 : vector<1x192xf32>
    %406 = vector.extract_strided_slice %403 {offsets = [0, 0], sizes = [1, 96], strides = [1, 1]} : vector<1x192xf32> to vector<1x96xf32>
    %407 = vector.extract_strided_slice %403 {offsets = [0, 96], sizes = [1, 96], strides = [1, 1]} : vector<1x192xf32> to vector<1x96xf32>
    %408 = vector.extract_strided_slice %405 {offsets = [0, 0], sizes = [1, 96], strides = [1, 1]} : vector<1x192xf32> to vector<1x96xf32>
    %409 = vector.extract_strided_slice %405 {offsets = [0, 96], sizes = [1, 96], strides = [1, 1]} : vector<1x192xf32> to vector<1x96xf32>
    %410 = vector.extract_strided_slice %406 {offsets = [0, 0], sizes = [1, 32], strides = [1, 1]} : vector<1x96xf32> to vector<1x32xf32>
    %411 = vector.extract_strided_slice %408 {offsets = [0, 0], sizes = [1, 32], strides = [1, 1]} : vector<1x96xf32> to vector<1x32xf32>
    %412 = arith.addf %410, %411 : vector<1x32xf32>
    %413 = arith.negf %412 : vector<1x32xf32>
    %414 = math.exp %413 : vector<1x32xf32>
    %cst_102 = arith.constant 1.000000e+00 : f32
    %415 = vector.broadcast %cst_102 : f32 to vector<1x32xf32>
    %416 = arith.addf %415, %414 : vector<1x32xf32>
    %417 = arith.divf %415, %416 : vector<1x32xf32>
    %418 = vector.extract_strided_slice %406 {offsets = [0, 32], sizes = [1, 32], strides = [1, 1]} : vector<1x96xf32> to vector<1x32xf32>
    %419 = vector.extract_strided_slice %408 {offsets = [0, 32], sizes = [1, 32], strides = [1, 1]} : vector<1x96xf32> to vector<1x32xf32>
    %420 = arith.addf %418, %419 : vector<1x32xf32>
    %421 = arith.negf %420 : vector<1x32xf32>
    %422 = math.exp %421 : vector<1x32xf32>
    %cst_103 = arith.constant 1.000000e+00 : f32
    %423 = vector.broadcast %cst_103 : f32 to vector<1x32xf32>
    %424 = arith.addf %423, %422 : vector<1x32xf32>
    %425 = arith.divf %423, %424 : vector<1x32xf32>
    %426 = vector.extract_strided_slice %406 {offsets = [0, 64], sizes = [1, 32], strides = [1, 1]} : vector<1x96xf32> to vector<1x32xf32>
    %427 = vector.extract_strided_slice %408 {offsets = [0, 64], sizes = [1, 32], strides = [1, 1]} : vector<1x96xf32> to vector<1x32xf32>
    %428 = arith.mulf %417, %427 : vector<1x32xf32>
    %429 = arith.addf %426, %428 : vector<1x32xf32>
    %430 = math.tanh %429 : vector<1x32xf32>
    %cst_104 = arith.constant 1.000000e+00 : f32
    %431 = vector.broadcast %cst_104 : f32 to vector<1x32xf32>
    %432 = arith.subf %431, %425 : vector<1x32xf32>
    %433 = arith.mulf %432, %430 : vector<1x32xf32>
    %434 = arith.mulf %425, %401 : vector<1x32xf32>
    %435 = arith.addf %433, %434 : vector<1x32xf32>
    %436 = vector.extract_strided_slice %409 {offsets = [0, 0], sizes = [1, 32], strides = [1, 1]} : vector<1x96xf32> to vector<1x32xf32>
    %437 = vector.extract_strided_slice %407 {offsets = [0, 0], sizes = [1, 32], strides = [1, 1]} : vector<1x96xf32> to vector<1x32xf32>
    %438 = arith.addf %436, %437 : vector<1x32xf32>
    %439 = arith.negf %438 : vector<1x32xf32>
    %440 = math.exp %439 : vector<1x32xf32>
    %cst_105 = arith.constant 1.000000e+00 : f32
    %441 = vector.broadcast %cst_105 : f32 to vector<1x32xf32>
    %442 = arith.addf %441, %440 : vector<1x32xf32>
    %443 = arith.divf %441, %442 : vector<1x32xf32>
    %444 = vector.extract_strided_slice %409 {offsets = [0, 32], sizes = [1, 32], strides = [1, 1]} : vector<1x96xf32> to vector<1x32xf32>
    %445 = vector.extract_strided_slice %407 {offsets = [0, 32], sizes = [1, 32], strides = [1, 1]} : vector<1x96xf32> to vector<1x32xf32>
    %446 = arith.addf %444, %445 : vector<1x32xf32>
    %447 = arith.negf %446 : vector<1x32xf32>
    %448 = math.exp %447 : vector<1x32xf32>
    %cst_106 = arith.constant 1.000000e+00 : f32
    %449 = vector.broadcast %cst_106 : f32 to vector<1x32xf32>
    %450 = arith.addf %449, %448 : vector<1x32xf32>
    %451 = arith.divf %449, %450 : vector<1x32xf32>
    %452 = vector.extract_strided_slice %409 {offsets = [0, 64], sizes = [1, 32], strides = [1, 1]} : vector<1x96xf32> to vector<1x32xf32>
    %453 = vector.extract_strided_slice %407 {offsets = [0, 64], sizes = [1, 32], strides = [1, 1]} : vector<1x96xf32> to vector<1x32xf32>
    %454 = arith.mulf %443, %453 : vector<1x32xf32>
    %455 = arith.addf %452, %454 : vector<1x32xf32>
    %456 = math.tanh %455 : vector<1x32xf32>
    %cst_107 = arith.constant 1.000000e+00 : f32
    %457 = vector.broadcast %cst_107 : f32 to vector<1x32xf32>
    %458 = arith.subf %457, %451 : vector<1x32xf32>
    %459 = arith.mulf %458, %456 : vector<1x32xf32>
    %460 = arith.mulf %451, %366 : vector<1x32xf32>
    %461 = arith.addf %459, %460 : vector<1x32xf32>
    %462 = arith.addf %435, %461 : vector<1x32xf32>
    %c3_i32_108 = arith.constant 3 : i32
    %463 = vector.broadcast %c3_i32_108 : i32 to vector<8x1xi32>
    %464 = arith.cmpi eq, %13, %463 : vector<8x1xi32>
    %465 = vector.shape_cast %464 : vector<8x1xi1> to vector<8x1xi1>
    %466 = vector.broadcast %465 : vector<8x1xi1> to vector<8x32xi1>
    %467 = vector.shape_cast %462 : vector<1x32xf32> to vector<1x32xf32>
    %468 = vector.broadcast %467 : vector<1x32xf32> to vector<8x32xf32>
    %469 = arith.select %466, %468, %346 : vector<8x32xi1>, vector<8x32xf32>
    %cst_109 = arith.constant dense<0.000000e+00> : vector<1x64xf32>
    %470 = tpu.matmul %462, %24, %cst_109 {dimension_numbers = #tpu.dot_dimension_numbers<[1], [0], [0], [1], [0, 0, 1, 1], [], []>} : vector<1x32xf32>, vector<32x64xf32>, vector<1x64xf32> -> vector<1x64xf32>
    %471 = vector.shape_cast %464 : vector<8x1xi1> to vector<8x1xi1>
    %472 = vector.broadcast %471 : vector<8x1xi1> to vector<8x64xi1>
    %473 = vector.shape_cast %470 : vector<1x64xf32> to vector<1x64xf32>
    %474 = vector.broadcast %473 : vector<1x64xf32> to vector<8x64xf32>
    %475 = arith.select %472, %474, %352 : vector<8x64xi1>, vector<8x64xf32>
    %476 = arith.mulf %462, %20 : vector<1x32xf32>
    %cst_110 = arith.constant dense<0.000000e+00> : vector<1xf32>
    %477 = vector.multi_reduction <add>, %476, %cst_110 [1] : vector<1x32xf32> to vector<1xf32>
    %478 = vector.shape_cast %477 : vector<1xf32> to vector<1x1xf32>
    %c3_i32_111 = arith.constant 3 : i32
    %479 = vector.broadcast %c3_i32_111 : i32 to vector<1x8xi32>
    %480 = arith.cmpi eq, %14, %479 : vector<1x8xi32>
    %481 = vector.shape_cast %478 : vector<1x1xf32> to vector<1x1xf32>
    %482 = vector.broadcast %481 : vector<1x1xf32> to vector<1x8xf32>
    %483 = arith.select %480, %482, %360 : vector<1x8xi1>, vector<1x8xf32>
    %c3_i32_112 = arith.constant 3 : i32
    %484 = vector.broadcast %c3_i32_112 : i32 to vector<15x8xi32>
    %485 = arith.cmpi eq, %15, %484 : vector<15x8xi32>
    %486 = vector.shape_cast %393 : vector<1x8xf32> to vector<1x8xf32>
    %487 = vector.broadcast %486 : vector<1x8xf32> to vector<15x8xf32>
    %488 = arith.select %485, %487, %365 : vector<15x8xi1>, vector<15x8xf32>
    %489 = vector.extract_strided_slice %12 {offsets = [4, 0], sizes = [1, 32], strides = [1, 1]} : vector<8x32xf32> to vector<1x32xf32>
    %490 = arith.mulf %489, %19 : vector<1x32xf32>
    %cst_113 = arith.constant dense<0.000000e+00> : vector<1xf32>
    %491 = vector.multi_reduction <add>, %490, %cst_113 [1] : vector<1x32xf32> to vector<1xf32>
    %492 = vector.shape_cast %491 : vector<1xf32> to vector<1x1xf32>
    %493 = vector.broadcast %492 : vector<1x1xf32> to vector<1x8xf32>
    %494 = arith.addf %493, %483 : vector<1x8xf32>
    %495 = vector.broadcast %22 : vector<1x1xf32> to vector<1x8xf32>
    %496 = arith.addf %494, %495 : vector<1x8xf32>
    %497 = vector.extract_strided_slice %3 {offsets = [4, 0], sizes = [1, 8], strides = [1, 1]} : vector<8x8xf32> to vector<1x8xf32>
    %cst_114 = arith.constant 1.000000e+00 : f32
    %498 = vector.broadcast %cst_114 : f32 to vector<1x8xf32>
    %499 = arith.subf %498, %497 : vector<1x8xf32>
    %cst_115 = arith.constant 1.000000e+30 : f32
    %500 = vector.broadcast %cst_115 : f32 to vector<1x8xf32>
    %501 = arith.mulf %499, %500 : vector<1x8xf32>
    %502 = arith.subf %496, %501 : vector<1x8xf32>
    %c4_i32 = arith.constant 4 : i32
    %503 = vector.broadcast %c4_i32 : i32 to vector<1x8xi32>
    %504 = arith.cmpi slt, %14, %503 : vector<1x8xi32>
    %cst_116 = arith.constant -9.99999968E+37 : f32
    %505 = vector.broadcast %cst_116 : f32 to vector<1x8xf32>
    %506 = arith.select %504, %502, %505 : vector<1x8xi1>, vector<1x8xf32>
    %cst_117 = arith.constant dense<0xFF800000> : vector<1xf32>
    %507 = vector.multi_reduction <maximumf>, %506, %cst_117 [1] : vector<1x8xf32> to vector<1xf32>
    %508 = vector.shape_cast %507 : vector<1xf32> to vector<1x1xf32>
    %509 = vector.broadcast %508 : vector<1x1xf32> to vector<1x8xf32>
    %510 = arith.subf %506, %509 : vector<1x8xf32>
    %511 = math.exp %510 : vector<1x8xf32>
    %cst_118 = arith.constant dense<0.000000e+00> : vector<1xf32>
    %512 = vector.multi_reduction <add>, %511, %cst_118 [1] : vector<1x8xf32> to vector<1xf32>
    %513 = vector.shape_cast %512 : vector<1xf32> to vector<1x1xf32>
    %514 = tpu.reciprocal %513 : vector<1x1xf32> -> vector<1x1xf32>
    %515 = vector.broadcast %514 : vector<1x1xf32> to vector<1x8xf32>
    %516 = arith.mulf %511, %515 : vector<1x8xf32>
    %517 = vector.extract_strided_slice %5 {offsets = [4, 0], sizes = [1, 8], strides = [1, 1]} : vector<8x8xf32> to vector<1x8xf32>
    %518 = arith.mulf %516, %517 : vector<1x8xf32>
    %519 = arith.subf %516, %518 : vector<1x8xf32>
    %520 = vector.extract_strided_slice %475 {offsets = [0, 0], sizes = [8, 32], strides = [1, 1]} : vector<8x64xf32> to vector<8x32xf32>
    %cst_119 = arith.constant dense<0.000000e+00> : vector<1x32xf32>
    %521 = tpu.matmul %518, %520, %cst_119 {dimension_numbers = #tpu.dot_dimension_numbers<[1], [0], [0], [1], [0, 0, 1, 1], [], []>} : vector<1x8xf32>, vector<8x32xf32>, vector<1x32xf32> -> vector<1x32xf32>
    %522 = vector.extract_strided_slice %475 {offsets = [0, 32], sizes = [8, 32], strides = [1, 1]} : vector<8x64xf32> to vector<8x32xf32>
    %cst_120 = arith.constant dense<0.000000e+00> : vector<1x32xf32>
    %523 = tpu.matmul %519, %522, %cst_120 {dimension_numbers = #tpu.dot_dimension_numbers<[1], [0], [0], [1], [0, 0, 1, 1], [], []>} : vector<1x8xf32>, vector<8x32xf32>, vector<1x32xf32> -> vector<1x32xf32>
    %524 = arith.addf %521, %523 : vector<1x32xf32>
    %cst_121 = arith.constant dense<0.000000e+00> : vector<1x192xf32>
    %525 = tpu.matmul %489, %26, %cst_121 {dimension_numbers = #tpu.dot_dimension_numbers<[1], [0], [0], [1], [0, 0, 1, 1], [], []>} : vector<1x32xf32>, vector<32x192xf32>, vector<1x192xf32> -> vector<1x192xf32>
    %526 = arith.addf %525, %30 : vector<1x192xf32>
    %cst_122 = arith.constant dense<0.000000e+00> : vector<1x192xf32>
    %527 = tpu.matmul %524, %28, %cst_122 {dimension_numbers = #tpu.dot_dimension_numbers<[1], [0], [0], [1], [0, 0, 1, 1], [], []>} : vector<1x32xf32>, vector<32x192xf32>, vector<1x192xf32> -> vector<1x192xf32>
    %528 = arith.addf %527, %32 : vector<1x192xf32>
    %529 = vector.extract_strided_slice %526 {offsets = [0, 0], sizes = [1, 96], strides = [1, 1]} : vector<1x192xf32> to vector<1x96xf32>
    %530 = vector.extract_strided_slice %526 {offsets = [0, 96], sizes = [1, 96], strides = [1, 1]} : vector<1x192xf32> to vector<1x96xf32>
    %531 = vector.extract_strided_slice %528 {offsets = [0, 0], sizes = [1, 96], strides = [1, 1]} : vector<1x192xf32> to vector<1x96xf32>
    %532 = vector.extract_strided_slice %528 {offsets = [0, 96], sizes = [1, 96], strides = [1, 1]} : vector<1x192xf32> to vector<1x96xf32>
    %533 = vector.extract_strided_slice %529 {offsets = [0, 0], sizes = [1, 32], strides = [1, 1]} : vector<1x96xf32> to vector<1x32xf32>
    %534 = vector.extract_strided_slice %531 {offsets = [0, 0], sizes = [1, 32], strides = [1, 1]} : vector<1x96xf32> to vector<1x32xf32>
    %535 = arith.addf %533, %534 : vector<1x32xf32>
    %536 = arith.negf %535 : vector<1x32xf32>
    %537 = math.exp %536 : vector<1x32xf32>
    %cst_123 = arith.constant 1.000000e+00 : f32
    %538 = vector.broadcast %cst_123 : f32 to vector<1x32xf32>
    %539 = arith.addf %538, %537 : vector<1x32xf32>
    %540 = arith.divf %538, %539 : vector<1x32xf32>
    %541 = vector.extract_strided_slice %529 {offsets = [0, 32], sizes = [1, 32], strides = [1, 1]} : vector<1x96xf32> to vector<1x32xf32>
    %542 = vector.extract_strided_slice %531 {offsets = [0, 32], sizes = [1, 32], strides = [1, 1]} : vector<1x96xf32> to vector<1x32xf32>
    %543 = arith.addf %541, %542 : vector<1x32xf32>
    %544 = arith.negf %543 : vector<1x32xf32>
    %545 = math.exp %544 : vector<1x32xf32>
    %cst_124 = arith.constant 1.000000e+00 : f32
    %546 = vector.broadcast %cst_124 : f32 to vector<1x32xf32>
    %547 = arith.addf %546, %545 : vector<1x32xf32>
    %548 = arith.divf %546, %547 : vector<1x32xf32>
    %549 = vector.extract_strided_slice %529 {offsets = [0, 64], sizes = [1, 32], strides = [1, 1]} : vector<1x96xf32> to vector<1x32xf32>
    %550 = vector.extract_strided_slice %531 {offsets = [0, 64], sizes = [1, 32], strides = [1, 1]} : vector<1x96xf32> to vector<1x32xf32>
    %551 = arith.mulf %540, %550 : vector<1x32xf32>
    %552 = arith.addf %549, %551 : vector<1x32xf32>
    %553 = math.tanh %552 : vector<1x32xf32>
    %cst_125 = arith.constant 1.000000e+00 : f32
    %554 = vector.broadcast %cst_125 : f32 to vector<1x32xf32>
    %555 = arith.subf %554, %548 : vector<1x32xf32>
    %556 = arith.mulf %555, %553 : vector<1x32xf32>
    %557 = arith.mulf %548, %524 : vector<1x32xf32>
    %558 = arith.addf %556, %557 : vector<1x32xf32>
    %559 = vector.extract_strided_slice %532 {offsets = [0, 0], sizes = [1, 32], strides = [1, 1]} : vector<1x96xf32> to vector<1x32xf32>
    %560 = vector.extract_strided_slice %530 {offsets = [0, 0], sizes = [1, 32], strides = [1, 1]} : vector<1x96xf32> to vector<1x32xf32>
    %561 = arith.addf %559, %560 : vector<1x32xf32>
    %562 = arith.negf %561 : vector<1x32xf32>
    %563 = math.exp %562 : vector<1x32xf32>
    %cst_126 = arith.constant 1.000000e+00 : f32
    %564 = vector.broadcast %cst_126 : f32 to vector<1x32xf32>
    %565 = arith.addf %564, %563 : vector<1x32xf32>
    %566 = arith.divf %564, %565 : vector<1x32xf32>
    %567 = vector.extract_strided_slice %532 {offsets = [0, 32], sizes = [1, 32], strides = [1, 1]} : vector<1x96xf32> to vector<1x32xf32>
    %568 = vector.extract_strided_slice %530 {offsets = [0, 32], sizes = [1, 32], strides = [1, 1]} : vector<1x96xf32> to vector<1x32xf32>
    %569 = arith.addf %567, %568 : vector<1x32xf32>
    %570 = arith.negf %569 : vector<1x32xf32>
    %571 = math.exp %570 : vector<1x32xf32>
    %cst_127 = arith.constant 1.000000e+00 : f32
    %572 = vector.broadcast %cst_127 : f32 to vector<1x32xf32>
    %573 = arith.addf %572, %571 : vector<1x32xf32>
    %574 = arith.divf %572, %573 : vector<1x32xf32>
    %575 = vector.extract_strided_slice %532 {offsets = [0, 64], sizes = [1, 32], strides = [1, 1]} : vector<1x96xf32> to vector<1x32xf32>
    %576 = vector.extract_strided_slice %530 {offsets = [0, 64], sizes = [1, 32], strides = [1, 1]} : vector<1x96xf32> to vector<1x32xf32>
    %577 = arith.mulf %566, %576 : vector<1x32xf32>
    %578 = arith.addf %575, %577 : vector<1x32xf32>
    %579 = math.tanh %578 : vector<1x32xf32>
    %cst_128 = arith.constant 1.000000e+00 : f32
    %580 = vector.broadcast %cst_128 : f32 to vector<1x32xf32>
    %581 = arith.subf %580, %574 : vector<1x32xf32>
    %582 = arith.mulf %581, %579 : vector<1x32xf32>
    %583 = arith.mulf %574, %489 : vector<1x32xf32>
    %584 = arith.addf %582, %583 : vector<1x32xf32>
    %585 = arith.addf %558, %584 : vector<1x32xf32>
    %c4_i32_129 = arith.constant 4 : i32
    %586 = vector.broadcast %c4_i32_129 : i32 to vector<8x1xi32>
    %587 = arith.cmpi eq, %13, %586 : vector<8x1xi32>
    %588 = vector.shape_cast %587 : vector<8x1xi1> to vector<8x1xi1>
    %589 = vector.broadcast %588 : vector<8x1xi1> to vector<8x32xi1>
    %590 = vector.shape_cast %585 : vector<1x32xf32> to vector<1x32xf32>
    %591 = vector.broadcast %590 : vector<1x32xf32> to vector<8x32xf32>
    %592 = arith.select %589, %591, %469 : vector<8x32xi1>, vector<8x32xf32>
    %cst_130 = arith.constant dense<0.000000e+00> : vector<1x64xf32>
    %593 = tpu.matmul %585, %24, %cst_130 {dimension_numbers = #tpu.dot_dimension_numbers<[1], [0], [0], [1], [0, 0, 1, 1], [], []>} : vector<1x32xf32>, vector<32x64xf32>, vector<1x64xf32> -> vector<1x64xf32>
    %594 = vector.shape_cast %587 : vector<8x1xi1> to vector<8x1xi1>
    %595 = vector.broadcast %594 : vector<8x1xi1> to vector<8x64xi1>
    %596 = vector.shape_cast %593 : vector<1x64xf32> to vector<1x64xf32>
    %597 = vector.broadcast %596 : vector<1x64xf32> to vector<8x64xf32>
    %598 = arith.select %595, %597, %475 : vector<8x64xi1>, vector<8x64xf32>
    %599 = arith.mulf %585, %20 : vector<1x32xf32>
    %cst_131 = arith.constant dense<0.000000e+00> : vector<1xf32>
    %600 = vector.multi_reduction <add>, %599, %cst_131 [1] : vector<1x32xf32> to vector<1xf32>
    %601 = vector.shape_cast %600 : vector<1xf32> to vector<1x1xf32>
    %c4_i32_132 = arith.constant 4 : i32
    %602 = vector.broadcast %c4_i32_132 : i32 to vector<1x8xi32>
    %603 = arith.cmpi eq, %14, %602 : vector<1x8xi32>
    %604 = vector.shape_cast %601 : vector<1x1xf32> to vector<1x1xf32>
    %605 = vector.broadcast %604 : vector<1x1xf32> to vector<1x8xf32>
    %606 = arith.select %603, %605, %483 : vector<1x8xi1>, vector<1x8xf32>
    %c4_i32_133 = arith.constant 4 : i32
    %607 = vector.broadcast %c4_i32_133 : i32 to vector<15x8xi32>
    %608 = arith.cmpi eq, %15, %607 : vector<15x8xi32>
    %609 = vector.shape_cast %516 : vector<1x8xf32> to vector<1x8xf32>
    %610 = vector.broadcast %609 : vector<1x8xf32> to vector<15x8xf32>
    %611 = arith.select %608, %610, %488 : vector<15x8xi1>, vector<15x8xf32>
    %612 = vector.extract_strided_slice %12 {offsets = [5, 0], sizes = [1, 32], strides = [1, 1]} : vector<8x32xf32> to vector<1x32xf32>
    %613 = arith.mulf %612, %19 : vector<1x32xf32>
    %cst_134 = arith.constant dense<0.000000e+00> : vector<1xf32>
    %614 = vector.multi_reduction <add>, %613, %cst_134 [1] : vector<1x32xf32> to vector<1xf32>
    %615 = vector.shape_cast %614 : vector<1xf32> to vector<1x1xf32>
    %616 = vector.broadcast %615 : vector<1x1xf32> to vector<1x8xf32>
    %617 = arith.addf %616, %606 : vector<1x8xf32>
    %618 = vector.broadcast %22 : vector<1x1xf32> to vector<1x8xf32>
    %619 = arith.addf %617, %618 : vector<1x8xf32>
    %620 = vector.extract_strided_slice %3 {offsets = [5, 0], sizes = [1, 8], strides = [1, 1]} : vector<8x8xf32> to vector<1x8xf32>
    %cst_135 = arith.constant 1.000000e+00 : f32
    %621 = vector.broadcast %cst_135 : f32 to vector<1x8xf32>
    %622 = arith.subf %621, %620 : vector<1x8xf32>
    %cst_136 = arith.constant 1.000000e+30 : f32
    %623 = vector.broadcast %cst_136 : f32 to vector<1x8xf32>
    %624 = arith.mulf %622, %623 : vector<1x8xf32>
    %625 = arith.subf %619, %624 : vector<1x8xf32>
    %c5_i32 = arith.constant 5 : i32
    %626 = vector.broadcast %c5_i32 : i32 to vector<1x8xi32>
    %627 = arith.cmpi slt, %14, %626 : vector<1x8xi32>
    %cst_137 = arith.constant -9.99999968E+37 : f32
    %628 = vector.broadcast %cst_137 : f32 to vector<1x8xf32>
    %629 = arith.select %627, %625, %628 : vector<1x8xi1>, vector<1x8xf32>
    %cst_138 = arith.constant dense<0xFF800000> : vector<1xf32>
    %630 = vector.multi_reduction <maximumf>, %629, %cst_138 [1] : vector<1x8xf32> to vector<1xf32>
    %631 = vector.shape_cast %630 : vector<1xf32> to vector<1x1xf32>
    %632 = vector.broadcast %631 : vector<1x1xf32> to vector<1x8xf32>
    %633 = arith.subf %629, %632 : vector<1x8xf32>
    %634 = math.exp %633 : vector<1x8xf32>
    %cst_139 = arith.constant dense<0.000000e+00> : vector<1xf32>
    %635 = vector.multi_reduction <add>, %634, %cst_139 [1] : vector<1x8xf32> to vector<1xf32>
    %636 = vector.shape_cast %635 : vector<1xf32> to vector<1x1xf32>
    %637 = tpu.reciprocal %636 : vector<1x1xf32> -> vector<1x1xf32>
    %638 = vector.broadcast %637 : vector<1x1xf32> to vector<1x8xf32>
    %639 = arith.mulf %634, %638 : vector<1x8xf32>
    %640 = vector.extract_strided_slice %5 {offsets = [5, 0], sizes = [1, 8], strides = [1, 1]} : vector<8x8xf32> to vector<1x8xf32>
    %641 = arith.mulf %639, %640 : vector<1x8xf32>
    %642 = arith.subf %639, %641 : vector<1x8xf32>
    %643 = vector.extract_strided_slice %598 {offsets = [0, 0], sizes = [8, 32], strides = [1, 1]} : vector<8x64xf32> to vector<8x32xf32>
    %cst_140 = arith.constant dense<0.000000e+00> : vector<1x32xf32>
    %644 = tpu.matmul %641, %643, %cst_140 {dimension_numbers = #tpu.dot_dimension_numbers<[1], [0], [0], [1], [0, 0, 1, 1], [], []>} : vector<1x8xf32>, vector<8x32xf32>, vector<1x32xf32> -> vector<1x32xf32>
    %645 = vector.extract_strided_slice %598 {offsets = [0, 32], sizes = [8, 32], strides = [1, 1]} : vector<8x64xf32> to vector<8x32xf32>
    %cst_141 = arith.constant dense<0.000000e+00> : vector<1x32xf32>
    %646 = tpu.matmul %642, %645, %cst_141 {dimension_numbers = #tpu.dot_dimension_numbers<[1], [0], [0], [1], [0, 0, 1, 1], [], []>} : vector<1x8xf32>, vector<8x32xf32>, vector<1x32xf32> -> vector<1x32xf32>
    %647 = arith.addf %644, %646 : vector<1x32xf32>
    %cst_142 = arith.constant dense<0.000000e+00> : vector<1x192xf32>
    %648 = tpu.matmul %612, %26, %cst_142 {dimension_numbers = #tpu.dot_dimension_numbers<[1], [0], [0], [1], [0, 0, 1, 1], [], []>} : vector<1x32xf32>, vector<32x192xf32>, vector<1x192xf32> -> vector<1x192xf32>
    %649 = arith.addf %648, %30 : vector<1x192xf32>
    %cst_143 = arith.constant dense<0.000000e+00> : vector<1x192xf32>
    %650 = tpu.matmul %647, %28, %cst_143 {dimension_numbers = #tpu.dot_dimension_numbers<[1], [0], [0], [1], [0, 0, 1, 1], [], []>} : vector<1x32xf32>, vector<32x192xf32>, vector<1x192xf32> -> vector<1x192xf32>
    %651 = arith.addf %650, %32 : vector<1x192xf32>
    %652 = vector.extract_strided_slice %649 {offsets = [0, 0], sizes = [1, 96], strides = [1, 1]} : vector<1x192xf32> to vector<1x96xf32>
    %653 = vector.extract_strided_slice %649 {offsets = [0, 96], sizes = [1, 96], strides = [1, 1]} : vector<1x192xf32> to vector<1x96xf32>
    %654 = vector.extract_strided_slice %651 {offsets = [0, 0], sizes = [1, 96], strides = [1, 1]} : vector<1x192xf32> to vector<1x96xf32>
    %655 = vector.extract_strided_slice %651 {offsets = [0, 96], sizes = [1, 96], strides = [1, 1]} : vector<1x192xf32> to vector<1x96xf32>
    %656 = vector.extract_strided_slice %652 {offsets = [0, 0], sizes = [1, 32], strides = [1, 1]} : vector<1x96xf32> to vector<1x32xf32>
    %657 = vector.extract_strided_slice %654 {offsets = [0, 0], sizes = [1, 32], strides = [1, 1]} : vector<1x96xf32> to vector<1x32xf32>
    %658 = arith.addf %656, %657 : vector<1x32xf32>
    %659 = arith.negf %658 : vector<1x32xf32>
    %660 = math.exp %659 : vector<1x32xf32>
    %cst_144 = arith.constant 1.000000e+00 : f32
    %661 = vector.broadcast %cst_144 : f32 to vector<1x32xf32>
    %662 = arith.addf %661, %660 : vector<1x32xf32>
    %663 = arith.divf %661, %662 : vector<1x32xf32>
    %664 = vector.extract_strided_slice %652 {offsets = [0, 32], sizes = [1, 32], strides = [1, 1]} : vector<1x96xf32> to vector<1x32xf32>
    %665 = vector.extract_strided_slice %654 {offsets = [0, 32], sizes = [1, 32], strides = [1, 1]} : vector<1x96xf32> to vector<1x32xf32>
    %666 = arith.addf %664, %665 : vector<1x32xf32>
    %667 = arith.negf %666 : vector<1x32xf32>
    %668 = math.exp %667 : vector<1x32xf32>
    %cst_145 = arith.constant 1.000000e+00 : f32
    %669 = vector.broadcast %cst_145 : f32 to vector<1x32xf32>
    %670 = arith.addf %669, %668 : vector<1x32xf32>
    %671 = arith.divf %669, %670 : vector<1x32xf32>
    %672 = vector.extract_strided_slice %652 {offsets = [0, 64], sizes = [1, 32], strides = [1, 1]} : vector<1x96xf32> to vector<1x32xf32>
    %673 = vector.extract_strided_slice %654 {offsets = [0, 64], sizes = [1, 32], strides = [1, 1]} : vector<1x96xf32> to vector<1x32xf32>
    %674 = arith.mulf %663, %673 : vector<1x32xf32>
    %675 = arith.addf %672, %674 : vector<1x32xf32>
    %676 = math.tanh %675 : vector<1x32xf32>
    %cst_146 = arith.constant 1.000000e+00 : f32
    %677 = vector.broadcast %cst_146 : f32 to vector<1x32xf32>
    %678 = arith.subf %677, %671 : vector<1x32xf32>
    %679 = arith.mulf %678, %676 : vector<1x32xf32>
    %680 = arith.mulf %671, %647 : vector<1x32xf32>
    %681 = arith.addf %679, %680 : vector<1x32xf32>
    %682 = vector.extract_strided_slice %655 {offsets = [0, 0], sizes = [1, 32], strides = [1, 1]} : vector<1x96xf32> to vector<1x32xf32>
    %683 = vector.extract_strided_slice %653 {offsets = [0, 0], sizes = [1, 32], strides = [1, 1]} : vector<1x96xf32> to vector<1x32xf32>
    %684 = arith.addf %682, %683 : vector<1x32xf32>
    %685 = arith.negf %684 : vector<1x32xf32>
    %686 = math.exp %685 : vector<1x32xf32>
    %cst_147 = arith.constant 1.000000e+00 : f32
    %687 = vector.broadcast %cst_147 : f32 to vector<1x32xf32>
    %688 = arith.addf %687, %686 : vector<1x32xf32>
    %689 = arith.divf %687, %688 : vector<1x32xf32>
    %690 = vector.extract_strided_slice %655 {offsets = [0, 32], sizes = [1, 32], strides = [1, 1]} : vector<1x96xf32> to vector<1x32xf32>
    %691 = vector.extract_strided_slice %653 {offsets = [0, 32], sizes = [1, 32], strides = [1, 1]} : vector<1x96xf32> to vector<1x32xf32>
    %692 = arith.addf %690, %691 : vector<1x32xf32>
    %693 = arith.negf %692 : vector<1x32xf32>
    %694 = math.exp %693 : vector<1x32xf32>
    %cst_148 = arith.constant 1.000000e+00 : f32
    %695 = vector.broadcast %cst_148 : f32 to vector<1x32xf32>
    %696 = arith.addf %695, %694 : vector<1x32xf32>
    %697 = arith.divf %695, %696 : vector<1x32xf32>
    %698 = vector.extract_strided_slice %655 {offsets = [0, 64], sizes = [1, 32], strides = [1, 1]} : vector<1x96xf32> to vector<1x32xf32>
    %699 = vector.extract_strided_slice %653 {offsets = [0, 64], sizes = [1, 32], strides = [1, 1]} : vector<1x96xf32> to vector<1x32xf32>
    %700 = arith.mulf %689, %699 : vector<1x32xf32>
    %701 = arith.addf %698, %700 : vector<1x32xf32>
    %702 = math.tanh %701 : vector<1x32xf32>
    %cst_149 = arith.constant 1.000000e+00 : f32
    %703 = vector.broadcast %cst_149 : f32 to vector<1x32xf32>
    %704 = arith.subf %703, %697 : vector<1x32xf32>
    %705 = arith.mulf %704, %702 : vector<1x32xf32>
    %706 = arith.mulf %697, %612 : vector<1x32xf32>
    %707 = arith.addf %705, %706 : vector<1x32xf32>
    %708 = arith.addf %681, %707 : vector<1x32xf32>
    %c5_i32_150 = arith.constant 5 : i32
    %709 = vector.broadcast %c5_i32_150 : i32 to vector<8x1xi32>
    %710 = arith.cmpi eq, %13, %709 : vector<8x1xi32>
    %711 = vector.shape_cast %710 : vector<8x1xi1> to vector<8x1xi1>
    %712 = vector.broadcast %711 : vector<8x1xi1> to vector<8x32xi1>
    %713 = vector.shape_cast %708 : vector<1x32xf32> to vector<1x32xf32>
    %714 = vector.broadcast %713 : vector<1x32xf32> to vector<8x32xf32>
    %715 = arith.select %712, %714, %592 : vector<8x32xi1>, vector<8x32xf32>
    %cst_151 = arith.constant dense<0.000000e+00> : vector<1x64xf32>
    %716 = tpu.matmul %708, %24, %cst_151 {dimension_numbers = #tpu.dot_dimension_numbers<[1], [0], [0], [1], [0, 0, 1, 1], [], []>} : vector<1x32xf32>, vector<32x64xf32>, vector<1x64xf32> -> vector<1x64xf32>
    %717 = vector.shape_cast %710 : vector<8x1xi1> to vector<8x1xi1>
    %718 = vector.broadcast %717 : vector<8x1xi1> to vector<8x64xi1>
    %719 = vector.shape_cast %716 : vector<1x64xf32> to vector<1x64xf32>
    %720 = vector.broadcast %719 : vector<1x64xf32> to vector<8x64xf32>
    %721 = arith.select %718, %720, %598 : vector<8x64xi1>, vector<8x64xf32>
    %722 = arith.mulf %708, %20 : vector<1x32xf32>
    %cst_152 = arith.constant dense<0.000000e+00> : vector<1xf32>
    %723 = vector.multi_reduction <add>, %722, %cst_152 [1] : vector<1x32xf32> to vector<1xf32>
    %724 = vector.shape_cast %723 : vector<1xf32> to vector<1x1xf32>
    %c5_i32_153 = arith.constant 5 : i32
    %725 = vector.broadcast %c5_i32_153 : i32 to vector<1x8xi32>
    %726 = arith.cmpi eq, %14, %725 : vector<1x8xi32>
    %727 = vector.shape_cast %724 : vector<1x1xf32> to vector<1x1xf32>
    %728 = vector.broadcast %727 : vector<1x1xf32> to vector<1x8xf32>
    %729 = arith.select %726, %728, %606 : vector<1x8xi1>, vector<1x8xf32>
    %c5_i32_154 = arith.constant 5 : i32
    %730 = vector.broadcast %c5_i32_154 : i32 to vector<15x8xi32>
    %731 = arith.cmpi eq, %15, %730 : vector<15x8xi32>
    %732 = vector.shape_cast %639 : vector<1x8xf32> to vector<1x8xf32>
    %733 = vector.broadcast %732 : vector<1x8xf32> to vector<15x8xf32>
    %734 = arith.select %731, %733, %611 : vector<15x8xi1>, vector<15x8xf32>
    %735 = vector.extract_strided_slice %12 {offsets = [6, 0], sizes = [1, 32], strides = [1, 1]} : vector<8x32xf32> to vector<1x32xf32>
    %736 = arith.mulf %735, %19 : vector<1x32xf32>
    %cst_155 = arith.constant dense<0.000000e+00> : vector<1xf32>
    %737 = vector.multi_reduction <add>, %736, %cst_155 [1] : vector<1x32xf32> to vector<1xf32>
    %738 = vector.shape_cast %737 : vector<1xf32> to vector<1x1xf32>
    %739 = vector.broadcast %738 : vector<1x1xf32> to vector<1x8xf32>
    %740 = arith.addf %739, %729 : vector<1x8xf32>
    %741 = vector.broadcast %22 : vector<1x1xf32> to vector<1x8xf32>
    %742 = arith.addf %740, %741 : vector<1x8xf32>
    %743 = vector.extract_strided_slice %3 {offsets = [6, 0], sizes = [1, 8], strides = [1, 1]} : vector<8x8xf32> to vector<1x8xf32>
    %cst_156 = arith.constant 1.000000e+00 : f32
    %744 = vector.broadcast %cst_156 : f32 to vector<1x8xf32>
    %745 = arith.subf %744, %743 : vector<1x8xf32>
    %cst_157 = arith.constant 1.000000e+30 : f32
    %746 = vector.broadcast %cst_157 : f32 to vector<1x8xf32>
    %747 = arith.mulf %745, %746 : vector<1x8xf32>
    %748 = arith.subf %742, %747 : vector<1x8xf32>
    %c6_i32 = arith.constant 6 : i32
    %749 = vector.broadcast %c6_i32 : i32 to vector<1x8xi32>
    %750 = arith.cmpi slt, %14, %749 : vector<1x8xi32>
    %cst_158 = arith.constant -9.99999968E+37 : f32
    %751 = vector.broadcast %cst_158 : f32 to vector<1x8xf32>
    %752 = arith.select %750, %748, %751 : vector<1x8xi1>, vector<1x8xf32>
    %cst_159 = arith.constant dense<0xFF800000> : vector<1xf32>
    %753 = vector.multi_reduction <maximumf>, %752, %cst_159 [1] : vector<1x8xf32> to vector<1xf32>
    %754 = vector.shape_cast %753 : vector<1xf32> to vector<1x1xf32>
    %755 = vector.broadcast %754 : vector<1x1xf32> to vector<1x8xf32>
    %756 = arith.subf %752, %755 : vector<1x8xf32>
    %757 = math.exp %756 : vector<1x8xf32>
    %cst_160 = arith.constant dense<0.000000e+00> : vector<1xf32>
    %758 = vector.multi_reduction <add>, %757, %cst_160 [1] : vector<1x8xf32> to vector<1xf32>
    %759 = vector.shape_cast %758 : vector<1xf32> to vector<1x1xf32>
    %760 = tpu.reciprocal %759 : vector<1x1xf32> -> vector<1x1xf32>
    %761 = vector.broadcast %760 : vector<1x1xf32> to vector<1x8xf32>
    %762 = arith.mulf %757, %761 : vector<1x8xf32>
    %763 = vector.extract_strided_slice %5 {offsets = [6, 0], sizes = [1, 8], strides = [1, 1]} : vector<8x8xf32> to vector<1x8xf32>
    %764 = arith.mulf %762, %763 : vector<1x8xf32>
    %765 = arith.subf %762, %764 : vector<1x8xf32>
    %766 = vector.extract_strided_slice %721 {offsets = [0, 0], sizes = [8, 32], strides = [1, 1]} : vector<8x64xf32> to vector<8x32xf32>
    %cst_161 = arith.constant dense<0.000000e+00> : vector<1x32xf32>
    %767 = tpu.matmul %764, %766, %cst_161 {dimension_numbers = #tpu.dot_dimension_numbers<[1], [0], [0], [1], [0, 0, 1, 1], [], []>} : vector<1x8xf32>, vector<8x32xf32>, vector<1x32xf32> -> vector<1x32xf32>
    %768 = vector.extract_strided_slice %721 {offsets = [0, 32], sizes = [8, 32], strides = [1, 1]} : vector<8x64xf32> to vector<8x32xf32>
    %cst_162 = arith.constant dense<0.000000e+00> : vector<1x32xf32>
    %769 = tpu.matmul %765, %768, %cst_162 {dimension_numbers = #tpu.dot_dimension_numbers<[1], [0], [0], [1], [0, 0, 1, 1], [], []>} : vector<1x8xf32>, vector<8x32xf32>, vector<1x32xf32> -> vector<1x32xf32>
    %770 = arith.addf %767, %769 : vector<1x32xf32>
    %cst_163 = arith.constant dense<0.000000e+00> : vector<1x192xf32>
    %771 = tpu.matmul %735, %26, %cst_163 {dimension_numbers = #tpu.dot_dimension_numbers<[1], [0], [0], [1], [0, 0, 1, 1], [], []>} : vector<1x32xf32>, vector<32x192xf32>, vector<1x192xf32> -> vector<1x192xf32>
    %772 = arith.addf %771, %30 : vector<1x192xf32>
    %cst_164 = arith.constant dense<0.000000e+00> : vector<1x192xf32>
    %773 = tpu.matmul %770, %28, %cst_164 {dimension_numbers = #tpu.dot_dimension_numbers<[1], [0], [0], [1], [0, 0, 1, 1], [], []>} : vector<1x32xf32>, vector<32x192xf32>, vector<1x192xf32> -> vector<1x192xf32>
    %774 = arith.addf %773, %32 : vector<1x192xf32>
    %775 = vector.extract_strided_slice %772 {offsets = [0, 0], sizes = [1, 96], strides = [1, 1]} : vector<1x192xf32> to vector<1x96xf32>
    %776 = vector.extract_strided_slice %772 {offsets = [0, 96], sizes = [1, 96], strides = [1, 1]} : vector<1x192xf32> to vector<1x96xf32>
    %777 = vector.extract_strided_slice %774 {offsets = [0, 0], sizes = [1, 96], strides = [1, 1]} : vector<1x192xf32> to vector<1x96xf32>
    %778 = vector.extract_strided_slice %774 {offsets = [0, 96], sizes = [1, 96], strides = [1, 1]} : vector<1x192xf32> to vector<1x96xf32>
    %779 = vector.extract_strided_slice %775 {offsets = [0, 0], sizes = [1, 32], strides = [1, 1]} : vector<1x96xf32> to vector<1x32xf32>
    %780 = vector.extract_strided_slice %777 {offsets = [0, 0], sizes = [1, 32], strides = [1, 1]} : vector<1x96xf32> to vector<1x32xf32>
    %781 = arith.addf %779, %780 : vector<1x32xf32>
    %782 = arith.negf %781 : vector<1x32xf32>
    %783 = math.exp %782 : vector<1x32xf32>
    %cst_165 = arith.constant 1.000000e+00 : f32
    %784 = vector.broadcast %cst_165 : f32 to vector<1x32xf32>
    %785 = arith.addf %784, %783 : vector<1x32xf32>
    %786 = arith.divf %784, %785 : vector<1x32xf32>
    %787 = vector.extract_strided_slice %775 {offsets = [0, 32], sizes = [1, 32], strides = [1, 1]} : vector<1x96xf32> to vector<1x32xf32>
    %788 = vector.extract_strided_slice %777 {offsets = [0, 32], sizes = [1, 32], strides = [1, 1]} : vector<1x96xf32> to vector<1x32xf32>
    %789 = arith.addf %787, %788 : vector<1x32xf32>
    %790 = arith.negf %789 : vector<1x32xf32>
    %791 = math.exp %790 : vector<1x32xf32>
    %cst_166 = arith.constant 1.000000e+00 : f32
    %792 = vector.broadcast %cst_166 : f32 to vector<1x32xf32>
    %793 = arith.addf %792, %791 : vector<1x32xf32>
    %794 = arith.divf %792, %793 : vector<1x32xf32>
    %795 = vector.extract_strided_slice %775 {offsets = [0, 64], sizes = [1, 32], strides = [1, 1]} : vector<1x96xf32> to vector<1x32xf32>
    %796 = vector.extract_strided_slice %777 {offsets = [0, 64], sizes = [1, 32], strides = [1, 1]} : vector<1x96xf32> to vector<1x32xf32>
    %797 = arith.mulf %786, %796 : vector<1x32xf32>
    %798 = arith.addf %795, %797 : vector<1x32xf32>
    %799 = math.tanh %798 : vector<1x32xf32>
    %cst_167 = arith.constant 1.000000e+00 : f32
    %800 = vector.broadcast %cst_167 : f32 to vector<1x32xf32>
    %801 = arith.subf %800, %794 : vector<1x32xf32>
    %802 = arith.mulf %801, %799 : vector<1x32xf32>
    %803 = arith.mulf %794, %770 : vector<1x32xf32>
    %804 = arith.addf %802, %803 : vector<1x32xf32>
    %805 = vector.extract_strided_slice %778 {offsets = [0, 0], sizes = [1, 32], strides = [1, 1]} : vector<1x96xf32> to vector<1x32xf32>
    %806 = vector.extract_strided_slice %776 {offsets = [0, 0], sizes = [1, 32], strides = [1, 1]} : vector<1x96xf32> to vector<1x32xf32>
    %807 = arith.addf %805, %806 : vector<1x32xf32>
    %808 = arith.negf %807 : vector<1x32xf32>
    %809 = math.exp %808 : vector<1x32xf32>
    %cst_168 = arith.constant 1.000000e+00 : f32
    %810 = vector.broadcast %cst_168 : f32 to vector<1x32xf32>
    %811 = arith.addf %810, %809 : vector<1x32xf32>
    %812 = arith.divf %810, %811 : vector<1x32xf32>
    %813 = vector.extract_strided_slice %778 {offsets = [0, 32], sizes = [1, 32], strides = [1, 1]} : vector<1x96xf32> to vector<1x32xf32>
    %814 = vector.extract_strided_slice %776 {offsets = [0, 32], sizes = [1, 32], strides = [1, 1]} : vector<1x96xf32> to vector<1x32xf32>
    %815 = arith.addf %813, %814 : vector<1x32xf32>
    %816 = arith.negf %815 : vector<1x32xf32>
    %817 = math.exp %816 : vector<1x32xf32>
    %cst_169 = arith.constant 1.000000e+00 : f32
    %818 = vector.broadcast %cst_169 : f32 to vector<1x32xf32>
    %819 = arith.addf %818, %817 : vector<1x32xf32>
    %820 = arith.divf %818, %819 : vector<1x32xf32>
    %821 = vector.extract_strided_slice %778 {offsets = [0, 64], sizes = [1, 32], strides = [1, 1]} : vector<1x96xf32> to vector<1x32xf32>
    %822 = vector.extract_strided_slice %776 {offsets = [0, 64], sizes = [1, 32], strides = [1, 1]} : vector<1x96xf32> to vector<1x32xf32>
    %823 = arith.mulf %812, %822 : vector<1x32xf32>
    %824 = arith.addf %821, %823 : vector<1x32xf32>
    %825 = math.tanh %824 : vector<1x32xf32>
    %cst_170 = arith.constant 1.000000e+00 : f32
    %826 = vector.broadcast %cst_170 : f32 to vector<1x32xf32>
    %827 = arith.subf %826, %820 : vector<1x32xf32>
    %828 = arith.mulf %827, %825 : vector<1x32xf32>
    %829 = arith.mulf %820, %735 : vector<1x32xf32>
    %830 = arith.addf %828, %829 : vector<1x32xf32>
    %831 = arith.addf %804, %830 : vector<1x32xf32>
    %c6_i32_171 = arith.constant 6 : i32
    %832 = vector.broadcast %c6_i32_171 : i32 to vector<8x1xi32>
    %833 = arith.cmpi eq, %13, %832 : vector<8x1xi32>
    %834 = vector.shape_cast %833 : vector<8x1xi1> to vector<8x1xi1>
    %835 = vector.broadcast %834 : vector<8x1xi1> to vector<8x32xi1>
    %836 = vector.shape_cast %831 : vector<1x32xf32> to vector<1x32xf32>
    %837 = vector.broadcast %836 : vector<1x32xf32> to vector<8x32xf32>
    %838 = arith.select %835, %837, %715 : vector<8x32xi1>, vector<8x32xf32>
    %cst_172 = arith.constant dense<0.000000e+00> : vector<1x64xf32>
    %839 = tpu.matmul %831, %24, %cst_172 {dimension_numbers = #tpu.dot_dimension_numbers<[1], [0], [0], [1], [0, 0, 1, 1], [], []>} : vector<1x32xf32>, vector<32x64xf32>, vector<1x64xf32> -> vector<1x64xf32>
    %840 = vector.shape_cast %833 : vector<8x1xi1> to vector<8x1xi1>
    %841 = vector.broadcast %840 : vector<8x1xi1> to vector<8x64xi1>
    %842 = vector.shape_cast %839 : vector<1x64xf32> to vector<1x64xf32>
    %843 = vector.broadcast %842 : vector<1x64xf32> to vector<8x64xf32>
    %844 = arith.select %841, %843, %721 : vector<8x64xi1>, vector<8x64xf32>
    %845 = arith.mulf %831, %20 : vector<1x32xf32>
    %cst_173 = arith.constant dense<0.000000e+00> : vector<1xf32>
    %846 = vector.multi_reduction <add>, %845, %cst_173 [1] : vector<1x32xf32> to vector<1xf32>
    %847 = vector.shape_cast %846 : vector<1xf32> to vector<1x1xf32>
    %c6_i32_174 = arith.constant 6 : i32
    %848 = vector.broadcast %c6_i32_174 : i32 to vector<1x8xi32>
    %849 = arith.cmpi eq, %14, %848 : vector<1x8xi32>
    %850 = vector.shape_cast %847 : vector<1x1xf32> to vector<1x1xf32>
    %851 = vector.broadcast %850 : vector<1x1xf32> to vector<1x8xf32>
    %852 = arith.select %849, %851, %729 : vector<1x8xi1>, vector<1x8xf32>
    %c6_i32_175 = arith.constant 6 : i32
    %853 = vector.broadcast %c6_i32_175 : i32 to vector<15x8xi32>
    %854 = arith.cmpi eq, %15, %853 : vector<15x8xi32>
    %855 = vector.shape_cast %762 : vector<1x8xf32> to vector<1x8xf32>
    %856 = vector.broadcast %855 : vector<1x8xf32> to vector<15x8xf32>
    %857 = arith.select %854, %856, %734 : vector<15x8xi1>, vector<15x8xf32>
    %858 = vector.extract_strided_slice %12 {offsets = [7, 0], sizes = [1, 32], strides = [1, 1]} : vector<8x32xf32> to vector<1x32xf32>
    %859 = arith.mulf %858, %19 : vector<1x32xf32>
    %cst_176 = arith.constant dense<0.000000e+00> : vector<1xf32>
    %860 = vector.multi_reduction <add>, %859, %cst_176 [1] : vector<1x32xf32> to vector<1xf32>
    %861 = vector.shape_cast %860 : vector<1xf32> to vector<1x1xf32>
    %862 = vector.broadcast %861 : vector<1x1xf32> to vector<1x8xf32>
    %863 = arith.addf %862, %852 : vector<1x8xf32>
    %864 = vector.broadcast %22 : vector<1x1xf32> to vector<1x8xf32>
    %865 = arith.addf %863, %864 : vector<1x8xf32>
    %866 = vector.extract_strided_slice %3 {offsets = [7, 0], sizes = [1, 8], strides = [1, 1]} : vector<8x8xf32> to vector<1x8xf32>
    %cst_177 = arith.constant 1.000000e+00 : f32
    %867 = vector.broadcast %cst_177 : f32 to vector<1x8xf32>
    %868 = arith.subf %867, %866 : vector<1x8xf32>
    %cst_178 = arith.constant 1.000000e+30 : f32
    %869 = vector.broadcast %cst_178 : f32 to vector<1x8xf32>
    %870 = arith.mulf %868, %869 : vector<1x8xf32>
    %871 = arith.subf %865, %870 : vector<1x8xf32>
    %c7_i32 = arith.constant 7 : i32
    %872 = vector.broadcast %c7_i32 : i32 to vector<1x8xi32>
    %873 = arith.cmpi slt, %14, %872 : vector<1x8xi32>
    %cst_179 = arith.constant -9.99999968E+37 : f32
    %874 = vector.broadcast %cst_179 : f32 to vector<1x8xf32>
    %875 = arith.select %873, %871, %874 : vector<1x8xi1>, vector<1x8xf32>
    %cst_180 = arith.constant dense<0xFF800000> : vector<1xf32>
    %876 = vector.multi_reduction <maximumf>, %875, %cst_180 [1] : vector<1x8xf32> to vector<1xf32>
    %877 = vector.shape_cast %876 : vector<1xf32> to vector<1x1xf32>
    %878 = vector.broadcast %877 : vector<1x1xf32> to vector<1x8xf32>
    %879 = arith.subf %875, %878 : vector<1x8xf32>
    %880 = math.exp %879 : vector<1x8xf32>
    %cst_181 = arith.constant dense<0.000000e+00> : vector<1xf32>
    %881 = vector.multi_reduction <add>, %880, %cst_181 [1] : vector<1x8xf32> to vector<1xf32>
    %882 = vector.shape_cast %881 : vector<1xf32> to vector<1x1xf32>
    %883 = tpu.reciprocal %882 : vector<1x1xf32> -> vector<1x1xf32>
    %884 = vector.broadcast %883 : vector<1x1xf32> to vector<1x8xf32>
    %885 = arith.mulf %880, %884 : vector<1x8xf32>
    %886 = vector.extract_strided_slice %5 {offsets = [7, 0], sizes = [1, 8], strides = [1, 1]} : vector<8x8xf32> to vector<1x8xf32>
    %887 = arith.mulf %885, %886 : vector<1x8xf32>
    %888 = arith.subf %885, %887 : vector<1x8xf32>
    %889 = vector.extract_strided_slice %844 {offsets = [0, 0], sizes = [8, 32], strides = [1, 1]} : vector<8x64xf32> to vector<8x32xf32>
    %cst_182 = arith.constant dense<0.000000e+00> : vector<1x32xf32>
    %890 = tpu.matmul %887, %889, %cst_182 {dimension_numbers = #tpu.dot_dimension_numbers<[1], [0], [0], [1], [0, 0, 1, 1], [], []>} : vector<1x8xf32>, vector<8x32xf32>, vector<1x32xf32> -> vector<1x32xf32>
    %891 = vector.extract_strided_slice %844 {offsets = [0, 32], sizes = [8, 32], strides = [1, 1]} : vector<8x64xf32> to vector<8x32xf32>
    %cst_183 = arith.constant dense<0.000000e+00> : vector<1x32xf32>
    %892 = tpu.matmul %888, %891, %cst_183 {dimension_numbers = #tpu.dot_dimension_numbers<[1], [0], [0], [1], [0, 0, 1, 1], [], []>} : vector<1x8xf32>, vector<8x32xf32>, vector<1x32xf32> -> vector<1x32xf32>
    %893 = arith.addf %890, %892 : vector<1x32xf32>
    %cst_184 = arith.constant dense<0.000000e+00> : vector<1x192xf32>
    %894 = tpu.matmul %858, %26, %cst_184 {dimension_numbers = #tpu.dot_dimension_numbers<[1], [0], [0], [1], [0, 0, 1, 1], [], []>} : vector<1x32xf32>, vector<32x192xf32>, vector<1x192xf32> -> vector<1x192xf32>
    %895 = arith.addf %894, %30 : vector<1x192xf32>
    %cst_185 = arith.constant dense<0.000000e+00> : vector<1x192xf32>
    %896 = tpu.matmul %893, %28, %cst_185 {dimension_numbers = #tpu.dot_dimension_numbers<[1], [0], [0], [1], [0, 0, 1, 1], [], []>} : vector<1x32xf32>, vector<32x192xf32>, vector<1x192xf32> -> vector<1x192xf32>
    %897 = arith.addf %896, %32 : vector<1x192xf32>
    %898 = vector.extract_strided_slice %895 {offsets = [0, 0], sizes = [1, 96], strides = [1, 1]} : vector<1x192xf32> to vector<1x96xf32>
    %899 = vector.extract_strided_slice %895 {offsets = [0, 96], sizes = [1, 96], strides = [1, 1]} : vector<1x192xf32> to vector<1x96xf32>
    %900 = vector.extract_strided_slice %897 {offsets = [0, 0], sizes = [1, 96], strides = [1, 1]} : vector<1x192xf32> to vector<1x96xf32>
    %901 = vector.extract_strided_slice %897 {offsets = [0, 96], sizes = [1, 96], strides = [1, 1]} : vector<1x192xf32> to vector<1x96xf32>
    %902 = vector.extract_strided_slice %898 {offsets = [0, 0], sizes = [1, 32], strides = [1, 1]} : vector<1x96xf32> to vector<1x32xf32>
    %903 = vector.extract_strided_slice %900 {offsets = [0, 0], sizes = [1, 32], strides = [1, 1]} : vector<1x96xf32> to vector<1x32xf32>
    %904 = arith.addf %902, %903 : vector<1x32xf32>
    %905 = arith.negf %904 : vector<1x32xf32>
    %906 = math.exp %905 : vector<1x32xf32>
    %cst_186 = arith.constant 1.000000e+00 : f32
    %907 = vector.broadcast %cst_186 : f32 to vector<1x32xf32>
    %908 = arith.addf %907, %906 : vector<1x32xf32>
    %909 = arith.divf %907, %908 : vector<1x32xf32>
    %910 = vector.extract_strided_slice %898 {offsets = [0, 32], sizes = [1, 32], strides = [1, 1]} : vector<1x96xf32> to vector<1x32xf32>
    %911 = vector.extract_strided_slice %900 {offsets = [0, 32], sizes = [1, 32], strides = [1, 1]} : vector<1x96xf32> to vector<1x32xf32>
    %912 = arith.addf %910, %911 : vector<1x32xf32>
    %913 = arith.negf %912 : vector<1x32xf32>
    %914 = math.exp %913 : vector<1x32xf32>
    %cst_187 = arith.constant 1.000000e+00 : f32
    %915 = vector.broadcast %cst_187 : f32 to vector<1x32xf32>
    %916 = arith.addf %915, %914 : vector<1x32xf32>
    %917 = arith.divf %915, %916 : vector<1x32xf32>
    %918 = vector.extract_strided_slice %898 {offsets = [0, 64], sizes = [1, 32], strides = [1, 1]} : vector<1x96xf32> to vector<1x32xf32>
    %919 = vector.extract_strided_slice %900 {offsets = [0, 64], sizes = [1, 32], strides = [1, 1]} : vector<1x96xf32> to vector<1x32xf32>
    %920 = arith.mulf %909, %919 : vector<1x32xf32>
    %921 = arith.addf %918, %920 : vector<1x32xf32>
    %922 = math.tanh %921 : vector<1x32xf32>
    %cst_188 = arith.constant 1.000000e+00 : f32
    %923 = vector.broadcast %cst_188 : f32 to vector<1x32xf32>
    %924 = arith.subf %923, %917 : vector<1x32xf32>
    %925 = arith.mulf %924, %922 : vector<1x32xf32>
    %926 = arith.mulf %917, %893 : vector<1x32xf32>
    %927 = arith.addf %925, %926 : vector<1x32xf32>
    %928 = vector.extract_strided_slice %901 {offsets = [0, 0], sizes = [1, 32], strides = [1, 1]} : vector<1x96xf32> to vector<1x32xf32>
    %929 = vector.extract_strided_slice %899 {offsets = [0, 0], sizes = [1, 32], strides = [1, 1]} : vector<1x96xf32> to vector<1x32xf32>
    %930 = arith.addf %928, %929 : vector<1x32xf32>
    %931 = arith.negf %930 : vector<1x32xf32>
    %932 = math.exp %931 : vector<1x32xf32>
    %cst_189 = arith.constant 1.000000e+00 : f32
    %933 = vector.broadcast %cst_189 : f32 to vector<1x32xf32>
    %934 = arith.addf %933, %932 : vector<1x32xf32>
    %935 = arith.divf %933, %934 : vector<1x32xf32>
    %936 = vector.extract_strided_slice %901 {offsets = [0, 32], sizes = [1, 32], strides = [1, 1]} : vector<1x96xf32> to vector<1x32xf32>
    %937 = vector.extract_strided_slice %899 {offsets = [0, 32], sizes = [1, 32], strides = [1, 1]} : vector<1x96xf32> to vector<1x32xf32>
    %938 = arith.addf %936, %937 : vector<1x32xf32>
    %939 = arith.negf %938 : vector<1x32xf32>
    %940 = math.exp %939 : vector<1x32xf32>
    %cst_190 = arith.constant 1.000000e+00 : f32
    %941 = vector.broadcast %cst_190 : f32 to vector<1x32xf32>
    %942 = arith.addf %941, %940 : vector<1x32xf32>
    %943 = arith.divf %941, %942 : vector<1x32xf32>
    %944 = vector.extract_strided_slice %901 {offsets = [0, 64], sizes = [1, 32], strides = [1, 1]} : vector<1x96xf32> to vector<1x32xf32>
    %945 = vector.extract_strided_slice %899 {offsets = [0, 64], sizes = [1, 32], strides = [1, 1]} : vector<1x96xf32> to vector<1x32xf32>
    %946 = arith.mulf %935, %945 : vector<1x32xf32>
    %947 = arith.addf %944, %946 : vector<1x32xf32>
    %948 = math.tanh %947 : vector<1x32xf32>
    %cst_191 = arith.constant 1.000000e+00 : f32
    %949 = vector.broadcast %cst_191 : f32 to vector<1x32xf32>
    %950 = arith.subf %949, %943 : vector<1x32xf32>
    %951 = arith.mulf %950, %948 : vector<1x32xf32>
    %952 = arith.mulf %943, %858 : vector<1x32xf32>
    %953 = arith.addf %951, %952 : vector<1x32xf32>
    %954 = arith.addf %927, %953 : vector<1x32xf32>
    %c7_i32_192 = arith.constant 7 : i32
    %955 = vector.broadcast %c7_i32_192 : i32 to vector<8x1xi32>
    %956 = arith.cmpi eq, %13, %955 : vector<8x1xi32>
    %957 = vector.shape_cast %956 : vector<8x1xi1> to vector<8x1xi1>
    %958 = vector.broadcast %957 : vector<8x1xi1> to vector<8x32xi1>
    %959 = vector.shape_cast %954 : vector<1x32xf32> to vector<1x32xf32>
    %960 = vector.broadcast %959 : vector<1x32xf32> to vector<8x32xf32>
    %961 = arith.select %958, %960, %838 : vector<8x32xi1>, vector<8x32xf32>
    %c7_i32_193 = arith.constant 7 : i32
    %962 = vector.broadcast %c7_i32_193 : i32 to vector<15x8xi32>
    %963 = arith.cmpi eq, %15, %962 : vector<15x8xi32>
    %964 = vector.shape_cast %885 : vector<1x8xf32> to vector<1x8xf32>
    %965 = vector.broadcast %964 : vector<1x8xf32> to vector<15x8xf32>
    %966 = arith.select %963, %965, %857 : vector<15x8xi1>, vector<15x8xf32>
    %c1 = arith.constant 1 : index
    %c0_194 = arith.constant 0 : index
    %c0_195 = arith.constant 0 : index
    %967 = vector.load %arg6[%c1, %c0_194, %c0_195] : memref<2x2x32xf32, #tpu.memory_space<vmem>>, vector<1x2x32xf32>
    %968 = vector.shape_cast %967 : vector<1x2x32xf32> to vector<2x32xf32>
    %969 = vector.extract_strided_slice %968 {offsets = [0, 0], sizes = [1, 32], strides = [1, 1]} : vector<2x32xf32> to vector<1x32xf32>
    %970 = vector.extract_strided_slice %968 {offsets = [1, 0], sizes = [1, 32], strides = [1, 1]} : vector<2x32xf32> to vector<1x32xf32>
    %c1_196 = arith.constant 1 : index
    %c0_197 = arith.constant 0 : index
    %c0_198 = arith.constant 0 : index
    %971 = vector.load %arg7[%c1_196, %c0_197, %c0_198] : memref<2x1x1xf32, #tpu.memory_space<vmem>>, vector<1x1x1xf32>
    %972 = vector.shape_cast %971 : vector<1x1x1xf32> to vector<1x1xf32>
    %c1_199 = arith.constant 1 : index
    %c0_200 = arith.constant 0 : index
    %c0_201 = arith.constant 0 : index
    %973 = vector.load %arg8[%c1_199, %c0_200, %c0_201] : memref<2x32x64xf32, #tpu.memory_space<vmem>>, vector<1x32x64xf32>
    %974 = vector.shape_cast %973 : vector<1x32x64xf32> to vector<32x64xf32>
    %c1_202 = arith.constant 1 : index
    %c0_203 = arith.constant 0 : index
    %c0_204 = arith.constant 0 : index
    %975 = vector.load %arg9[%c1_202, %c0_203, %c0_204] : memref<2x32x192xf32, #tpu.memory_space<vmem>>, vector<1x32x192xf32>
    %976 = vector.shape_cast %975 : vector<1x32x192xf32> to vector<32x192xf32>
    %c1_205 = arith.constant 1 : index
    %c0_206 = arith.constant 0 : index
    %c0_207 = arith.constant 0 : index
    %977 = vector.load %arg10[%c1_205, %c0_206, %c0_207] : memref<2x32x192xf32, #tpu.memory_space<vmem>>, vector<1x32x192xf32>
    %978 = vector.shape_cast %977 : vector<1x32x192xf32> to vector<32x192xf32>
    %c1_208 = arith.constant 1 : index
    %c0_209 = arith.constant 0 : index
    %c0_210 = arith.constant 0 : index
    %979 = vector.load %arg11[%c1_208, %c0_209, %c0_210] : memref<2x1x192xf32, #tpu.memory_space<vmem>>, vector<1x1x192xf32>
    %980 = vector.shape_cast %979 : vector<1x1x192xf32> to vector<1x192xf32>
    %c1_211 = arith.constant 1 : index
    %c0_212 = arith.constant 0 : index
    %c0_213 = arith.constant 0 : index
    %981 = vector.load %arg12[%c1_211, %c0_212, %c0_213] : memref<2x1x192xf32, #tpu.memory_space<vmem>>, vector<1x1x192xf32>
    %982 = vector.shape_cast %981 : vector<1x1x192xf32> to vector<1x192xf32>
    %cst_214 = arith.constant 0.000000e+00 : f32
    %983 = vector.broadcast %cst_214 : f32 to vector<8x32xf32>
    %cst_215 = arith.constant 0.000000e+00 : f32
    %984 = vector.broadcast %cst_215 : f32 to vector<8x64xf32>
    %cst_216 = arith.constant 0.000000e+00 : f32
    %985 = vector.broadcast %cst_216 : f32 to vector<1x8xf32>
    %986 = vector.extract_strided_slice %961 {offsets = [0, 0], sizes = [1, 32], strides = [1, 1]} : vector<8x32xf32> to vector<1x32xf32>
    %cst_217 = arith.constant 0.000000e+00 : f32
    %987 = vector.broadcast %cst_217 : f32 to vector<1x32xf32>
    %cst_218 = arith.constant dense<0.000000e+00> : vector<1x192xf32>
    %988 = tpu.matmul %986, %976, %cst_218 {dimension_numbers = #tpu.dot_dimension_numbers<[1], [0], [0], [1], [0, 0, 1, 1], [], []>} : vector<1x32xf32>, vector<32x192xf32>, vector<1x192xf32> -> vector<1x192xf32>
    %989 = arith.addf %988, %980 : vector<1x192xf32>
    %cst_219 = arith.constant dense<0.000000e+00> : vector<1x192xf32>
    %990 = tpu.matmul %987, %978, %cst_219 {dimension_numbers = #tpu.dot_dimension_numbers<[1], [0], [0], [1], [0, 0, 1, 1], [], []>} : vector<1x32xf32>, vector<32x192xf32>, vector<1x192xf32> -> vector<1x192xf32>
    %991 = arith.addf %990, %982 : vector<1x192xf32>
    %992 = vector.extract_strided_slice %989 {offsets = [0, 0], sizes = [1, 96], strides = [1, 1]} : vector<1x192xf32> to vector<1x96xf32>
    %993 = vector.extract_strided_slice %989 {offsets = [0, 96], sizes = [1, 96], strides = [1, 1]} : vector<1x192xf32> to vector<1x96xf32>
    %994 = vector.extract_strided_slice %991 {offsets = [0, 0], sizes = [1, 96], strides = [1, 1]} : vector<1x192xf32> to vector<1x96xf32>
    %995 = vector.extract_strided_slice %991 {offsets = [0, 96], sizes = [1, 96], strides = [1, 1]} : vector<1x192xf32> to vector<1x96xf32>
    %996 = vector.extract_strided_slice %992 {offsets = [0, 0], sizes = [1, 32], strides = [1, 1]} : vector<1x96xf32> to vector<1x32xf32>
    %997 = vector.extract_strided_slice %994 {offsets = [0, 0], sizes = [1, 32], strides = [1, 1]} : vector<1x96xf32> to vector<1x32xf32>
    %998 = arith.addf %996, %997 : vector<1x32xf32>
    %999 = arith.negf %998 : vector<1x32xf32>
    %1000 = math.exp %999 : vector<1x32xf32>
    %cst_220 = arith.constant 1.000000e+00 : f32
    %1001 = vector.broadcast %cst_220 : f32 to vector<1x32xf32>
    %1002 = arith.addf %1001, %1000 : vector<1x32xf32>
    %1003 = arith.divf %1001, %1002 : vector<1x32xf32>
    %1004 = vector.extract_strided_slice %992 {offsets = [0, 32], sizes = [1, 32], strides = [1, 1]} : vector<1x96xf32> to vector<1x32xf32>
    %1005 = vector.extract_strided_slice %994 {offsets = [0, 32], sizes = [1, 32], strides = [1, 1]} : vector<1x96xf32> to vector<1x32xf32>
    %1006 = arith.addf %1004, %1005 : vector<1x32xf32>
    %1007 = arith.negf %1006 : vector<1x32xf32>
    %1008 = math.exp %1007 : vector<1x32xf32>
    %cst_221 = arith.constant 1.000000e+00 : f32
    %1009 = vector.broadcast %cst_221 : f32 to vector<1x32xf32>
    %1010 = arith.addf %1009, %1008 : vector<1x32xf32>
    %1011 = arith.divf %1009, %1010 : vector<1x32xf32>
    %1012 = vector.extract_strided_slice %992 {offsets = [0, 64], sizes = [1, 32], strides = [1, 1]} : vector<1x96xf32> to vector<1x32xf32>
    %1013 = vector.extract_strided_slice %994 {offsets = [0, 64], sizes = [1, 32], strides = [1, 1]} : vector<1x96xf32> to vector<1x32xf32>
    %1014 = arith.mulf %1003, %1013 : vector<1x32xf32>
    %1015 = arith.addf %1012, %1014 : vector<1x32xf32>
    %1016 = math.tanh %1015 : vector<1x32xf32>
    %cst_222 = arith.constant 1.000000e+00 : f32
    %1017 = vector.broadcast %cst_222 : f32 to vector<1x32xf32>
    %1018 = arith.subf %1017, %1011 : vector<1x32xf32>
    %1019 = arith.mulf %1018, %1016 : vector<1x32xf32>
    %1020 = arith.mulf %1011, %987 : vector<1x32xf32>
    %1021 = arith.addf %1019, %1020 : vector<1x32xf32>
    %1022 = vector.extract_strided_slice %995 {offsets = [0, 0], sizes = [1, 32], strides = [1, 1]} : vector<1x96xf32> to vector<1x32xf32>
    %1023 = vector.extract_strided_slice %993 {offsets = [0, 0], sizes = [1, 32], strides = [1, 1]} : vector<1x96xf32> to vector<1x32xf32>
    %1024 = arith.addf %1022, %1023 : vector<1x32xf32>
    %1025 = arith.negf %1024 : vector<1x32xf32>
    %1026 = math.exp %1025 : vector<1x32xf32>
    %cst_223 = arith.constant 1.000000e+00 : f32
    %1027 = vector.broadcast %cst_223 : f32 to vector<1x32xf32>
    %1028 = arith.addf %1027, %1026 : vector<1x32xf32>
    %1029 = arith.divf %1027, %1028 : vector<1x32xf32>
    %1030 = vector.extract_strided_slice %995 {offsets = [0, 32], sizes = [1, 32], strides = [1, 1]} : vector<1x96xf32> to vector<1x32xf32>
    %1031 = vector.extract_strided_slice %993 {offsets = [0, 32], sizes = [1, 32], strides = [1, 1]} : vector<1x96xf32> to vector<1x32xf32>
    %1032 = arith.addf %1030, %1031 : vector<1x32xf32>
    %1033 = arith.negf %1032 : vector<1x32xf32>
    %1034 = math.exp %1033 : vector<1x32xf32>
    %cst_224 = arith.constant 1.000000e+00 : f32
    %1035 = vector.broadcast %cst_224 : f32 to vector<1x32xf32>
    %1036 = arith.addf %1035, %1034 : vector<1x32xf32>
    %1037 = arith.divf %1035, %1036 : vector<1x32xf32>
    %1038 = vector.extract_strided_slice %995 {offsets = [0, 64], sizes = [1, 32], strides = [1, 1]} : vector<1x96xf32> to vector<1x32xf32>
    %1039 = vector.extract_strided_slice %993 {offsets = [0, 64], sizes = [1, 32], strides = [1, 1]} : vector<1x96xf32> to vector<1x32xf32>
    %1040 = arith.mulf %1029, %1039 : vector<1x32xf32>
    %1041 = arith.addf %1038, %1040 : vector<1x32xf32>
    %1042 = math.tanh %1041 : vector<1x32xf32>
    %cst_225 = arith.constant 1.000000e+00 : f32
    %1043 = vector.broadcast %cst_225 : f32 to vector<1x32xf32>
    %1044 = arith.subf %1043, %1037 : vector<1x32xf32>
    %1045 = arith.mulf %1044, %1042 : vector<1x32xf32>
    %1046 = arith.mulf %1037, %986 : vector<1x32xf32>
    %1047 = arith.addf %1045, %1046 : vector<1x32xf32>
    %1048 = arith.addf %1021, %1047 : vector<1x32xf32>
    %c0_i32_226 = arith.constant 0 : i32
    %1049 = vector.broadcast %c0_i32_226 : i32 to vector<8x1xi32>
    %1050 = arith.cmpi eq, %13, %1049 : vector<8x1xi32>
    %1051 = vector.shape_cast %1050 : vector<8x1xi1> to vector<8x1xi1>
    %1052 = vector.broadcast %1051 : vector<8x1xi1> to vector<8x32xi1>
    %1053 = vector.shape_cast %1048 : vector<1x32xf32> to vector<1x32xf32>
    %1054 = vector.broadcast %1053 : vector<1x32xf32> to vector<8x32xf32>
    %1055 = arith.select %1052, %1054, %983 : vector<8x32xi1>, vector<8x32xf32>
    %cst_227 = arith.constant dense<0.000000e+00> : vector<1x64xf32>
    %1056 = tpu.matmul %1048, %974, %cst_227 {dimension_numbers = #tpu.dot_dimension_numbers<[1], [0], [0], [1], [0, 0, 1, 1], [], []>} : vector<1x32xf32>, vector<32x64xf32>, vector<1x64xf32> -> vector<1x64xf32>
    %1057 = vector.shape_cast %1050 : vector<8x1xi1> to vector<8x1xi1>
    %1058 = vector.broadcast %1057 : vector<8x1xi1> to vector<8x64xi1>
    %1059 = vector.shape_cast %1056 : vector<1x64xf32> to vector<1x64xf32>
    %1060 = vector.broadcast %1059 : vector<1x64xf32> to vector<8x64xf32>
    %1061 = arith.select %1058, %1060, %984 : vector<8x64xi1>, vector<8x64xf32>
    %1062 = arith.mulf %1048, %970 : vector<1x32xf32>
    %cst_228 = arith.constant dense<0.000000e+00> : vector<1xf32>
    %1063 = vector.multi_reduction <add>, %1062, %cst_228 [1] : vector<1x32xf32> to vector<1xf32>
    %1064 = vector.shape_cast %1063 : vector<1xf32> to vector<1x1xf32>
    %c0_i32_229 = arith.constant 0 : i32
    %1065 = vector.broadcast %c0_i32_229 : i32 to vector<1x8xi32>
    %1066 = arith.cmpi eq, %14, %1065 : vector<1x8xi32>
    %1067 = vector.shape_cast %1064 : vector<1x1xf32> to vector<1x1xf32>
    %1068 = vector.broadcast %1067 : vector<1x1xf32> to vector<1x8xf32>
    %1069 = arith.select %1066, %1068, %985 : vector<1x8xi1>, vector<1x8xf32>
    %1070 = vector.extract_strided_slice %961 {offsets = [1, 0], sizes = [1, 32], strides = [1, 1]} : vector<8x32xf32> to vector<1x32xf32>
    %1071 = arith.mulf %1070, %969 : vector<1x32xf32>
    %cst_230 = arith.constant dense<0.000000e+00> : vector<1xf32>
    %1072 = vector.multi_reduction <add>, %1071, %cst_230 [1] : vector<1x32xf32> to vector<1xf32>
    %1073 = vector.shape_cast %1072 : vector<1xf32> to vector<1x1xf32>
    %1074 = vector.broadcast %1073 : vector<1x1xf32> to vector<1x8xf32>
    %1075 = arith.addf %1074, %1069 : vector<1x8xf32>
    %1076 = vector.broadcast %972 : vector<1x1xf32> to vector<1x8xf32>
    %1077 = arith.addf %1075, %1076 : vector<1x8xf32>
    %1078 = vector.extract_strided_slice %3 {offsets = [1, 0], sizes = [1, 8], strides = [1, 1]} : vector<8x8xf32> to vector<1x8xf32>
    %cst_231 = arith.constant 1.000000e+00 : f32
    %1079 = vector.broadcast %cst_231 : f32 to vector<1x8xf32>
    %1080 = arith.subf %1079, %1078 : vector<1x8xf32>
    %cst_232 = arith.constant 1.000000e+30 : f32
    %1081 = vector.broadcast %cst_232 : f32 to vector<1x8xf32>
    %1082 = arith.mulf %1080, %1081 : vector<1x8xf32>
    %1083 = arith.subf %1077, %1082 : vector<1x8xf32>
    %c1_i32_233 = arith.constant 1 : i32
    %1084 = vector.broadcast %c1_i32_233 : i32 to vector<1x8xi32>
    %1085 = arith.cmpi slt, %14, %1084 : vector<1x8xi32>
    %cst_234 = arith.constant -9.99999968E+37 : f32
    %1086 = vector.broadcast %cst_234 : f32 to vector<1x8xf32>
    %1087 = arith.select %1085, %1083, %1086 : vector<1x8xi1>, vector<1x8xf32>
    %cst_235 = arith.constant dense<0xFF800000> : vector<1xf32>
    %1088 = vector.multi_reduction <maximumf>, %1087, %cst_235 [1] : vector<1x8xf32> to vector<1xf32>
    %1089 = vector.shape_cast %1088 : vector<1xf32> to vector<1x1xf32>
    %1090 = vector.broadcast %1089 : vector<1x1xf32> to vector<1x8xf32>
    %1091 = arith.subf %1087, %1090 : vector<1x8xf32>
    %1092 = math.exp %1091 : vector<1x8xf32>
    %cst_236 = arith.constant dense<0.000000e+00> : vector<1xf32>
    %1093 = vector.multi_reduction <add>, %1092, %cst_236 [1] : vector<1x8xf32> to vector<1xf32>
    %1094 = vector.shape_cast %1093 : vector<1xf32> to vector<1x1xf32>
    %1095 = tpu.reciprocal %1094 : vector<1x1xf32> -> vector<1x1xf32>
    %1096 = vector.broadcast %1095 : vector<1x1xf32> to vector<1x8xf32>
    %1097 = arith.mulf %1092, %1096 : vector<1x8xf32>
    %1098 = vector.extract_strided_slice %5 {offsets = [1, 0], sizes = [1, 8], strides = [1, 1]} : vector<8x8xf32> to vector<1x8xf32>
    %1099 = arith.mulf %1097, %1098 : vector<1x8xf32>
    %1100 = arith.subf %1097, %1099 : vector<1x8xf32>
    %1101 = vector.extract_strided_slice %1061 {offsets = [0, 0], sizes = [8, 32], strides = [1, 1]} : vector<8x64xf32> to vector<8x32xf32>
    %cst_237 = arith.constant dense<0.000000e+00> : vector<1x32xf32>
    %1102 = tpu.matmul %1099, %1101, %cst_237 {dimension_numbers = #tpu.dot_dimension_numbers<[1], [0], [0], [1], [0, 0, 1, 1], [], []>} : vector<1x8xf32>, vector<8x32xf32>, vector<1x32xf32> -> vector<1x32xf32>
    %1103 = vector.extract_strided_slice %1061 {offsets = [0, 32], sizes = [8, 32], strides = [1, 1]} : vector<8x64xf32> to vector<8x32xf32>
    %cst_238 = arith.constant dense<0.000000e+00> : vector<1x32xf32>
    %1104 = tpu.matmul %1100, %1103, %cst_238 {dimension_numbers = #tpu.dot_dimension_numbers<[1], [0], [0], [1], [0, 0, 1, 1], [], []>} : vector<1x8xf32>, vector<8x32xf32>, vector<1x32xf32> -> vector<1x32xf32>
    %1105 = arith.addf %1102, %1104 : vector<1x32xf32>
    %cst_239 = arith.constant dense<0.000000e+00> : vector<1x192xf32>
    %1106 = tpu.matmul %1070, %976, %cst_239 {dimension_numbers = #tpu.dot_dimension_numbers<[1], [0], [0], [1], [0, 0, 1, 1], [], []>} : vector<1x32xf32>, vector<32x192xf32>, vector<1x192xf32> -> vector<1x192xf32>
    %1107 = arith.addf %1106, %980 : vector<1x192xf32>
    %cst_240 = arith.constant dense<0.000000e+00> : vector<1x192xf32>
    %1108 = tpu.matmul %1105, %978, %cst_240 {dimension_numbers = #tpu.dot_dimension_numbers<[1], [0], [0], [1], [0, 0, 1, 1], [], []>} : vector<1x32xf32>, vector<32x192xf32>, vector<1x192xf32> -> vector<1x192xf32>
    %1109 = arith.addf %1108, %982 : vector<1x192xf32>
    %1110 = vector.extract_strided_slice %1107 {offsets = [0, 0], sizes = [1, 96], strides = [1, 1]} : vector<1x192xf32> to vector<1x96xf32>
    %1111 = vector.extract_strided_slice %1107 {offsets = [0, 96], sizes = [1, 96], strides = [1, 1]} : vector<1x192xf32> to vector<1x96xf32>
    %1112 = vector.extract_strided_slice %1109 {offsets = [0, 0], sizes = [1, 96], strides = [1, 1]} : vector<1x192xf32> to vector<1x96xf32>
    %1113 = vector.extract_strided_slice %1109 {offsets = [0, 96], sizes = [1, 96], strides = [1, 1]} : vector<1x192xf32> to vector<1x96xf32>
    %1114 = vector.extract_strided_slice %1110 {offsets = [0, 0], sizes = [1, 32], strides = [1, 1]} : vector<1x96xf32> to vector<1x32xf32>
    %1115 = vector.extract_strided_slice %1112 {offsets = [0, 0], sizes = [1, 32], strides = [1, 1]} : vector<1x96xf32> to vector<1x32xf32>
    %1116 = arith.addf %1114, %1115 : vector<1x32xf32>
    %1117 = arith.negf %1116 : vector<1x32xf32>
    %1118 = math.exp %1117 : vector<1x32xf32>
    %cst_241 = arith.constant 1.000000e+00 : f32
    %1119 = vector.broadcast %cst_241 : f32 to vector<1x32xf32>
    %1120 = arith.addf %1119, %1118 : vector<1x32xf32>
    %1121 = arith.divf %1119, %1120 : vector<1x32xf32>
    %1122 = vector.extract_strided_slice %1110 {offsets = [0, 32], sizes = [1, 32], strides = [1, 1]} : vector<1x96xf32> to vector<1x32xf32>
    %1123 = vector.extract_strided_slice %1112 {offsets = [0, 32], sizes = [1, 32], strides = [1, 1]} : vector<1x96xf32> to vector<1x32xf32>
    %1124 = arith.addf %1122, %1123 : vector<1x32xf32>
    %1125 = arith.negf %1124 : vector<1x32xf32>
    %1126 = math.exp %1125 : vector<1x32xf32>
    %cst_242 = arith.constant 1.000000e+00 : f32
    %1127 = vector.broadcast %cst_242 : f32 to vector<1x32xf32>
    %1128 = arith.addf %1127, %1126 : vector<1x32xf32>
    %1129 = arith.divf %1127, %1128 : vector<1x32xf32>
    %1130 = vector.extract_strided_slice %1110 {offsets = [0, 64], sizes = [1, 32], strides = [1, 1]} : vector<1x96xf32> to vector<1x32xf32>
    %1131 = vector.extract_strided_slice %1112 {offsets = [0, 64], sizes = [1, 32], strides = [1, 1]} : vector<1x96xf32> to vector<1x32xf32>
    %1132 = arith.mulf %1121, %1131 : vector<1x32xf32>
    %1133 = arith.addf %1130, %1132 : vector<1x32xf32>
    %1134 = math.tanh %1133 : vector<1x32xf32>
    %cst_243 = arith.constant 1.000000e+00 : f32
    %1135 = vector.broadcast %cst_243 : f32 to vector<1x32xf32>
    %1136 = arith.subf %1135, %1129 : vector<1x32xf32>
    %1137 = arith.mulf %1136, %1134 : vector<1x32xf32>
    %1138 = arith.mulf %1129, %1105 : vector<1x32xf32>
    %1139 = arith.addf %1137, %1138 : vector<1x32xf32>
    %1140 = vector.extract_strided_slice %1113 {offsets = [0, 0], sizes = [1, 32], strides = [1, 1]} : vector<1x96xf32> to vector<1x32xf32>
    %1141 = vector.extract_strided_slice %1111 {offsets = [0, 0], sizes = [1, 32], strides = [1, 1]} : vector<1x96xf32> to vector<1x32xf32>
    %1142 = arith.addf %1140, %1141 : vector<1x32xf32>
    %1143 = arith.negf %1142 : vector<1x32xf32>
    %1144 = math.exp %1143 : vector<1x32xf32>
    %cst_244 = arith.constant 1.000000e+00 : f32
    %1145 = vector.broadcast %cst_244 : f32 to vector<1x32xf32>
    %1146 = arith.addf %1145, %1144 : vector<1x32xf32>
    %1147 = arith.divf %1145, %1146 : vector<1x32xf32>
    %1148 = vector.extract_strided_slice %1113 {offsets = [0, 32], sizes = [1, 32], strides = [1, 1]} : vector<1x96xf32> to vector<1x32xf32>
    %1149 = vector.extract_strided_slice %1111 {offsets = [0, 32], sizes = [1, 32], strides = [1, 1]} : vector<1x96xf32> to vector<1x32xf32>
    %1150 = arith.addf %1148, %1149 : vector<1x32xf32>
    %1151 = arith.negf %1150 : vector<1x32xf32>
    %1152 = math.exp %1151 : vector<1x32xf32>
    %cst_245 = arith.constant 1.000000e+00 : f32
    %1153 = vector.broadcast %cst_245 : f32 to vector<1x32xf32>
    %1154 = arith.addf %1153, %1152 : vector<1x32xf32>
    %1155 = arith.divf %1153, %1154 : vector<1x32xf32>
    %1156 = vector.extract_strided_slice %1113 {offsets = [0, 64], sizes = [1, 32], strides = [1, 1]} : vector<1x96xf32> to vector<1x32xf32>
    %1157 = vector.extract_strided_slice %1111 {offsets = [0, 64], sizes = [1, 32], strides = [1, 1]} : vector<1x96xf32> to vector<1x32xf32>
    %1158 = arith.mulf %1147, %1157 : vector<1x32xf32>
    %1159 = arith.addf %1156, %1158 : vector<1x32xf32>
    %1160 = math.tanh %1159 : vector<1x32xf32>
    %cst_246 = arith.constant 1.000000e+00 : f32
    %1161 = vector.broadcast %cst_246 : f32 to vector<1x32xf32>
    %1162 = arith.subf %1161, %1155 : vector<1x32xf32>
    %1163 = arith.mulf %1162, %1160 : vector<1x32xf32>
    %1164 = arith.mulf %1155, %1070 : vector<1x32xf32>
    %1165 = arith.addf %1163, %1164 : vector<1x32xf32>
    %1166 = arith.addf %1139, %1165 : vector<1x32xf32>
    %c1_i32_247 = arith.constant 1 : i32
    %1167 = vector.broadcast %c1_i32_247 : i32 to vector<8x1xi32>
    %1168 = arith.cmpi eq, %13, %1167 : vector<8x1xi32>
    %1169 = vector.shape_cast %1168 : vector<8x1xi1> to vector<8x1xi1>
    %1170 = vector.broadcast %1169 : vector<8x1xi1> to vector<8x32xi1>
    %1171 = vector.shape_cast %1166 : vector<1x32xf32> to vector<1x32xf32>
    %1172 = vector.broadcast %1171 : vector<1x32xf32> to vector<8x32xf32>
    %1173 = arith.select %1170, %1172, %1055 : vector<8x32xi1>, vector<8x32xf32>
    %cst_248 = arith.constant dense<0.000000e+00> : vector<1x64xf32>
    %1174 = tpu.matmul %1166, %974, %cst_248 {dimension_numbers = #tpu.dot_dimension_numbers<[1], [0], [0], [1], [0, 0, 1, 1], [], []>} : vector<1x32xf32>, vector<32x64xf32>, vector<1x64xf32> -> vector<1x64xf32>
    %1175 = vector.shape_cast %1168 : vector<8x1xi1> to vector<8x1xi1>
    %1176 = vector.broadcast %1175 : vector<8x1xi1> to vector<8x64xi1>
    %1177 = vector.shape_cast %1174 : vector<1x64xf32> to vector<1x64xf32>
    %1178 = vector.broadcast %1177 : vector<1x64xf32> to vector<8x64xf32>
    %1179 = arith.select %1176, %1178, %1061 : vector<8x64xi1>, vector<8x64xf32>
    %1180 = arith.mulf %1166, %970 : vector<1x32xf32>
    %cst_249 = arith.constant dense<0.000000e+00> : vector<1xf32>
    %1181 = vector.multi_reduction <add>, %1180, %cst_249 [1] : vector<1x32xf32> to vector<1xf32>
    %1182 = vector.shape_cast %1181 : vector<1xf32> to vector<1x1xf32>
    %c1_i32_250 = arith.constant 1 : i32
    %1183 = vector.broadcast %c1_i32_250 : i32 to vector<1x8xi32>
    %1184 = arith.cmpi eq, %14, %1183 : vector<1x8xi32>
    %1185 = vector.shape_cast %1182 : vector<1x1xf32> to vector<1x1xf32>
    %1186 = vector.broadcast %1185 : vector<1x1xf32> to vector<1x8xf32>
    %1187 = arith.select %1184, %1186, %1069 : vector<1x8xi1>, vector<1x8xf32>
    %c8_i32 = arith.constant 8 : i32
    %1188 = vector.broadcast %c8_i32 : i32 to vector<15x8xi32>
    %1189 = arith.cmpi eq, %15, %1188 : vector<15x8xi32>
    %1190 = vector.shape_cast %1097 : vector<1x8xf32> to vector<1x8xf32>
    %1191 = vector.broadcast %1190 : vector<1x8xf32> to vector<15x8xf32>
    %1192 = arith.select %1189, %1191, %966 : vector<15x8xi1>, vector<15x8xf32>
    %1193 = vector.extract_strided_slice %961 {offsets = [2, 0], sizes = [1, 32], strides = [1, 1]} : vector<8x32xf32> to vector<1x32xf32>
    %1194 = arith.mulf %1193, %969 : vector<1x32xf32>
    %cst_251 = arith.constant dense<0.000000e+00> : vector<1xf32>
    %1195 = vector.multi_reduction <add>, %1194, %cst_251 [1] : vector<1x32xf32> to vector<1xf32>
    %1196 = vector.shape_cast %1195 : vector<1xf32> to vector<1x1xf32>
    %1197 = vector.broadcast %1196 : vector<1x1xf32> to vector<1x8xf32>
    %1198 = arith.addf %1197, %1187 : vector<1x8xf32>
    %1199 = vector.broadcast %972 : vector<1x1xf32> to vector<1x8xf32>
    %1200 = arith.addf %1198, %1199 : vector<1x8xf32>
    %1201 = vector.extract_strided_slice %3 {offsets = [2, 0], sizes = [1, 8], strides = [1, 1]} : vector<8x8xf32> to vector<1x8xf32>
    %cst_252 = arith.constant 1.000000e+00 : f32
    %1202 = vector.broadcast %cst_252 : f32 to vector<1x8xf32>
    %1203 = arith.subf %1202, %1201 : vector<1x8xf32>
    %cst_253 = arith.constant 1.000000e+30 : f32
    %1204 = vector.broadcast %cst_253 : f32 to vector<1x8xf32>
    %1205 = arith.mulf %1203, %1204 : vector<1x8xf32>
    %1206 = arith.subf %1200, %1205 : vector<1x8xf32>
    %c2_i32_254 = arith.constant 2 : i32
    %1207 = vector.broadcast %c2_i32_254 : i32 to vector<1x8xi32>
    %1208 = arith.cmpi slt, %14, %1207 : vector<1x8xi32>
    %cst_255 = arith.constant -9.99999968E+37 : f32
    %1209 = vector.broadcast %cst_255 : f32 to vector<1x8xf32>
    %1210 = arith.select %1208, %1206, %1209 : vector<1x8xi1>, vector<1x8xf32>
    %cst_256 = arith.constant dense<0xFF800000> : vector<1xf32>
    %1211 = vector.multi_reduction <maximumf>, %1210, %cst_256 [1] : vector<1x8xf32> to vector<1xf32>
    %1212 = vector.shape_cast %1211 : vector<1xf32> to vector<1x1xf32>
    %1213 = vector.broadcast %1212 : vector<1x1xf32> to vector<1x8xf32>
    %1214 = arith.subf %1210, %1213 : vector<1x8xf32>
    %1215 = math.exp %1214 : vector<1x8xf32>
    %cst_257 = arith.constant dense<0.000000e+00> : vector<1xf32>
    %1216 = vector.multi_reduction <add>, %1215, %cst_257 [1] : vector<1x8xf32> to vector<1xf32>
    %1217 = vector.shape_cast %1216 : vector<1xf32> to vector<1x1xf32>
    %1218 = tpu.reciprocal %1217 : vector<1x1xf32> -> vector<1x1xf32>
    %1219 = vector.broadcast %1218 : vector<1x1xf32> to vector<1x8xf32>
    %1220 = arith.mulf %1215, %1219 : vector<1x8xf32>
    %1221 = vector.extract_strided_slice %5 {offsets = [2, 0], sizes = [1, 8], strides = [1, 1]} : vector<8x8xf32> to vector<1x8xf32>
    %1222 = arith.mulf %1220, %1221 : vector<1x8xf32>
    %1223 = arith.subf %1220, %1222 : vector<1x8xf32>
    %1224 = vector.extract_strided_slice %1179 {offsets = [0, 0], sizes = [8, 32], strides = [1, 1]} : vector<8x64xf32> to vector<8x32xf32>
    %cst_258 = arith.constant dense<0.000000e+00> : vector<1x32xf32>
    %1225 = tpu.matmul %1222, %1224, %cst_258 {dimension_numbers = #tpu.dot_dimension_numbers<[1], [0], [0], [1], [0, 0, 1, 1], [], []>} : vector<1x8xf32>, vector<8x32xf32>, vector<1x32xf32> -> vector<1x32xf32>
    %1226 = vector.extract_strided_slice %1179 {offsets = [0, 32], sizes = [8, 32], strides = [1, 1]} : vector<8x64xf32> to vector<8x32xf32>
    %cst_259 = arith.constant dense<0.000000e+00> : vector<1x32xf32>
    %1227 = tpu.matmul %1223, %1226, %cst_259 {dimension_numbers = #tpu.dot_dimension_numbers<[1], [0], [0], [1], [0, 0, 1, 1], [], []>} : vector<1x8xf32>, vector<8x32xf32>, vector<1x32xf32> -> vector<1x32xf32>
    %1228 = arith.addf %1225, %1227 : vector<1x32xf32>
    %cst_260 = arith.constant dense<0.000000e+00> : vector<1x192xf32>
    %1229 = tpu.matmul %1193, %976, %cst_260 {dimension_numbers = #tpu.dot_dimension_numbers<[1], [0], [0], [1], [0, 0, 1, 1], [], []>} : vector<1x32xf32>, vector<32x192xf32>, vector<1x192xf32> -> vector<1x192xf32>
    %1230 = arith.addf %1229, %980 : vector<1x192xf32>
    %cst_261 = arith.constant dense<0.000000e+00> : vector<1x192xf32>
    %1231 = tpu.matmul %1228, %978, %cst_261 {dimension_numbers = #tpu.dot_dimension_numbers<[1], [0], [0], [1], [0, 0, 1, 1], [], []>} : vector<1x32xf32>, vector<32x192xf32>, vector<1x192xf32> -> vector<1x192xf32>
    %1232 = arith.addf %1231, %982 : vector<1x192xf32>
    %1233 = vector.extract_strided_slice %1230 {offsets = [0, 0], sizes = [1, 96], strides = [1, 1]} : vector<1x192xf32> to vector<1x96xf32>
    %1234 = vector.extract_strided_slice %1230 {offsets = [0, 96], sizes = [1, 96], strides = [1, 1]} : vector<1x192xf32> to vector<1x96xf32>
    %1235 = vector.extract_strided_slice %1232 {offsets = [0, 0], sizes = [1, 96], strides = [1, 1]} : vector<1x192xf32> to vector<1x96xf32>
    %1236 = vector.extract_strided_slice %1232 {offsets = [0, 96], sizes = [1, 96], strides = [1, 1]} : vector<1x192xf32> to vector<1x96xf32>
    %1237 = vector.extract_strided_slice %1233 {offsets = [0, 0], sizes = [1, 32], strides = [1, 1]} : vector<1x96xf32> to vector<1x32xf32>
    %1238 = vector.extract_strided_slice %1235 {offsets = [0, 0], sizes = [1, 32], strides = [1, 1]} : vector<1x96xf32> to vector<1x32xf32>
    %1239 = arith.addf %1237, %1238 : vector<1x32xf32>
    %1240 = arith.negf %1239 : vector<1x32xf32>
    %1241 = math.exp %1240 : vector<1x32xf32>
    %cst_262 = arith.constant 1.000000e+00 : f32
    %1242 = vector.broadcast %cst_262 : f32 to vector<1x32xf32>
    %1243 = arith.addf %1242, %1241 : vector<1x32xf32>
    %1244 = arith.divf %1242, %1243 : vector<1x32xf32>
    %1245 = vector.extract_strided_slice %1233 {offsets = [0, 32], sizes = [1, 32], strides = [1, 1]} : vector<1x96xf32> to vector<1x32xf32>
    %1246 = vector.extract_strided_slice %1235 {offsets = [0, 32], sizes = [1, 32], strides = [1, 1]} : vector<1x96xf32> to vector<1x32xf32>
    %1247 = arith.addf %1245, %1246 : vector<1x32xf32>
    %1248 = arith.negf %1247 : vector<1x32xf32>
    %1249 = math.exp %1248 : vector<1x32xf32>
    %cst_263 = arith.constant 1.000000e+00 : f32
    %1250 = vector.broadcast %cst_263 : f32 to vector<1x32xf32>
    %1251 = arith.addf %1250, %1249 : vector<1x32xf32>
    %1252 = arith.divf %1250, %1251 : vector<1x32xf32>
    %1253 = vector.extract_strided_slice %1233 {offsets = [0, 64], sizes = [1, 32], strides = [1, 1]} : vector<1x96xf32> to vector<1x32xf32>
    %1254 = vector.extract_strided_slice %1235 {offsets = [0, 64], sizes = [1, 32], strides = [1, 1]} : vector<1x96xf32> to vector<1x32xf32>
    %1255 = arith.mulf %1244, %1254 : vector<1x32xf32>
    %1256 = arith.addf %1253, %1255 : vector<1x32xf32>
    %1257 = math.tanh %1256 : vector<1x32xf32>
    %cst_264 = arith.constant 1.000000e+00 : f32
    %1258 = vector.broadcast %cst_264 : f32 to vector<1x32xf32>
    %1259 = arith.subf %1258, %1252 : vector<1x32xf32>
    %1260 = arith.mulf %1259, %1257 : vector<1x32xf32>
    %1261 = arith.mulf %1252, %1228 : vector<1x32xf32>
    %1262 = arith.addf %1260, %1261 : vector<1x32xf32>
    %1263 = vector.extract_strided_slice %1236 {offsets = [0, 0], sizes = [1, 32], strides = [1, 1]} : vector<1x96xf32> to vector<1x32xf32>
    %1264 = vector.extract_strided_slice %1234 {offsets = [0, 0], sizes = [1, 32], strides = [1, 1]} : vector<1x96xf32> to vector<1x32xf32>
    %1265 = arith.addf %1263, %1264 : vector<1x32xf32>
    %1266 = arith.negf %1265 : vector<1x32xf32>
    %1267 = math.exp %1266 : vector<1x32xf32>
    %cst_265 = arith.constant 1.000000e+00 : f32
    %1268 = vector.broadcast %cst_265 : f32 to vector<1x32xf32>
    %1269 = arith.addf %1268, %1267 : vector<1x32xf32>
    %1270 = arith.divf %1268, %1269 : vector<1x32xf32>
    %1271 = vector.extract_strided_slice %1236 {offsets = [0, 32], sizes = [1, 32], strides = [1, 1]} : vector<1x96xf32> to vector<1x32xf32>
    %1272 = vector.extract_strided_slice %1234 {offsets = [0, 32], sizes = [1, 32], strides = [1, 1]} : vector<1x96xf32> to vector<1x32xf32>
    %1273 = arith.addf %1271, %1272 : vector<1x32xf32>
    %1274 = arith.negf %1273 : vector<1x32xf32>
    %1275 = math.exp %1274 : vector<1x32xf32>
    %cst_266 = arith.constant 1.000000e+00 : f32
    %1276 = vector.broadcast %cst_266 : f32 to vector<1x32xf32>
    %1277 = arith.addf %1276, %1275 : vector<1x32xf32>
    %1278 = arith.divf %1276, %1277 : vector<1x32xf32>
    %1279 = vector.extract_strided_slice %1236 {offsets = [0, 64], sizes = [1, 32], strides = [1, 1]} : vector<1x96xf32> to vector<1x32xf32>
    %1280 = vector.extract_strided_slice %1234 {offsets = [0, 64], sizes = [1, 32], strides = [1, 1]} : vector<1x96xf32> to vector<1x32xf32>
    %1281 = arith.mulf %1270, %1280 : vector<1x32xf32>
    %1282 = arith.addf %1279, %1281 : vector<1x32xf32>
    %1283 = math.tanh %1282 : vector<1x32xf32>
    %cst_267 = arith.constant 1.000000e+00 : f32
    %1284 = vector.broadcast %cst_267 : f32 to vector<1x32xf32>
    %1285 = arith.subf %1284, %1278 : vector<1x32xf32>
    %1286 = arith.mulf %1285, %1283 : vector<1x32xf32>
    %1287 = arith.mulf %1278, %1193 : vector<1x32xf32>
    %1288 = arith.addf %1286, %1287 : vector<1x32xf32>
    %1289 = arith.addf %1262, %1288 : vector<1x32xf32>
    %c2_i32_268 = arith.constant 2 : i32
    %1290 = vector.broadcast %c2_i32_268 : i32 to vector<8x1xi32>
    %1291 = arith.cmpi eq, %13, %1290 : vector<8x1xi32>
    %1292 = vector.shape_cast %1291 : vector<8x1xi1> to vector<8x1xi1>
    %1293 = vector.broadcast %1292 : vector<8x1xi1> to vector<8x32xi1>
    %1294 = vector.shape_cast %1289 : vector<1x32xf32> to vector<1x32xf32>
    %1295 = vector.broadcast %1294 : vector<1x32xf32> to vector<8x32xf32>
    %1296 = arith.select %1293, %1295, %1173 : vector<8x32xi1>, vector<8x32xf32>
    %cst_269 = arith.constant dense<0.000000e+00> : vector<1x64xf32>
    %1297 = tpu.matmul %1289, %974, %cst_269 {dimension_numbers = #tpu.dot_dimension_numbers<[1], [0], [0], [1], [0, 0, 1, 1], [], []>} : vector<1x32xf32>, vector<32x64xf32>, vector<1x64xf32> -> vector<1x64xf32>
    %1298 = vector.shape_cast %1291 : vector<8x1xi1> to vector<8x1xi1>
    %1299 = vector.broadcast %1298 : vector<8x1xi1> to vector<8x64xi1>
    %1300 = vector.shape_cast %1297 : vector<1x64xf32> to vector<1x64xf32>
    %1301 = vector.broadcast %1300 : vector<1x64xf32> to vector<8x64xf32>
    %1302 = arith.select %1299, %1301, %1179 : vector<8x64xi1>, vector<8x64xf32>
    %1303 = arith.mulf %1289, %970 : vector<1x32xf32>
    %cst_270 = arith.constant dense<0.000000e+00> : vector<1xf32>
    %1304 = vector.multi_reduction <add>, %1303, %cst_270 [1] : vector<1x32xf32> to vector<1xf32>
    %1305 = vector.shape_cast %1304 : vector<1xf32> to vector<1x1xf32>
    %c2_i32_271 = arith.constant 2 : i32
    %1306 = vector.broadcast %c2_i32_271 : i32 to vector<1x8xi32>
    %1307 = arith.cmpi eq, %14, %1306 : vector<1x8xi32>
    %1308 = vector.shape_cast %1305 : vector<1x1xf32> to vector<1x1xf32>
    %1309 = vector.broadcast %1308 : vector<1x1xf32> to vector<1x8xf32>
    %1310 = arith.select %1307, %1309, %1187 : vector<1x8xi1>, vector<1x8xf32>
    %c9_i32 = arith.constant 9 : i32
    %1311 = vector.broadcast %c9_i32 : i32 to vector<15x8xi32>
    %1312 = arith.cmpi eq, %15, %1311 : vector<15x8xi32>
    %1313 = vector.shape_cast %1220 : vector<1x8xf32> to vector<1x8xf32>
    %1314 = vector.broadcast %1313 : vector<1x8xf32> to vector<15x8xf32>
    %1315 = arith.select %1312, %1314, %1192 : vector<15x8xi1>, vector<15x8xf32>
    %1316 = vector.extract_strided_slice %961 {offsets = [3, 0], sizes = [1, 32], strides = [1, 1]} : vector<8x32xf32> to vector<1x32xf32>
    %1317 = arith.mulf %1316, %969 : vector<1x32xf32>
    %cst_272 = arith.constant dense<0.000000e+00> : vector<1xf32>
    %1318 = vector.multi_reduction <add>, %1317, %cst_272 [1] : vector<1x32xf32> to vector<1xf32>
    %1319 = vector.shape_cast %1318 : vector<1xf32> to vector<1x1xf32>
    %1320 = vector.broadcast %1319 : vector<1x1xf32> to vector<1x8xf32>
    %1321 = arith.addf %1320, %1310 : vector<1x8xf32>
    %1322 = vector.broadcast %972 : vector<1x1xf32> to vector<1x8xf32>
    %1323 = arith.addf %1321, %1322 : vector<1x8xf32>
    %1324 = vector.extract_strided_slice %3 {offsets = [3, 0], sizes = [1, 8], strides = [1, 1]} : vector<8x8xf32> to vector<1x8xf32>
    %cst_273 = arith.constant 1.000000e+00 : f32
    %1325 = vector.broadcast %cst_273 : f32 to vector<1x8xf32>
    %1326 = arith.subf %1325, %1324 : vector<1x8xf32>
    %cst_274 = arith.constant 1.000000e+30 : f32
    %1327 = vector.broadcast %cst_274 : f32 to vector<1x8xf32>
    %1328 = arith.mulf %1326, %1327 : vector<1x8xf32>
    %1329 = arith.subf %1323, %1328 : vector<1x8xf32>
    %c3_i32_275 = arith.constant 3 : i32
    %1330 = vector.broadcast %c3_i32_275 : i32 to vector<1x8xi32>
    %1331 = arith.cmpi slt, %14, %1330 : vector<1x8xi32>
    %cst_276 = arith.constant -9.99999968E+37 : f32
    %1332 = vector.broadcast %cst_276 : f32 to vector<1x8xf32>
    %1333 = arith.select %1331, %1329, %1332 : vector<1x8xi1>, vector<1x8xf32>
    %cst_277 = arith.constant dense<0xFF800000> : vector<1xf32>
    %1334 = vector.multi_reduction <maximumf>, %1333, %cst_277 [1] : vector<1x8xf32> to vector<1xf32>
    %1335 = vector.shape_cast %1334 : vector<1xf32> to vector<1x1xf32>
    %1336 = vector.broadcast %1335 : vector<1x1xf32> to vector<1x8xf32>
    %1337 = arith.subf %1333, %1336 : vector<1x8xf32>
    %1338 = math.exp %1337 : vector<1x8xf32>
    %cst_278 = arith.constant dense<0.000000e+00> : vector<1xf32>
    %1339 = vector.multi_reduction <add>, %1338, %cst_278 [1] : vector<1x8xf32> to vector<1xf32>
    %1340 = vector.shape_cast %1339 : vector<1xf32> to vector<1x1xf32>
    %1341 = tpu.reciprocal %1340 : vector<1x1xf32> -> vector<1x1xf32>
    %1342 = vector.broadcast %1341 : vector<1x1xf32> to vector<1x8xf32>
    %1343 = arith.mulf %1338, %1342 : vector<1x8xf32>
    %1344 = vector.extract_strided_slice %5 {offsets = [3, 0], sizes = [1, 8], strides = [1, 1]} : vector<8x8xf32> to vector<1x8xf32>
    %1345 = arith.mulf %1343, %1344 : vector<1x8xf32>
    %1346 = arith.subf %1343, %1345 : vector<1x8xf32>
    %1347 = vector.extract_strided_slice %1302 {offsets = [0, 0], sizes = [8, 32], strides = [1, 1]} : vector<8x64xf32> to vector<8x32xf32>
    %cst_279 = arith.constant dense<0.000000e+00> : vector<1x32xf32>
    %1348 = tpu.matmul %1345, %1347, %cst_279 {dimension_numbers = #tpu.dot_dimension_numbers<[1], [0], [0], [1], [0, 0, 1, 1], [], []>} : vector<1x8xf32>, vector<8x32xf32>, vector<1x32xf32> -> vector<1x32xf32>
    %1349 = vector.extract_strided_slice %1302 {offsets = [0, 32], sizes = [8, 32], strides = [1, 1]} : vector<8x64xf32> to vector<8x32xf32>
    %cst_280 = arith.constant dense<0.000000e+00> : vector<1x32xf32>
    %1350 = tpu.matmul %1346, %1349, %cst_280 {dimension_numbers = #tpu.dot_dimension_numbers<[1], [0], [0], [1], [0, 0, 1, 1], [], []>} : vector<1x8xf32>, vector<8x32xf32>, vector<1x32xf32> -> vector<1x32xf32>
    %1351 = arith.addf %1348, %1350 : vector<1x32xf32>
    %cst_281 = arith.constant dense<0.000000e+00> : vector<1x192xf32>
    %1352 = tpu.matmul %1316, %976, %cst_281 {dimension_numbers = #tpu.dot_dimension_numbers<[1], [0], [0], [1], [0, 0, 1, 1], [], []>} : vector<1x32xf32>, vector<32x192xf32>, vector<1x192xf32> -> vector<1x192xf32>
    %1353 = arith.addf %1352, %980 : vector<1x192xf32>
    %cst_282 = arith.constant dense<0.000000e+00> : vector<1x192xf32>
    %1354 = tpu.matmul %1351, %978, %cst_282 {dimension_numbers = #tpu.dot_dimension_numbers<[1], [0], [0], [1], [0, 0, 1, 1], [], []>} : vector<1x32xf32>, vector<32x192xf32>, vector<1x192xf32> -> vector<1x192xf32>
    %1355 = arith.addf %1354, %982 : vector<1x192xf32>
    %1356 = vector.extract_strided_slice %1353 {offsets = [0, 0], sizes = [1, 96], strides = [1, 1]} : vector<1x192xf32> to vector<1x96xf32>
    %1357 = vector.extract_strided_slice %1353 {offsets = [0, 96], sizes = [1, 96], strides = [1, 1]} : vector<1x192xf32> to vector<1x96xf32>
    %1358 = vector.extract_strided_slice %1355 {offsets = [0, 0], sizes = [1, 96], strides = [1, 1]} : vector<1x192xf32> to vector<1x96xf32>
    %1359 = vector.extract_strided_slice %1355 {offsets = [0, 96], sizes = [1, 96], strides = [1, 1]} : vector<1x192xf32> to vector<1x96xf32>
    %1360 = vector.extract_strided_slice %1356 {offsets = [0, 0], sizes = [1, 32], strides = [1, 1]} : vector<1x96xf32> to vector<1x32xf32>
    %1361 = vector.extract_strided_slice %1358 {offsets = [0, 0], sizes = [1, 32], strides = [1, 1]} : vector<1x96xf32> to vector<1x32xf32>
    %1362 = arith.addf %1360, %1361 : vector<1x32xf32>
    %1363 = arith.negf %1362 : vector<1x32xf32>
    %1364 = math.exp %1363 : vector<1x32xf32>
    %cst_283 = arith.constant 1.000000e+00 : f32
    %1365 = vector.broadcast %cst_283 : f32 to vector<1x32xf32>
    %1366 = arith.addf %1365, %1364 : vector<1x32xf32>
    %1367 = arith.divf %1365, %1366 : vector<1x32xf32>
    %1368 = vector.extract_strided_slice %1356 {offsets = [0, 32], sizes = [1, 32], strides = [1, 1]} : vector<1x96xf32> to vector<1x32xf32>
    %1369 = vector.extract_strided_slice %1358 {offsets = [0, 32], sizes = [1, 32], strides = [1, 1]} : vector<1x96xf32> to vector<1x32xf32>
    %1370 = arith.addf %1368, %1369 : vector<1x32xf32>
    %1371 = arith.negf %1370 : vector<1x32xf32>
    %1372 = math.exp %1371 : vector<1x32xf32>
    %cst_284 = arith.constant 1.000000e+00 : f32
    %1373 = vector.broadcast %cst_284 : f32 to vector<1x32xf32>
    %1374 = arith.addf %1373, %1372 : vector<1x32xf32>
    %1375 = arith.divf %1373, %1374 : vector<1x32xf32>
    %1376 = vector.extract_strided_slice %1356 {offsets = [0, 64], sizes = [1, 32], strides = [1, 1]} : vector<1x96xf32> to vector<1x32xf32>
    %1377 = vector.extract_strided_slice %1358 {offsets = [0, 64], sizes = [1, 32], strides = [1, 1]} : vector<1x96xf32> to vector<1x32xf32>
    %1378 = arith.mulf %1367, %1377 : vector<1x32xf32>
    %1379 = arith.addf %1376, %1378 : vector<1x32xf32>
    %1380 = math.tanh %1379 : vector<1x32xf32>
    %cst_285 = arith.constant 1.000000e+00 : f32
    %1381 = vector.broadcast %cst_285 : f32 to vector<1x32xf32>
    %1382 = arith.subf %1381, %1375 : vector<1x32xf32>
    %1383 = arith.mulf %1382, %1380 : vector<1x32xf32>
    %1384 = arith.mulf %1375, %1351 : vector<1x32xf32>
    %1385 = arith.addf %1383, %1384 : vector<1x32xf32>
    %1386 = vector.extract_strided_slice %1359 {offsets = [0, 0], sizes = [1, 32], strides = [1, 1]} : vector<1x96xf32> to vector<1x32xf32>
    %1387 = vector.extract_strided_slice %1357 {offsets = [0, 0], sizes = [1, 32], strides = [1, 1]} : vector<1x96xf32> to vector<1x32xf32>
    %1388 = arith.addf %1386, %1387 : vector<1x32xf32>
    %1389 = arith.negf %1388 : vector<1x32xf32>
    %1390 = math.exp %1389 : vector<1x32xf32>
    %cst_286 = arith.constant 1.000000e+00 : f32
    %1391 = vector.broadcast %cst_286 : f32 to vector<1x32xf32>
    %1392 = arith.addf %1391, %1390 : vector<1x32xf32>
    %1393 = arith.divf %1391, %1392 : vector<1x32xf32>
    %1394 = vector.extract_strided_slice %1359 {offsets = [0, 32], sizes = [1, 32], strides = [1, 1]} : vector<1x96xf32> to vector<1x32xf32>
    %1395 = vector.extract_strided_slice %1357 {offsets = [0, 32], sizes = [1, 32], strides = [1, 1]} : vector<1x96xf32> to vector<1x32xf32>
    %1396 = arith.addf %1394, %1395 : vector<1x32xf32>
    %1397 = arith.negf %1396 : vector<1x32xf32>
    %1398 = math.exp %1397 : vector<1x32xf32>
    %cst_287 = arith.constant 1.000000e+00 : f32
    %1399 = vector.broadcast %cst_287 : f32 to vector<1x32xf32>
    %1400 = arith.addf %1399, %1398 : vector<1x32xf32>
    %1401 = arith.divf %1399, %1400 : vector<1x32xf32>
    %1402 = vector.extract_strided_slice %1359 {offsets = [0, 64], sizes = [1, 32], strides = [1, 1]} : vector<1x96xf32> to vector<1x32xf32>
    %1403 = vector.extract_strided_slice %1357 {offsets = [0, 64], sizes = [1, 32], strides = [1, 1]} : vector<1x96xf32> to vector<1x32xf32>
    %1404 = arith.mulf %1393, %1403 : vector<1x32xf32>
    %1405 = arith.addf %1402, %1404 : vector<1x32xf32>
    %1406 = math.tanh %1405 : vector<1x32xf32>
    %cst_288 = arith.constant 1.000000e+00 : f32
    %1407 = vector.broadcast %cst_288 : f32 to vector<1x32xf32>
    %1408 = arith.subf %1407, %1401 : vector<1x32xf32>
    %1409 = arith.mulf %1408, %1406 : vector<1x32xf32>
    %1410 = arith.mulf %1401, %1316 : vector<1x32xf32>
    %1411 = arith.addf %1409, %1410 : vector<1x32xf32>
    %1412 = arith.addf %1385, %1411 : vector<1x32xf32>
    %c3_i32_289 = arith.constant 3 : i32
    %1413 = vector.broadcast %c3_i32_289 : i32 to vector<8x1xi32>
    %1414 = arith.cmpi eq, %13, %1413 : vector<8x1xi32>
    %1415 = vector.shape_cast %1414 : vector<8x1xi1> to vector<8x1xi1>
    %1416 = vector.broadcast %1415 : vector<8x1xi1> to vector<8x32xi1>
    %1417 = vector.shape_cast %1412 : vector<1x32xf32> to vector<1x32xf32>
    %1418 = vector.broadcast %1417 : vector<1x32xf32> to vector<8x32xf32>
    %1419 = arith.select %1416, %1418, %1296 : vector<8x32xi1>, vector<8x32xf32>
    %cst_290 = arith.constant dense<0.000000e+00> : vector<1x64xf32>
    %1420 = tpu.matmul %1412, %974, %cst_290 {dimension_numbers = #tpu.dot_dimension_numbers<[1], [0], [0], [1], [0, 0, 1, 1], [], []>} : vector<1x32xf32>, vector<32x64xf32>, vector<1x64xf32> -> vector<1x64xf32>
    %1421 = vector.shape_cast %1414 : vector<8x1xi1> to vector<8x1xi1>
    %1422 = vector.broadcast %1421 : vector<8x1xi1> to vector<8x64xi1>
    %1423 = vector.shape_cast %1420 : vector<1x64xf32> to vector<1x64xf32>
    %1424 = vector.broadcast %1423 : vector<1x64xf32> to vector<8x64xf32>
    %1425 = arith.select %1422, %1424, %1302 : vector<8x64xi1>, vector<8x64xf32>
    %1426 = arith.mulf %1412, %970 : vector<1x32xf32>
    %cst_291 = arith.constant dense<0.000000e+00> : vector<1xf32>
    %1427 = vector.multi_reduction <add>, %1426, %cst_291 [1] : vector<1x32xf32> to vector<1xf32>
    %1428 = vector.shape_cast %1427 : vector<1xf32> to vector<1x1xf32>
    %c3_i32_292 = arith.constant 3 : i32
    %1429 = vector.broadcast %c3_i32_292 : i32 to vector<1x8xi32>
    %1430 = arith.cmpi eq, %14, %1429 : vector<1x8xi32>
    %1431 = vector.shape_cast %1428 : vector<1x1xf32> to vector<1x1xf32>
    %1432 = vector.broadcast %1431 : vector<1x1xf32> to vector<1x8xf32>
    %1433 = arith.select %1430, %1432, %1310 : vector<1x8xi1>, vector<1x8xf32>
    %c10_i32 = arith.constant 10 : i32
    %1434 = vector.broadcast %c10_i32 : i32 to vector<15x8xi32>
    %1435 = arith.cmpi eq, %15, %1434 : vector<15x8xi32>
    %1436 = vector.shape_cast %1343 : vector<1x8xf32> to vector<1x8xf32>
    %1437 = vector.broadcast %1436 : vector<1x8xf32> to vector<15x8xf32>
    %1438 = arith.select %1435, %1437, %1315 : vector<15x8xi1>, vector<15x8xf32>
    %1439 = vector.extract_strided_slice %961 {offsets = [4, 0], sizes = [1, 32], strides = [1, 1]} : vector<8x32xf32> to vector<1x32xf32>
    %1440 = arith.mulf %1439, %969 : vector<1x32xf32>
    %cst_293 = arith.constant dense<0.000000e+00> : vector<1xf32>
    %1441 = vector.multi_reduction <add>, %1440, %cst_293 [1] : vector<1x32xf32> to vector<1xf32>
    %1442 = vector.shape_cast %1441 : vector<1xf32> to vector<1x1xf32>
    %1443 = vector.broadcast %1442 : vector<1x1xf32> to vector<1x8xf32>
    %1444 = arith.addf %1443, %1433 : vector<1x8xf32>
    %1445 = vector.broadcast %972 : vector<1x1xf32> to vector<1x8xf32>
    %1446 = arith.addf %1444, %1445 : vector<1x8xf32>
    %1447 = vector.extract_strided_slice %3 {offsets = [4, 0], sizes = [1, 8], strides = [1, 1]} : vector<8x8xf32> to vector<1x8xf32>
    %cst_294 = arith.constant 1.000000e+00 : f32
    %1448 = vector.broadcast %cst_294 : f32 to vector<1x8xf32>
    %1449 = arith.subf %1448, %1447 : vector<1x8xf32>
    %cst_295 = arith.constant 1.000000e+30 : f32
    %1450 = vector.broadcast %cst_295 : f32 to vector<1x8xf32>
    %1451 = arith.mulf %1449, %1450 : vector<1x8xf32>
    %1452 = arith.subf %1446, %1451 : vector<1x8xf32>
    %c4_i32_296 = arith.constant 4 : i32
    %1453 = vector.broadcast %c4_i32_296 : i32 to vector<1x8xi32>
    %1454 = arith.cmpi slt, %14, %1453 : vector<1x8xi32>
    %cst_297 = arith.constant -9.99999968E+37 : f32
    %1455 = vector.broadcast %cst_297 : f32 to vector<1x8xf32>
    %1456 = arith.select %1454, %1452, %1455 : vector<1x8xi1>, vector<1x8xf32>
    %cst_298 = arith.constant dense<0xFF800000> : vector<1xf32>
    %1457 = vector.multi_reduction <maximumf>, %1456, %cst_298 [1] : vector<1x8xf32> to vector<1xf32>
    %1458 = vector.shape_cast %1457 : vector<1xf32> to vector<1x1xf32>
    %1459 = vector.broadcast %1458 : vector<1x1xf32> to vector<1x8xf32>
    %1460 = arith.subf %1456, %1459 : vector<1x8xf32>
    %1461 = math.exp %1460 : vector<1x8xf32>
    %cst_299 = arith.constant dense<0.000000e+00> : vector<1xf32>
    %1462 = vector.multi_reduction <add>, %1461, %cst_299 [1] : vector<1x8xf32> to vector<1xf32>
    %1463 = vector.shape_cast %1462 : vector<1xf32> to vector<1x1xf32>
    %1464 = tpu.reciprocal %1463 : vector<1x1xf32> -> vector<1x1xf32>
    %1465 = vector.broadcast %1464 : vector<1x1xf32> to vector<1x8xf32>
    %1466 = arith.mulf %1461, %1465 : vector<1x8xf32>
    %1467 = vector.extract_strided_slice %5 {offsets = [4, 0], sizes = [1, 8], strides = [1, 1]} : vector<8x8xf32> to vector<1x8xf32>
    %1468 = arith.mulf %1466, %1467 : vector<1x8xf32>
    %1469 = arith.subf %1466, %1468 : vector<1x8xf32>
    %1470 = vector.extract_strided_slice %1425 {offsets = [0, 0], sizes = [8, 32], strides = [1, 1]} : vector<8x64xf32> to vector<8x32xf32>
    %cst_300 = arith.constant dense<0.000000e+00> : vector<1x32xf32>
    %1471 = tpu.matmul %1468, %1470, %cst_300 {dimension_numbers = #tpu.dot_dimension_numbers<[1], [0], [0], [1], [0, 0, 1, 1], [], []>} : vector<1x8xf32>, vector<8x32xf32>, vector<1x32xf32> -> vector<1x32xf32>
    %1472 = vector.extract_strided_slice %1425 {offsets = [0, 32], sizes = [8, 32], strides = [1, 1]} : vector<8x64xf32> to vector<8x32xf32>
    %cst_301 = arith.constant dense<0.000000e+00> : vector<1x32xf32>
    %1473 = tpu.matmul %1469, %1472, %cst_301 {dimension_numbers = #tpu.dot_dimension_numbers<[1], [0], [0], [1], [0, 0, 1, 1], [], []>} : vector<1x8xf32>, vector<8x32xf32>, vector<1x32xf32> -> vector<1x32xf32>
    %1474 = arith.addf %1471, %1473 : vector<1x32xf32>
    %cst_302 = arith.constant dense<0.000000e+00> : vector<1x192xf32>
    %1475 = tpu.matmul %1439, %976, %cst_302 {dimension_numbers = #tpu.dot_dimension_numbers<[1], [0], [0], [1], [0, 0, 1, 1], [], []>} : vector<1x32xf32>, vector<32x192xf32>, vector<1x192xf32> -> vector<1x192xf32>
    %1476 = arith.addf %1475, %980 : vector<1x192xf32>
    %cst_303 = arith.constant dense<0.000000e+00> : vector<1x192xf32>
    %1477 = tpu.matmul %1474, %978, %cst_303 {dimension_numbers = #tpu.dot_dimension_numbers<[1], [0], [0], [1], [0, 0, 1, 1], [], []>} : vector<1x32xf32>, vector<32x192xf32>, vector<1x192xf32> -> vector<1x192xf32>
    %1478 = arith.addf %1477, %982 : vector<1x192xf32>
    %1479 = vector.extract_strided_slice %1476 {offsets = [0, 0], sizes = [1, 96], strides = [1, 1]} : vector<1x192xf32> to vector<1x96xf32>
    %1480 = vector.extract_strided_slice %1476 {offsets = [0, 96], sizes = [1, 96], strides = [1, 1]} : vector<1x192xf32> to vector<1x96xf32>
    %1481 = vector.extract_strided_slice %1478 {offsets = [0, 0], sizes = [1, 96], strides = [1, 1]} : vector<1x192xf32> to vector<1x96xf32>
    %1482 = vector.extract_strided_slice %1478 {offsets = [0, 96], sizes = [1, 96], strides = [1, 1]} : vector<1x192xf32> to vector<1x96xf32>
    %1483 = vector.extract_strided_slice %1479 {offsets = [0, 0], sizes = [1, 32], strides = [1, 1]} : vector<1x96xf32> to vector<1x32xf32>
    %1484 = vector.extract_strided_slice %1481 {offsets = [0, 0], sizes = [1, 32], strides = [1, 1]} : vector<1x96xf32> to vector<1x32xf32>
    %1485 = arith.addf %1483, %1484 : vector<1x32xf32>
    %1486 = arith.negf %1485 : vector<1x32xf32>
    %1487 = math.exp %1486 : vector<1x32xf32>
    %cst_304 = arith.constant 1.000000e+00 : f32
    %1488 = vector.broadcast %cst_304 : f32 to vector<1x32xf32>
    %1489 = arith.addf %1488, %1487 : vector<1x32xf32>
    %1490 = arith.divf %1488, %1489 : vector<1x32xf32>
    %1491 = vector.extract_strided_slice %1479 {offsets = [0, 32], sizes = [1, 32], strides = [1, 1]} : vector<1x96xf32> to vector<1x32xf32>
    %1492 = vector.extract_strided_slice %1481 {offsets = [0, 32], sizes = [1, 32], strides = [1, 1]} : vector<1x96xf32> to vector<1x32xf32>
    %1493 = arith.addf %1491, %1492 : vector<1x32xf32>
    %1494 = arith.negf %1493 : vector<1x32xf32>
    %1495 = math.exp %1494 : vector<1x32xf32>
    %cst_305 = arith.constant 1.000000e+00 : f32
    %1496 = vector.broadcast %cst_305 : f32 to vector<1x32xf32>
    %1497 = arith.addf %1496, %1495 : vector<1x32xf32>
    %1498 = arith.divf %1496, %1497 : vector<1x32xf32>
    %1499 = vector.extract_strided_slice %1479 {offsets = [0, 64], sizes = [1, 32], strides = [1, 1]} : vector<1x96xf32> to vector<1x32xf32>
    %1500 = vector.extract_strided_slice %1481 {offsets = [0, 64], sizes = [1, 32], strides = [1, 1]} : vector<1x96xf32> to vector<1x32xf32>
    %1501 = arith.mulf %1490, %1500 : vector<1x32xf32>
    %1502 = arith.addf %1499, %1501 : vector<1x32xf32>
    %1503 = math.tanh %1502 : vector<1x32xf32>
    %cst_306 = arith.constant 1.000000e+00 : f32
    %1504 = vector.broadcast %cst_306 : f32 to vector<1x32xf32>
    %1505 = arith.subf %1504, %1498 : vector<1x32xf32>
    %1506 = arith.mulf %1505, %1503 : vector<1x32xf32>
    %1507 = arith.mulf %1498, %1474 : vector<1x32xf32>
    %1508 = arith.addf %1506, %1507 : vector<1x32xf32>
    %1509 = vector.extract_strided_slice %1482 {offsets = [0, 0], sizes = [1, 32], strides = [1, 1]} : vector<1x96xf32> to vector<1x32xf32>
    %1510 = vector.extract_strided_slice %1480 {offsets = [0, 0], sizes = [1, 32], strides = [1, 1]} : vector<1x96xf32> to vector<1x32xf32>
    %1511 = arith.addf %1509, %1510 : vector<1x32xf32>
    %1512 = arith.negf %1511 : vector<1x32xf32>
    %1513 = math.exp %1512 : vector<1x32xf32>
    %cst_307 = arith.constant 1.000000e+00 : f32
    %1514 = vector.broadcast %cst_307 : f32 to vector<1x32xf32>
    %1515 = arith.addf %1514, %1513 : vector<1x32xf32>
    %1516 = arith.divf %1514, %1515 : vector<1x32xf32>
    %1517 = vector.extract_strided_slice %1482 {offsets = [0, 32], sizes = [1, 32], strides = [1, 1]} : vector<1x96xf32> to vector<1x32xf32>
    %1518 = vector.extract_strided_slice %1480 {offsets = [0, 32], sizes = [1, 32], strides = [1, 1]} : vector<1x96xf32> to vector<1x32xf32>
    %1519 = arith.addf %1517, %1518 : vector<1x32xf32>
    %1520 = arith.negf %1519 : vector<1x32xf32>
    %1521 = math.exp %1520 : vector<1x32xf32>
    %cst_308 = arith.constant 1.000000e+00 : f32
    %1522 = vector.broadcast %cst_308 : f32 to vector<1x32xf32>
    %1523 = arith.addf %1522, %1521 : vector<1x32xf32>
    %1524 = arith.divf %1522, %1523 : vector<1x32xf32>
    %1525 = vector.extract_strided_slice %1482 {offsets = [0, 64], sizes = [1, 32], strides = [1, 1]} : vector<1x96xf32> to vector<1x32xf32>
    %1526 = vector.extract_strided_slice %1480 {offsets = [0, 64], sizes = [1, 32], strides = [1, 1]} : vector<1x96xf32> to vector<1x32xf32>
    %1527 = arith.mulf %1516, %1526 : vector<1x32xf32>
    %1528 = arith.addf %1525, %1527 : vector<1x32xf32>
    %1529 = math.tanh %1528 : vector<1x32xf32>
    %cst_309 = arith.constant 1.000000e+00 : f32
    %1530 = vector.broadcast %cst_309 : f32 to vector<1x32xf32>
    %1531 = arith.subf %1530, %1524 : vector<1x32xf32>
    %1532 = arith.mulf %1531, %1529 : vector<1x32xf32>
    %1533 = arith.mulf %1524, %1439 : vector<1x32xf32>
    %1534 = arith.addf %1532, %1533 : vector<1x32xf32>
    %1535 = arith.addf %1508, %1534 : vector<1x32xf32>
    %c4_i32_310 = arith.constant 4 : i32
    %1536 = vector.broadcast %c4_i32_310 : i32 to vector<8x1xi32>
    %1537 = arith.cmpi eq, %13, %1536 : vector<8x1xi32>
    %1538 = vector.shape_cast %1537 : vector<8x1xi1> to vector<8x1xi1>
    %1539 = vector.broadcast %1538 : vector<8x1xi1> to vector<8x32xi1>
    %1540 = vector.shape_cast %1535 : vector<1x32xf32> to vector<1x32xf32>
    %1541 = vector.broadcast %1540 : vector<1x32xf32> to vector<8x32xf32>
    %1542 = arith.select %1539, %1541, %1419 : vector<8x32xi1>, vector<8x32xf32>
    %cst_311 = arith.constant dense<0.000000e+00> : vector<1x64xf32>
    %1543 = tpu.matmul %1535, %974, %cst_311 {dimension_numbers = #tpu.dot_dimension_numbers<[1], [0], [0], [1], [0, 0, 1, 1], [], []>} : vector<1x32xf32>, vector<32x64xf32>, vector<1x64xf32> -> vector<1x64xf32>
    %1544 = vector.shape_cast %1537 : vector<8x1xi1> to vector<8x1xi1>
    %1545 = vector.broadcast %1544 : vector<8x1xi1> to vector<8x64xi1>
    %1546 = vector.shape_cast %1543 : vector<1x64xf32> to vector<1x64xf32>
    %1547 = vector.broadcast %1546 : vector<1x64xf32> to vector<8x64xf32>
    %1548 = arith.select %1545, %1547, %1425 : vector<8x64xi1>, vector<8x64xf32>
    %1549 = arith.mulf %1535, %970 : vector<1x32xf32>
    %cst_312 = arith.constant dense<0.000000e+00> : vector<1xf32>
    %1550 = vector.multi_reduction <add>, %1549, %cst_312 [1] : vector<1x32xf32> to vector<1xf32>
    %1551 = vector.shape_cast %1550 : vector<1xf32> to vector<1x1xf32>
    %c4_i32_313 = arith.constant 4 : i32
    %1552 = vector.broadcast %c4_i32_313 : i32 to vector<1x8xi32>
    %1553 = arith.cmpi eq, %14, %1552 : vector<1x8xi32>
    %1554 = vector.shape_cast %1551 : vector<1x1xf32> to vector<1x1xf32>
    %1555 = vector.broadcast %1554 : vector<1x1xf32> to vector<1x8xf32>
    %1556 = arith.select %1553, %1555, %1433 : vector<1x8xi1>, vector<1x8xf32>
    %c11_i32 = arith.constant 11 : i32
    %1557 = vector.broadcast %c11_i32 : i32 to vector<15x8xi32>
    %1558 = arith.cmpi eq, %15, %1557 : vector<15x8xi32>
    %1559 = vector.shape_cast %1466 : vector<1x8xf32> to vector<1x8xf32>
    %1560 = vector.broadcast %1559 : vector<1x8xf32> to vector<15x8xf32>
    %1561 = arith.select %1558, %1560, %1438 : vector<15x8xi1>, vector<15x8xf32>
    %1562 = vector.extract_strided_slice %961 {offsets = [5, 0], sizes = [1, 32], strides = [1, 1]} : vector<8x32xf32> to vector<1x32xf32>
    %1563 = arith.mulf %1562, %969 : vector<1x32xf32>
    %cst_314 = arith.constant dense<0.000000e+00> : vector<1xf32>
    %1564 = vector.multi_reduction <add>, %1563, %cst_314 [1] : vector<1x32xf32> to vector<1xf32>
    %1565 = vector.shape_cast %1564 : vector<1xf32> to vector<1x1xf32>
    %1566 = vector.broadcast %1565 : vector<1x1xf32> to vector<1x8xf32>
    %1567 = arith.addf %1566, %1556 : vector<1x8xf32>
    %1568 = vector.broadcast %972 : vector<1x1xf32> to vector<1x8xf32>
    %1569 = arith.addf %1567, %1568 : vector<1x8xf32>
    %1570 = vector.extract_strided_slice %3 {offsets = [5, 0], sizes = [1, 8], strides = [1, 1]} : vector<8x8xf32> to vector<1x8xf32>
    %cst_315 = arith.constant 1.000000e+00 : f32
    %1571 = vector.broadcast %cst_315 : f32 to vector<1x8xf32>
    %1572 = arith.subf %1571, %1570 : vector<1x8xf32>
    %cst_316 = arith.constant 1.000000e+30 : f32
    %1573 = vector.broadcast %cst_316 : f32 to vector<1x8xf32>
    %1574 = arith.mulf %1572, %1573 : vector<1x8xf32>
    %1575 = arith.subf %1569, %1574 : vector<1x8xf32>
    %c5_i32_317 = arith.constant 5 : i32
    %1576 = vector.broadcast %c5_i32_317 : i32 to vector<1x8xi32>
    %1577 = arith.cmpi slt, %14, %1576 : vector<1x8xi32>
    %cst_318 = arith.constant -9.99999968E+37 : f32
    %1578 = vector.broadcast %cst_318 : f32 to vector<1x8xf32>
    %1579 = arith.select %1577, %1575, %1578 : vector<1x8xi1>, vector<1x8xf32>
    %cst_319 = arith.constant dense<0xFF800000> : vector<1xf32>
    %1580 = vector.multi_reduction <maximumf>, %1579, %cst_319 [1] : vector<1x8xf32> to vector<1xf32>
    %1581 = vector.shape_cast %1580 : vector<1xf32> to vector<1x1xf32>
    %1582 = vector.broadcast %1581 : vector<1x1xf32> to vector<1x8xf32>
    %1583 = arith.subf %1579, %1582 : vector<1x8xf32>
    %1584 = math.exp %1583 : vector<1x8xf32>
    %cst_320 = arith.constant dense<0.000000e+00> : vector<1xf32>
    %1585 = vector.multi_reduction <add>, %1584, %cst_320 [1] : vector<1x8xf32> to vector<1xf32>
    %1586 = vector.shape_cast %1585 : vector<1xf32> to vector<1x1xf32>
    %1587 = tpu.reciprocal %1586 : vector<1x1xf32> -> vector<1x1xf32>
    %1588 = vector.broadcast %1587 : vector<1x1xf32> to vector<1x8xf32>
    %1589 = arith.mulf %1584, %1588 : vector<1x8xf32>
    %1590 = vector.extract_strided_slice %5 {offsets = [5, 0], sizes = [1, 8], strides = [1, 1]} : vector<8x8xf32> to vector<1x8xf32>
    %1591 = arith.mulf %1589, %1590 : vector<1x8xf32>
    %1592 = arith.subf %1589, %1591 : vector<1x8xf32>
    %1593 = vector.extract_strided_slice %1548 {offsets = [0, 0], sizes = [8, 32], strides = [1, 1]} : vector<8x64xf32> to vector<8x32xf32>
    %cst_321 = arith.constant dense<0.000000e+00> : vector<1x32xf32>
    %1594 = tpu.matmul %1591, %1593, %cst_321 {dimension_numbers = #tpu.dot_dimension_numbers<[1], [0], [0], [1], [0, 0, 1, 1], [], []>} : vector<1x8xf32>, vector<8x32xf32>, vector<1x32xf32> -> vector<1x32xf32>
    %1595 = vector.extract_strided_slice %1548 {offsets = [0, 32], sizes = [8, 32], strides = [1, 1]} : vector<8x64xf32> to vector<8x32xf32>
    %cst_322 = arith.constant dense<0.000000e+00> : vector<1x32xf32>
    %1596 = tpu.matmul %1592, %1595, %cst_322 {dimension_numbers = #tpu.dot_dimension_numbers<[1], [0], [0], [1], [0, 0, 1, 1], [], []>} : vector<1x8xf32>, vector<8x32xf32>, vector<1x32xf32> -> vector<1x32xf32>
    %1597 = arith.addf %1594, %1596 : vector<1x32xf32>
    %cst_323 = arith.constant dense<0.000000e+00> : vector<1x192xf32>
    %1598 = tpu.matmul %1562, %976, %cst_323 {dimension_numbers = #tpu.dot_dimension_numbers<[1], [0], [0], [1], [0, 0, 1, 1], [], []>} : vector<1x32xf32>, vector<32x192xf32>, vector<1x192xf32> -> vector<1x192xf32>
    %1599 = arith.addf %1598, %980 : vector<1x192xf32>
    %cst_324 = arith.constant dense<0.000000e+00> : vector<1x192xf32>
    %1600 = tpu.matmul %1597, %978, %cst_324 {dimension_numbers = #tpu.dot_dimension_numbers<[1], [0], [0], [1], [0, 0, 1, 1], [], []>} : vector<1x32xf32>, vector<32x192xf32>, vector<1x192xf32> -> vector<1x192xf32>
    %1601 = arith.addf %1600, %982 : vector<1x192xf32>
    %1602 = vector.extract_strided_slice %1599 {offsets = [0, 0], sizes = [1, 96], strides = [1, 1]} : vector<1x192xf32> to vector<1x96xf32>
    %1603 = vector.extract_strided_slice %1599 {offsets = [0, 96], sizes = [1, 96], strides = [1, 1]} : vector<1x192xf32> to vector<1x96xf32>
    %1604 = vector.extract_strided_slice %1601 {offsets = [0, 0], sizes = [1, 96], strides = [1, 1]} : vector<1x192xf32> to vector<1x96xf32>
    %1605 = vector.extract_strided_slice %1601 {offsets = [0, 96], sizes = [1, 96], strides = [1, 1]} : vector<1x192xf32> to vector<1x96xf32>
    %1606 = vector.extract_strided_slice %1602 {offsets = [0, 0], sizes = [1, 32], strides = [1, 1]} : vector<1x96xf32> to vector<1x32xf32>
    %1607 = vector.extract_strided_slice %1604 {offsets = [0, 0], sizes = [1, 32], strides = [1, 1]} : vector<1x96xf32> to vector<1x32xf32>
    %1608 = arith.addf %1606, %1607 : vector<1x32xf32>
    %1609 = arith.negf %1608 : vector<1x32xf32>
    %1610 = math.exp %1609 : vector<1x32xf32>
    %cst_325 = arith.constant 1.000000e+00 : f32
    %1611 = vector.broadcast %cst_325 : f32 to vector<1x32xf32>
    %1612 = arith.addf %1611, %1610 : vector<1x32xf32>
    %1613 = arith.divf %1611, %1612 : vector<1x32xf32>
    %1614 = vector.extract_strided_slice %1602 {offsets = [0, 32], sizes = [1, 32], strides = [1, 1]} : vector<1x96xf32> to vector<1x32xf32>
    %1615 = vector.extract_strided_slice %1604 {offsets = [0, 32], sizes = [1, 32], strides = [1, 1]} : vector<1x96xf32> to vector<1x32xf32>
    %1616 = arith.addf %1614, %1615 : vector<1x32xf32>
    %1617 = arith.negf %1616 : vector<1x32xf32>
    %1618 = math.exp %1617 : vector<1x32xf32>
    %cst_326 = arith.constant 1.000000e+00 : f32
    %1619 = vector.broadcast %cst_326 : f32 to vector<1x32xf32>
    %1620 = arith.addf %1619, %1618 : vector<1x32xf32>
    %1621 = arith.divf %1619, %1620 : vector<1x32xf32>
    %1622 = vector.extract_strided_slice %1602 {offsets = [0, 64], sizes = [1, 32], strides = [1, 1]} : vector<1x96xf32> to vector<1x32xf32>
    %1623 = vector.extract_strided_slice %1604 {offsets = [0, 64], sizes = [1, 32], strides = [1, 1]} : vector<1x96xf32> to vector<1x32xf32>
    %1624 = arith.mulf %1613, %1623 : vector<1x32xf32>
    %1625 = arith.addf %1622, %1624 : vector<1x32xf32>
    %1626 = math.tanh %1625 : vector<1x32xf32>
    %cst_327 = arith.constant 1.000000e+00 : f32
    %1627 = vector.broadcast %cst_327 : f32 to vector<1x32xf32>
    %1628 = arith.subf %1627, %1621 : vector<1x32xf32>
    %1629 = arith.mulf %1628, %1626 : vector<1x32xf32>
    %1630 = arith.mulf %1621, %1597 : vector<1x32xf32>
    %1631 = arith.addf %1629, %1630 : vector<1x32xf32>
    %1632 = vector.extract_strided_slice %1605 {offsets = [0, 0], sizes = [1, 32], strides = [1, 1]} : vector<1x96xf32> to vector<1x32xf32>
    %1633 = vector.extract_strided_slice %1603 {offsets = [0, 0], sizes = [1, 32], strides = [1, 1]} : vector<1x96xf32> to vector<1x32xf32>
    %1634 = arith.addf %1632, %1633 : vector<1x32xf32>
    %1635 = arith.negf %1634 : vector<1x32xf32>
    %1636 = math.exp %1635 : vector<1x32xf32>
    %cst_328 = arith.constant 1.000000e+00 : f32
    %1637 = vector.broadcast %cst_328 : f32 to vector<1x32xf32>
    %1638 = arith.addf %1637, %1636 : vector<1x32xf32>
    %1639 = arith.divf %1637, %1638 : vector<1x32xf32>
    %1640 = vector.extract_strided_slice %1605 {offsets = [0, 32], sizes = [1, 32], strides = [1, 1]} : vector<1x96xf32> to vector<1x32xf32>
    %1641 = vector.extract_strided_slice %1603 {offsets = [0, 32], sizes = [1, 32], strides = [1, 1]} : vector<1x96xf32> to vector<1x32xf32>
    %1642 = arith.addf %1640, %1641 : vector<1x32xf32>
    %1643 = arith.negf %1642 : vector<1x32xf32>
    %1644 = math.exp %1643 : vector<1x32xf32>
    %cst_329 = arith.constant 1.000000e+00 : f32
    %1645 = vector.broadcast %cst_329 : f32 to vector<1x32xf32>
    %1646 = arith.addf %1645, %1644 : vector<1x32xf32>
    %1647 = arith.divf %1645, %1646 : vector<1x32xf32>
    %1648 = vector.extract_strided_slice %1605 {offsets = [0, 64], sizes = [1, 32], strides = [1, 1]} : vector<1x96xf32> to vector<1x32xf32>
    %1649 = vector.extract_strided_slice %1603 {offsets = [0, 64], sizes = [1, 32], strides = [1, 1]} : vector<1x96xf32> to vector<1x32xf32>
    %1650 = arith.mulf %1639, %1649 : vector<1x32xf32>
    %1651 = arith.addf %1648, %1650 : vector<1x32xf32>
    %1652 = math.tanh %1651 : vector<1x32xf32>
    %cst_330 = arith.constant 1.000000e+00 : f32
    %1653 = vector.broadcast %cst_330 : f32 to vector<1x32xf32>
    %1654 = arith.subf %1653, %1647 : vector<1x32xf32>
    %1655 = arith.mulf %1654, %1652 : vector<1x32xf32>
    %1656 = arith.mulf %1647, %1562 : vector<1x32xf32>
    %1657 = arith.addf %1655, %1656 : vector<1x32xf32>
    %1658 = arith.addf %1631, %1657 : vector<1x32xf32>
    %c5_i32_331 = arith.constant 5 : i32
    %1659 = vector.broadcast %c5_i32_331 : i32 to vector<8x1xi32>
    %1660 = arith.cmpi eq, %13, %1659 : vector<8x1xi32>
    %1661 = vector.shape_cast %1660 : vector<8x1xi1> to vector<8x1xi1>
    %1662 = vector.broadcast %1661 : vector<8x1xi1> to vector<8x32xi1>
    %1663 = vector.shape_cast %1658 : vector<1x32xf32> to vector<1x32xf32>
    %1664 = vector.broadcast %1663 : vector<1x32xf32> to vector<8x32xf32>
    %1665 = arith.select %1662, %1664, %1542 : vector<8x32xi1>, vector<8x32xf32>
    %cst_332 = arith.constant dense<0.000000e+00> : vector<1x64xf32>
    %1666 = tpu.matmul %1658, %974, %cst_332 {dimension_numbers = #tpu.dot_dimension_numbers<[1], [0], [0], [1], [0, 0, 1, 1], [], []>} : vector<1x32xf32>, vector<32x64xf32>, vector<1x64xf32> -> vector<1x64xf32>
    %1667 = vector.shape_cast %1660 : vector<8x1xi1> to vector<8x1xi1>
    %1668 = vector.broadcast %1667 : vector<8x1xi1> to vector<8x64xi1>
    %1669 = vector.shape_cast %1666 : vector<1x64xf32> to vector<1x64xf32>
    %1670 = vector.broadcast %1669 : vector<1x64xf32> to vector<8x64xf32>
    %1671 = arith.select %1668, %1670, %1548 : vector<8x64xi1>, vector<8x64xf32>
    %1672 = arith.mulf %1658, %970 : vector<1x32xf32>
    %cst_333 = arith.constant dense<0.000000e+00> : vector<1xf32>
    %1673 = vector.multi_reduction <add>, %1672, %cst_333 [1] : vector<1x32xf32> to vector<1xf32>
    %1674 = vector.shape_cast %1673 : vector<1xf32> to vector<1x1xf32>
    %c5_i32_334 = arith.constant 5 : i32
    %1675 = vector.broadcast %c5_i32_334 : i32 to vector<1x8xi32>
    %1676 = arith.cmpi eq, %14, %1675 : vector<1x8xi32>
    %1677 = vector.shape_cast %1674 : vector<1x1xf32> to vector<1x1xf32>
    %1678 = vector.broadcast %1677 : vector<1x1xf32> to vector<1x8xf32>
    %1679 = arith.select %1676, %1678, %1556 : vector<1x8xi1>, vector<1x8xf32>
    %c12_i32 = arith.constant 12 : i32
    %1680 = vector.broadcast %c12_i32 : i32 to vector<15x8xi32>
    %1681 = arith.cmpi eq, %15, %1680 : vector<15x8xi32>
    %1682 = vector.shape_cast %1589 : vector<1x8xf32> to vector<1x8xf32>
    %1683 = vector.broadcast %1682 : vector<1x8xf32> to vector<15x8xf32>
    %1684 = arith.select %1681, %1683, %1561 : vector<15x8xi1>, vector<15x8xf32>
    %1685 = vector.extract_strided_slice %961 {offsets = [6, 0], sizes = [1, 32], strides = [1, 1]} : vector<8x32xf32> to vector<1x32xf32>
    %1686 = arith.mulf %1685, %969 : vector<1x32xf32>
    %cst_335 = arith.constant dense<0.000000e+00> : vector<1xf32>
    %1687 = vector.multi_reduction <add>, %1686, %cst_335 [1] : vector<1x32xf32> to vector<1xf32>
    %1688 = vector.shape_cast %1687 : vector<1xf32> to vector<1x1xf32>
    %1689 = vector.broadcast %1688 : vector<1x1xf32> to vector<1x8xf32>
    %1690 = arith.addf %1689, %1679 : vector<1x8xf32>
    %1691 = vector.broadcast %972 : vector<1x1xf32> to vector<1x8xf32>
    %1692 = arith.addf %1690, %1691 : vector<1x8xf32>
    %1693 = vector.extract_strided_slice %3 {offsets = [6, 0], sizes = [1, 8], strides = [1, 1]} : vector<8x8xf32> to vector<1x8xf32>
    %cst_336 = arith.constant 1.000000e+00 : f32
    %1694 = vector.broadcast %cst_336 : f32 to vector<1x8xf32>
    %1695 = arith.subf %1694, %1693 : vector<1x8xf32>
    %cst_337 = arith.constant 1.000000e+30 : f32
    %1696 = vector.broadcast %cst_337 : f32 to vector<1x8xf32>
    %1697 = arith.mulf %1695, %1696 : vector<1x8xf32>
    %1698 = arith.subf %1692, %1697 : vector<1x8xf32>
    %c6_i32_338 = arith.constant 6 : i32
    %1699 = vector.broadcast %c6_i32_338 : i32 to vector<1x8xi32>
    %1700 = arith.cmpi slt, %14, %1699 : vector<1x8xi32>
    %cst_339 = arith.constant -9.99999968E+37 : f32
    %1701 = vector.broadcast %cst_339 : f32 to vector<1x8xf32>
    %1702 = arith.select %1700, %1698, %1701 : vector<1x8xi1>, vector<1x8xf32>
    %cst_340 = arith.constant dense<0xFF800000> : vector<1xf32>
    %1703 = vector.multi_reduction <maximumf>, %1702, %cst_340 [1] : vector<1x8xf32> to vector<1xf32>
    %1704 = vector.shape_cast %1703 : vector<1xf32> to vector<1x1xf32>
    %1705 = vector.broadcast %1704 : vector<1x1xf32> to vector<1x8xf32>
    %1706 = arith.subf %1702, %1705 : vector<1x8xf32>
    %1707 = math.exp %1706 : vector<1x8xf32>
    %cst_341 = arith.constant dense<0.000000e+00> : vector<1xf32>
    %1708 = vector.multi_reduction <add>, %1707, %cst_341 [1] : vector<1x8xf32> to vector<1xf32>
    %1709 = vector.shape_cast %1708 : vector<1xf32> to vector<1x1xf32>
    %1710 = tpu.reciprocal %1709 : vector<1x1xf32> -> vector<1x1xf32>
    %1711 = vector.broadcast %1710 : vector<1x1xf32> to vector<1x8xf32>
    %1712 = arith.mulf %1707, %1711 : vector<1x8xf32>
    %1713 = vector.extract_strided_slice %5 {offsets = [6, 0], sizes = [1, 8], strides = [1, 1]} : vector<8x8xf32> to vector<1x8xf32>
    %1714 = arith.mulf %1712, %1713 : vector<1x8xf32>
    %1715 = arith.subf %1712, %1714 : vector<1x8xf32>
    %1716 = vector.extract_strided_slice %1671 {offsets = [0, 0], sizes = [8, 32], strides = [1, 1]} : vector<8x64xf32> to vector<8x32xf32>
    %cst_342 = arith.constant dense<0.000000e+00> : vector<1x32xf32>
    %1717 = tpu.matmul %1714, %1716, %cst_342 {dimension_numbers = #tpu.dot_dimension_numbers<[1], [0], [0], [1], [0, 0, 1, 1], [], []>} : vector<1x8xf32>, vector<8x32xf32>, vector<1x32xf32> -> vector<1x32xf32>
    %1718 = vector.extract_strided_slice %1671 {offsets = [0, 32], sizes = [8, 32], strides = [1, 1]} : vector<8x64xf32> to vector<8x32xf32>
    %cst_343 = arith.constant dense<0.000000e+00> : vector<1x32xf32>
    %1719 = tpu.matmul %1715, %1718, %cst_343 {dimension_numbers = #tpu.dot_dimension_numbers<[1], [0], [0], [1], [0, 0, 1, 1], [], []>} : vector<1x8xf32>, vector<8x32xf32>, vector<1x32xf32> -> vector<1x32xf32>
    %1720 = arith.addf %1717, %1719 : vector<1x32xf32>
    %cst_344 = arith.constant dense<0.000000e+00> : vector<1x192xf32>
    %1721 = tpu.matmul %1685, %976, %cst_344 {dimension_numbers = #tpu.dot_dimension_numbers<[1], [0], [0], [1], [0, 0, 1, 1], [], []>} : vector<1x32xf32>, vector<32x192xf32>, vector<1x192xf32> -> vector<1x192xf32>
    %1722 = arith.addf %1721, %980 : vector<1x192xf32>
    %cst_345 = arith.constant dense<0.000000e+00> : vector<1x192xf32>
    %1723 = tpu.matmul %1720, %978, %cst_345 {dimension_numbers = #tpu.dot_dimension_numbers<[1], [0], [0], [1], [0, 0, 1, 1], [], []>} : vector<1x32xf32>, vector<32x192xf32>, vector<1x192xf32> -> vector<1x192xf32>
    %1724 = arith.addf %1723, %982 : vector<1x192xf32>
    %1725 = vector.extract_strided_slice %1722 {offsets = [0, 0], sizes = [1, 96], strides = [1, 1]} : vector<1x192xf32> to vector<1x96xf32>
    %1726 = vector.extract_strided_slice %1722 {offsets = [0, 96], sizes = [1, 96], strides = [1, 1]} : vector<1x192xf32> to vector<1x96xf32>
    %1727 = vector.extract_strided_slice %1724 {offsets = [0, 0], sizes = [1, 96], strides = [1, 1]} : vector<1x192xf32> to vector<1x96xf32>
    %1728 = vector.extract_strided_slice %1724 {offsets = [0, 96], sizes = [1, 96], strides = [1, 1]} : vector<1x192xf32> to vector<1x96xf32>
    %1729 = vector.extract_strided_slice %1725 {offsets = [0, 0], sizes = [1, 32], strides = [1, 1]} : vector<1x96xf32> to vector<1x32xf32>
    %1730 = vector.extract_strided_slice %1727 {offsets = [0, 0], sizes = [1, 32], strides = [1, 1]} : vector<1x96xf32> to vector<1x32xf32>
    %1731 = arith.addf %1729, %1730 : vector<1x32xf32>
    %1732 = arith.negf %1731 : vector<1x32xf32>
    %1733 = math.exp %1732 : vector<1x32xf32>
    %cst_346 = arith.constant 1.000000e+00 : f32
    %1734 = vector.broadcast %cst_346 : f32 to vector<1x32xf32>
    %1735 = arith.addf %1734, %1733 : vector<1x32xf32>
    %1736 = arith.divf %1734, %1735 : vector<1x32xf32>
    %1737 = vector.extract_strided_slice %1725 {offsets = [0, 32], sizes = [1, 32], strides = [1, 1]} : vector<1x96xf32> to vector<1x32xf32>
    %1738 = vector.extract_strided_slice %1727 {offsets = [0, 32], sizes = [1, 32], strides = [1, 1]} : vector<1x96xf32> to vector<1x32xf32>
    %1739 = arith.addf %1737, %1738 : vector<1x32xf32>
    %1740 = arith.negf %1739 : vector<1x32xf32>
    %1741 = math.exp %1740 : vector<1x32xf32>
    %cst_347 = arith.constant 1.000000e+00 : f32
    %1742 = vector.broadcast %cst_347 : f32 to vector<1x32xf32>
    %1743 = arith.addf %1742, %1741 : vector<1x32xf32>
    %1744 = arith.divf %1742, %1743 : vector<1x32xf32>
    %1745 = vector.extract_strided_slice %1725 {offsets = [0, 64], sizes = [1, 32], strides = [1, 1]} : vector<1x96xf32> to vector<1x32xf32>
    %1746 = vector.extract_strided_slice %1727 {offsets = [0, 64], sizes = [1, 32], strides = [1, 1]} : vector<1x96xf32> to vector<1x32xf32>
    %1747 = arith.mulf %1736, %1746 : vector<1x32xf32>
    %1748 = arith.addf %1745, %1747 : vector<1x32xf32>
    %1749 = math.tanh %1748 : vector<1x32xf32>
    %cst_348 = arith.constant 1.000000e+00 : f32
    %1750 = vector.broadcast %cst_348 : f32 to vector<1x32xf32>
    %1751 = arith.subf %1750, %1744 : vector<1x32xf32>
    %1752 = arith.mulf %1751, %1749 : vector<1x32xf32>
    %1753 = arith.mulf %1744, %1720 : vector<1x32xf32>
    %1754 = arith.addf %1752, %1753 : vector<1x32xf32>
    %1755 = vector.extract_strided_slice %1728 {offsets = [0, 0], sizes = [1, 32], strides = [1, 1]} : vector<1x96xf32> to vector<1x32xf32>
    %1756 = vector.extract_strided_slice %1726 {offsets = [0, 0], sizes = [1, 32], strides = [1, 1]} : vector<1x96xf32> to vector<1x32xf32>
    %1757 = arith.addf %1755, %1756 : vector<1x32xf32>
    %1758 = arith.negf %1757 : vector<1x32xf32>
    %1759 = math.exp %1758 : vector<1x32xf32>
    %cst_349 = arith.constant 1.000000e+00 : f32
    %1760 = vector.broadcast %cst_349 : f32 to vector<1x32xf32>
    %1761 = arith.addf %1760, %1759 : vector<1x32xf32>
    %1762 = arith.divf %1760, %1761 : vector<1x32xf32>
    %1763 = vector.extract_strided_slice %1728 {offsets = [0, 32], sizes = [1, 32], strides = [1, 1]} : vector<1x96xf32> to vector<1x32xf32>
    %1764 = vector.extract_strided_slice %1726 {offsets = [0, 32], sizes = [1, 32], strides = [1, 1]} : vector<1x96xf32> to vector<1x32xf32>
    %1765 = arith.addf %1763, %1764 : vector<1x32xf32>
    %1766 = arith.negf %1765 : vector<1x32xf32>
    %1767 = math.exp %1766 : vector<1x32xf32>
    %cst_350 = arith.constant 1.000000e+00 : f32
    %1768 = vector.broadcast %cst_350 : f32 to vector<1x32xf32>
    %1769 = arith.addf %1768, %1767 : vector<1x32xf32>
    %1770 = arith.divf %1768, %1769 : vector<1x32xf32>
    %1771 = vector.extract_strided_slice %1728 {offsets = [0, 64], sizes = [1, 32], strides = [1, 1]} : vector<1x96xf32> to vector<1x32xf32>
    %1772 = vector.extract_strided_slice %1726 {offsets = [0, 64], sizes = [1, 32], strides = [1, 1]} : vector<1x96xf32> to vector<1x32xf32>
    %1773 = arith.mulf %1762, %1772 : vector<1x32xf32>
    %1774 = arith.addf %1771, %1773 : vector<1x32xf32>
    %1775 = math.tanh %1774 : vector<1x32xf32>
    %cst_351 = arith.constant 1.000000e+00 : f32
    %1776 = vector.broadcast %cst_351 : f32 to vector<1x32xf32>
    %1777 = arith.subf %1776, %1770 : vector<1x32xf32>
    %1778 = arith.mulf %1777, %1775 : vector<1x32xf32>
    %1779 = arith.mulf %1770, %1685 : vector<1x32xf32>
    %1780 = arith.addf %1778, %1779 : vector<1x32xf32>
    %1781 = arith.addf %1754, %1780 : vector<1x32xf32>
    %c6_i32_352 = arith.constant 6 : i32
    %1782 = vector.broadcast %c6_i32_352 : i32 to vector<8x1xi32>
    %1783 = arith.cmpi eq, %13, %1782 : vector<8x1xi32>
    %1784 = vector.shape_cast %1783 : vector<8x1xi1> to vector<8x1xi1>
    %1785 = vector.broadcast %1784 : vector<8x1xi1> to vector<8x32xi1>
    %1786 = vector.shape_cast %1781 : vector<1x32xf32> to vector<1x32xf32>
    %1787 = vector.broadcast %1786 : vector<1x32xf32> to vector<8x32xf32>
    %1788 = arith.select %1785, %1787, %1665 : vector<8x32xi1>, vector<8x32xf32>
    %cst_353 = arith.constant dense<0.000000e+00> : vector<1x64xf32>
    %1789 = tpu.matmul %1781, %974, %cst_353 {dimension_numbers = #tpu.dot_dimension_numbers<[1], [0], [0], [1], [0, 0, 1, 1], [], []>} : vector<1x32xf32>, vector<32x64xf32>, vector<1x64xf32> -> vector<1x64xf32>
    %1790 = vector.shape_cast %1783 : vector<8x1xi1> to vector<8x1xi1>
    %1791 = vector.broadcast %1790 : vector<8x1xi1> to vector<8x64xi1>
    %1792 = vector.shape_cast %1789 : vector<1x64xf32> to vector<1x64xf32>
    %1793 = vector.broadcast %1792 : vector<1x64xf32> to vector<8x64xf32>
    %1794 = arith.select %1791, %1793, %1671 : vector<8x64xi1>, vector<8x64xf32>
    %1795 = arith.mulf %1781, %970 : vector<1x32xf32>
    %cst_354 = arith.constant dense<0.000000e+00> : vector<1xf32>
    %1796 = vector.multi_reduction <add>, %1795, %cst_354 [1] : vector<1x32xf32> to vector<1xf32>
    %1797 = vector.shape_cast %1796 : vector<1xf32> to vector<1x1xf32>
    %c6_i32_355 = arith.constant 6 : i32
    %1798 = vector.broadcast %c6_i32_355 : i32 to vector<1x8xi32>
    %1799 = arith.cmpi eq, %14, %1798 : vector<1x8xi32>
    %1800 = vector.shape_cast %1797 : vector<1x1xf32> to vector<1x1xf32>
    %1801 = vector.broadcast %1800 : vector<1x1xf32> to vector<1x8xf32>
    %1802 = arith.select %1799, %1801, %1679 : vector<1x8xi1>, vector<1x8xf32>
    %c13_i32 = arith.constant 13 : i32
    %1803 = vector.broadcast %c13_i32 : i32 to vector<15x8xi32>
    %1804 = arith.cmpi eq, %15, %1803 : vector<15x8xi32>
    %1805 = vector.shape_cast %1712 : vector<1x8xf32> to vector<1x8xf32>
    %1806 = vector.broadcast %1805 : vector<1x8xf32> to vector<15x8xf32>
    %1807 = arith.select %1804, %1806, %1684 : vector<15x8xi1>, vector<15x8xf32>
    %1808 = vector.extract_strided_slice %961 {offsets = [7, 0], sizes = [1, 32], strides = [1, 1]} : vector<8x32xf32> to vector<1x32xf32>
    %1809 = arith.mulf %1808, %969 : vector<1x32xf32>
    %cst_356 = arith.constant dense<0.000000e+00> : vector<1xf32>
    %1810 = vector.multi_reduction <add>, %1809, %cst_356 [1] : vector<1x32xf32> to vector<1xf32>
    %1811 = vector.shape_cast %1810 : vector<1xf32> to vector<1x1xf32>
    %1812 = vector.broadcast %1811 : vector<1x1xf32> to vector<1x8xf32>
    %1813 = arith.addf %1812, %1802 : vector<1x8xf32>
    %1814 = vector.broadcast %972 : vector<1x1xf32> to vector<1x8xf32>
    %1815 = arith.addf %1813, %1814 : vector<1x8xf32>
    %1816 = vector.extract_strided_slice %3 {offsets = [7, 0], sizes = [1, 8], strides = [1, 1]} : vector<8x8xf32> to vector<1x8xf32>
    %cst_357 = arith.constant 1.000000e+00 : f32
    %1817 = vector.broadcast %cst_357 : f32 to vector<1x8xf32>
    %1818 = arith.subf %1817, %1816 : vector<1x8xf32>
    %cst_358 = arith.constant 1.000000e+30 : f32
    %1819 = vector.broadcast %cst_358 : f32 to vector<1x8xf32>
    %1820 = arith.mulf %1818, %1819 : vector<1x8xf32>
    %1821 = arith.subf %1815, %1820 : vector<1x8xf32>
    %c7_i32_359 = arith.constant 7 : i32
    %1822 = vector.broadcast %c7_i32_359 : i32 to vector<1x8xi32>
    %1823 = arith.cmpi slt, %14, %1822 : vector<1x8xi32>
    %cst_360 = arith.constant -9.99999968E+37 : f32
    %1824 = vector.broadcast %cst_360 : f32 to vector<1x8xf32>
    %1825 = arith.select %1823, %1821, %1824 : vector<1x8xi1>, vector<1x8xf32>
    %cst_361 = arith.constant dense<0xFF800000> : vector<1xf32>
    %1826 = vector.multi_reduction <maximumf>, %1825, %cst_361 [1] : vector<1x8xf32> to vector<1xf32>
    %1827 = vector.shape_cast %1826 : vector<1xf32> to vector<1x1xf32>
    %1828 = vector.broadcast %1827 : vector<1x1xf32> to vector<1x8xf32>
    %1829 = arith.subf %1825, %1828 : vector<1x8xf32>
    %1830 = math.exp %1829 : vector<1x8xf32>
    %cst_362 = arith.constant dense<0.000000e+00> : vector<1xf32>
    %1831 = vector.multi_reduction <add>, %1830, %cst_362 [1] : vector<1x8xf32> to vector<1xf32>
    %1832 = vector.shape_cast %1831 : vector<1xf32> to vector<1x1xf32>
    %1833 = tpu.reciprocal %1832 : vector<1x1xf32> -> vector<1x1xf32>
    %1834 = vector.broadcast %1833 : vector<1x1xf32> to vector<1x8xf32>
    %1835 = arith.mulf %1830, %1834 : vector<1x8xf32>
    %1836 = vector.extract_strided_slice %5 {offsets = [7, 0], sizes = [1, 8], strides = [1, 1]} : vector<8x8xf32> to vector<1x8xf32>
    %1837 = arith.mulf %1835, %1836 : vector<1x8xf32>
    %1838 = arith.subf %1835, %1837 : vector<1x8xf32>
    %1839 = vector.extract_strided_slice %1794 {offsets = [0, 0], sizes = [8, 32], strides = [1, 1]} : vector<8x64xf32> to vector<8x32xf32>
    %cst_363 = arith.constant dense<0.000000e+00> : vector<1x32xf32>
    %1840 = tpu.matmul %1837, %1839, %cst_363 {dimension_numbers = #tpu.dot_dimension_numbers<[1], [0], [0], [1], [0, 0, 1, 1], [], []>} : vector<1x8xf32>, vector<8x32xf32>, vector<1x32xf32> -> vector<1x32xf32>
    %1841 = vector.extract_strided_slice %1794 {offsets = [0, 32], sizes = [8, 32], strides = [1, 1]} : vector<8x64xf32> to vector<8x32xf32>
    %cst_364 = arith.constant dense<0.000000e+00> : vector<1x32xf32>
    %1842 = tpu.matmul %1838, %1841, %cst_364 {dimension_numbers = #tpu.dot_dimension_numbers<[1], [0], [0], [1], [0, 0, 1, 1], [], []>} : vector<1x8xf32>, vector<8x32xf32>, vector<1x32xf32> -> vector<1x32xf32>
    %1843 = arith.addf %1840, %1842 : vector<1x32xf32>
    %cst_365 = arith.constant dense<0.000000e+00> : vector<1x192xf32>
    %1844 = tpu.matmul %1808, %976, %cst_365 {dimension_numbers = #tpu.dot_dimension_numbers<[1], [0], [0], [1], [0, 0, 1, 1], [], []>} : vector<1x32xf32>, vector<32x192xf32>, vector<1x192xf32> -> vector<1x192xf32>
    %1845 = arith.addf %1844, %980 : vector<1x192xf32>
    %cst_366 = arith.constant dense<0.000000e+00> : vector<1x192xf32>
    %1846 = tpu.matmul %1843, %978, %cst_366 {dimension_numbers = #tpu.dot_dimension_numbers<[1], [0], [0], [1], [0, 0, 1, 1], [], []>} : vector<1x32xf32>, vector<32x192xf32>, vector<1x192xf32> -> vector<1x192xf32>
    %1847 = arith.addf %1846, %982 : vector<1x192xf32>
    %1848 = vector.extract_strided_slice %1845 {offsets = [0, 0], sizes = [1, 96], strides = [1, 1]} : vector<1x192xf32> to vector<1x96xf32>
    %1849 = vector.extract_strided_slice %1845 {offsets = [0, 96], sizes = [1, 96], strides = [1, 1]} : vector<1x192xf32> to vector<1x96xf32>
    %1850 = vector.extract_strided_slice %1847 {offsets = [0, 0], sizes = [1, 96], strides = [1, 1]} : vector<1x192xf32> to vector<1x96xf32>
    %1851 = vector.extract_strided_slice %1847 {offsets = [0, 96], sizes = [1, 96], strides = [1, 1]} : vector<1x192xf32> to vector<1x96xf32>
    %1852 = vector.extract_strided_slice %1848 {offsets = [0, 0], sizes = [1, 32], strides = [1, 1]} : vector<1x96xf32> to vector<1x32xf32>
    %1853 = vector.extract_strided_slice %1850 {offsets = [0, 0], sizes = [1, 32], strides = [1, 1]} : vector<1x96xf32> to vector<1x32xf32>
    %1854 = arith.addf %1852, %1853 : vector<1x32xf32>
    %1855 = arith.negf %1854 : vector<1x32xf32>
    %1856 = math.exp %1855 : vector<1x32xf32>
    %cst_367 = arith.constant 1.000000e+00 : f32
    %1857 = vector.broadcast %cst_367 : f32 to vector<1x32xf32>
    %1858 = arith.addf %1857, %1856 : vector<1x32xf32>
    %1859 = arith.divf %1857, %1858 : vector<1x32xf32>
    %1860 = vector.extract_strided_slice %1848 {offsets = [0, 32], sizes = [1, 32], strides = [1, 1]} : vector<1x96xf32> to vector<1x32xf32>
    %1861 = vector.extract_strided_slice %1850 {offsets = [0, 32], sizes = [1, 32], strides = [1, 1]} : vector<1x96xf32> to vector<1x32xf32>
    %1862 = arith.addf %1860, %1861 : vector<1x32xf32>
    %1863 = arith.negf %1862 : vector<1x32xf32>
    %1864 = math.exp %1863 : vector<1x32xf32>
    %cst_368 = arith.constant 1.000000e+00 : f32
    %1865 = vector.broadcast %cst_368 : f32 to vector<1x32xf32>
    %1866 = arith.addf %1865, %1864 : vector<1x32xf32>
    %1867 = arith.divf %1865, %1866 : vector<1x32xf32>
    %1868 = vector.extract_strided_slice %1848 {offsets = [0, 64], sizes = [1, 32], strides = [1, 1]} : vector<1x96xf32> to vector<1x32xf32>
    %1869 = vector.extract_strided_slice %1850 {offsets = [0, 64], sizes = [1, 32], strides = [1, 1]} : vector<1x96xf32> to vector<1x32xf32>
    %1870 = arith.mulf %1859, %1869 : vector<1x32xf32>
    %1871 = arith.addf %1868, %1870 : vector<1x32xf32>
    %1872 = math.tanh %1871 : vector<1x32xf32>
    %cst_369 = arith.constant 1.000000e+00 : f32
    %1873 = vector.broadcast %cst_369 : f32 to vector<1x32xf32>
    %1874 = arith.subf %1873, %1867 : vector<1x32xf32>
    %1875 = arith.mulf %1874, %1872 : vector<1x32xf32>
    %1876 = arith.mulf %1867, %1843 : vector<1x32xf32>
    %1877 = arith.addf %1875, %1876 : vector<1x32xf32>
    %1878 = vector.extract_strided_slice %1851 {offsets = [0, 0], sizes = [1, 32], strides = [1, 1]} : vector<1x96xf32> to vector<1x32xf32>
    %1879 = vector.extract_strided_slice %1849 {offsets = [0, 0], sizes = [1, 32], strides = [1, 1]} : vector<1x96xf32> to vector<1x32xf32>
    %1880 = arith.addf %1878, %1879 : vector<1x32xf32>
    %1881 = arith.negf %1880 : vector<1x32xf32>
    %1882 = math.exp %1881 : vector<1x32xf32>
    %cst_370 = arith.constant 1.000000e+00 : f32
    %1883 = vector.broadcast %cst_370 : f32 to vector<1x32xf32>
    %1884 = arith.addf %1883, %1882 : vector<1x32xf32>
    %1885 = arith.divf %1883, %1884 : vector<1x32xf32>
    %1886 = vector.extract_strided_slice %1851 {offsets = [0, 32], sizes = [1, 32], strides = [1, 1]} : vector<1x96xf32> to vector<1x32xf32>
    %1887 = vector.extract_strided_slice %1849 {offsets = [0, 32], sizes = [1, 32], strides = [1, 1]} : vector<1x96xf32> to vector<1x32xf32>
    %1888 = arith.addf %1886, %1887 : vector<1x32xf32>
    %1889 = arith.negf %1888 : vector<1x32xf32>
    %1890 = math.exp %1889 : vector<1x32xf32>
    %cst_371 = arith.constant 1.000000e+00 : f32
    %1891 = vector.broadcast %cst_371 : f32 to vector<1x32xf32>
    %1892 = arith.addf %1891, %1890 : vector<1x32xf32>
    %1893 = arith.divf %1891, %1892 : vector<1x32xf32>
    %1894 = vector.extract_strided_slice %1851 {offsets = [0, 64], sizes = [1, 32], strides = [1, 1]} : vector<1x96xf32> to vector<1x32xf32>
    %1895 = vector.extract_strided_slice %1849 {offsets = [0, 64], sizes = [1, 32], strides = [1, 1]} : vector<1x96xf32> to vector<1x32xf32>
    %1896 = arith.mulf %1885, %1895 : vector<1x32xf32>
    %1897 = arith.addf %1894, %1896 : vector<1x32xf32>
    %1898 = math.tanh %1897 : vector<1x32xf32>
    %cst_372 = arith.constant 1.000000e+00 : f32
    %1899 = vector.broadcast %cst_372 : f32 to vector<1x32xf32>
    %1900 = arith.subf %1899, %1893 : vector<1x32xf32>
    %1901 = arith.mulf %1900, %1898 : vector<1x32xf32>
    %1902 = arith.mulf %1893, %1808 : vector<1x32xf32>
    %1903 = arith.addf %1901, %1902 : vector<1x32xf32>
    %1904 = arith.addf %1877, %1903 : vector<1x32xf32>
    %c7_i32_373 = arith.constant 7 : i32
    %1905 = vector.broadcast %c7_i32_373 : i32 to vector<8x1xi32>
    %1906 = arith.cmpi eq, %13, %1905 : vector<8x1xi32>
    %1907 = vector.shape_cast %1906 : vector<8x1xi1> to vector<8x1xi1>
    %1908 = vector.broadcast %1907 : vector<8x1xi1> to vector<8x32xi1>
    %1909 = vector.shape_cast %1904 : vector<1x32xf32> to vector<1x32xf32>
    %1910 = vector.broadcast %1909 : vector<1x32xf32> to vector<8x32xf32>
    %1911 = arith.select %1908, %1910, %1788 : vector<8x32xi1>, vector<8x32xf32>
    %c14_i32 = arith.constant 14 : i32
    %1912 = vector.broadcast %c14_i32 : i32 to vector<15x8xi32>
    %1913 = arith.cmpi eq, %15, %1912 : vector<15x8xi32>
    %1914 = vector.shape_cast %1835 : vector<1x8xf32> to vector<1x8xf32>
    %1915 = vector.broadcast %1914 : vector<1x8xf32> to vector<15x8xf32>
    %1916 = arith.select %1913, %1915, %1807 : vector<15x8xi1>, vector<15x8xf32>
    %c0_374 = arith.constant 0 : index
    %c0_375 = arith.constant 0 : index
    %c0_376 = arith.constant 0 : index
    %1917 = vector.load %arg20[%c0_374, %c0_375, %c0_376] : memref<1x15x8xf32, #tpu.memory_space<vmem>>, vector<1x15x8xf32>
    %1918 = vector.shape_cast %1917 : vector<1x15x8xf32> to vector<15x8xf32>
    %1919 = vector.shape_cast %1916 : vector<15x8xf32> to vector<1x15x8xf32>
    tpu.vector_store %arg20[%c0_374, %c0_375, %c0_376], %1919 {strides = array<i32>} : memref<1x15x8xf32, #tpu.memory_space<vmem>>, vector<1x15x8xf32>,
    %c0_377 = arith.constant 0 : index
    %c0_378 = arith.constant 0 : index
    %1920 = vector.load %arg13[%c0_377, %c0_378] : memref<144x32xf32, #tpu.memory_space<vmem>>, vector<144x32xf32>
    %1921 = vector.extract_strided_slice %1920 {offsets = [0, 0], sizes = [32, 32], strides = [1, 1]} : vector<144x32xf32> to vector<32x32xf32>
    %cst_379 = arith.constant dense<0.000000e+00> : vector<8x32xf32>
    %1922 = tpu.matmul %12, %1921, %cst_379 {dimension_numbers = #tpu.dot_dimension_numbers<[1], [0], [0], [1], [0, 0, 1, 1], [], []>} : vector<8x32xf32>, vector<32x32xf32>, vector<8x32xf32> -> vector<8x32xf32>
    %1923 = vector.extract_strided_slice %1920 {offsets = [32, 0], sizes = [32, 32], strides = [1, 1]} : vector<144x32xf32> to vector<32x32xf32>
    %cst_380 = arith.constant dense<0.000000e+00> : vector<8x32xf32>
    %1924 = tpu.matmul %961, %1923, %cst_380 {dimension_numbers = #tpu.dot_dimension_numbers<[1], [0], [0], [1], [0, 0, 1, 1], [], []>} : vector<8x32xf32>, vector<32x32xf32>, vector<8x32xf32> -> vector<8x32xf32>
    %1925 = arith.addf %1922, %1924 : vector<8x32xf32>
    %1926 = vector.extract_strided_slice %1920 {offsets = [64, 0], sizes = [32, 32], strides = [1, 1]} : vector<144x32xf32> to vector<32x32xf32>
    %cst_381 = arith.constant dense<0.000000e+00> : vector<8x32xf32>
    %1927 = tpu.matmul %1911, %1926, %cst_381 {dimension_numbers = #tpu.dot_dimension_numbers<[1], [0], [0], [1], [0, 0, 1, 1], [], []>} : vector<8x32xf32>, vector<32x32xf32>, vector<8x32xf32> -> vector<8x32xf32>
    %1928 = arith.addf %1925, %1927 : vector<8x32xf32>
    %1929 = vector.extract_strided_slice %1920 {offsets = [96, 0], sizes = [48, 32], strides = [1, 1]} : vector<144x32xf32> to vector<48x32xf32>
    %cst_382 = arith.constant dense<0.000000e+00> : vector<8x32xf32>
    %1930 = tpu.matmul %1, %1929, %cst_382 {dimension_numbers = #tpu.dot_dimension_numbers<[1], [0], [0], [1], [0, 0, 1, 1], [], []>} : vector<8x48xf32>, vector<48x32xf32>, vector<8x32xf32> -> vector<8x32xf32>
    %1931 = arith.addf %1928, %1930 : vector<8x32xf32>
    %c0_383 = arith.constant 0 : index
    %c0_384 = arith.constant 0 : index
    %1932 = vector.load %arg14[%c0_383, %c0_384] : memref<1x32xf32, #tpu.memory_space<vmem>>, vector<1x32xf32>
    %1933 = vector.broadcast %1932 : vector<1x32xf32> to vector<8x32xf32>
    %1934 = arith.addf %1931, %1933 : vector<8x32xf32>
    %cst_385 = arith.constant 0.000000e+00 : f32
    %1935 = vector.broadcast %cst_385 : f32 to vector<8x32xf32>
    %1936 = arith.maximumf %1934, %1935 : vector<8x32xf32>
    %c0_386 = arith.constant 0 : index
    %c0_387 = arith.constant 0 : index
    %c0_388 = arith.constant 0 : index
    %1937 = vector.load %arg15[%c0_386, %c0_387, %c0_388] : memref<1x32x32xf32, #tpu.memory_space<vmem>>, vector<1x32x32xf32>
    %1938 = vector.shape_cast %1937 : vector<1x32x32xf32> to vector<32x32xf32>
    %cst_389 = arith.constant dense<0.000000e+00> : vector<8x32xf32>
    %1939 = tpu.matmul %1936, %1938, %cst_389 {dimension_numbers = #tpu.dot_dimension_numbers<[1], [0], [0], [1], [0, 0, 1, 1], [], []>} : vector<8x32xf32>, vector<32x32xf32>, vector<8x32xf32> -> vector<8x32xf32>
    %c0_390 = arith.constant 0 : index
    %c0_391 = arith.constant 0 : index
    %c0_392 = arith.constant 0 : index
    %1940 = vector.load %arg16[%c0_390, %c0_391, %c0_392] : memref<1x1x32xf32, #tpu.memory_space<vmem>>, vector<1x1x32xf32>
    %1941 = vector.shape_cast %1940 : vector<1x1x32xf32> to vector<1x32xf32>
    %1942 = vector.broadcast %1941 : vector<1x32xf32> to vector<8x32xf32>
    %1943 = arith.addf %1939, %1942 : vector<8x32xf32>
    %cst_393 = arith.constant 0.000000e+00 : f32
    %1944 = vector.broadcast %cst_393 : f32 to vector<8x32xf32>
    %1945 = arith.maximumf %1943, %1944 : vector<8x32xf32>
    %c0_394 = arith.constant 0 : index
    %c0_395 = arith.constant 0 : index
    %1946 = vector.load %arg17[%c0_394, %c0_395] : memref<32x6xf32, #tpu.memory_space<vmem>>, vector<32x6xf32>
    %cst_396 = arith.constant dense<0.000000e+00> : vector<8x6xf32>
    %1947 = tpu.matmul %1945, %1946, %cst_396 {dimension_numbers = #tpu.dot_dimension_numbers<[1], [0], [0], [1], [0, 0, 1, 1], [], []>} : vector<8x32xf32>, vector<32x6xf32>, vector<8x6xf32> -> vector<8x6xf32>
    %c0_397 = arith.constant 0 : index
    %c0_398 = arith.constant 0 : index
    %1948 = vector.load %arg18[%c0_397, %c0_398] : memref<1x6xf32, #tpu.memory_space<vmem>>, vector<1x6xf32>
    %1949 = vector.broadcast %1948 : vector<1x6xf32> to vector<8x6xf32>
    %1950 = arith.addf %1947, %1949 : vector<8x6xf32>
    %c0_399 = arith.constant 0 : index
    %c0_400 = arith.constant 0 : index
    %c0_401 = arith.constant 0 : index
    %1951 = vector.load %arg19[%c0_399, %c0_400, %c0_401] : memref<1x8x6xf32, #tpu.memory_space<vmem>>, vector<1x8x6xf32>
    %1952 = vector.shape_cast %1951 : vector<1x8x6xf32> to vector<8x6xf32>
    %1953 = vector.shape_cast %1950 : vector<8x6xf32> to vector<1x8x6xf32>
    tpu.vector_store %arg19[%c0_399, %c0_400, %c0_401], %1953 {strides = array<i32>} : memref<1x8x6xf32, #tpu.memory_space<vmem>>, vector<1x8x6xf32>,
    return
  }
  func.func @transform_0(%arg0: i32) -> (i32, i32, i32) {
    %c0_i32 = arith.constant 0 : i32
    %c0_i32_0 = arith.constant 0 : i32
    %c0_i32_1 = arith.constant 0 : i32
    return %arg0, %c0_i32, %c0_i32_0 : i32, i32, i32
  }
  func.func @transform_1(%arg0: i32) -> (i32, i32, i32) {
    %c0_i32 = arith.constant 0 : i32
    %c0_i32_0 = arith.constant 0 : i32
    %c0_i32_1 = arith.constant 0 : i32
    return %arg0, %c0_i32, %c0_i32_0 : i32, i32, i32
  }
  func.func @transform_2(%arg0: i32) -> (i32, i32, i32) {
    %c0_i32 = arith.constant 0 : i32
    %c0_i32_0 = arith.constant 0 : i32
    %c0_i32_1 = arith.constant 0 : i32
    return %arg0, %c0_i32, %c0_i32_0 : i32, i32, i32
  }
  func.func @transform_3(%arg0: i32) -> (i32, i32) {
    %c0_i32 = arith.constant 0 : i32
    %c0_i32_0 = arith.constant 0 : i32
    %c0_i32_1 = arith.constant 0 : i32
    return %c0_i32, %c0_i32_0 : i32, i32
  }
  func.func @transform_4(%arg0: i32) -> (i32, i32) {
    %c0_i32 = arith.constant 0 : i32
    %c0_i32_0 = arith.constant 0 : i32
    %c0_i32_1 = arith.constant 0 : i32
    return %c0_i32, %c0_i32_0 : i32, i32
  }
  func.func @transform_5(%arg0: i32) -> (i32, i32, i32) {
    %c0_i32 = arith.constant 0 : i32
    %c0_i32_0 = arith.constant 0 : i32
    %c0_i32_1 = arith.constant 0 : i32
    %c0_i32_2 = arith.constant 0 : i32
    return %c0_i32, %c0_i32_0, %c0_i32_1 : i32, i32, i32
  }
  func.func @transform_6(%arg0: i32) -> (i32, i32, i32) {
    %c0_i32 = arith.constant 0 : i32
    %c0_i32_0 = arith.constant 0 : i32
    %c0_i32_1 = arith.constant 0 : i32
    %c0_i32_2 = arith.constant 0 : i32
    return %c0_i32, %c0_i32_0, %c0_i32_1 : i32, i32, i32
  }
  func.func @transform_7(%arg0: i32) -> (i32, i32, i32) {
    %c0_i32 = arith.constant 0 : i32
    %c0_i32_0 = arith.constant 0 : i32
    %c0_i32_1 = arith.constant 0 : i32
    %c0_i32_2 = arith.constant 0 : i32
    return %c0_i32, %c0_i32_0, %c0_i32_1 : i32, i32, i32
  }
  func.func @transform_8(%arg0: i32) -> (i32, i32, i32) {
    %c0_i32 = arith.constant 0 : i32
    %c0_i32_0 = arith.constant 0 : i32
    %c0_i32_1 = arith.constant 0 : i32
    %c0_i32_2 = arith.constant 0 : i32
    return %c0_i32, %c0_i32_0, %c0_i32_1 : i32, i32, i32
  }
  func.func @transform_9(%arg0: i32) -> (i32, i32, i32) {
    %c0_i32 = arith.constant 0 : i32
    %c0_i32_0 = arith.constant 0 : i32
    %c0_i32_1 = arith.constant 0 : i32
    %c0_i32_2 = arith.constant 0 : i32
    return %c0_i32, %c0_i32_0, %c0_i32_1 : i32, i32, i32
  }
  func.func @transform_10(%arg0: i32) -> (i32, i32, i32) {
    %c0_i32 = arith.constant 0 : i32
    %c0_i32_0 = arith.constant 0 : i32
    %c0_i32_1 = arith.constant 0 : i32
    %c0_i32_2 = arith.constant 0 : i32
    return %c0_i32, %c0_i32_0, %c0_i32_1 : i32, i32, i32
  }
  func.func @transform_11(%arg0: i32) -> (i32, i32, i32) {
    %c0_i32 = arith.constant 0 : i32
    %c0_i32_0 = arith.constant 0 : i32
    %c0_i32_1 = arith.constant 0 : i32
    %c0_i32_2 = arith.constant 0 : i32
    return %c0_i32, %c0_i32_0, %c0_i32_1 : i32, i32, i32
  }
  func.func @transform_12(%arg0: i32) -> (i32, i32) {
    %c0_i32 = arith.constant 0 : i32
    %c0_i32_0 = arith.constant 0 : i32
    %c0_i32_1 = arith.constant 0 : i32
    return %c0_i32, %c0_i32_0 : i32, i32
  }
  func.func @transform_13(%arg0: i32) -> (i32, i32) {
    %c0_i32 = arith.constant 0 : i32
    %c0_i32_0 = arith.constant 0 : i32
    %c0_i32_1 = arith.constant 0 : i32
    return %c0_i32, %c0_i32_0 : i32, i32
  }
  func.func @transform_14(%arg0: i32) -> (i32, i32, i32) {
    %c0_i32 = arith.constant 0 : i32
    %c0_i32_0 = arith.constant 0 : i32
    %c0_i32_1 = arith.constant 0 : i32
    %c0_i32_2 = arith.constant 0 : i32
    return %c0_i32, %c0_i32_0, %c0_i32_1 : i32, i32, i32
  }
  func.func @transform_15(%arg0: i32) -> (i32, i32, i32) {
    %c0_i32 = arith.constant 0 : i32
    %c0_i32_0 = arith.constant 0 : i32
    %c0_i32_1 = arith.constant 0 : i32
    %c0_i32_2 = arith.constant 0 : i32
    return %c0_i32, %c0_i32_0, %c0_i32_1 : i32, i32, i32
  }
  func.func @transform_16(%arg0: i32) -> (i32, i32) {
    %c0_i32 = arith.constant 0 : i32
    %c0_i32_0 = arith.constant 0 : i32
    %c0_i32_1 = arith.constant 0 : i32
    return %c0_i32, %c0_i32_0 : i32, i32
  }
  func.func @transform_17(%arg0: i32) -> (i32, i32) {
    %c0_i32 = arith.constant 0 : i32
    %c0_i32_0 = arith.constant 0 : i32
    %c0_i32_1 = arith.constant 0 : i32
    return %c0_i32, %c0_i32_0 : i32, i32
  }
  func.func @transform_18(%arg0: i32) -> (i32, i32, i32) {
    %c0_i32 = arith.constant 0 : i32
    %c0_i32_0 = arith.constant 0 : i32
    %c0_i32_1 = arith.constant 0 : i32
    return %arg0, %c0_i32, %c0_i32_0 : i32, i32, i32
  }
  func.func @transform_19(%arg0: i32) -> (i32, i32, i32) {
    %c0_i32 = arith.constant 0 : i32
    %c0_i32_0 = arith.constant 0 : i32
    %c0_i32_1 = arith.constant 0 : i32
    return %arg0, %c0_i32, %c0_i32_0 : i32, i32, i32
  }
}

</mosaic_0001>

<bundles_post_ra>
// kernel: tpu_custom_call.1
= control target key start
LH: loop header
LB: loop body
LE: loop exit
PB: predicated region body
PF: predicated region fallthrough
CT: control target
= control target key end

     0   :  { %s9026_s0 = inlined_call_operand.hbm [shape: f32[2,8,48], index: 0, kind: input, shape index: {}]   ;;  %s9027_s1 = inlined_call_operand.hbm [shape: f32[2,8,8], index: 1, kind: input, shape index: {}]   ;;  %s9028_s2 = inlined_call_operand.hbm [shape: f32[2,8,8], index: 2, kind: input, shape index: {}]   ;;  %s9029_s3 = inlined_call_operand.vmem [shape: f32[48,32], index: 3, kind: input, shape index: {}]   ;;  %s9030_s4 = inlined_call_operand.vmem [shape: f32[1,32], index: 4, kind: input, shape index: {}]   ;;  %s9031_s5 = inlined_call_operand.vmem [shape: f32[2,2,32], index: 5, kind: input, shape index: {}]   ;;  %s9032_s6 = inlined_call_operand.vmem [shape: f32[2,1,1], index: 6, kind: input, shape index: {}]   ;;  %s9033_s7 = inlined_call_operand.hbm [shape: f32[2,32,64], index: 7, kind: input, shape index: {}]   ;;  %s9034_s8 = inlined_call_operand.vmem [shape: f32[2,32,192], index: 8, kind: input, shape index: {}]   ;;  %s9035_s9 = inlined_call_operand.vmem [shape: f32[2,32,192], index: 9, kind: input, shape index: {}]   ;;  %s9036_s10 = inlined_call_operand.vmem [shape: f32[2,1,192], index: 10, kind: input, shape index: {}]   ;;  %s9037_s11 = inlined_call_operand.vmem [shape: f32[2,1,192], index: 11, kind: input, shape index: {}]   ;;  %s9038_s12 = inlined_call_operand.vmem [shape: f32[144,32], index: 12, kind: input, shape index: {}]   ;;  %s9039_s13 = inlined_call_operand.vmem [shape: f32[1,32], index: 13, kind: input, shape index: {}]   ;;  %s9040_s14 = inlined_call_operand.hbm [shape: f32[1,32,32], index: 14, kind: input, shape index: {}]   ;;  %s9041_s15 = inlined_call_operand.vmem [shape: f32[1,1,32], index: 15, kind: input, shape index: {}]   ;;  %s9042_s16 = inlined_call_operand.vmem [shape: f32[32,6], index: 16, kind: input, shape index: {}]   ;;  %s9043_s17 = inlined_call_operand.vmem [shape: f32[1,6], index: 17, kind: input, shape index: {}]   ;;  %s9044_s18 = inlined_call_operand.vmem [shape: f32[2,8,6], index: 18, kind: output, shape index: {0}]   ;;  %s9045_s19 = inlined_call_operand.vmem [shape: f32[2,15,8], index: 19, kind: output, shape index: {1}]  }
   0x1   :  { %9087 = sst [smem:[#allocation15_spill]] %s9026_s0 }
   0x2   :  { %9088 = sst [smem:[#allocation16_spill]] %s9027_s1 }
   0x3   :  { %9089 = sst [smem:[#allocation17_spill]] %s9028_s2 }
   0x4   :  { %9090 = sst [smem:[#allocation18_spill]] %s9029_s3 }
   0x5   :  { %9091 = sst [smem:[#allocation19_spill]] %s9032_s6 }
   0x6   :  { %9092 = sst [smem:[#allocation20_spill]] %s9033_s7 }
   0x7   :  { %9093 = sst [smem:[#allocation21_spill]] %s9038_s12 }
   0x8   :  { %9094 = sst [smem:[#allocation22_spill]] %s9039_s13 }
   0x9   :  { %9095 = sst [smem:[#allocation23_spill]] %s9040_s14 }
   0xa   :  { %9096 = sst [smem:[#allocation24_spill]] %s9041_s15 }
   0xb   :  { %9097 = sst [smem:[#allocation25_spill]] %s9042_s16 }
   0xc   :  { %9098 = sst [smem:[#allocation26_spill]] %s9043_s17 }
   0xd   :  { %9099 = sst [smem:[#allocation27_spill]] %s9044_s18 }
   0xe   :  { %9100 = sst [smem:[#allocation28_spill]] %s9045_s19 }
   0xf   :  { %25 = vsyncpa [#allocation3], 0 }
  0x10   :  { %27 = vsyncpa [#allocation3 + $0x1], 0 }
  0x11   :  { %28 = vsyncpa [#allocation5], 0 }
  0x12   :  { %30 = vsyncpa [#allocation5 + $0x1], 0 }
  0x13   :  { %31 = vsyncpa [#allocation8], 0  ;;  %s6856_s0 = smov 0   ;;  %s6858_s30 = smov 0  }
  0x14   :  { %s6860_s20 = smov 0   ;;  %s6862_s21 = smov 0  }
  0x15 LB: > { %s9101_s7 = sld [smem:[#allocation20_spill]]  ;;  %s6878_s23 = sadd.s32 4294967295, %s6745_s21   ;;  %s6745_s21 = sphi %s6862_s21, %s9163_s21   ;;  %s6741_s20 = sphi %s6860_s20, %s9167_s20   ;;  %s6737_s30 = sphi %s6858_s30, %s9166_s30   ;;  %s6733_s0 = sphi %s6856_s0, %s9165_s0  }
  0x16   : > { %p5962_p0 = scmp.ge.s32.totalorder %s6745_s21, 1  ;;  %p58_p1 = scmp.eq.s32.totalorder %s6878_s23, 0 }
  0x17   : > { %p487_p2 = scmp.lt.s32.totalorder %s6745_s21, 3  ;;  %s6747_s25 = smov [#allocation7]  }
  0x18   : > { %s512_s3 = sshll.u32 %s6747_s25, 4  ;;  %s9050_s27 = smov 128   ;;  %s513_s3 = int_to_ptr.vmem [resolvable:$true] %s512_s3 }
  0x19   : > { %p6883_p3 = pnand %p5962_p0, %p487_p2  ;;  %s9051_s28 = smov 8  }
  0x1a   : > { %s6901_s29 = sadd.s32 1, %s6745_s21   ;;  %s44_s22 = sadd.s32 1, %s6741_s20 }
  0x1b   : > { %s510_s2 = sshll.u32 %s9101_s7, 4  ;;  %p6161_p4 = pneg %p6883_p3  ;;  %s511_s2 = int_to_ptr.hbm [resolvable:$true] %s510_s2 }
  0x1c   : > { %9104 = sst [smem:[#allocation13_spill]] %s6901_s29  ;;  %s41_s1 = ssub.s32 %s6745_s21, %s6901_s29 }
  0x1d   : > { %p6891_p5 = pnand %p6161_p4, %p58_p1  ;;  %p42_p6 = scmp.eq.s32.totalorder %s41_s1, 0 }
  0x1e   : > { %p51_p7 = scmp.ne.s32.totalorder %s6741_s20, %s6737_s30  ;;  %p52_p8 = scmp.eq.s32.totalorder %s6745_s21, 0 }
  0x1f   : > { %6164 = dma.hbm_to_vmem [thread:$0]  (!%p6891_p5), %s511_s2, 1024, %s513_s3, [#allocation8], %s9050_s27, %s9050_s27, %s9051_s28  }
  0x20   : > { %p57_p9 = scmp.ne.s32.totalorder %s6737_s30, %s6733_s0  ;;  %p53_p10 = por %p52_p8, %p51_p7 }
  0x21   : > { %s6911_s25 = scalar_select %p42_p6, %s6741_s20, %s44_s22  }
  0x22   : > { %p6915_p11 = por %p58_p1, %p57_p9  ;;  %p6180_p12 = scmp.lt.s32.totalorder %s6745_s21, 2 }
  0x23   : > { %9105 = sst [smem:[#allocation14_spill]] %s6911_s25  ;;  %s9054_s2 = sand.u32 1, %s6741_s20  }
  0x24   : > { %s6923_s3 = sshll.u32 %s9054_s2, 3  ;;  %s6926_s27 = sshll.u32 %s6745_s21, 3 }
  0x25   : > { %p6928_p13 = pnand %p6180_p12, %p53_p10  ;;  %s586_s0 = sand.u32 1, %s6745_s21  }
  0x26   : > { %s9108_s25 = sld [smem:[#allocation16_spill]]  ;;  %s590_s17 = scalar_lea.vmem [#allocation4], %s6923_s3 }
  0x27   : > { %s598_s15 = sshll.u32 %s590_s17, 4  ;;  %s6938_s2 = scalar_lea.sflag [#allocation5], %s586_s0  ;;  %s599_s15 = int_to_ptr.vmem [resolvable:$true] %s598_s15 }
  0x28   : > { %p6587_p2 = pneg %p6928_p13 }
  0x2c   : > { %s594_s29 = scalar_lea.hbm %s9108_s25, %s6926_s27 }
  0x2d   : > { %s596_s18 = sshll.u32 %s594_s29, 4  ;;  %s6590_s29 = scalar_lea.hbm %s9108_s25, 16  ;;  %s597_s18 = int_to_ptr.hbm [resolvable:$true] %s596_s18 }
  0x2e   : > { %s6583_s13 = sshra.s32 %s597_s18, 4  ;;  %s6584_s13 = int_to_ptr.hbm [resolvable:$true] %s6583_s13 }
  0x2f   : > { %s6585_s16 = scalar_lea.hbm %s6584_s13, 8  ;;  %p6591_p7 = scmp.lt.s32.totalorder %s6584_s13, %s9108_s25 }
  0x30   : > { %p6586_p0 = scmp.ne.s32.totalorder %s6584_s13, %s6585_s16  ;;  %p6592_p8 = scmp.lt.s32.totalorder %s6590_s29, %s6585_s16 }
  0x32   : > { %p6588_p4 = pnand %p6587_p2, %p6586_p0  ;;  %p6593_p9 = por %p6592_p8, %p6591_p7 }
  0x34   : > { %p6589_p6 = pneg %p6588_p4 }
  0x36   : > { %p6594_p10 = pnand %p6593_p9, %p6589_p6 }
  0x38   : > { %6597 = shalt.err (!%p6594_p10)
}
  0x39   : > { %6174 = dma.hbm_to_vmem [thread:$0]  (!%p6928_p13), %s597_s18, 128, %s599_s15, %s6938_s2  }
  0x3a   : > { %s9109_s14 = sld [smem:[#allocation23_spill]]  ;;  %s6750_s28 = smov [#allocation9]  }
  0x3b   : > { %s544_s13 = sshll.u32 %s6750_s28, 4  ;;  %s9110_s16 = smov 8   ;;  %s545_s13 = int_to_ptr.vmem [resolvable:$true] %s544_s13 }
  0x3c   : > { %s9111_s29 = smov 128   ;;  %s9112_s25 = sld [smem:[#allocation15_spill]] }
  0x3d   : > { %s571_s15 = scalar_lea.vmem [#allocation2], %s6923_s3  ;;  %s9113_s12 = sand.u32 1, %s6741_s20  }
  0x3e   : > { %s579_s18 = sshll.u32 %s571_s15, 4  ;;  %s568_s0 = scalar_lea.sflag [#allocation3], %s9113_s12  ;;  %s580_s18 = int_to_ptr.vmem [resolvable:$true] %s579_s18 }
  0x40   : > { %s542_s21 = sshll.u32 %s9109_s14, 4  ;;  %s543_s21 = int_to_ptr.hbm [resolvable:$true] %s542_s21 }
  0x41   : > { %6167 = dma.hbm_to_vmem [thread:$0]  (!%p6891_p5), %s543_s21, 512, %s545_s13, [#allocation8], %s9111_s29, %s9111_s29, %s9110_s16  }
  0x42   : > { %s575_s19 = scalar_lea.hbm %s9112_s25, %s6926_s27  ;;  %s6650_s13 = scalar_lea.hbm %s9112_s25, 16 }
  0x43   : > { %s577_s6 = sshll.u32 %s575_s19, 4  ;;  %s578_s6 = int_to_ptr.hbm [resolvable:$true] %s577_s6 }
  0x44   : > { %s6643_s14 = sshra.s32 %s578_s6, 4  ;;  %s6644_s14 = int_to_ptr.hbm [resolvable:$true] %s6643_s14 }
  0x45   : > { %s6645_s28 = scalar_lea.hbm %s6644_s14, 8  ;;  %p6651_p5 = scmp.lt.s32.totalorder %s6644_s14, %s9112_s25 }
  0x46   : > { %p6646_p12 = scmp.ne.s32.totalorder %s6644_s14, %s6645_s28  ;;  %p6652_p6 = scmp.lt.s32.totalorder %s6650_s13, %s6645_s28 }
  0x48   : > { %p6648_p0 = pnand %p6646_p12, %p6587_p2  ;;  %p6653_p7 = por %p6652_p6, %p6651_p5 }
  0x4a   : > { %p6649_p4 = pneg %p6648_p0 }
  0x4c   : > { %p6654_p8 = pnand %p6653_p7, %p6649_p4 }
  0x4e   : > { %6657 = shalt.err (!%p6654_p8)
}
  0x4f   : > { %6171 = dma.hbm_to_vmem [thread:$0]  (!%p6928_p13), %s578_s6, 128, %s580_s18, %s568_s0  }
  0x50   : > { %s9114_s17 = sld [smem:[#allocation17_spill]]  ;;  %s609_s26 = scalar_lea.vmem [#allocation6], %s6923_s3 }
  0x51   : > { %s617_s21 = sshll.u32 %s609_s26, 4  ;;  %s618_s21 = int_to_ptr.vmem [resolvable:$true] %s617_s21 }
  0x56   : > { %s613_s15 = scalar_lea.hbm %s9114_s17, %s6926_s27  ;;  %s6680_s6 = scalar_lea.hbm %s9114_s17, 16 }
  0x57   : > { %s615_s12 = sshll.u32 %s613_s15, 4  ;;  %s616_s12 = int_to_ptr.hbm [resolvable:$true] %s615_s12 }
  0x58   : > { %s6673_s14 = sshra.s32 %s616_s12, 4  ;;  %s6674_s14 = int_to_ptr.hbm [resolvable:$true] %s6673_s14 }
  0x59   : > { %s6675_s28 = scalar_lea.hbm %s6674_s14, 8  ;;  %p6681_p0 = scmp.lt.s32.totalorder %s6674_s14, %s9114_s17 }
  0x5a   : > { %p6676_p9 = scmp.ne.s32.totalorder %s6674_s14, %s6675_s28  ;;  %p6682_p4 = scmp.lt.s32.totalorder %s6680_s6, %s6675_s28 }
  0x5c   : > { %p6678_p10 = pnand %p6676_p9, %p6587_p2  ;;  %p6683_p5 = por %p6682_p4, %p6681_p0 }
  0x5e   : > { %p6679_p12 = pneg %p6678_p10 }
  0x60   : > { %p6684_p6 = pnand %p6683_p5, %p6679_p12 }
  0x62   : > { %6687 = shalt.err (!%p6684_p6)
}
  0x63   : > { %6177 = dma.hbm_to_vmem [thread:$0]  (!%p6928_p13), %s616_s12, 128, %s618_s21, %s6938_s2  }
  0x64   : > { %626 = sbr.rel (%p6883_p3) target bundleno = 18192 (0x4710), region = 92  ;;  %s628_s27 = sand.u32 (!%p6883_p3), 1, %s6737_s30  }
  0x65   : > { %s7000_s3 = sshll.u32 (!%p6883_p3), %s628_s27, 3  ;;  %s629_s19 = scalar_lea.sflag (!%p6883_p3), [#allocation3], %s628_s27 }
  0x66   : > { %s632_s29 = scalar_lea.vmem (!%p6883_p3), [#allocation2], %s7000_s3 }
  0x69   : > { %6720 = dma.done.wait (%p6915_p11), %s629_s19, 128  }
  0x6a   : > { %6722 = vsyncadd (%p6915_p11), %s629_s19, 4294967168  ;;  %s638_s2 = sand.u32 1, %s6878_s23   ;;  %s642_s24 = scalar_lea.vmem [#allocation4], %s7000_s3 }
  0x6b   : > { %s639_s1 = scalar_lea.sflag [#allocation5], %s638_s2 }
  0x6c   : > { %6724 = dma.done.wait (%p6915_p11), %s639_s1, 256  }
  0x6d   : > { %6726 = vsyncadd (%p6915_p11), %s639_s1, 4294967040  ;;  %s7014_s22 = scalar_lea.vmem [#allocation6], %s7000_s3 }
  0x6e   : > { %6728 = dma.done.wait (%p58_p1), [#allocation8], 1536  }
  0x6f   : > { %6730 = vsyncadd (%p58_p1), [#allocation8], 4294965760  ;;  %s9115_s26 = sld [smem:[#allocation18_spill]]  ;;  %v7032_v3 = vld [vmem:[%s9035_s9 + $0x30] sm:$0xff]  ;;  %v7037_v4 = vld [vmem:[%s9035_s9 + $0x20] sm:$0xff]  ;;  %vm9059_vm0 = vcmask 392192  }
  0x70   : > { %877 = vmatpush.msra.mxu3 %v7032_v3  ;;  %v7043_v5 = vld [vmem:[%s9034_s8 + $0x30] sm:$0xff]  ;;  %v7048_v6 = vld [vmem:[%s9034_s8 + $0x38] sm:$0xff]  ;;  %v7067_v10 = vld [vmem:[%s9035_s9] sm:$0xff]  ;;  %v6751_v13 = vmov 0.0   ;;  %vm813_vm1 = vcmask 261120   ;;  %s6752_s28 = smov 64  }
  0x71   : > { %v7056_v8 = vld [vmem:[%s9035_s9 + $0x10] sm:$0xff]  ;;  %829 = vmatpush.msra.mxu1 %v7043_v5  ;;  %849 = vmatpush.msra.mxu2 %v7048_v6  ;;  %v741_v12 = vld [vmem:[%s632_s29] sm:$0xff]  ;;  %v7098_v17 = vld [vmem:[%s9034_s8 + $0x18] sm:$0xff]  ;;  %s6753_s6 = smov 32   ;;  %s6754_s18 = smov 96   ;;  %vm1039_vm10 = vcmask 254977  }
  0x72   : > { %878 = vmatpush.msra.mxu3 %v7037_v4  ;;  %v7081_v14 = vld [vmem:[%s9034_s8 + $0x20] sm:$0xff]  ;;  %v7086_v15 = vld [vmem:[%s9034_s8 + $0x28] sm:$0xff]  ;;  %v7093_v16 = vld [vmem:[%s9034_s8 + $0x10] sm:$0xff]  ;;  %s9116_s19 = sld [smem:[#allocation19_spill]]  ;;  %vm1030_vm11 = vcmask 253952   ;;  %vm1059_vm15 = vcmask 58369  }
  0x73   : > { %830 = vmatpush.msra.mxu1 %v7081_v14  ;;  %850 = vmatpush.msra.mxu2 %v7086_v15  ;;  %v7105_v18 = vld [vmem:[%s9034_s8] sm:$0xff]  ;;  %v7110_v19 = vld [vmem:[%s9034_s8 + $0x8] sm:$0xff]  ;;  %v7117_v20 = vld [vmem:[%s9035_s9 + $0x38] sm:$0xff]  ;;  %p732_p1 = scmp.lt.s32.totalorder %s6878_s23, 1  ;;  %s9117_s2 = sld [smem:[#allocation28_spill]] }
  0x74   : > { %879 = vmatpush.msra.mxu3 %v7056_v8  ;;  %v7122_v21 = vld [vmem:[%s9035_s9 + $0x28] sm:$0xff]  ;;  %v7128_v22 = vld [vmem:[%s9035_s9 + $0x18] sm:$0xff]  ;;  %v6226_v24 = vld [vmem:[%s9030_s4] ss:$0 sm:$0xff]  ;;  %s9155_s27 = sld [smem:[#allocation21_spill]] }
  0x75   : > { %v749_v0 = vld [vmem:[%s9115_s26 + $0x28] sm:$0xff]  ;;  %v748_v1 = vld [vmem:[%s9115_s26 + $0x20] sm:$0xff]  ;;  %v747_v2 = vld [vmem:[%s9115_s26 + $0x18] sm:$0xff]  ;;  %831 = vmatpush.msra.mxu1 %v7093_v16  ;;  %851 = vmatpush.msra.mxu2 %v7098_v17  ;;  %s9169_s23 = smov (!%p732_p1, %s6878_s23), 1  ;;  %s9158_s13 = sld [smem:[#allocation25_spill]] }
  0x76   : > { %768 = vmatpush.msra.mxu0 %v749_v0  ;;  %v746_v7 = vld [vmem:[%s9115_s26 + $0x10] sm:$0xff]  ;;  %v745_v9 = vld [vmem:[%s9115_s26 + $0x8] sm:$0xff]  ;;  %v744_v11 = vld [vmem:[%s9115_s26] sm:$0xff]  ;;  %880 = vmatpush.msra.mxu3 %v7067_v10  ;;  %s6146_s0 = sshll.u32 %s9169_s23, 4  ;;  %s5978_s21 = sshll.u32 %s9169_s23, 3 }
  0x77   : > { %881 = vmatmul.f32.vlgmr.msra.gmra.mxu3 %v6751_v13  ;;  %832 = vmatpush.msra.mxu1 %v7105_v18  ;;  %v7134_v23 = vld [vmem:[%s9035_s9 + $0x8] sm:$0xff]  ;;  %v806_v29 = vld [vmem:[%s9036_s10] sm:$0x3]  ;;  %s9162_s3 = sld [smem:[#allocation27_spill]] }
  0x78   : > { %769 = vmatpush.msra.mxu0 %v748_v1  ;;  %852 = vmatpush.msra.mxu2 %v7110_v19  ;;  %v7160_v30 = vperm.slane %v806_v29, 1  ;;  %v807_v33 = vld [vmem:[%s9037_s11] sm:$0x3]  ;;  %v7171_v37 = vperm.slane %v806_v29, 0 }
  0x79   : > { %897 = vmatpush.msrb.mxu1 %v7117_v20  ;;  %v7167_v34 = vperm.slane %v807_v33, 0  ;;  %v7179_v58 = vld [vmem:[%s9031_s5] sm:$0x3]  ;;  %v7185_v60 = vperm.slane %v807_v33, 1  ;;  %s7969_s1 = scalar_lea.vmem %s9117_s2, %s6146_s0  ;;  %s9159_s0 = sld [smem:[#allocation22_spill]] }
  0x7a   : > { %770 = vmatpush.msra.mxu0 %v747_v2  ;;  %v1021_v59 = vrot.slane %v7179_v58, 1 }
  0x7b   : > { %898 = vmatpush.msrb.mxu1 %v7122_v21 }
  0x7c   : > { %771 = vmatpush.msra.mxu0 %v746_v7 }
  0x7d   : > { %899 = vmatpush.msrb.mxu1 %v7128_v22 }
  0x7e   : > { %772 = vmatpush.msra.mxu0 %v745_v9 }
  0x7f   : > { %900 = vmatpush.msrb.mxu1 %v7134_v23 }
  0x80   : > { %773 = vmatpush.msra.mxu0 %v744_v11 }
  0x81   : > { %5981 = vmatmul.msk.f32.vlgmr.msra.gmra.mxu0 %vm9059_vm0, %v741_v12 }
  0xfa   : > { %v882_v35 = vpop.f32.mrf.mxu3 }
  0xfb   : > { %v883_v36 = vadd.f32 %v882_v35, %v7167_v34 }
  0xfe   : > { %v775_v25 = vpop.f32.mrf.mxu0 }
  0xff   : > { %v776_v26 = vadd.f32 %v6226_v24, %v775_v25 }
 0x101   : > { %v7141_v27 = vmax.f32 %v776_v26, 0.0 }
 0x103   : > { %5982 = vmatmul.msk.f32.vlgmr.msra.gmra.mxu1 %vm813_vm1, %v7141_v27  ;;  %5983 = vmatmul.msk.f32.vlgmr.msra.gmra.mxu2 %vm813_vm1, %v7141_v27  ;;  %v7153_v28 = vrot.slane %v7141_v27, 1 }
 0x104   : > { %1154 = vmatpush.msra.mxu1 %v7043_v5 }
 0x106   : > { %1155 = vmatpush.msra.mxu1 %v7081_v14 }
 0x108   : > { %1156 = vmatpush.msra.mxu1 %v7093_v16 }
 0x10a   : > { %1157 = vmatpush.msra.mxu1 %v7105_v18 }
 0x10b   : > { %901 = vmatmul.f32.vlgmr.msrb.gmra.mxu1 %v6751_v13 }
 0x113   : > { %5990 = vmatmul.msk.f32.vlgmr.msra.gmra.mxu1 %vm813_vm1, %v7153_v28 }
 0x180   : > { %v834_v38 = vpop.f32.mrf.mxu1 }
 0x181   : > { %v835_v39 = vadd.f32 %v834_v38, %v7171_v37 }
 0x183   : > { %v905_v40 = vadd.f32 %v883_v36, %v835_v39 }
 0x185   : > { %v5984_v41 = vmul.f32 -1.442695, %v905_v40 }
 0x186   : > { %v854_v31 = vpop.f32.mrf.mxu2 }
 0x187   : > { %v855_v32 = vadd.f32 %v854_v31, %v7160_v30  ;;  %6230 = vpow2.f32 %v5984_v41 }
 0x188   : > { %v902_v61 = vpop.f32.mrf.mxu1 }
 0x189   : > { %965 = vrot.lane.b32.xlu0 %v855_v32, %s6752_s28  ;;  %v903_v62 = vadd.f32 %v902_v61, %v7185_v60  ;;  %v7211_v61 = vld [vmem:[#allocation7] sm:$0xff] }
 0x18b   : > { %v944_v11 = vadd.f32 %v903_v62, %v855_v32 }
 0x18d   : > { %v6231_v42 = vpop.eup %6230  ;;  %v5985_v12 = vmul.f32 -1.442695, %v944_v11 }
 0x18e   : > { %v909_v43 = vadd.f32 1.0, %v6231_v42 }
 0x190   : > { %6232 = vrcp.f32 %v909_v43  ;;  %v921_v49 = vand.u32 2147483648, %v909_v43  ;;  %vm915_vm3 = vweird.f32 %v909_v43  ;;  %v919_v50 = vand.u32 2147483647, %v909_v43 }
 0x191   : > { %926 = vrot.lane.b32.xlu0 %v883_v36, %s6752_s28 }
 0x192   : > { %v922_v52 = vor.u32 1.1754944e-38, %v921_v49  ;;  %vm920_vm5 = vcmp.eq.f32.partialorder %v919_v50, 8.507059e+37 }
 0x196   : > { %v6233_v44 = vpop.eup %6232 }
 0x197   : > { %v911_v45 = vmul.f32 %v6233_v44, %v909_v43  ;;  %vm916_vm2 = vweird.f32 %v6233_v44 }
 0x198   : > { %vm917_vm4 = vmor %vm915_vm3, %vm916_vm2 }
 0x199   : > { %v912_v46 = vsub.f32 1.0, %v911_v45 }
 0x19b   : > { %v913_v47 = vmul.f32 %v6233_v44, %v912_v46 }
 0x19d   : > { %v914_v48 = vadd.f32 %v6233_v44, %v913_v47 }
 0x19f   : > { %v918_v51 = vsel %vm917_vm4, %v6233_v44, %v914_v48 }
 0x1a0   : > { %v923_v54 = vsel %vm920_vm5, %v922_v52, %v918_v51 }
 0x1a1   : > { %v936_v47 = vsub.f32 1.0, %v923_v54  ;;  %v942_v49 = vmul.f32 0.0, %v923_v54 }
 0x1fb   : > { %v966_v53 = vpop.permute.xlu0 %965 }
 0x1fc   : > { %v968_v55 = vmul.f32 %v966_v53, %v923_v54 }
 0x1fe   : > { %970 = vrot.lane.b32.xlu1 %v968_v55, %s6752_s28 }
 0x203   : > { %v927_v56 = vpop.permute.xlu0 %926 }
 0x204   : > { %v929_v57 = vmul.f32 %v927_v56, %v923_v54  ;;  %v7201_v56 = vld [vmem:[#allocation7 + $0x18] sm:$0xff]  ;;  %v7207_v54 = vld [vmem:[#allocation7 + $0x8] sm:$0xff] }
 0x205   : > { %1010 = vmatpush.msrb.mxu2 %v7201_v56  ;;  %1334 = vmatpush.msrb.mxu1 %v7201_v56 }
 0x206   : > { %931 = vrot.lane.b32.xlu1 %v929_v57, %s6752_s28  ;;  %v7203_v57 = vld [vmem:[#allocation7 + $0x10] sm:$0xff] }
 0x207   : > { %1011 = vmatpush.msrb.mxu2 %v7203_v57  ;;  %1335 = vmatpush.msrb.mxu1 %v7203_v57 }
 0x209   : > { %1012 = vmatpush.msrb.mxu2 %v7207_v54  ;;  %1336 = vmatpush.msrb.mxu1 %v7207_v54 }
 0x20b   : > { %1013 = vmatpush.msrb.mxu2 %v7211_v61  ;;  %1337 = vmatpush.msrb.mxu1 %v7211_v61 }
 0x20d   : > { %1174 = vmatpush.msra.mxu2 %v7048_v6  ;;  %1487 = vmatpush.msra.mxu1 %v7048_v6 }
 0x20e   : > { %1022 = vrot.lane.b32.xlu1 %v1021_v59, %s6753_s6 }
 0x20f   : > { %1175 = vmatpush.msra.mxu2 %v7086_v15  ;;  %1488 = vmatpush.msra.mxu1 %v7086_v15 }
 0x211   : > { %1176 = vmatpush.msra.mxu2 %v7098_v17  ;;  %1489 = vmatpush.msra.mxu1 %v7098_v17 }
 0x213   : > { %1177 = vmatpush.msra.mxu2 %v7110_v19  ;;  %1490 = vmatpush.msra.mxu1 %v7110_v19 }
 0x270   : > { %v971_v63 = vpop.permute.xlu1 %970 }
 0x271   : > { %v973_v0 = vadd.f32 %v971_v63, %v903_v62  ;;  %v1036_v62 = vrot.slane %v7179_v58, 7 }
 0x273   : > { %6234 = vtanh.f32 %v973_v0  ;;  %v1038_v63 = vmul.f32 %v1036_v62, %v7141_v27 }
 0x275   : > { %v1040_v0 = vsel %vm1039_vm10, %v1038_v63, 0.0 }
 0x278   : > { %v932_v1 = vpop.permute.xlu1 %931 }
 0x279   : > { %v6235_v2 = vpop.eup %6234  ;;  %v934_v7 = vadd.f32 %v932_v1, %v835_v39  ;;  %v785_v1 = vld [vmem:[%s9116_s19] sm:$0x1] }
 0x27a   : > { %977 = vrot.lane.b32.xlu2 %v6235_v2, %s6754_s18  ;;  %v6755_v2 = vmov 0  }
 0x27b   : > { %6236 = vtanh.f32 %v934_v7  ;;  %6224 = vset.pattern.permute.xlu0 %v6755_v2  ;;  %6225 = vset.pattern.permute.xlu1 %v6755_v2 }
 0x27c   : > { %6238 = vpow2.f32 %v5985_v12  ;;  %v779_v12 = vlaneseq }
 0x280   : > { %v7192_v52 = vpop.permute.xlu1 %1022 }
 0x281   : > { %v6237_v9 = vpop.eup %6236 }
 0x282   : > { %938 = vrot.lane.b32.xlu2 %v6237_v9, %s6754_s18  ;;  %v6239_v24 = vpop.eup %6238 }
 0x283   : > { %v948_v25 = vadd.f32 1.0, %v6239_v24  ;;  %v7235_v24 = vshrl.u32 %v779_v12, 7 }
 0x285   : > { %6240 = vrcp.f32 %v948_v25  ;;  %v960_v36 = vand.u32 2147483648, %v948_v25  ;;  %vm954_vm7 = vweird.f32 %v948_v25  ;;  %v958_v38 = vand.u32 2147483647, %v948_v25 }
 0x286   : > { %vm988_vm12 = vcmp.eq.s32.totalorder %v7235_v24, 0 }
 0x287   : > { %v961_v40 = vor.u32 1.1754944e-38, %v960_v36  ;;  %vm959_vm9 = vcmp.eq.f32.partialorder %v958_v38, 8.507059e+37 }
 0x28b   : > { %v6241_v26 = vpop.eup %6240 }
 0x28c   : > { %v950_v29 = vmul.f32 %v6241_v26, %v948_v25  ;;  %vm955_vm6 = vweird.f32 %v6241_v26 }
 0x28d   : > { %vm956_vm8 = vmor %vm954_vm7, %vm955_vm6  ;;  %vm1092_vm6 = vcmask 64512  }
 0x28e   : > { %v951_v31 = vsub.f32 1.0, %v950_v29 }
 0x290   : > { %v952_v33 = vmul.f32 %v6241_v26, %v951_v31  ;;  %v7247_v31 = vand.u32 127, %v779_v12 }
 0x292   : > { %v953_v35 = vadd.f32 %v6241_v26, %v952_v33  ;;  %v742_v33 = vld [vmem:[%s642_s24] sm:$0xff]  ;;  %vm1034_vm13 = vcmp.eq.s32.totalorder %v7247_v31, 0  ;;  %vm1057_vm14 = vcmp.lt.s32.totalorder %v7247_v31, 1 }
 0x293   : > { %v1054_v38 = vsub.f32 1.0, %v742_v33 }
 0x294   : > { %v957_v39 = vsel %vm956_vm8, %v6241_v26, %v953_v35 }
 0x295   : > { %v962_v41 = vsel %vm959_vm9, %v961_v40, %v957_v39 }
 0x296   : > { %v975_v32 = vsub.f32 1.0, %v962_v41  ;;  %v981_v43 = vmul.f32 %v962_v41, %v7141_v27 }
 0x2d4   : > { %v978_v42 = vpop.permute.xlu2 %977 }
 0x2d5   : > { %v980_v44 = vmul.f32 %v978_v42, %v975_v32 }
 0x2d7   : > { %v982_v45 = vadd.f32 %v981_v43, %v980_v44  ;;  %v7262_v43 = vmul.f32 1e+30, %v1054_v38  ;;  %v7281_v38 = vld [vmem:[%s7014_s22] sm:$0xff] }
 0x2d9   : > { %984 = vrot.lane.b32.xlu0 %v982_v45, %s6753_s6 }
 0x2dc   : > { %v939_v46 = vpop.permute.xlu2 %938 }
 0x2dd   : > { %v941_v48 = vmul.f32 %v939_v46, %v936_v47 }
 0x2df   : > { %v943_v50 = vadd.f32 %v942_v49, %v941_v48 }
 0x34b   : > { %v985_v51 = vpop.permute.xlu0 %984 }
 0x34c   : > { %v7194_v53 = vadd.f32 %v985_v51, %v943_v50 }
 0x34e   : > { %994 = vrot.lane.b32.xlu2 %v7194_v53, %s6754_s18  ;;  %v1025_v55 = vmul.f32 %v7192_v52, %v7194_v53 }
 0x350   : > { %1027 = vrot.lane.b32.xlu0 %v1025_v55, %s6754_s18 }
 0x358   : > { %1049 = vperm.xlu0 %6224, %v785_v1  }
 0x377   : > { %1041 = vadd.xlane.f32.xlu2 %v1040_v0 }
 0x3a8   : > { %v995_v7 = vpop.permute.xlu2 %994 }
 0x3a9   : > { %5986 = vmatmul.msk.f32.vlgmr.msrb.gmra.mxu2 %vm813_vm1, %v995_v7 }
 0x3b1   : > { %5991 = vmatmul.msk.f32.vlgmr.msra.gmra.mxu2 %vm813_vm1, %v7153_v28 }
 0x3c2   : > { %v1028_v9 = vpop.permute.xlu0 %1027 }
 0x3c3   : > { %v1031_v11 = vsel %vm1030_vm11, %v1028_v9, 0.0 }
 0x3c4   : > { %1032 = vadd.xlane.f32.xlu1 %v1031_v11 }
 0x3ca   : > { %v1050_v35 = vpop.permute.xlu0 %1049 }
 0x3cb   : > { %v7260_v41 = vperm.slane %v1050_v35, 0 }
 0x3ea   : > { %v1042_v32 = vpop.xlane.xlu2 %1041 }
 0x42c   : > { %v1015_v25 = vpop.f32.mrf.mxu2 }
 0x42d   : > { %v1018_v26 = vperm.slane %v1015_v25, 0 }
 0x42f   : > { %5988 = vmatpush.msk.msrb.mxu0 %vm988_vm12, %v1018_v26  ;;  %v7242_v29 = vsel %vm988_vm12, %v1018_v26, 0.0 }
 0x430   : > { %1089 = vrot.lane.b32.xlu1 %v7242_v29, %s6754_s18 }
 0x431   : > { %1217 = vmatpush.msra.mxu0 %v7117_v20 }
 0x433   : > { %1218 = vmatpush.msra.mxu0 %v7122_v21 }
 0x434   : > { %v1179_v63 = vpop.f32.mrf.mxu2 }
 0x435   : > { %1219 = vmatpush.msra.mxu0 %v7128_v22  ;;  %v7276_v0 = vadd.f32 %v1179_v63, %v7160_v30 }
 0x437   : > { %1220 = vmatpush.msra.mxu0 %v7134_v23  ;;  %v1033_v36 = vpop.xlane.xlu1 %1032 }
 0x438   : > { %v7257_v39 = vsel %vm1034_vm13, %v1033_v36, 0.0 }
 0x439   : > { %v1044_v40 = vrot.slane %v7257_v39, 7 }
 0x43b   : > { %v1046_v42 = vadd.f32 %v1044_v40, %v1042_v32 }
 0x43d   : > { %v1053_v44 = vadd.f32 %v7260_v41, %v1046_v42 }
 0x43f   : > { %v1056_v45 = vsub.f32 %v1053_v44, %v7262_v43 }
 0x441   : > { %v1058_v46 = vsel %vm1057_vm14, %v1056_v45, -1e+38 }
 0x442   : > { %v1060_v47 = vsel %vm1059_vm15, %v1058_v46, -inf }
 0x443   : > { %1061 = vmax.xlane.f32.xlu0 %v1060_v47 }
 0x4a2   : > { %v1090_v48 = vpop.permute.xlu1 %1089 }
 0x4a3   : > { %1110 = vmatpush.msrb.mxu3 %v1090_v48 }
 0x4a5   : > { %1197 = vmatpush.msra.mxu3 %v7032_v3 }
 0x4a7   : > { %1198 = vmatpush.msra.mxu3 %v7037_v4 }
 0x4a9   : > { %1199 = vmatpush.msra.mxu3 %v7056_v8 }
 0x4ab   : > { %1200 = vmatpush.msra.mxu3 %v7067_v10 }
 0x4b6   : > { %v1062_v49 = vpop.xlane.xlu0 %1061 }
 0x4b7   : > { %v1063_v50 = vsub.f32 %v1058_v46, %v1062_v49  ;;  %v7300_v49 = vrot.slane %v7141_v27, 2 }
 0x4b9   : > { %v1064_v51 = vmul.f32 1.442695, %v1063_v50  ;;  %v1159_v50 = vpop.f32.mrf.mxu1 }
 0x4bb   : > { %6242 = vpow2.f32 %v1064_v51 }
 0x4c1   : > { %v6243_v55 = vpop.eup %6242 }
 0x4c2   : > { %v1066_v62 = vsel %vm1059_vm15, %v6243_v55, 0.0 }
 0x4c3   : > { %1067 = vadd.xlane.f32.xlu2 %v1066_v62 }
 0x4db   : > { %1288 = vrot.lane.b32.xlu2 %v7276_v0, %s6752_s28 }
 0x536   : > { %v1068_v1 = vpop.xlane.xlu2 %1067 }
 0x537   : > { %6244 = vrcp.f32 %v1068_v1  ;;  %v1080_v11 = vand.u32 2147483648, %v1068_v1  ;;  %v1078_v25 = vand.u32 2147483647, %v1068_v1  ;;  %vm1074_vm3 = vweird.f32 %v1068_v1 }
 0x539   : > { %v1081_v33 = vor.u32 1.1754944e-38, %v1080_v11  ;;  %vm1079_vm5 = vcmp.eq.f32.partialorder %v1078_v25, 8.507059e+37 }
 0x53d   : > { %v6245_v2 = vpop.eup %6244 }
 0x53e   : > { %v1070_v7 = vmul.f32 %v6245_v2, %v1068_v1  ;;  %vm1075_vm2 = vweird.f32 %v6245_v2 }
 0x53f   : > { %vm1076_vm4 = vmor %vm1074_vm3, %vm1075_vm2 }
 0x540   : > { %v1071_v9 = vsub.f32 1.0, %v1070_v7 }
 0x542   : > { %v1072_v12 = vmul.f32 %v6245_v2, %v1071_v9 }
 0x544   : > { %v1073_v26 = vadd.f32 %v6245_v2, %v1072_v12 }
 0x546   : > { %v1077_v35 = vsel %vm1076_vm4, %v6245_v2, %v1073_v26 }
 0x547   : > { %v1082_v36 = vsel %vm1079_vm5, %v1081_v33, %v1077_v35 }
 0x548   : > { %v7283_v40 = vmul.f32 %v6243_v55, %v1082_v36  ;;  %v1160_v55 = vadd.f32 %v1159_v50, %v7171_v37 }
 0x54a   : > { %v1084_v32 = vmul.f32 %v7283_v40, %v7281_v38 }
 0x54c   : > { %v1116_v42 = vrot.slane %v1084_v32, 1  ;;  %v1085_v44 = vsub.f32 %v7283_v40, %v1084_v32 }
 0x54e   : > { %5989 = vmatmul.msk.f32.vlgmr.msrb.gmra.mxu0 %vm1092_vm6, %v1116_v42  ;;  %v1087_v45 = vrot.slane %v1085_v44, 1  ;;  %v1289_v42 = vpop.permute.xlu2 %1288 }
 0x54f   : > { %1467 = vmatpush.msrb.mxu0 %v7043_v5 }
 0x550   : > { %5987 = vmatmul.msk.f32.vlgmr.msrb.gmra.mxu3 %vm1092_vm6, %v1087_v45 }
 0x551   : > { %1468 = vmatpush.msrb.mxu0 %v7081_v14 }
 0x553   : > { %1469 = vmatpush.msrb.mxu0 %v7093_v16 }
 0x555   : > { %1470 = vmatpush.msrb.mxu0 %v7105_v18 }
 0x5cb   : > { %v1136_v46 = vpop.f32.mrf.mxu0 }
 0x5d3   : > { %v1112_v47 = vpop.f32.mrf.mxu3 }
 0x5d4   : > { %v1137_v48 = vadd.f32 %v1136_v46, %v1112_v47 }
 0x5d6   : > { %5992 = vmatmul.msk.f32.vlgmr.msra.gmra.mxu3 %vm813_vm1, %v1137_v48  ;;  %5993 = vmatmul.msk.f32.vlgmr.msra.gmra.mxu0 %vm813_vm1, %v1137_v48 }
 0x5d7   : > { %1647 = vmatpush.msra.mxu0 %v7201_v56 }
 0x5d9   : > { %1648 = vmatpush.msra.mxu0 %v7203_v57 }
 0x5db   : > { %1649 = vmatpush.msra.mxu0 %v7207_v54 }
 0x5dd   : > { %1650 = vmatpush.msra.mxu0 %v7211_v61 }
 0x5de   : > { %5999 = vmatmul.msk.f32.vlgmr.msrb.gmra.mxu0 %vm813_vm1, %v7300_v49 }
 0x5df   : > { %1800 = vmatpush.msrb.mxu0 %v7048_v6 }
 0x5e1   : > { %1801 = vmatpush.msrb.mxu0 %v7086_v15 }
 0x5e3   : > { %1802 = vmatpush.msrb.mxu0 %v7098_v17 }
 0x5e5   : > { %1803 = vmatpush.msrb.mxu0 %v7110_v19 }
 0x653   : > { %v1222_v50 = vpop.f32.mrf.mxu0 }
 0x659   : > { %v1202_v51 = vpop.f32.mrf.mxu3 }
 0x65a   : > { %v1203_v62 = vadd.f32 %v1202_v51, %v7167_v34  ;;  %v1223_v51 = vadd.f32 %v1222_v50, %v7185_v60 }
 0x65c   : > { %v1225_v63 = vadd.f32 %v1203_v62, %v1160_v55  ;;  %1246 = vrot.lane.b32.xlu0 %v1203_v62, %s6752_s28 }
 0x65e   : > { %v5994_v1 = vmul.f32 -1.442695, %v1225_v63 }
 0x660   : > { %6246 = vpow2.f32 %v5994_v1 }
 0x666   : > { %v6247_v2 = vpop.eup %6246 }
 0x667   : > { %v1229_v7 = vadd.f32 1.0, %v6247_v2 }
 0x669   : > { %6248 = vrcp.f32 %v1229_v7  ;;  %v1241_v25 = vand.u32 2147483648, %v1229_v7  ;;  %v1239_v33 = vand.u32 2147483647, %v1229_v7  ;;  %vm1235_vm8 = vweird.f32 %v1229_v7 }
 0x66b   : > { %v1242_v36 = vor.u32 1.1754944e-38, %v1241_v25  ;;  %vm1240_vm2 = vcmp.eq.f32.partialorder %v1239_v33, 8.507059e+37 }
 0x66f   : > { %v6249_v9 = vpop.eup %6248 }
 0x670   : > { %v1231_v11 = vmul.f32 %v6249_v9, %v1229_v7  ;;  %vm1236_vm7 = vweird.f32 %v6249_v9 }
 0x671   : > { %vm1237_vm9 = vmor %vm1235_vm8, %vm1236_vm7  ;;  %vm1312_vm8 = vcmp.eq.s32.totalorder %v7235_v24, 1 }
 0x672   : > { %v1232_v12 = vsub.f32 1.0, %v1231_v11  ;;  %v1267_v11 = vadd.f32 %v1223_v51, %v7276_v0 }
 0x674   : > { %v1233_v26 = vmul.f32 %v6249_v9, %v1232_v12  ;;  %v5995_v12 = vmul.f32 -1.442695, %v1267_v11 }
 0x676   : > { %v1234_v35 = vadd.f32 %v6249_v9, %v1233_v26 }
 0x678   : > { %v1238_v32 = vsel %vm1237_vm9, %v6249_v9, %v1234_v35  ;;  %vm1361_vm9 = vcmask 256002  }
 0x679   : > { %v1243_v44 = vsel %vm1240_vm2, %v1242_v36, %v1238_v32  ;;  %vm1352_vm2 = vcmp.eq.s32.totalorder %v7247_v31, 1 }
 0x67a   : > { %v1291_v45 = vmul.f32 %v1289_v42, %v1243_v44 }
 0x67c   : > { %1293 = vrot.lane.b32.xlu1 %v1291_v45, %s6752_s28 }
 0x6ce   : > { %v1247_v46 = vpop.permute.xlu0 %1246 }
 0x6cf   : > { %v1249_v47 = vmul.f32 %v1247_v46, %v1243_v44 }
 0x6d1   : > { %1251 = vrot.lane.b32.xlu2 %v1249_v47, %s6752_s28 }
 0x6ee   : > { %v1294_v62 = vpop.permute.xlu1 %1293 }
 0x6ef   : > { %v1296_v63 = vadd.f32 %v1294_v62, %v1223_v51 }
 0x6f1   : > { %6250 = vtanh.f32 %v1296_v63 }
 0x6f7   : > { %v6251_v1 = vpop.eup %6250 }
 0x6f8   : > { %1300 = vrot.lane.b32.xlu1 %v6251_v1, %s6754_s18 }
 0x700   : > { %1262 = vrot.lane.b32.xlu1 %v1137_v48, %s6753_s6 }
 0x72b   : > { %v1252_v2 = vpop.permute.xlu2 %1251 }
 0x72c   : > { %v1254_v7 = vadd.f32 %v1252_v2, %v1160_v55  ;;  %v1256_v2 = vsub.f32 1.0, %v1243_v44 }
 0x72e   : > { %6252 = vtanh.f32 %v1254_v7 }
 0x72f   : > { %6254 = vpow2.f32 %v5995_v12 }
 0x734   : > { %v6253_v9 = vpop.eup %6252 }
 0x735   : > { %1258 = vrot.lane.b32.xlu2 %v6253_v9, %s6754_s18  ;;  %v6255_v25 = vpop.eup %6254 }
 0x736   : > { %v1271_v26 = vadd.f32 1.0, %v6255_v25  ;;  %v991_v25 = vperm.slane %v7194_v53, 0  ;;  %v1358_v53 = vrot.slane %v7179_v58, 6 }
 0x738   : > { %6256 = vrcp.f32 %v1271_v26  ;;  %v1283_v48 = vand.u32 2147483648, %v1271_v26  ;;  %vm1277_vm4 = vweird.f32 %v1271_v26  ;;  %v1281_v55 = vand.u32 2147483647, %v1271_v26 }
 0x73a   : > { %v1284_v46 = vor.u32 1.1754944e-38, %v1283_v48  ;;  %vm1282_vm7 = vcmp.eq.f32.partialorder %v1281_v55, 8.507059e+37 }
 0x73e   : > { %v6257_v33 = vpop.eup %6256 }
 0x73f   : > { %v1273_v35 = vmul.f32 %v6257_v33, %v1271_v26  ;;  %vm1278_vm3 = vweird.f32 %v6257_v33 }
 0x740   : > { %vm1279_vm5 = vmor %vm1277_vm4, %vm1278_vm3  ;;  %vm9060_vm3 = vcmp.lt.s32.totalorder %v7247_v31, 2  ;;  %vm9061_vm4 = vcmask 59394  }
 0x741   : > { %v1274_v36 = vsub.f32 1.0, %v1273_v35 }
 0x743   : > { %v1275_v32 = vmul.f32 %v6257_v33, %v1274_v36 }
 0x745   : > { %v1276_v42 = vadd.f32 %v6257_v33, %v1275_v32  ;;  %v1360_v32 = vmul.f32 %v1358_v53, %v7141_v27 }
 0x747   : > { %v1280_v45 = vsel %vm1279_vm5, %v6257_v33, %v1276_v42  ;;  %v1362_v42 = vsel %vm1361_vm9, %v1360_v32, 0.0  ;;  %v1355_v32 = vperm.slane %v7283_v40, 1 }
 0x748   : > { %v1285_v0 = vsel %vm1282_vm7, %v1284_v46, %v1280_v45 }
 0x749   : > { %v1298_v47 = vsub.f32 1.0, %v1285_v0  ;;  %v1305_v51 = vmul.f32 %v1285_v0, %v7153_v28  ;;  %v992_v28 = vsel %vm988_vm12, %v991_v25, 0.0 }
 0x76a   : > { %v1301_v50 = vpop.permute.xlu1 %1300 }
 0x76b   : > { %v1303_v62 = vmul.f32 %v1301_v50, %v1298_v47 }
 0x76d   : > { %v1306_v63 = vadd.f32 %v1305_v51, %v1303_v62 }
 0x76f   : > { %1308 = vrot.lane.b32.xlu0 %v1306_v63, %s6753_s6 }
 0x772   : > { %v1263_v7 = vpop.permute.xlu1 %1262 }
 0x773   : > { %v1265_v11 = vmul.f32 %v1263_v7, %v1243_v44 }
 0x78f   : > { %v1259_v1 = vpop.permute.xlu2 %1258 }
 0x790   : > { %v1261_v9 = vmul.f32 %v1259_v1, %v1256_v2 }
 0x792   : > { %v1266_v12 = vadd.f32 %v1265_v11, %v1261_v9 }
 0x7e1   : > { %v1309_v26 = vpop.permute.xlu0 %1308 }
 0x7e2   : > { %v1311_v33 = vadd.f32 %v1309_v26, %v1266_v12 }
 0x7e4   : > { %v1315_v35 = vperm.slane %v1311_v33, 0  ;;  %1318 = vrot.lane.b32.xlu2 %v1311_v33, %s6754_s18  ;;  %v1344_v36 = vmul.f32 %v1311_v33, %v7192_v52 }
 0x7e6   : > { %1346 = vrot.lane.b32.xlu1 %v1344_v36, %s6754_s18  ;;  %v7330_v44 = vsel %vm1312_vm8, %v1315_v35, %v992_v28 }
 0x80d   : > { %1363 = vadd.xlane.f32.xlu2 %v1362_v42 }
 0x83e   : > { %v1319_v48 = vpop.permute.xlu2 %1318 }
 0x83f   : > { %5996 = vmatmul.msk.f32.vlgmr.msrb.gmra.mxu1 %vm813_vm1, %v1319_v48 }
 0x847   : > { %6000 = vmatmul.msk.f32.vlgmr.msra.gmra.mxu1 %vm813_vm1, %v7300_v49 }
 0x858   : > { %v1347_v55 = vpop.permute.xlu1 %1346 }
 0x859   : > { %v1349_v45 = vsel %vm1030_vm11, %v1347_v55, 0.0 }
 0x85a   : > { %1350 = vadd.xlane.f32.xlu0 %v1349_v45 }
 0x880   : > { %v1364_v62 = vpop.xlane.xlu2 %1363 }
 0x8bc   : > { %v1339_v46 = vpop.f32.mrf.mxu1 }
 0x8bd   : > { %v1342_v0 = vperm.slane %v1339_v46, 0  ;;  %v1356_v46 = vsel %vm1312_vm8, %v1355_v32, 0.0 }
 0x8bf   : > { %v7342_v47 = vsel %vm1312_vm8, %v1342_v0, %v7242_v29 }
 0x8c0   : > { %1403 = vrot.lane.b32.xlu2 %v7342_v47, %s6754_s18  ;;  %1447 = vmatpush.msrb.mxu3 %v7342_v47 }
 0x8c2   : > { %1530 = vmatpush.msra.mxu3 %v7117_v20 }
 0x8c4   : > { %1531 = vmatpush.msra.mxu3 %v7122_v21  ;;  %v1492_v1 = vpop.f32.mrf.mxu1 }
 0x8c6   : > { %1532 = vmatpush.msra.mxu3 %v7128_v22 }
 0x8c8   : > { %1533 = vmatpush.msra.mxu3 %v7134_v23 }
 0x8cd   : > { %v1351_v50 = vpop.xlane.xlu0 %1350 }
 0x8ce   : > { %v7355_v29 = vsel %vm1352_vm2, %v1351_v50, %v7257_v39  ;;  %v7365_v39 = vadd.f32 %v1492_v1, %v7160_v30 }
 0x8cf   : > { %v1366_v51 = vrot.slane %v7355_v29, 6 }
 0x8d1   : > { %v1368_v63 = vadd.f32 %v1366_v51, %v1364_v62 }
 0x8d3   : > { %v1369_v20 = vadd.f32 %v1368_v63, %v7260_v41 }
 0x8d5   : > { %v1370_v21 = vsub.f32 %v1369_v20, %v7262_v43 }
 0x8d7   : > { %v1372_v22 = vsel %vm9060_vm3, %v1370_v21, -1e+38 }
 0x8d8   : > { %v1374_v23 = vsel %vm9061_vm4, %v1372_v22, -inf }
 0x8d9   : > { %1375 = vmax.xlane.f32.xlu1 %v1374_v23 }
 0x8f2   : > { %1601 = vrot.lane.b32.xlu1 %v7365_v39, %s6752_s28 }
 0x91a   : > { %v1404_v2 = vpop.permute.xlu2 %1403 }
 0x91b   : > { %1423 = vmatpush.msrb.mxu2 %v1404_v2 }
 0x91d   : > { %1510 = vmatpush.msra.mxu2 %v7032_v3 }
 0x91f   : > { %1511 = vmatpush.msra.mxu2 %v7037_v4 }
 0x921   : > { %1512 = vmatpush.msra.mxu2 %v7056_v8 }
 0x923   : > { %1513 = vmatpush.msra.mxu2 %v7067_v10 }
 0x94c   : > { %v1376_v7 = vpop.xlane.xlu1 %1375 }
 0x94d   : > { %v1377_v9 = vsub.f32 %v1372_v22, %v1376_v7 }
 0x94f   : > { %v1378_v11 = vmul.f32 1.442695, %v1377_v9 }
 0x951   : > { %6258 = vpow2.f32 %v1378_v11 }
 0x957   : > { %v6259_v12 = vpop.eup %6258 }
 0x958   : > { %v1380_v25 = vsel %vm9061_vm4, %v6259_v12, 0.0  ;;  %vm9065_vm4 = vcmp.eq.s32.totalorder %v7235_v24, 2 }
 0x959   : > { %1381 = vadd.xlane.f32.xlu0 %v1380_v25 }
 0x9cc   : > { %v1382_v26 = vpop.xlane.xlu0 %1381 }
 0x9cd   : > { %6260 = vrcp.f32 %v1382_v26  ;;  %v1394_v3 = vand.u32 2147483648, %v1382_v26  ;;  %v1392_v4 = vand.u32 2147483647, %v1382_v26  ;;  %vm1388_vm7 = vweird.f32 %v1382_v26 }
 0x9cf   : > { %v1395_v10 = vor.u32 1.1754944e-38, %v1394_v3  ;;  %vm1393_vm3 = vcmp.eq.f32.partialorder %v1392_v4, 8.507059e+37 }
 0x9d3   : > { %v6261_v33 = vpop.eup %6260 }
 0x9d4   : > { %v1384_v35 = vmul.f32 %v6261_v33, %v1382_v26  ;;  %vm1389_vm5 = vweird.f32 %v6261_v33  ;;  %v1602_v26 = vpop.permute.xlu1 %1601 }
 0x9d5   : > { %vm1390_vm0 = vmor %vm1388_vm7, %vm1389_vm5 }
 0x9d6   : > { %v1385_v36 = vsub.f32 1.0, %v1384_v35 }
 0x9d8   : > { %v1386_v28 = vmul.f32 %v6261_v33, %v1385_v36 }
 0x9da   : > { %v1387_v8 = vadd.f32 %v6261_v33, %v1386_v28 }
 0x9dc   : > { %v1391_v53 = vsel %vm1390_vm0, %v6261_v33, %v1387_v8 }
 0x9dd   : > { %v1396_v42 = vsel %vm1393_vm3, %v1395_v10, %v1391_v53 }
 0x9de   : > { %v1397_v48 = vmul.f32 %v6259_v12, %v1396_v42 }
 0x9e0   : > { %v1668_v55 = vperm.slane %v1397_v48, 2  ;;  %v1398_v45 = vmul.f32 %v1397_v48, %v7281_v38 }
 0x9e2   : > { %v1429_v0 = vrot.slane %v1398_v45, 2  ;;  %v1399_v50 = vsub.f32 %v1397_v48, %v1398_v45  ;;  %v7381_v51 = vsel %vm9065_vm4, %v1668_v55, %v1356_v46 }
 0x9e4   : > { %5998 = vmatmul.msk.f32.vlgmr.msrb.gmra.mxu3 %vm1092_vm6, %v1429_v0  ;;  %v1401_v62 = vrot.slane %v1399_v50, 2 }
 0x9e5   : > { %1780 = vmatpush.msrb.mxu3 %v7043_v5  ;;  %v7395_v5 = vrot.slane %v7141_v27, 3 }
 0x9e6   : > { %5997 = vmatmul.msk.f32.vlgmr.msrb.gmra.mxu2 %vm1092_vm6, %v1401_v62 }
 0x9e7   : > { %1781 = vmatpush.msrb.mxu3 %v7081_v14  ;;  %v1472_v14 = vpop.f32.mrf.mxu0 }
 0x9e9   : > { %1782 = vmatpush.msrb.mxu3 %v7093_v16 }
 0x9eb   : > { %1783 = vmatpush.msrb.mxu3 %v7105_v18  ;;  %v1473_v18 = vadd.f32 %v1472_v14, %v7171_v37 }
 0xa67   : > { %v1449_v40 = vpop.f32.mrf.mxu3 }
 0xa69   : > { %v1425_v63 = vpop.f32.mrf.mxu2 }
 0xa6a   : > { %v1450_v20 = vadd.f32 %v1449_v40, %v1425_v63 }
 0xa6c   : > { %6001 = vmatmul.msk.f32.vlgmr.msra.gmra.mxu2 %vm813_vm1, %v1450_v20  ;;  %6002 = vmatmul.msk.f32.vlgmr.msra.gmra.mxu3 %vm813_vm1, %v1450_v20 }
 0xa6d   : > { %1960 = vmatpush.msra.mxu3 %v7201_v56 }
 0xa6f   : > { %1961 = vmatpush.msra.mxu3 %v7203_v57 }
 0xa71   : > { %1962 = vmatpush.msra.mxu3 %v7207_v54 }
 0xa73   : > { %1963 = vmatpush.msra.mxu3 %v7211_v61 }
 0xa74   : > { %6008 = vmatmul.msk.f32.vlgmr.msrb.gmra.mxu3 %vm813_vm1, %v7395_v5 }
 0xa75   : > { %2113 = vmatpush.msrb.mxu3 %v7048_v6 }
 0xa77   : > { %2114 = vmatpush.msrb.mxu3 %v7086_v15 }
 0xa79   : > { %2115 = vmatpush.msrb.mxu3 %v7098_v17 }
 0xa7b   : > { %2116 = vmatpush.msrb.mxu3 %v7110_v19 }
 0xaef   : > { %v1515_v16 = vpop.f32.mrf.mxu2  ;;  %v1535_v28 = vpop.f32.mrf.mxu3 }
 0xaf0   : > { %v1516_v21 = vadd.f32 %v1515_v16, %v7167_v34  ;;  %v1536_v4 = vadd.f32 %v1535_v28, %v7185_v60 }
 0xaf2   : > { %v1538_v22 = vadd.f32 %v1516_v21, %v1473_v18  ;;  %1559 = vrot.lane.b32.xlu0 %v1516_v21, %s6752_s28  ;;  %v1580_v32 = vadd.f32 %v1536_v4, %v7365_v39 }
 0xaf4   : > { %v6003_v23 = vmul.f32 -1.442695, %v1538_v22  ;;  %v6004_v42 = vmul.f32 -1.442695, %v1580_v32 }
 0xaf6   : > { %6262 = vpow2.f32 %v6003_v23 }
 0xafc   : > { %v6263_v1 = vpop.eup %6262 }
 0xafd   : > { %v1542_v2 = vadd.f32 1.0, %v6263_v1 }
 0xaff   : > { %6264 = vrcp.f32 %v1542_v2  ;;  %v1554_v17 = vand.u32 2147483648, %v1542_v2  ;;  %v1552_v19 = vand.u32 2147483647, %v1542_v2  ;;  %vm1548_vm3 = vweird.f32 %v1542_v2 }
 0xb01   : > { %v1555_v12 = vor.u32 1.1754944e-38, %v1554_v17  ;;  %vm1553_vm7 = vcmp.eq.f32.partialorder %v1552_v19, 8.507059e+37 }
 0xb05   : > { %v6265_v6 = vpop.eup %6264 }
 0xb06   : > { %v1544_v15 = vmul.f32 %v6265_v6, %v1542_v2  ;;  %vm1549_vm0 = vweird.f32 %v6265_v6 }
 0xb07   : > { %vm1550_vm5 = vmor %vm1548_vm3, %vm1549_vm0 }
 0xb08   : > { %v1545_v7 = vsub.f32 1.0, %v1544_v15 }
 0xb0a   : > { %v1546_v9 = vmul.f32 %v6265_v6, %v1545_v7 }
 0xb0c   : > { %v1547_v11 = vadd.f32 %v6265_v6, %v1546_v9 }
 0xb0e   : > { %v1551_v25 = vsel %vm1550_vm5, %v6265_v6, %v1547_v11 }
 0xb0f   : > { %v1556_v33 = vsel %vm1553_vm7, %v1555_v12, %v1551_v25 }
 0xb10   : > { %v1604_v35 = vmul.f32 %v1602_v26, %v1556_v33  ;;  %v1569_v7 = vsub.f32 1.0, %v1556_v33 }
 0xb12   : > { %1606 = vrot.lane.b32.xlu2 %v1604_v35, %s6752_s28 }
 0xb64   : > { %v1560_v36 = vpop.permute.xlu0 %1559 }
 0xb65   : > { %v1562_v3 = vmul.f32 %v1560_v36, %v1556_v33  ;;  %v1671_v36 = vrot.slane %v7179_v58, 5 }
 0xb67   : > { %1564 = vrot.lane.b32.xlu0 %v1562_v3, %s6752_s28  ;;  %v1673_v3 = vmul.f32 %v1671_v36, %v7141_v27 }
 0xb6c   : > { %v1607_v8 = vpop.permute.xlu2 %1606 }
 0xb6d   : > { %v1609_v10 = vadd.f32 %v1607_v8, %v1536_v4 }
 0xb6f   : > { %6266 = vtanh.f32 %v1609_v10  ;;  %1575 = vrot.lane.b32.xlu0 %v1450_v20, %s6753_s6 }
 0xb70   : > { %6268 = vpow2.f32 %v6004_v42 }
 0xb75   : > { %v6267_v53 = vpop.eup %6266 }
 0xb76   : > { %1613 = vrot.lane.b32.xlu1 %v6267_v53, %s6754_s18  ;;  %v6269_v48 = vpop.eup %6268 }
 0xb77   : > { %v1584_v55 = vadd.f32 1.0, %v6269_v48 }
 0xb79   : > { %6270 = vrcp.f32 %v1584_v55  ;;  %v1596_v20 = vand.u32 2147483648, %v1584_v55  ;;  %vm1590_vm3 = vweird.f32 %v1584_v55  ;;  %v1594_v14 = vand.u32 2147483647, %v1584_v55 }
 0xb7b   : > { %v1597_v21 = vor.u32 1.1754944e-38, %v1596_v20  ;;  %vm1595_vm7 = vcmp.eq.f32.partialorder %v1594_v14, 8.507059e+37  ;;  %v7470_v20 = vld [vmem:[%s9035_s9 + $0x18] sm:$0xff]  ;;  %v7478_v14 = vld [vmem:[%s9035_s9 + $0x8] sm:$0xff] }
 0xb7f   : > { %v6271_v45 = vpop.eup %6270 }
 0xb80   : > { %v1586_v46 = vmul.f32 %v6271_v45, %v1584_v55  ;;  %vm1591_vm0 = vweird.f32 %v6271_v45 }
 0xb81   : > { %vm1592_vm5 = vmor %vm1590_vm3, %vm1591_vm0  ;;  %vm9064_vm0 = vcmask 257027   ;;  %vm9063_vm3 = vcmp.eq.s32.totalorder %v7247_v31, 2 }
 0xb82   : > { %v1587_v0 = vsub.f32 1.0, %v1586_v46 }
 0xb84   : > { %v1588_v62 = vmul.f32 %v6271_v45, %v1587_v0 }
 0xb86   : > { %v1589_v63 = vadd.f32 %v6271_v45, %v1588_v62  ;;  %v7455_v62 = vld [vmem:[%s9035_s9 + $0x38] sm:$0xff] }
 0xb88   : > { %v1593_v16 = vsel %vm1592_vm5, %v6271_v45, %v1589_v63  ;;  %vm9062_vm5 = vcmp.lt.s32.totalorder %v7247_v31, 3 }
 0xb89   : > { %v1598_v22 = vsel %vm1595_vm7, %v1597_v21, %v1593_v16  ;;  %vm9066_vm7 = vcmask 60419   ;;  %v7484_v21 = vld [vmem:[%s9035_s9 + $0x30] sm:$0xff] }
 0xb8a   : > { %v1611_v23 = vsub.f32 1.0, %v1598_v22  ;;  %v1618_v2 = vmul.f32 %v1598_v22, %v7300_v49 }
 0xbd9   : > { %v1565_v50 = vpop.permute.xlu0 %1564 }
 0xbda   : > { %v1567_v40 = vadd.f32 %v1565_v50, %v1473_v18 }
 0xbdc   : > { %6272 = vtanh.f32 %v1567_v40  ;;  %v7461_v40 = vld [vmem:[%s9035_s9 + $0x28] sm:$0xff] }
 0xbe1   : > { %v1576_v17 = vpop.permute.xlu0 %1575 }
 0xbe2   : > { %v6273_v39 = vpop.eup %6272  ;;  %v1578_v19 = vmul.f32 %v1576_v17, %v1556_v33  ;;  %v1675_v33 = vsel %vm9064_vm0, %v1673_v3, 0.0 }
 0xbe3   : > { %1571 = vrot.lane.b32.xlu2 %v6273_v39, %s6754_s18 }
 0xbe8   : > { %v1614_v1 = vpop.permute.xlu1 %1613 }
 0xbe9   : > { %v1616_v6 = vmul.f32 %v1614_v1, %v1611_v23  ;;  %v7490_v23 = vld [vmem:[%s9035_s9 + $0x20] sm:$0xff] }
 0xbeb   : > { %v1619_v18 = vadd.f32 %v1618_v2, %v1616_v6  ;;  %v7496_v2 = vld [vmem:[%s9035_s9 + $0x10] sm:$0xff]  ;;  %v7502_v6 = vld [vmem:[%s9035_s9] sm:$0xff] }
 0xbed   : > { %1621 = vrot.lane.b32.xlu1 %v1619_v18, %s6753_s6 }
 0xc3d   : > { %v1572_v15 = vpop.permute.xlu2 %1571 }
 0xc3e   : > { %v1574_v9 = vmul.f32 %v1572_v15, %v1569_v7 }
 0xc40   : > { %v1579_v11 = vadd.f32 %v1578_v19, %v1574_v9 }
 0xc5f   : > { %v1622_v12 = vpop.permute.xlu1 %1621 }
 0xc60   : > { %v1624_v25 = vadd.f32 %v1622_v12, %v1579_v11 }
 0xc62   : > { %v1628_v26 = vperm.slane %v1624_v25, 0  ;;  %1631 = vrot.lane.b32.xlu0 %v1624_v25, %s6754_s18  ;;  %v1657_v35 = vmul.f32 %v1624_v25, %v7192_v52 }
 0xc64   : > { %1659 = vrot.lane.b32.xlu2 %v1657_v35, %s6754_s18  ;;  %v7422_v49 = vsel %vm9065_vm4, %v1628_v26, %v7330_v44 }
 0xc8d   : > { %1676 = vadd.xlane.f32.xlu2 %v1675_v33 }
 0xcbe   : > { %v1660_v28 = vpop.permute.xlu2 %1659 }
 0xcbf   : > { %v1662_v4 = vsel %vm1030_vm11, %v1660_v28, 0.0 }
 0xcc0   : > { %1663 = vadd.xlane.f32.xlu1 %v1662_v4 }
 0xcd4   : > { %v1632_v8 = vpop.permute.xlu0 %1631 }
 0xcd5   : > { %6005 = vmatmul.msk.f32.vlgmr.msra.gmra.mxu0 %vm813_vm1, %v1632_v8 }
 0xcdd   : > { %6009 = vmatmul.msk.f32.vlgmr.msrb.gmra.mxu0 %vm813_vm1, %v7395_v5 }
 0xd00   : > { %v1677_v32 = vpop.xlane.xlu2 %1676 }
 0xd33   : > { %v1664_v44 = vpop.xlane.xlu1 %1663 }
 0xd34   : > { %v7435_v10 = vsel %vm9063_vm3, %v1664_v44, %v7355_v29 }
 0xd35   : > { %v1679_v53 = vrot.slane %v7435_v10, 5 }
 0xd37   : > { %v1681_v42 = vadd.f32 %v1679_v53, %v1677_v32 }
 0xd39   : > { %v1682_v48 = vadd.f32 %v1681_v42, %v7260_v41  ;;  %v7517_v42 = vld [vmem:[%s9034_s8 + $0x30] sm:$0xff] }
 0xd3b   : > { %v1683_v55 = vsub.f32 %v1682_v48, %v7262_v43  ;;  %v7536_v48 = vld [vmem:[%s9034_s8] sm:$0xff] }
 0xd3d   : > { %v1685_v45 = vsel %vm9062_vm5, %v1683_v55, -1e+38 }
 0xd3e   : > { %v1687_v46 = vsel %vm9066_vm7, %v1685_v45, -inf }
 0xd3f   : > { %1688 = vmax.xlane.f32.xlu0 %v1687_v46 }
 0xd52   : > { %v1652_v0 = vpop.f32.mrf.mxu0 }
 0xd53   : > { %v1655_v29 = vperm.slane %v1652_v0, 0  ;;  %v7545_v0 = vrot.slane %v7141_v27, 4 }
 0xd55   : > { %v7447_v50 = vsel %vm9065_vm4, %v1655_v29, %v7342_v47  ;;  %v7553_v29 = vld [vmem:[%s9034_s8 + $0x38] sm:$0xff] }
 0xd56   : > { %1760 = vmatpush.msrb.mxu2 %v7447_v50  ;;  %1716 = vrot.lane.b32.xlu2 %v7447_v50, %s6754_s18 }
 0xd58   : > { %1843 = vmatpush.msra.mxu2 %v7455_v62 }
 0xd5a   : > { %1844 = vmatpush.msra.mxu2 %v7461_v40  ;;  %v1805_v47 = vpop.f32.mrf.mxu0 }
 0xd5b   : > { %v7465_v63 = vadd.f32 %v1805_v47, %v7160_v30 }
 0xd5c   : > { %1845 = vmatpush.msra.mxu2 %v7470_v20 }
 0xd5d   : > { %1914 = vrot.lane.b32.xlu0 %v7465_v63, %s6752_s28 }
 0xd5e   : > { %1846 = vmatpush.msra.mxu2 %v7478_v14 }
 0xdb0   : > { %v1717_v16 = vpop.permute.xlu2 %1716 }
 0xdb1   : > { %1736 = vmatpush.msrb.mxu1 %v1717_v16 }
 0xdb2   : > { %v1689_v39 = vpop.xlane.xlu0 %1688 }
 0xdb3   : > { %1823 = vmatpush.msra.mxu1 %v7484_v21  ;;  %v1690_v22 = vsub.f32 %v1685_v45, %v1689_v39 }
 0xdb5   : > { %1824 = vmatpush.msra.mxu1 %v7490_v23  ;;  %v1691_v1 = vmul.f32 1.442695, %v1690_v22 }
 0xdb7   : > { %1825 = vmatpush.msra.mxu1 %v7496_v2  ;;  %6274 = vpow2.f32 %v1691_v1 }
 0xdb9   : > { %1826 = vmatpush.msra.mxu1 %v7502_v6 }
 0xdbd   : > { %v6275_v18 = vpop.eup %6274 }
 0xdbe   : > { %v1693_v15 = vsel %vm9066_vm7, %v6275_v18, 0.0  ;;  %vm9071_vm7 = vcmp.eq.s32.totalorder %v7235_v24, 3 }
 0xdbf   : > { %1694 = vadd.xlane.f32.xlu1 %v1693_v15 }
 0xe32   : > { %v1695_v7 = vpop.xlane.xlu1 %1694 }
 0xe33   : > { %6276 = vrcp.f32 %v1695_v7  ;;  %v1707_v11 = vand.u32 2147483648, %v1695_v7  ;;  %v1705_v25 = vand.u32 2147483647, %v1695_v7  ;;  %vm1701_vm3 = vweird.f32 %v1695_v7 }
 0xe35   : > { %v1708_v35 = vor.u32 1.1754944e-38, %v1707_v11  ;;  %vm1706_vm4 = vcmp.eq.f32.partialorder %v1705_v25, 8.507059e+37 }
 0xe39   : > { %v6277_v17 = vpop.eup %6276 }
 0xe3a   : > { %v1697_v9 = vmul.f32 %v6277_v17, %v1695_v7  ;;  %vm1702_vm5 = vweird.f32 %v6277_v17 }
 0xe3b   : > { %vm1703_vm0 = vmor %vm1701_vm3, %vm1702_vm5 }
 0xe3c   : > { %v1698_v19 = vsub.f32 1.0, %v1697_v9 }
 0xe3e   : > { %v1699_v12 = vmul.f32 %v6277_v17, %v1698_v19 }
 0xe40   : > { %v1700_v26 = vadd.f32 %v6277_v17, %v1699_v12 }
 0xe42   : > { %v1704_v36 = vsel %vm1703_vm0, %v6277_v17, %v1700_v26 }
 0xe43   : > { %v1709_v3 = vsel %vm1706_vm4, %v1708_v35, %v1704_v36  ;;  %v1915_v36 = vpop.permute.xlu0 %1914 }
 0xe44   : > { %v1710_v33 = vmul.f32 %v6275_v18, %v1709_v3 }
 0xe46   : > { %v1711_v28 = vmul.f32 %v1710_v33, %v7281_v38  ;;  %v1981_v4 = vperm.slane %v1710_v33, 3  ;;  %v7524_v38 = vld [vmem:[%s9034_s8 + $0x20] sm:$0xff] }
 0xe48   : > { %v1742_v8 = vrot.slane %v1711_v28, 3  ;;  %v1712_v44 = vsub.f32 %v1710_v33, %v1711_v28  ;;  %v7511_v53 = vsel %vm9071_vm7, %v1981_v4, %v7381_v51  ;;  %v7530_v51 = vld [vmem:[%s9034_s8 + $0x10] sm:$0xff] }
 0xe4a   : > { %6007 = vmatmul.msk.f32.vlgmr.msrb.gmra.mxu2 %vm1092_vm6, %v1742_v8  ;;  %v1714_v32 = vrot.slane %v1712_v44, 3 }
 0xe4b   : > { %2093 = vmatpush.msrb.mxu2 %v7517_v42 }
 0xe4c   : > { %6006 = vmatmul.msk.f32.vlgmr.msrb.gmra.mxu1 %vm1092_vm6, %v1714_v32 }
 0xe4d   : > { %2094 = vmatpush.msrb.mxu2 %v7524_v38 }
 0xe4f   : > { %2095 = vmatpush.msrb.mxu2 %v7530_v51 }
 0xe51   : > { %2096 = vmatpush.msrb.mxu2 %v7536_v48 }
 0xec9   : > { %v1738_v55 = vpop.f32.mrf.mxu1 }
 0xecd   : > { %v1762_v45 = vpop.f32.mrf.mxu2 }
 0xece   : > { %v1763_v46 = vadd.f32 %v1762_v45, %v1738_v55 }
 0xed0   : > { %6010 = vmatmul.msk.f32.vlgmr.msra.gmra.mxu1 %vm813_vm1, %v1763_v46  ;;  %6011 = vmatmul.msk.f32.vlgmr.msra.gmra.mxu2 %vm813_vm1, %v1763_v46 }
 0xed1   : > { %2273 = vmatpush.msra.mxu2 %v7201_v56  ;;  %v7559_v56 = vld [vmem:[%s9034_s8 + $0x28] sm:$0xff] }
 0xed3   : > { %2274 = vmatpush.msra.mxu2 %v7203_v57  ;;  %v7565_v57 = vld [vmem:[%s9034_s8 + $0x18] sm:$0xff] }
 0xed5   : > { %2275 = vmatpush.msra.mxu2 %v7207_v54  ;;  %v7571_v54 = vld [vmem:[%s9034_s8 + $0x8] sm:$0xff] }
 0xed7   : > { %2276 = vmatpush.msra.mxu2 %v7211_v61  ;;  %v1785_v61 = vpop.f32.mrf.mxu3 }
 0xed8   : > { %6017 = vmatmul.msk.f32.vlgmr.msrb.gmra.mxu2 %vm813_vm1, %v7545_v0  ;;  %v1786_v16 = vadd.f32 %v1785_v61, %v7171_v37 }
 0xed9   : > { %2426 = vmatpush.msrb.mxu2 %v7553_v29 }
 0xedb   : > { %2427 = vmatpush.msrb.mxu2 %v7559_v56 }
 0xedd   : > { %2428 = vmatpush.msrb.mxu2 %v7565_v57 }
 0xedf   : > { %2429 = vmatpush.msrb.mxu2 %v7571_v54 }
 0xf4d   : > { %v1828_v47 = vpop.f32.mrf.mxu1 }
 0xf4e   : > { %v1829_v39 = vadd.f32 %v1828_v47, %v7167_v34 }
 0xf50   : > { %v1851_v22 = vadd.f32 %v1829_v39, %v1786_v16  ;;  %1872 = vrot.lane.b32.xlu1 %v1829_v39, %s6752_s28 }
 0xf52   : > { %v6012_v1 = vmul.f32 -1.442695, %v1851_v22 }
 0xf53   : > { %v1848_v8 = vpop.f32.mrf.mxu2 }
 0xf54   : > { %6278 = vpow2.f32 %v6012_v1  ;;  %v1849_v44 = vadd.f32 %v1848_v8, %v7185_v60 }
 0xf56   : > { %v1893_v22 = vadd.f32 %v1849_v44, %v7465_v63 }
 0xf58   : > { %v6013_v1 = vmul.f32 -1.442695, %v1893_v22 }
 0xf5a   : > { %v6279_v18 = vpop.eup %6278 }
 0xf5b   : > { %v1855_v15 = vadd.f32 1.0, %v6279_v18 }
 0xf5d   : > { %6280 = vrcp.f32 %v1855_v15  ;;  %v1867_v19 = vand.u32 2147483648, %v1855_v15  ;;  %v1865_v12 = vand.u32 2147483647, %v1855_v15  ;;  %vm1861_vm0 = vweird.f32 %v1855_v15 }
 0xf5f   : > { %v1868_v26 = vor.u32 1.1754944e-38, %v1867_v19  ;;  %vm1866_vm5 = vcmp.eq.f32.partialorder %v1865_v12, 8.507059e+37 }
 0xf63   : > { %v6281_v7 = vpop.eup %6280 }
 0xf64   : > { %v1857_v17 = vmul.f32 %v6281_v7, %v1855_v15  ;;  %vm1862_vm4 = vweird.f32 %v6281_v7 }
 0xf65   : > { %vm1863_vm3 = vmor %vm1861_vm0, %vm1862_vm4 }
 0xf66   : > { %v1858_v9 = vsub.f32 1.0, %v1857_v17 }
 0xf68   : > { %v1859_v11 = vmul.f32 %v6281_v7, %v1858_v9 }
 0xf6a   : > { %v1860_v25 = vadd.f32 %v6281_v7, %v1859_v11 }
 0xf6c   : > { %v1864_v35 = vsel %vm1863_vm3, %v6281_v7, %v1860_v25 }
 0xf6d   : > { %v1869_v3 = vsel %vm1866_vm5, %v1868_v26, %v1864_v35 }
 0xf6e   : > { %v1917_v33 = vmul.f32 %v1915_v36, %v1869_v3  ;;  %v1882_v8 = vsub.f32 1.0, %v1869_v3 }
 0xf70   : > { %1919 = vrot.lane.b32.xlu0 %v1917_v33, %s6752_s28 }
 0xfc2   : > { %v1873_v28 = vpop.permute.xlu1 %1872 }
 0xfc3   : > { %v1875_v4 = vmul.f32 %v1873_v28, %v1869_v3 }
 0xfc5   : > { %1877 = vrot.lane.b32.xlu2 %v1875_v4, %s6752_s28 }
 0xfcd   : > { %1888 = vrot.lane.b32.xlu2 %v1763_v46, %s6753_s6 }
 0xfe2   : > { %v1920_v32 = vpop.permute.xlu0 %1919 }
 0xfe3   : > { %v1922_v55 = vadd.f32 %v1920_v32, %v1849_v44 }
 0xfe5   : > { %6282 = vtanh.f32 %v1922_v55 }
 0xfeb   : > { %v6283_v45 = vpop.eup %6282 }
 0xfec   : > { %1926 = vrot.lane.b32.xlu1 %v6283_v45, %s6754_s18 }
0x101f   : > { %v1878_v61 = vpop.permute.xlu2 %1877 }
0x1020   : > { %v1880_v47 = vadd.f32 %v1878_v61, %v1786_v16 }
0x1022   : > { %6284 = vtanh.f32 %v1880_v47 }
0x1023   : > { %6286 = vpow2.f32 %v6013_v1  ;;  %v7597_v1 = vld [vmem:[%s9031_s5] sm:$0x3] }
0x1027   : > { %v1889_v44 = vpop.permute.xlu2 %1888 }
0x1028   : > { %v6285_v39 = vpop.eup %6284  ;;  %v1891_v55 = vmul.f32 %v1889_v44, %v1869_v3  ;;  %v1984_v3 = vrot.slane %v7597_v1, 4 }
0x1029   : > { %1884 = vrot.lane.b32.xlu0 %v6285_v39, %s6754_s18  ;;  %v6287_v46 = vpop.eup %6286 }
0x102a   : > { %v1897_v18 = vadd.f32 1.0, %v6287_v46  ;;  %v1986_v46 = vmul.f32 %v1984_v3, %v7141_v27 }
0x102c   : > { %6288 = vrcp.f32 %v1897_v18  ;;  %v1909_v11 = vand.u32 2147483648, %v1897_v18  ;;  %vm1903_vm0 = vweird.f32 %v1897_v18  ;;  %v1907_v16 = vand.u32 2147483647, %v1897_v18 }
0x102e   : > { %v1910_v25 = vor.u32 1.1754944e-38, %v1909_v11  ;;  %vm1908_vm5 = vcmp.eq.f32.partialorder %v1907_v16, 8.507059e+37 }
0x1032   : > { %v6289_v15 = vpop.eup %6288 }
0x1033   : > { %v1899_v7 = vmul.f32 %v6289_v15, %v1897_v18  ;;  %vm1904_vm4 = vweird.f32 %v6289_v15 }
0x1034   : > { %vm1905_vm3 = vmor %vm1903_vm0, %vm1904_vm4  ;;  %vm9070_vm4 = vcmask 258052   ;;  %vm9069_vm0 = vcmp.eq.s32.totalorder %v7247_v31, 3 }
0x1035   : > { %v1900_v17 = vsub.f32 1.0, %v1899_v7  ;;  %v1988_v18 = vsel %vm9070_vm4, %v1986_v46, 0.0 }
0x1037   : > { %v1901_v9 = vmul.f32 %v6289_v15, %v1900_v17 }
0x1039   : > { %v1902_v19 = vadd.f32 %v6289_v15, %v1901_v9 }
0x103b   : > { %v1906_v12 = vsel %vm1905_vm3, %v6289_v15, %v1902_v19  ;;  %vm9068_vm3 = vcmp.lt.s32.totalorder %v7247_v31, 4 }
0x103c   : > { %v1911_v63 = vsel %vm1908_vm5, %v1910_v25, %v1906_v12  ;;  %vm9067_vm5 = vcmask 61444  }
0x103d   : > { %v1924_v26 = vsub.f32 1.0, %v1911_v63  ;;  %v1931_v36 = vmul.f32 %v1911_v63, %v7395_v5 }
0x105e   : > { %v1927_v35 = vpop.permute.xlu1 %1926 }
0x105f   : > { %v1929_v33 = vmul.f32 %v1927_v35, %v1924_v26 }
0x1061   : > { %v1932_v28 = vadd.f32 %v1931_v36, %v1929_v33 }
0x1063   : > { %1934 = vrot.lane.b32.xlu1 %v1932_v28, %s6753_s6 }
0x109b   : > { %v1885_v4 = vpop.permute.xlu0 %1884 }
0x109c   : > { %v1887_v32 = vmul.f32 %v1885_v4, %v1882_v8 }
0x109e   : > { %v1892_v45 = vadd.f32 %v1891_v55, %v1887_v32 }
0x10d5   : > { %v1935_v61 = vpop.permute.xlu1 %1934 }
0x10d6   : > { %v1937_v47 = vadd.f32 %v1935_v61, %v1892_v45 }
0x10d8   : > { %v1941_v39 = vperm.slane %v1937_v47, 0  ;;  %1944 = vrot.lane.b32.xlu0 %v1937_v47, %s6754_s18  ;;  %v1970_v22 = vmul.f32 %v1937_v47, %v7192_v52 }
0x10da   : > { %1972 = vrot.lane.b32.xlu2 %v1970_v22, %s6754_s18  ;;  %v7592_v5 = vsel %vm9071_vm7, %v1941_v39, %v7422_v49 }
0x1102   : > { %1989 = vadd.xlane.f32.xlu0 %v1988_v18 }
0x1134   : > { %v1973_v15 = vpop.permute.xlu2 %1972 }
0x1135   : > { %v1975_v7 = vsel %vm1030_vm11, %v1973_v15, 0.0 }
0x1136   : > { %1976 = vadd.xlane.f32.xlu1 %v1975_v7 }
0x114a   : > { %v1945_v17 = vpop.permute.xlu0 %1944 }
0x114b   : > { %6014 = vmatmul.msk.f32.vlgmr.msra.gmra.mxu3 %vm813_vm1, %v1945_v17 }
0x1153   : > { %6018 = vmatmul.msk.f32.vlgmr.msrb.gmra.mxu3 %vm813_vm1, %v7545_v0 }
0x1175   : > { %v1990_v11 = vpop.xlane.xlu0 %1989 }
0x11a9   : > { %v1977_v49 = vpop.xlane.xlu1 %1976 }
0x11aa   : > { %v7610_v9 = vsel %vm9069_vm0, %v1977_v49, %v7435_v10 }
0x11ab   : > { %v1992_v19 = vrot.slane %v7610_v9, 4 }
0x11ad   : > { %v1994_v16 = vadd.f32 %v1992_v19, %v1990_v11  ;;  %v7643_v11 = vld [vmem:[%s7014_s22] sm:$0xff] }
0x11af   : > { %v1995_v12 = vadd.f32 %v1994_v16, %v7260_v41 }
0x11b1   : > { %v1996_v25 = vsub.f32 %v1995_v12, %v7262_v43 }
0x11b3   : > { %v1998_v63 = vsel %vm9068_vm3, %v1996_v25, -1e+38 }
0x11b4   : > { %v2000_v26 = vsel %vm9067_vm5, %v1998_v63, -inf }
0x11b5   : > { %2001 = vmax.xlane.f32.xlu2 %v2000_v26 }
0x11ce   : > { %v1965_v35 = vpop.f32.mrf.mxu3 }
0x11cf   : > { %v1968_v10 = vperm.slane %v1965_v35, 0 }
0x11d1   : > { %v7622_v36 = vsel %vm9071_vm7, %v1968_v10, %v7447_v50  ;;  %vm9076_vm7 = vcmp.eq.s32.totalorder %v7235_v24, 4 }
0x11d2   : > { %2029 = vrot.lane.b32.xlu0 %v7622_v36, %s6754_s18  ;;  %2073 = vmatpush.msrb.mxu1 %v7622_v36 }
0x11d4   : > { %2156 = vmatpush.msra.mxu1 %v7455_v62 }
0x11d6   : > { %2157 = vmatpush.msra.mxu1 %v7461_v40  ;;  %v2118_v33 = vpop.f32.mrf.mxu3 }
0x11d7   : > { %v7630_v28 = vadd.f32 %v2118_v33, %v7160_v30 }
0x11d8   : > { %2158 = vmatpush.msra.mxu1 %v7470_v20 }
0x11d9   : > { %2227 = vrot.lane.b32.xlu2 %v7630_v28, %s6752_s28 }
0x11da   : > { %2159 = vmatpush.msra.mxu1 %v7478_v14 }
0x1228   : > { %v2002_v50 = vpop.xlane.xlu2 %2001 }
0x1229   : > { %v2003_v4 = vsub.f32 %v1998_v63, %v2002_v50  ;;  %v7662_v50 = vld [vmem:[#allocation7 + $0x10] sm:$0xff] }
0x122b   : > { %v2004_v8 = vmul.f32 1.442695, %v2003_v4  ;;  %v7665_v4 = vld [vmem:[#allocation7 + $0x8] sm:$0xff] }
0x122d   : > { %6290 = vpow2.f32 %v2004_v8  ;;  %v7669_v8 = vrot.slane %v7141_v27, 5 }
0x1233   : > { %v6291_v44 = vpop.eup %6290 }
0x1234   : > { %v2006_v32 = vsel %vm9067_vm5, %v6291_v44, 0.0 }
0x1235   : > { %2007 = vadd.xlane.f32.xlu1 %v2006_v32  ;;  %v2098_v32 = vpop.f32.mrf.mxu2 }
0x1244   : > { %v2030_v55 = vpop.permute.xlu0 %2029 }
0x1245   : > { %2049 = vmatpush.msra.mxu0 %v2030_v55 }
0x1247   : > { %2136 = vmatpush.msrb.mxu0 %v7484_v21 }
0x1249   : > { %2137 = vmatpush.msrb.mxu0 %v7490_v23 }
0x124b   : > { %2138 = vmatpush.msrb.mxu0 %v7496_v2 }
0x124d   : > { %2139 = vmatpush.msrb.mxu0 %v7502_v6 }
0x12a8   : > { %v2008_v45 = vpop.xlane.xlu1 %2007 }
0x12a9   : > { %6292 = vrcp.f32 %v2008_v45  ;;  %v2020_v22 = vand.u32 2147483648, %v2008_v45  ;;  %v2018_v46 = vand.u32 2147483647, %v2008_v45  ;;  %vm2014_vm3 = vweird.f32 %v2008_v45 }
0x12ab   : > { %v2021_v15 = vor.u32 1.1754944e-38, %v2020_v22  ;;  %vm2019_vm4 = vcmp.eq.f32.partialorder %v2018_v46, 8.507059e+37 }
0x12af   : > { %v6293_v61 = vpop.eup %6292 }
0x12b0   : > { %v2010_v47 = vmul.f32 %v6293_v61, %v2008_v45  ;;  %vm2015_vm5 = vweird.f32 %v6293_v61  ;;  %v2099_v45 = vadd.f32 %v2098_v32, %v7171_v37 }
0x12b1   : > { %vm2016_vm0 = vmor %vm2014_vm3, %vm2015_vm5 }
0x12b2   : > { %v2011_v39 = vsub.f32 1.0, %v2010_v47 }
0x12b4   : > { %v2012_v3 = vmul.f32 %v6293_v61, %v2011_v39 }
0x12b6   : > { %v2013_v18 = vadd.f32 %v6293_v61, %v2012_v3 }
0x12b8   : > { %v2017_v7 = vsel %vm2016_vm0, %v6293_v61, %v2013_v18 }
0x12b9   : > { %v2022_v17 = vsel %vm2019_vm4, %v2021_v15, %v2017_v7 }
0x12ba   : > { %v2023_v49 = vmul.f32 %v6291_v44, %v2022_v17  ;;  %v7671_v44 = vld [vmem:[#allocation7] sm:$0xff] }
0x12bc   : > { %v2294_v19 = vperm.slane %v2023_v49, 4  ;;  %v2024_v16 = vmul.f32 %v7643_v11, %v2023_v49 }
0x12be   : > { %v2055_v12 = vrot.slane %v2024_v16, 4  ;;  %v2025_v25 = vsub.f32 %v2023_v49, %v2024_v16  ;;  %v7649_v63 = vsel %vm9076_vm7, %v2294_v19, %v7511_v53  ;;  %v7659_v53 = vld [vmem:[#allocation7 + $0x18] sm:$0xff] }
0x12c0   : > { %6016 = vmatmul.msk.f32.vlgmr.msrb.gmra.mxu1 %vm1092_vm6, %v2055_v12  ;;  %v2027_v26 = vrot.slane %v2025_v25, 4  ;;  %v2228_v25 = vpop.permute.xlu2 %2227 }
0x12c1   : > { %2406 = vmatpush.msrb.mxu1 %v7517_v42 }
0x12c2   : > { %6015 = vmatmul.msk.f32.vlgmr.msra.gmra.mxu0 %vm1092_vm6, %v2027_v26 }
0x12c3   : > { %2407 = vmatpush.msrb.mxu1 %v7524_v38 }
0x12c5   : > { %2408 = vmatpush.msrb.mxu1 %v7530_v51 }
0x12c7   : > { %2409 = vmatpush.msrb.mxu1 %v7536_v48 }
0x133d   : > { %v2075_v35 = vpop.f32.mrf.mxu1 }
0x133f   : > { %v2051_v10 = vpop.f32.mrf.mxu0 }
0x1340   : > { %v2076_v33 = vadd.f32 %v2075_v35, %v2051_v10 }
0x1342   : > { %6019 = vmatmul.msk.f32.vlgmr.msrb.gmra.mxu0 %vm813_vm1, %v2076_v33  ;;  %6020 = vmatmul.msk.f32.vlgmr.msra.gmra.mxu1 %vm813_vm1, %v2076_v33 }
0x1343   : > { %2586 = vmatpush.msra.mxu1 %v7659_v53 }
0x1345   : > { %2587 = vmatpush.msra.mxu1 %v7662_v50 }
0x1347   : > { %2588 = vmatpush.msra.mxu1 %v7665_v4 }
0x1349   : > { %2589 = vmatpush.msra.mxu1 %v7671_v44 }
0x134a   : > { %6026 = vmatmul.msk.f32.vlgmr.msrb.gmra.mxu1 %vm813_vm1, %v7669_v8 }
0x134b   : > { %2739 = vmatpush.msrb.mxu1 %v7553_v29 }
0x134d   : > { %2740 = vmatpush.msrb.mxu1 %v7559_v56 }
0x134f   : > { %2741 = vmatpush.msrb.mxu1 %v7565_v57 }
0x1351   : > { %2742 = vmatpush.msrb.mxu1 %v7571_v54 }
0x13bf   : > { %v2141_v55 = vpop.f32.mrf.mxu0 }
0x13c0   : > { %v2142_v61 = vadd.f32 %v2141_v55, %v7167_v34  ;;  %v2161_v55 = vpop.f32.mrf.mxu1 }
0x13c2   : > { %v2164_v47 = vadd.f32 %v2142_v61, %v2099_v45  ;;  %2185 = vrot.lane.b32.xlu1 %v2142_v61, %s6752_s28  ;;  %v2162_v61 = vadd.f32 %v2161_v55, %v7185_v60 }
0x13c4   : > { %v6021_v39 = vmul.f32 -1.442695, %v2164_v47 }
0x13c6   : > { %6294 = vpow2.f32 %v6021_v39 }
0x13cc   : > { %v6295_v22 = vpop.eup %6294 }
0x13cd   : > { %v2168_v3 = vadd.f32 1.0, %v6295_v22 }
0x13cf   : > { %6296 = vrcp.f32 %v2168_v3  ;;  %v2180_v7 = vand.u32 2147483648, %v2168_v3  ;;  %v2178_v49 = vand.u32 2147483647, %v2168_v3  ;;  %vm2174_vm0 = vweird.f32 %v2168_v3 }
0x13d1   : > { %v2181_v16 = vor.u32 1.1754944e-38, %v2180_v7  ;;  %vm2179_vm5 = vcmp.eq.f32.partialorder %v2178_v49, 8.507059e+37 }
0x13d5   : > { %v6297_v46 = vpop.eup %6296 }
0x13d6   : > { %v2170_v18 = vmul.f32 %v6297_v46, %v2168_v3  ;;  %vm2175_vm4 = vweird.f32 %v6297_v46 }
0x13d7   : > { %vm2176_vm3 = vmor %vm2174_vm0, %vm2175_vm4 }
0x13d8   : > { %v2171_v15 = vsub.f32 1.0, %v2170_v18 }
0x13da   : > { %v2172_v17 = vmul.f32 %v6297_v46, %v2171_v15  ;;  %v2206_v15 = vadd.f32 %v2162_v61, %v7630_v28 }
0x13dc   : > { %v2173_v19 = vadd.f32 %v6297_v46, %v2172_v17  ;;  %v6022_v7 = vmul.f32 -1.442695, %v2206_v15 }
0x13de   : > { %v2177_v12 = vsel %vm2176_vm3, %v6297_v46, %v2173_v19 }
0x13df   : > { %v2182_v26 = vsel %vm2179_vm5, %v2181_v16, %v2177_v12 }
0x13e0   : > { %v2230_v35 = vmul.f32 %v2228_v25, %v2182_v26 }
0x13e2   : > { %2232 = vrot.lane.b32.xlu0 %v2230_v35, %s6752_s28 }
0x1434   : > { %v2186_v10 = vpop.permute.xlu1 %2185 }
0x1435   : > { %v2188_v32 = vmul.f32 %v2186_v10, %v2182_v26 }
0x1437   : > { %2190 = vrot.lane.b32.xlu2 %v2188_v32, %s6752_s28 }
0x143f   : > { %2201 = vrot.lane.b32.xlu2 %v2076_v33, %s6753_s6 }
0x1454   : > { %v2233_v47 = vpop.permute.xlu0 %2232 }
0x1455   : > { %v2235_v39 = vadd.f32 %v2233_v47, %v2162_v61 }
0x1457   : > { %6298 = vtanh.f32 %v2235_v39 }
0x145d   : > { %v6299_v22 = vpop.eup %6298 }
0x145e   : > { %2239 = vrot.lane.b32.xlu0 %v6299_v22, %s6754_s18 }
0x1491   : > { %v2191_v3 = vpop.permute.xlu2 %2190 }
0x1492   : > { %v2193_v46 = vadd.f32 %v2191_v3, %v2099_v45 }
0x1494   : > { %6300 = vtanh.f32 %v2193_v46  ;;  %v2195_v46 = vsub.f32 1.0, %v2182_v26 }
0x1495   : > { %6302 = vpow2.f32 %v6022_v7 }
0x149a   : > { %v6301_v18 = vpop.eup %6300 }
0x149b   : > { %2197 = vrot.lane.b32.xlu1 %v6301_v18, %s6754_s18  ;;  %v6303_v33 = vpop.eup %6302  ;;  %v2202_v18 = vpop.permute.xlu2 %2201 }
0x149c   : > { %v2210_v17 = vadd.f32 1.0, %v6303_v33  ;;  %v2204_v7 = vmul.f32 %v2202_v18, %v2182_v26 }
0x149e   : > { %6304 = vrcp.f32 %v2210_v17  ;;  %v2222_v35 = vand.u32 2147483648, %v2210_v17  ;;  %vm2216_vm0 = vweird.f32 %v2210_v17  ;;  %v2220_v45 = vand.u32 2147483647, %v2210_v17 }
0x14a0   : > { %v2223_v32 = vor.u32 1.1754944e-38, %v2222_v35  ;;  %vm2221_vm5 = vcmp.eq.f32.partialorder %v2220_v45, 8.507059e+37 }
0x14a4   : > { %v6305_v49 = vpop.eup %6304 }
0x14a5   : > { %v2212_v19 = vmul.f32 %v6305_v49, %v2210_v17  ;;  %vm2217_vm4 = vweird.f32 %v6305_v49 }
0x14a6   : > { %vm2218_vm3 = vmor %vm2216_vm0, %vm2217_vm4  ;;  %vm9074_vm4 = vcmask 259077   ;;  %vm9073_vm0 = vcmp.eq.s32.totalorder %v7247_v31, 4 }
0x14a7   : > { %v2213_v16 = vsub.f32 1.0, %v2212_v19 }
0x14a9   : > { %v2214_v12 = vmul.f32 %v6305_v49, %v2213_v16 }
0x14ab   : > { %v2215_v25 = vadd.f32 %v6305_v49, %v2214_v12  ;;  %v2297_v12 = vrot.slane %v7597_v1, 3 }
0x14ad   : > { %v2219_v10 = vsel %vm2218_vm3, %v6305_v49, %v2215_v25  ;;  %v2299_v25 = vmul.f32 %v2297_v12, %v7141_v27  ;;  %vm9072_vm3 = vcmp.lt.s32.totalorder %v7247_v31, 5 }
0x14ae   : > { %v2224_v28 = vsel %vm2221_vm5, %v2223_v32, %v2219_v10  ;;  %vm9075_vm5 = vcmask 62469  }
0x14af   : > { %v2237_v55 = vsub.f32 1.0, %v2224_v28  ;;  %v2244_v47 = vmul.f32 %v2224_v28, %v7545_v0  ;;  %v2301_v26 = vsel %vm9074_vm4, %v2299_v25, 0.0 }
0x14d0   : > { %v2240_v61 = vpop.permute.xlu0 %2239 }
0x14d1   : > { %v2242_v39 = vmul.f32 %v2240_v61, %v2237_v55 }
0x14d3   : > { %v2245_v22 = vadd.f32 %v2244_v47, %v2242_v39 }
0x14d5   : > { %2247 = vrot.lane.b32.xlu0 %v2245_v22, %s6753_s6 }
0x150d   : > { %v2198_v3 = vpop.permute.xlu1 %2197 }
0x150e   : > { %v2200_v15 = vmul.f32 %v2198_v3, %v2195_v46 }
0x1510   : > { %v2205_v33 = vadd.f32 %v2204_v7, %v2200_v15 }
0x1547   : > { %v2248_v17 = vpop.permute.xlu0 %2247 }
0x1548   : > { %v2250_v19 = vadd.f32 %v2248_v17, %v2205_v33 }
0x154a   : > { %v2254_v49 = vperm.slane %v2250_v19, 0  ;;  %2257 = vrot.lane.b32.xlu1 %v2250_v19, %s6754_s18  ;;  %v2283_v16 = vmul.f32 %v2250_v19, %v7192_v52 }
0x154c   : > { %2285 = vrot.lane.b32.xlu2 %v2283_v16, %s6754_s18  ;;  %v7698_v0 = vsel %vm9076_vm7, %v2254_v49, %v7592_v5 }
0x1574   : > { %2302 = vadd.xlane.f32.xlu1 %v2301_v26 }
0x15a6   : > { %v2286_v35 = vpop.permute.xlu2 %2285 }
0x15a7   : > { %v2288_v45 = vsel %vm1030_vm11, %v2286_v35, 0.0 }
0x15a8   : > { %2289 = vadd.xlane.f32.xlu0 %v2288_v45 }
0x15bc   : > { %v2258_v10 = vpop.permute.xlu1 %2257 }
0x15bd   : > { %6023 = vmatmul.msk.f32.vlgmr.msra.gmra.mxu2 %vm813_vm1, %v2258_v10 }
0x15c5   : > { %6027 = vmatmul.msk.f32.vlgmr.msrb.gmra.mxu2 %vm813_vm1, %v7669_v8 }
0x15e7   : > { %v2303_v55 = vpop.xlane.xlu1 %2302 }
0x161b   : > { %v2290_v5 = vpop.xlane.xlu0 %2289 }
0x161c   : > { %v7711_v32 = vsel %vm9073_vm0, %v2290_v5, %v7610_v9 }
0x161d   : > { %v2305_v28 = vrot.slane %v7711_v32, 3 }
0x161f   : > { %v2307_v61 = vadd.f32 %v2305_v28, %v2303_v55 }
0x1621   : > { %v2308_v47 = vadd.f32 %v2307_v61, %v7260_v41 }
0x1623   : > { %v2309_v39 = vsub.f32 %v2308_v47, %v7262_v43 }
0x1625   : > { %v2311_v22 = vsel %vm9072_vm3, %v2309_v39, -1e+38 }
0x1626   : > { %v2313_v3 = vsel %vm9075_vm5, %v2311_v22, -inf }
0x1627   : > { %2314 = vmax.xlane.f32.xlu2 %v2313_v3 }
0x1640   : > { %v2278_v46 = vpop.f32.mrf.mxu2 }
0x1641   : > { %v2281_v9 = vperm.slane %v2278_v46, 0 }
0x1643   : > { %v7723_v18 = vsel %vm9076_vm7, %v2281_v9, %v7622_v36  ;;  %vm9080_vm7 = vcmp.eq.s32.totalorder %v7235_v24, 5 }
0x1644   : > { %2386 = vmatpush.msra.mxu0 %v7723_v18  ;;  %2342 = vrot.lane.b32.xlu2 %v7723_v18, %s6754_s18 }
0x1646   : > { %2469 = vmatpush.msrb.mxu0 %v7455_v62 }
0x1648   : > { %2470 = vmatpush.msrb.mxu0 %v7461_v40  ;;  %v2431_v15 = vpop.f32.mrf.mxu2 }
0x1649   : > { %v7731_v7 = vadd.f32 %v2431_v15, %v7160_v30 }
0x164a   : > { %2471 = vmatpush.msrb.mxu0 %v7470_v20 }
0x164b   : > { %2540 = vrot.lane.b32.xlu1 %v7731_v7, %s6752_s28 }
0x164c   : > { %2472 = vmatpush.msrb.mxu0 %v7478_v14 }
0x169a   : > { %v2315_v36 = vpop.xlane.xlu2 %2314 }
0x169b   : > { %v2316_v33 = vsub.f32 %v2311_v22, %v2315_v36 }
0x169d   : > { %v2317_v17 = vmul.f32 1.442695, %v2316_v33 }
0x169f   : > { %6306 = vpow2.f32 %v2317_v17 }
0x16a2   : > { %v2343_v19 = vpop.permute.xlu2 %2342 }
0x16a3   : > { %2362 = vmatpush.msra.mxu3 %v2343_v19 }
0x16a5   : > { %2449 = vmatpush.msrb.mxu3 %v7484_v21  ;;  %v6307_v62 = vpop.eup %6306 }
0x16a6   : > { %v2319_v40 = vsel %vm9075_vm5, %v6307_v62, 0.0 }
0x16a7   : > { %2450 = vmatpush.msrb.mxu3 %v7490_v23  ;;  %2320 = vadd.xlane.f32.xlu0 %v2319_v40 }
0x16a9   : > { %2451 = vmatpush.msrb.mxu3 %v7496_v2 }
0x16ab   : > { %2452 = vmatpush.msrb.mxu3 %v7502_v6 }
0x16bd   : > { %v2541_v33 = vpop.permute.xlu1 %2540 }
0x171a   : > { %v2321_v20 = vpop.xlane.xlu0 %2320 }
0x171b   : > { %6308 = vrcp.f32 %v2321_v20  ;;  %v2333_v12 = vand.u32 2147483648, %v2321_v20  ;;  %v2331_v26 = vand.u32 2147483647, %v2321_v20  ;;  %vm2327_vm0 = vweird.f32 %v2321_v20 }
0x171d   : > { %v2334_v35 = vor.u32 1.1754944e-38, %v2333_v12  ;;  %vm2332_vm5 = vcmp.eq.f32.partialorder %v2331_v26, 8.507059e+37 }
0x1721   : > { %v6309_v14 = vpop.eup %6308 }
0x1722   : > { %v2323_v49 = vmul.f32 %v6309_v14, %v2321_v20  ;;  %vm2328_vm3 = vweird.f32 %v6309_v14 }
0x1723   : > { %vm2329_vm4 = vmor %vm2327_vm0, %vm2328_vm3 }
0x1724   : > { %v2324_v16 = vsub.f32 1.0, %v2323_v49 }
0x1726   : > { %v2325_v25 = vmul.f32 %v6309_v14, %v2324_v16 }
0x1728   : > { %v2326_v21 = vadd.f32 %v6309_v14, %v2325_v25 }
0x172a   : > { %v2330_v45 = vsel %vm2329_vm4, %v6309_v14, %v2326_v21 }
0x172b   : > { %v2335_v23 = vsel %vm2332_vm5, %v2334_v35, %v2330_v45 }
0x172c   : > { %v2336_v10 = vmul.f32 %v6307_v62, %v2335_v23 }
0x172e   : > { %v2337_v2 = vmul.f32 %v7643_v11, %v2336_v10  ;;  %v2607_v6 = vperm.slane %v2336_v10, 5 }
0x1730   : > { %v2368_v5 = vrot.slane %v2337_v2, 5  ;;  %v2338_v28 = vsub.f32 %v2336_v10, %v2337_v2  ;;  %v7747_v55 = vsel %vm9080_vm7, %v2607_v6, %v7649_v63 }
0x1732   : > { %6025 = vmatmul.msk.f32.vlgmr.msra.gmra.mxu0 %vm1092_vm6, %v2368_v5  ;;  %v2340_v61 = vrot.slane %v2338_v28, 5 }
0x1733   : > { %2719 = vmatpush.msra.mxu0 %v7517_v42  ;;  %v7761_v42 = vrot.slane %v7141_v27, 6 }
0x1734   : > { %6024 = vmatmul.msk.f32.vlgmr.msra.gmra.mxu3 %vm1092_vm6, %v2340_v61 }
0x1735   : > { %2720 = vmatpush.msra.mxu0 %v7524_v38  ;;  %v2411_v38 = vpop.f32.mrf.mxu1 }
0x1737   : > { %2721 = vmatpush.msra.mxu0 %v7530_v51 }
0x1739   : > { %2722 = vmatpush.msra.mxu0 %v7536_v48  ;;  %v2412_v48 = vadd.f32 %v2411_v38, %v7171_v37 }
0x17af   : > { %v2388_v47 = vpop.f32.mrf.mxu0 }
0x17b7   : > { %v2364_v39 = vpop.f32.mrf.mxu3 }
0x17b8   : > { %v2389_v22 = vadd.f32 %v2388_v47, %v2364_v39 }
0x17ba   : > { %6028 = vmatmul.msk.f32.vlgmr.msrb.gmra.mxu3 %vm813_vm1, %v2389_v22  ;;  %6029 = vmatmul.msk.f32.vlgmr.msrb.gmra.mxu0 %vm813_vm1, %v2389_v22 }
0x17bb   : > { %2899 = vmatpush.msrb.mxu0 %v7659_v53 }
0x17bd   : > { %2900 = vmatpush.msrb.mxu0 %v7662_v50 }
0x17bf   : > { %2901 = vmatpush.msrb.mxu0 %v7665_v4 }
0x17c1   : > { %2902 = vmatpush.msrb.mxu0 %v7671_v44 }
0x17c2   : > { %6035 = vmatmul.msk.f32.vlgmr.msra.gmra.mxu0 %vm813_vm1, %v7761_v42 }
0x17c3   : > { %3051 = vmatpush.msra.mxu0 %v7553_v29 }
0x17c5   : > { %3052 = vmatpush.msra.mxu0 %v7559_v56 }
0x17c7   : > { %3053 = vmatpush.msra.mxu0 %v7565_v57 }
0x17c9   : > { %3054 = vmatpush.msra.mxu0 %v7571_v54 }
0x1837   : > { %v2474_v20 = vpop.f32.mrf.mxu0 }
0x1838   : > { %v2475_v14 = vadd.f32 %v2474_v20, %v7185_v60 }
0x183a   : > { %v2519_v25 = vadd.f32 %v2475_v14, %v7731_v7 }
0x183c   : > { %v6031_v26 = vmul.f32 -1.442695, %v2519_v25 }
0x183d   : > { %v2454_v51 = vpop.f32.mrf.mxu3 }
0x183e   : > { %v2455_v63 = vadd.f32 %v2454_v51, %v7167_v34 }
0x1840   : > { %v2477_v53 = vadd.f32 %v2455_v63, %v2412_v48  ;;  %2498 = vrot.lane.b32.xlu0 %v2455_v63, %s6752_s28 }
0x1842   : > { %v6030_v50 = vmul.f32 -1.442695, %v2477_v53 }
0x1844   : > { %6310 = vpow2.f32 %v6030_v50 }
0x184a   : > { %v6311_v4 = vpop.eup %6310 }
0x184b   : > { %v2481_v44 = vadd.f32 1.0, %v6311_v4 }
0x184d   : > { %6312 = vrcp.f32 %v2481_v44  ;;  %v2493_v57 = vand.u32 2147483648, %v2481_v44  ;;  %v2491_v54 = vand.u32 2147483647, %v2481_v44  ;;  %vm2487_vm0 = vweird.f32 %v2481_v44 }
0x184f   : > { %v2494_v15 = vor.u32 1.1754944e-38, %v2493_v57  ;;  %vm2492_vm5 = vcmp.eq.f32.partialorder %v2491_v54, 8.507059e+37 }
0x1853   : > { %v6313_v29 = vpop.eup %6312 }
0x1854   : > { %v2483_v56 = vmul.f32 %v6313_v29, %v2481_v44  ;;  %vm2488_vm4 = vweird.f32 %v6313_v29 }
0x1855   : > { %vm2489_vm3 = vmor %vm2487_vm0, %vm2488_vm4 }
0x1856   : > { %v2484_v3 = vsub.f32 1.0, %v2483_v56 }
0x1858   : > { %v2485_v46 = vmul.f32 %v6313_v29, %v2484_v3 }
0x185a   : > { %v2486_v9 = vadd.f32 %v6313_v29, %v2485_v46 }
0x185c   : > { %v2490_v36 = vsel %vm2489_vm3, %v6313_v29, %v2486_v9 }
0x185d   : > { %v2495_v17 = vsel %vm2492_vm5, %v2494_v15, %v2490_v36  ;;  %v2610_v36 = vrot.slane %v7597_v1, 2 }
0x185e   : > { %v2543_v19 = vmul.f32 %v2541_v33, %v2495_v17  ;;  %v2508_v44 = vsub.f32 1.0, %v2495_v17 }
0x185f   : > { %v2612_v33 = vmul.f32 %v2610_v36, %v7141_v27 }
0x1860   : > { %2545 = vrot.lane.b32.xlu2 %v2543_v19, %s6752_s28 }
0x18b2   : > { %v2499_v62 = vpop.permute.xlu0 %2498 }
0x18b3   : > { %v2501_v40 = vmul.f32 %v2499_v62, %v2495_v17 }
0x18b5   : > { %2503 = vrot.lane.b32.xlu0 %v2501_v40, %s6752_s28 }
0x18ba   : > { %v2546_v49 = vpop.permute.xlu2 %2545 }
0x18bb   : > { %v2548_v16 = vadd.f32 %v2546_v49, %v2475_v14  ;;  %v7808_v14 = vld [vmem:[%s9035_s9 + $0x38] sm:$0xff]  ;;  %v7814_v49 = vld [vmem:[%s9035_s9 + $0x28] sm:$0xff] }
0x18bd   : > { %6314 = vtanh.f32 %v2548_v16  ;;  %2514 = vrot.lane.b32.xlu0 %v2389_v22, %s6753_s6  ;;  %v7826_v16 = vld [vmem:[%s9035_s9 + $0x8] sm:$0xff] }
0x18be   : > { %6316 = vpow2.f32 %v6031_v26 }
0x18c3   : > { %v6315_v12 = vpop.eup %6314 }
0x18c4   : > { %2552 = vrot.lane.b32.xlu1 %v6315_v12, %s6754_s18  ;;  %v6317_v21 = vpop.eup %6316 }
0x18c5   : > { %v2523_v35 = vadd.f32 1.0, %v6317_v21 }
0x18c7   : > { %6318 = vrcp.f32 %v2523_v35  ;;  %v2535_v61 = vand.u32 2147483648, %v2523_v35  ;;  %vm2529_vm0 = vweird.f32 %v2523_v35  ;;  %v2533_v47 = vand.u32 2147483647, %v2523_v35 }
0x18c9   : > { %v2536_v22 = vor.u32 1.1754944e-38, %v2535_v61  ;;  %vm2534_vm5 = vcmp.eq.f32.partialorder %v2533_v47, 8.507059e+37  ;;  %v7856_v61 = vld [vmem:[%s9035_s9 + $0x20] sm:$0xff]  ;;  %v7862_v47 = vld [vmem:[%s9035_s9 + $0x10] sm:$0xff] }
0x18cd   : > { %v6319_v45 = vpop.eup %6318 }
0x18ce   : > { %v2525_v23 = vmul.f32 %v6319_v45, %v2523_v35  ;;  %vm2530_vm4 = vweird.f32 %v6319_v45 }
0x18cf   : > { %vm2531_vm3 = vmor %vm2529_vm0, %vm2530_vm4  ;;  %vm9079_vm4 = vcmask 260102   ;;  %vm9078_vm0 = vcmp.eq.s32.totalorder %v7247_v31, 5 }
0x18d0   : > { %v2526_v10 = vsub.f32 1.0, %v2525_v23 }
0x18d2   : > { %v2527_v6 = vmul.f32 %v6319_v45, %v2526_v10 }
0x18d4   : > { %v2528_v28 = vadd.f32 %v6319_v45, %v2527_v6 }
0x18d6   : > { %v2532_v39 = vsel %vm2531_vm3, %v6319_v45, %v2528_v28  ;;  %vm9077_vm3 = vcmp.lt.s32.totalorder %v7247_v31, 6  ;;  %v7850_v28 = vld [vmem:[%s9035_s9 + $0x30] sm:$0xff] }
0x18d7   : > { %v2537_v38 = vsel %vm2534_vm5, %v2536_v22, %v2532_v39  ;;  %vm9081_vm5 = vcmask 63494   ;;  %v7868_v39 = vld [vmem:[%s9035_s9] sm:$0xff] }
0x18d8   : > { %v2550_v51 = vsub.f32 1.0, %v2537_v38  ;;  %v2557_v53 = vmul.f32 %v2537_v38, %v7669_v8 }
0x1927   : > { %v2504_v2 = vpop.permute.xlu0 %2503 }
0x1928   : > { %v2506_v5 = vadd.f32 %v2504_v2, %v2412_v48 }
0x192a   : > { %6320 = vtanh.f32 %v2506_v5 }
0x192f   : > { %v2515_v29 = vpop.permute.xlu0 %2514 }
0x1930   : > { %v6321_v7 = vpop.eup %6320  ;;  %v2517_v3 = vmul.f32 %v2515_v29, %v2495_v17  ;;  %v2614_v17 = vsel %vm9079_vm4, %v2612_v33, 0.0 }
0x1931   : > { %2510 = vrot.lane.b32.xlu2 %v6321_v7, %s6754_s18 }
0x1936   : > { %v2553_v63 = vpop.permute.xlu1 %2552 }
0x1937   : > { %v2555_v50 = vmul.f32 %v2553_v63, %v2550_v51 }
0x1939   : > { %v2558_v48 = vadd.f32 %v2557_v53, %v2555_v50 }
0x193b   : > { %2560 = vrot.lane.b32.xlu1 %v2558_v48, %s6753_s6 }
0x198b   : > { %v2511_v4 = vpop.permute.xlu2 %2510 }
0x198c   : > { %v2513_v56 = vmul.f32 %v2511_v4, %v2508_v44 }
0x198e   : > { %v2518_v57 = vadd.f32 %v2517_v3, %v2513_v56 }
0x19ad   : > { %v2561_v46 = vpop.permute.xlu1 %2560 }
0x19ae   : > { %v2563_v54 = vadd.f32 %v2561_v46, %v2518_v57 }
0x19b0   : > { %v2567_v9 = vperm.slane %v2563_v54, 0  ;;  %2570 = vrot.lane.b32.xlu2 %v2563_v54, %s6754_s18  ;;  %v2596_v15 = vmul.f32 %v2563_v54, %v7192_v52 }
0x19b2   : > { %2598 = vrot.lane.b32.xlu0 %v2596_v15, %s6754_s18  ;;  %v7788_v8 = vsel %vm9080_vm7, %v2567_v9, %v7698_v0 }
0x19d9   : > { %2615 = vadd.xlane.f32.xlu2 %v2614_v17 }
0x1a0a   : > { %v2571_v19 = vpop.permute.xlu2 %2570 }
0x1a0b   : > { %6032 = vmatmul.msk.f32.vlgmr.msra.gmra.mxu1 %vm813_vm1, %v2571_v19 }
0x1a13   : > { %6036 = vmatmul.msk.f32.vlgmr.msrb.gmra.mxu1 %vm813_vm1, %v7761_v42 }
0x1a24   : > { %v2599_v62 = vpop.permute.xlu0 %2598 }
0x1a25   : > { %v2601_v40 = vsel %vm1030_vm11, %v2599_v62, 0.0 }
0x1a26   : > { %2602 = vadd.xlane.f32.xlu1 %v2601_v40  ;;  %v6508_v40 = vld [vmem:[%s9034_s8 + $0x30] sm:$0xff] }
0x1a4c   : > { %v2616_v21 = vpop.xlane.xlu2 %2615 }
0x1a88   : > { %v2591_v0 = vpop.f32.mrf.mxu1 }
0x1a89   : > { %v2594_v20 = vperm.slane %v2591_v0, 0  ;;  %v6511_v0 = vld [vmem:[%s9034_s8] sm:$0xff] }
0x1a8b   : > { %v7800_v1 = vsel %vm9080_vm7, %v2594_v20, %v7723_v18  ;;  %v7820_v18 = vld [vmem:[%s9035_s9 + $0x18] sm:$0xff] }
0x1a8c   : > { %2655 = vrot.lane.b32.xlu2 %v7800_v1, %s6754_s18  ;;  %2699 = vmatpush.msra.mxu3 %v7800_v1 }
0x1a8e   : > { %2782 = vmatpush.msrb.mxu3 %v7808_v14 }
0x1a90   : > { %2783 = vmatpush.msrb.mxu3 %v7814_v49  ;;  %v2744_v6 = vpop.f32.mrf.mxu1 }
0x1a92   : > { %2784 = vmatpush.msrb.mxu3 %v7820_v18 }
0x1a94   : > { %2785 = vmatpush.msrb.mxu3 %v7826_v16 }
0x1a99   : > { %v2603_v12 = vpop.xlane.xlu1 %2602 }
0x1a9a   : > { %v7833_v25 = vsel %vm9078_vm0, %v2603_v12, %v7711_v32  ;;  %v7843_v32 = vadd.f32 %v2744_v6, %v7160_v30 }
0x1a9b   : > { %v2618_v26 = vrot.slane %v7833_v25, 2 }
0x1a9d   : > { %v2620_v35 = vadd.f32 %v2618_v26, %v2616_v21  ;;  %v7896_v21 = vrot.slane %v7141_v27, 7 }
0x1a9f   : > { %v2621_v45 = vadd.f32 %v2620_v35, %v7260_v41  ;;  %v2724_v35 = vpop.f32.mrf.mxu0 }
0x1aa1   : > { %v2622_v23 = vsub.f32 %v2621_v45, %v7262_v43 }
0x1aa3   : > { %v2624_v10 = vsel %vm9077_vm3, %v2622_v23, -1e+38  ;;  %v2725_v23 = vadd.f32 %v2724_v35, %v7171_v37 }
0x1aa4   : > { %v2626_v2 = vsel %vm9081_vm5, %v2624_v10, -inf }
0x1aa5   : > { %2627 = vmax.xlane.f32.xlu0 %v2626_v2 }
0x1ab9   : > { %2853 = vrot.lane.b32.xlu0 %v7843_v32, %s6752_s28 }
0x1ae6   : > { %v2656_v5 = vpop.permute.xlu2 %2655 }
0x1ae7   : > { %2675 = vmatpush.msra.mxu2 %v2656_v5 }
0x1ae9   : > { %2762 = vmatpush.msrb.mxu2 %v7850_v28 }
0x1aeb   : > { %2763 = vmatpush.msrb.mxu2 %v7856_v61 }
0x1aed   : > { %2764 = vmatpush.msrb.mxu2 %v7862_v47 }
0x1aef   : > { %2765 = vmatpush.msrb.mxu2 %v7868_v39 }
0x1b18   : > { %v2628_v7 = vpop.xlane.xlu0 %2627 }
0x1b19   : > { %v2629_v22 = vsub.f32 %v2624_v10, %v2628_v7 }
0x1b1b   : > { %v2630_v38 = vmul.f32 1.442695, %v2629_v22 }
0x1b1d   : > { %6322 = vpow2.f32 %v2630_v38 }
0x1b23   : > { %v6323_v51 = vpop.eup %6322 }
0x1b24   : > { %v2632_v63 = vsel %vm9081_vm5, %v6323_v51, 0.0  ;;  %vm9086_vm5 = vcmp.eq.s32.totalorder %v7235_v24, 6 }
0x1b25   : > { %2633 = vadd.xlane.f32.xlu1 %v2632_v63 }
0x1b98   : > { %v2634_v53 = vpop.xlane.xlu1 %2633 }
0x1b99   : > { %6324 = vrcp.f32 %v2634_v53  ;;  %v2646_v44 = vand.u32 2147483648, %v2634_v53  ;;  %v2644_v56 = vand.u32 2147483647, %v2634_v53  ;;  %vm2640_vm0 = vweird.f32 %v2634_v53 }
0x1b9b   : > { %v2647_v57 = vor.u32 1.1754944e-38, %v2646_v44  ;;  %vm2645_vm7 = vcmp.eq.f32.partialorder %v2644_v56, 8.507059e+37 }
0x1b9f   : > { %v6325_v50 = vpop.eup %6324 }
0x1ba0   : > { %v2636_v48 = vmul.f32 %v6325_v50, %v2634_v53  ;;  %vm2641_vm3 = vweird.f32 %v6325_v50 }
0x1ba1   : > { %vm2642_vm4 = vmor %vm2640_vm0, %vm2641_vm3 }
0x1ba2   : > { %v2637_v4 = vsub.f32 1.0, %v2636_v48 }
0x1ba4   : > { %v2638_v29 = vmul.f32 %v6325_v50, %v2637_v4 }
0x1ba6   : > { %v2639_v3 = vadd.f32 %v6325_v50, %v2638_v29  ;;  %v2854_v29 = vpop.permute.xlu0 %2853 }
0x1ba8   : > { %v2643_v46 = vsel %vm2642_vm4, %v6325_v50, %v2639_v3 }
0x1ba9   : > { %v2648_v54 = vsel %vm2645_vm7, %v2647_v57, %v2643_v46 }
0x1baa   : > { %v2649_v9 = vmul.f32 %v6323_v51, %v2648_v54 }
0x1bac   : > { %v2650_v15 = vmul.f32 %v7643_v11, %v2649_v9  ;;  %v2920_v36 = vperm.slane %v2649_v9, 6  ;;  %v6509_v11 = vld [vmem:[%s9034_s8 + $0x20] sm:$0xff] }
0x1bae   : > { %v2681_v33 = vrot.slane %v2650_v15, 6  ;;  %v2651_v17 = vsub.f32 %v2649_v9, %v2650_v15  ;;  %v7877_v19 = vsel %vm9086_vm5, %v2920_v36, %v7747_v55  ;;  %v6510_v55 = vld [vmem:[%s9034_s8 + $0x10] sm:$0xff] }
0x1bb0   : > { %6034 = vmatmul.msk.f32.vlgmr.msra.gmra.mxu3 %vm1092_vm6, %v2681_v33  ;;  %v2653_v62 = vrot.slane %v2651_v17, 6 }
0x1bb1   : > { %3031 = vmatpush.msra.mxu3 %v6508_v40 }
0x1bb2   : > { %6033 = vmatmul.msk.f32.vlgmr.msra.gmra.mxu2 %vm1092_vm6, %v2653_v62 }
0x1bb3   : > { %3032 = vmatpush.msra.mxu3 %v6509_v11 }
0x1bb5   : > { %3033 = vmatpush.msra.mxu3 %v6510_v55 }
0x1bb7   : > { %3034 = vmatpush.msra.mxu3 %v6511_v0 }
0x1c33   : > { %v2701_v20 = vpop.f32.mrf.mxu3 }
0x1c35   : > { %v2677_v12 = vpop.f32.mrf.mxu2 }
0x1c36   : > { %v2702_v26 = vadd.f32 %v2701_v20, %v2677_v12 }
0x1c38   : > { %6037 = vmatmul.msk.f32.vlgmr.msrb.gmra.mxu2 %vm813_vm1, %v2702_v26  ;;  %6038 = vmatmul.msk.f32.vlgmr.msrb.gmra.mxu3 %vm813_vm1, %v2702_v26 }
0x1c40   : > { %6044 = vmatmul.msk.f32.vlgmr.msra.gmra.mxu3 %vm813_vm1, %v7896_v21 }
0x1cbb   : > { %v2767_v45 = vpop.f32.mrf.mxu2  ;;  %v2787_v54 = vpop.f32.mrf.mxu3 }
0x1cbc   : > { %v2768_v10 = vadd.f32 %v2767_v45, %v7167_v34  ;;  %v2788_v9 = vadd.f32 %v2787_v54, %v7185_v60 }
0x1cbe   : > { %v2790_v2 = vadd.f32 %v2768_v10, %v2725_v23  ;;  %2811 = vrot.lane.b32.xlu1 %v2768_v10, %s6752_s28  ;;  %v2832_v11 = vadd.f32 %v2788_v9, %v7843_v32 }
0x1cc0   : > { %v6039_v6 = vmul.f32 -1.442695, %v2790_v2  ;;  %v6040_v55 = vmul.f32 -1.442695, %v2832_v11 }
0x1cc2   : > { %6326 = vpow2.f32 %v6039_v6 }
0x1cc8   : > { %v6327_v5 = vpop.eup %6326 }
0x1cc9   : > { %v2794_v7 = vadd.f32 1.0, %v6327_v5 }
0x1ccb   : > { %6328 = vrcp.f32 %v2794_v7  ;;  %v2806_v63 = vand.u32 2147483648, %v2794_v7  ;;  %v2804_v50 = vand.u32 2147483647, %v2794_v7  ;;  %vm2800_vm4 = vweird.f32 %v2794_v7 }
0x1ccd   : > { %v2807_v4 = vor.u32 1.1754944e-38, %v2806_v63  ;;  %vm2805_vm3 = vcmp.eq.f32.partialorder %v2804_v50, 8.507059e+37 }
0x1cd1   : > { %v6329_v22 = vpop.eup %6328 }
0x1cd2   : > { %v2796_v38 = vmul.f32 %v6329_v22, %v2794_v7  ;;  %vm2801_vm7 = vweird.f32 %v6329_v22 }
0x1cd3   : > { %vm2802_vm0 = vmor %vm2800_vm4, %vm2801_vm7 }
0x1cd4   : > { %v2797_v51 = vsub.f32 1.0, %v2796_v38 }
0x1cd6   : > { %v2798_v53 = vmul.f32 %v6329_v22, %v2797_v51 }
0x1cd8   : > { %v2799_v48 = vadd.f32 %v6329_v22, %v2798_v53 }
0x1cda   : > { %v2803_v44 = vsel %vm2802_vm0, %v6329_v22, %v2799_v48 }
0x1cdb   : > { %v2808_v56 = vsel %vm2805_vm3, %v2807_v4, %v2803_v44 }
0x1cdc   : > { %v2856_v3 = vmul.f32 %v2854_v29, %v2808_v56  ;;  %v2821_v50 = vsub.f32 1.0, %v2808_v56 }
0x1cde   : > { %2858 = vrot.lane.b32.xlu0 %v2856_v3, %s6752_s28 }
0x1d30   : > { %v2812_v57 = vpop.permute.xlu1 %2811 }
0x1d31   : > { %v2814_v46 = vmul.f32 %v2812_v57, %v2808_v56 }
0x1d33   : > { %2816 = vrot.lane.b32.xlu2 %v2814_v46, %s6752_s28 }
0x1d3b   : > { %2827 = vrot.lane.b32.xlu2 %v2702_v26, %s6753_s6 }
0x1d50   : > { %v2859_v15 = vpop.permute.xlu0 %2858 }
0x1d51   : > { %v2861_v36 = vadd.f32 %v2859_v15, %v2788_v9  ;;  %v2924_v9 = vmul.f32 %v1021_v59, %v7141_v27 }
0x1d53   : > { %6330 = vtanh.f32 %v2861_v36 }
0x1d59   : > { %v6331_v33 = vpop.eup %6330 }
0x1d5a   : > { %2865 = vrot.lane.b32.xlu1 %v6331_v33, %s6754_s18 }
0x1d8d   : > { %v2817_v17 = vpop.permute.xlu2 %2816 }
0x1d8e   : > { %v2819_v62 = vadd.f32 %v2817_v17, %v2725_v23 }
0x1d90   : > { %6332 = vtanh.f32 %v2819_v62 }
0x1d91   : > { %6334 = vpow2.f32 %v6040_v55 }
0x1d95   : > { %v2828_v48 = vpop.permute.xlu2 %2827 }
0x1d96   : > { %v6333_v40 = vpop.eup %6332  ;;  %v2830_v44 = vmul.f32 %v2828_v48, %v2808_v56 }
0x1d97   : > { %2823 = vrot.lane.b32.xlu0 %v6333_v40, %s6754_s18  ;;  %v6335_v0 = vpop.eup %6334 }
0x1d98   : > { %v2836_v20 = vadd.f32 1.0, %v6335_v0 }
0x1d9a   : > { %6336 = vrcp.f32 %v2836_v20  ;;  %v2848_v2 = vand.u32 2147483648, %v2836_v20  ;;  %vm2842_vm4 = vweird.f32 %v2836_v20  ;;  %v2846_v23 = vand.u32 2147483647, %v2836_v20 }
0x1d9c   : > { %v2849_v5 = vor.u32 1.1754944e-38, %v2848_v2  ;;  %vm2847_vm3 = vcmp.eq.f32.partialorder %v2846_v23, 8.507059e+37 }
0x1da0   : > { %v6337_v12 = vpop.eup %6336 }
0x1da1   : > { %v2838_v26 = vmul.f32 %v6337_v12, %v2836_v20  ;;  %vm2843_vm7 = vweird.f32 %v6337_v12 }
0x1da2   : > { %vm2844_vm0 = vmor %vm2842_vm4, %vm2843_vm7  ;;  %vm9084_vm7 = vcmask 261127   ;;  %vm9083_vm4 = vcmp.eq.s32.totalorder %v7247_v31, 6 }
0x1da3   : > { %v2839_v35 = vsub.f32 1.0, %v2838_v26  ;;  %v2926_v56 = vsel %vm9084_vm7, %v2924_v9, 0.0 }
0x1da5   : > { %v2840_v45 = vmul.f32 %v6337_v12, %v2839_v35 }
0x1da7   : > { %v2841_v10 = vadd.f32 %v6337_v12, %v2840_v45 }
0x1da9   : > { %v2845_v6 = vsel %vm2844_vm0, %v6337_v12, %v2841_v10  ;;  %vm9082_vm0 = vcmp.lt.s32.totalorder %v7247_v31, 7 }
0x1daa   : > { %v2850_v32 = vsel %vm2847_vm3, %v2849_v5, %v2845_v6  ;;  %vm9085_vm3 = vcmask 64519  }
0x1dab   : > { %v2863_v7 = vsub.f32 1.0, %v2850_v32  ;;  %v2870_v38 = vmul.f32 %v2850_v32, %v7761_v42  ;;  %v7963_v32 = vld [vmem:[%s7014_s22] sm:$0xff] }
0x1dcc   : > { %v2866_v22 = vpop.permute.xlu1 %2865 }
0x1dcd   : > { %v2868_v51 = vmul.f32 %v2866_v22, %v2863_v7 }
0x1dcf   : > { %v2871_v63 = vadd.f32 %v2870_v38, %v2868_v51 }
0x1dd1   : > { %2873 = vrot.lane.b32.xlu1 %v2871_v63, %s6753_s6 }
0x1e09   : > { %v2824_v53 = vpop.permute.xlu0 %2823 }
0x1e0a   : > { %v2826_v4 = vmul.f32 %v2824_v53, %v2821_v50 }
0x1e0c   : > { %v2831_v29 = vadd.f32 %v2830_v44, %v2826_v4  ;;  %v3036_v44 = vpop.f32.mrf.mxu3 }
0x1e43   : > { %v2874_v3 = vpop.permute.xlu1 %2873 }
0x1e44   : > { %v2876_v57 = vadd.f32 %v2874_v3, %v2831_v29  ;;  %v3037_v3 = vadd.f32 %v3036_v44, %v7171_v37  ;;  %v8043_v44 = vld [vmem:[%s9034_s8 + $0x68] sm:$0xff] }
0x1e46   : > { %v2880_v46 = vperm.slane %v2876_v57, 0  ;;  %2883 = vrot.lane.b32.xlu2 %v2876_v57, %s6754_s18  ;;  %v2909_v54 = vmul.f32 %v2876_v57, %v7192_v52 }
0x1e48   : > { %2911 = vrot.lane.b32.xlu0 %v2909_v54, %s6754_s18  ;;  %v7918_v42 = vsel %vm9086_vm5, %v2880_v46, %v7788_v8 }
0x1e72   : > { %2927 = vadd.xlane.f32.xlu0 %v2926_v56 }
0x1ea0   : > { %v2884_v15 = vpop.permute.xlu2 %2883 }
0x1ea1   : > { %6041 = vmatmul.msk.f32.vlgmr.msrb.gmra.mxu0 %vm813_vm1, %v2884_v15 }
0x1ea9   : > { %6045 = vmatmul.msk.f32.vlgmr.msra.gmra.mxu0 %vm813_vm1, %v7896_v21 }
0x1eba   : > { %v2912_v52 = vpop.permute.xlu0 %2911 }
0x1ebb   : > { %v2914_v36 = vsel %vm1030_vm11, %v2912_v52, 0.0 }
0x1ebc   : > { %2915 = vadd.xlane.f32.xlu1 %v2914_v36 }
0x1f1e   : > { %v2904_v8 = vpop.f32.mrf.mxu0 }
0x1f1f   : > { %v2907_v33 = vperm.slane %v2904_v8, 0 }
0x1f21   : > { %v2908_v58 = vsel %vm9086_vm5, %v2907_v33, %v7800_v1  ;;  %v2928_v1 = vpop.xlane.xlu0 %2927  ;;  %vm3189_vm5 = vcmp.eq.s32.totalorder %v7235_v24, 7 }
0x1f22   : > { %3011 = vmatpush.msra.mxu2 %v2908_v58  ;;  %2967 = vrot.lane.b32.xlu0 %v2908_v58, %s6754_s18 }
0x1f24   : > { %3094 = vmatpush.msrb.mxu2 %v7808_v14 }
0x1f26   : > { %3095 = vmatpush.msrb.mxu2 %v7814_v49 }
0x1f28   : > { %3096 = vmatpush.msrb.mxu2 %v7820_v18 }
0x1f2a   : > { %3097 = vmatpush.msrb.mxu2 %v7826_v16  ;;  %v3056_v16 = vpop.f32.mrf.mxu0 }
0x1f2b   : > { %v7947_v55 = vadd.f32 %v3056_v16, %v7160_v30 }
0x1f2f   : > { %v2916_v59 = vpop.xlane.xlu1 %2915 }
0x1f30   : > { %v2918_v17 = vsel %vm9083_vm4, %v2916_v59, %v7833_v25 }
0x1f31   : > { %v2930_v62 = vrot.slane %v2918_v17, 1 }
0x1f33   : > { %v2932_v40 = vadd.f32 %v2930_v62, %v2928_v1 }
0x1f35   : > { %v2933_v11 = vadd.f32 %v2932_v40, %v7260_v41 }
0x1f37   : > { %v2934_v14 = vsub.f32 %v2933_v11, %v7262_v43 }
0x1f39   : > { %v2936_v49 = vsel %vm9082_vm0, %v2934_v14, -1e+38 }
0x1f3a   : > { %v2938_v18 = vsel %vm9085_vm3, %v2936_v49, -inf }
0x1f3b   : > { %2939 = vmax.xlane.f32.xlu2 %v2938_v18 }
0x1f53   : > { %3165 = vrot.lane.b32.xlu2 %v7947_v55, %s6752_s28 }
0x1f94   : > { %v2968_v25 = vpop.permute.xlu0 %2967 }
0x1f95   : > { %2987 = vmatpush.msra.mxu1 %v2968_v25 }
0x1f97   : > { %3074 = vmatpush.msrb.mxu1 %v7850_v28 }
0x1f99   : > { %3075 = vmatpush.msrb.mxu1 %v7856_v61 }
0x1f9b   : > { %3076 = vmatpush.msrb.mxu1 %v7862_v47 }
0x1f9d   : > { %3077 = vmatpush.msrb.mxu1 %v7868_v39 }
0x1fae   : > { %v2940_v41 = vpop.xlane.xlu2 %2939 }
0x1faf   : > { %v2941_v0 = vsub.f32 %v2936_v49, %v2940_v41 }
0x1fb1   : > { %v2942_v20 = vmul.f32 1.442695, %v2941_v0 }
0x1fb3   : > { %6338 = vpow2.f32 %v2942_v20 }
0x1fb6   : > { %v3166_v59 = vpop.permute.xlu2 %3165 }
0x1fb9   : > { %v6339_v30 = vpop.eup %6338 }
0x1fba   : > { %v2944_v12 = vsel %vm9085_vm3, %v6339_v30, 0.0 }
0x1fbb   : > { %2945 = vadd.xlane.f32.xlu1 %v2944_v12 }
0x202e   : > { %v2946_v26 = vpop.xlane.xlu1 %2945 }
0x202f   : > { %6340 = vrcp.f32 %v2946_v26  ;;  %v2958_v61 = vand.u32 2147483648, %v2946_v26  ;;  %v2956_v39 = vand.u32 2147483647, %v2946_v26  ;;  %vm2952_vm4 = vweird.f32 %v2946_v26 }
0x2031   : > { %v2959_v2 = vor.u32 1.1754944e-38, %v2958_v61  ;;  %vm2957_vm3 = vcmp.eq.f32.partialorder %v2956_v39, 8.507059e+37 }
0x2035   : > { %v6341_v35 = vpop.eup %6340 }
0x2036   : > { %v2948_v45 = vmul.f32 %v6341_v35, %v2946_v26  ;;  %vm2953_vm0 = vweird.f32 %v6341_v35 }
0x2037   : > { %vm2954_vm7 = vmor %vm2952_vm4, %vm2953_vm0 }
0x2038   : > { %v2949_v28 = vsub.f32 1.0, %v2948_v45 }
0x203a   : > { %v2950_v47 = vmul.f32 %v6341_v35, %v2949_v28 }
0x203c   : > { %v2951_v10 = vadd.f32 %v6341_v35, %v2950_v47 }
0x203e   : > { %v2955_v23 = vsel %vm2954_vm7, %v6341_v35, %v2951_v10 }
0x203f   : > { %v2960_v6 = vsel %vm2957_vm3, %v2959_v2, %v2955_v23 }
0x2040   : > { %v2961_v5 = vmul.f32 %v6339_v30, %v2960_v6 }
0x2042   : > { %v2962_v7 = vmul.f32 %v7963_v32, %v2961_v5  ;;  %v3195_v22 = vperm.slane %v2961_v5, 7 }
0x2044   : > { %v2993_v38 = vrot.slane %v2962_v7, 7  ;;  %v2963_v51 = vsub.f32 %v2961_v5, %v2962_v7  ;;  %v3196_v63 = vsel %vm3189_vm5, %v3195_v22, %v7877_v19 }
0x2045   : > { %5622 = vst.msk [vmem:[%s7969_s1] sm:$0xff] %vm1092_vm6, %v3196_v63  ;;  %v8015_v63 = vld [vmem:[%s9035_s9 + $0x68] sm:$0xff] }
0x2046   : > { %6043 = vmatmul.msk.f32.vlgmr.msra.gmra.mxu2 %vm1092_vm6, %v2993_v38  ;;  %v2965_v53 = vrot.slane %v2963_v51, 7  ;;  %v7999_v38 = vld [vmem:[%s9035_s9 + $0x70] sm:$0xff]  ;;  %v8004_v51 = vld [vmem:[%s9035_s9 + $0x60] sm:$0xff] }
0x2048   : > { %6042 = vmatmul.msk.f32.vlgmr.msra.gmra.mxu1 %vm1092_vm6, %v2965_v53  ;;  %v8020_v53 = vld [vmem:[%s9035_s9 + $0x50] sm:$0xff] }
0x2049   : > { %3296 = vmatpush.msra.mxu1 %v7999_v38 }
0x204b   : > { %3297 = vmatpush.msra.mxu1 %v8004_v51 }
0x204d   : > { %3298 = vmatpush.msra.mxu1 %v8020_v53 }
0x20c5   : > { %v2989_v50 = vpop.f32.mrf.mxu1 }
0x20c9   : > { %v3013_v48 = vpop.f32.mrf.mxu2 }
0x20ca   : > { %v3014_v4 = vadd.f32 %v3013_v48, %v2989_v50  ;;  %v8026_v50 = vld [vmem:[%s9034_s8 + $0x78] sm:$0xff]  ;;  %v8031_v48 = vld [vmem:[%s9034_s8 + $0x70] sm:$0xff] }
0x20cb   : > { %3271 = vmatpush.msrb.mxu0 %v8026_v50  ;;  %3251 = vmatpush.msrb.mxu3 %v8031_v48 }
0x20cc   : > { %6046 = vmatmul.msk.f32.vlgmr.msrb.gmra.mxu1 %vm813_vm1, %v3014_v4  ;;  %6047 = vmatmul.msk.f32.vlgmr.msrb.gmra.mxu2 %vm813_vm1, %v3014_v4 }
0x20cd   : > { %3272 = vmatpush.msrb.mxu0 %v8043_v44 }
0x2149   : > { %v3079_v29 = vpop.f32.mrf.mxu1 }
0x214a   : > { %v3080_v19 = vadd.f32 %v3079_v29, %v7167_v34  ;;  %v8048_v29 = vld [vmem:[%s9034_s8 + $0x60] sm:$0xff] }
0x214b   : > { %3252 = vmatpush.msrb.mxu3 %v8048_v29 }
0x214c   : > { %v3102_v57 = vadd.f32 %v3080_v19, %v3037_v3  ;;  %3123 = vrot.lane.b32.xlu1 %v3080_v19, %s6752_s28  ;;  %v8060_v19 = vld [vmem:[%s9034_s8 + $0x58] sm:$0xff] }
0x214d   : > { %3273 = vmatpush.msrb.mxu0 %v8060_v19 }
0x214e   : > { %v6048_v46 = vmul.f32 -1.442695, %v3102_v57  ;;  %v8066_v57 = vld [vmem:[%s9035_s9 + $0x48] sm:$0xff] }
0x214f   : > { %v3099_v11 = vpop.f32.mrf.mxu2 }
0x2150   : > { %6342 = vpow2.f32 %v6048_v46  ;;  %v3100_v14 = vadd.f32 %v3099_v11, %v7185_v60  ;;  %v8074_v46 = vld [vmem:[%s9034_s8 + $0x50] sm:$0xff] }
0x2151   : > { %3253 = vmatpush.msrb.mxu3 %v8074_v46 }
0x2152   : > { %v3144_v20 = vadd.f32 %v3100_v14, %v7947_v55 }
0x2154   : > { %v6049_v30 = vmul.f32 -1.442695, %v3144_v20 }
0x2156   : > { %v6343_v54 = vpop.eup %6342 }
0x2157   : > { %v3106_v9 = vadd.f32 1.0, %v6343_v54  ;;  %v8081_v54 = vld [vmem:[%s9034_s8 + $0x48] sm:$0xff] }
0x2158   : > { %3274 = vmatpush.msrb.mxu0 %v8081_v54 }
0x2159   : > { %6344 = vrcp.f32 %v3106_v9  ;;  %v3118_v36 = vand.u32 2147483648, %v3106_v9  ;;  %v3116_v33 = vand.u32 2147483647, %v3106_v9  ;;  %vm3112_vm4 = vweird.f32 %v3106_v9 }
0x215b   : > { %v3119_v37 = vor.u32 1.1754944e-38, %v3118_v36  ;;  %vm3117_vm3 = vcmp.eq.f32.partialorder %v3116_v33, 8.507059e+37 }
0x215f   : > { %v6345_v56 = vpop.eup %6344 }
0x2160   : > { %v3108_v15 = vmul.f32 %v6345_v56, %v3106_v9  ;;  %vm3113_vm7 = vweird.f32 %v6345_v56  ;;  %v8088_v9 = vld [vmem:[%s9034_s8 + $0x40] sm:$0xff] }
0x2161   : > { %vm3114_vm0 = vmor %vm3112_vm4, %vm3113_vm7  ;;  %3254 = vmatpush.msrb.mxu3 %v8088_v9 }
0x2162   : > { %v3109_v52 = vsub.f32 1.0, %v3108_v15 }
0x2164   : > { %v3110_v8 = vmul.f32 %v6345_v56, %v3109_v52 }
0x2166   : > { %v3111_v58 = vadd.f32 %v6345_v56, %v3110_v8 }
0x2168   : > { %v3115_v34 = vsel %vm3114_vm0, %v6345_v56, %v3111_v58 }
0x2169   : > { %v7983_v17 = vsel %vm3117_vm3, %v3119_v37, %v3115_v34 }
0x216a   : > { %v3168_v62 = vmul.f32 %v3166_v59, %v7983_v17  ;;  %v3133_v15 = vsub.f32 1.0, %v7983_v17  ;;  %v6069_v59 = vld [vmem:[%s9037_s11 + $0x2] sm:$0x3] }
0x216c   : > { %3170 = vrot.lane.b32.xlu0 %v3168_v62, %s6752_s28  ;;  %v8110_v62 = vperm.slane %v6069_v59, 0 }
0x21be   : > { %v3124_v1 = vpop.permute.xlu1 %3123 }
0x21bf   : > { %v3126_v40 = vmul.f32 %v3124_v1, %v7983_v17 }
0x21c1   : > { %3128 = vrot.lane.b32.xlu2 %v3126_v40, %s6752_s28 }
0x21c9   : > { %3139 = vrot.lane.b32.xlu2 %v3014_v4, %s6753_s6  ;;  %v8037_v4 = vld [vmem:[%s9035_s9 + $0x58] sm:$0xff] }
0x21de   : > { %v3171_v49 = vpop.permute.xlu0 %3170 }
0x21df   : > { %v3173_v18 = vadd.f32 %v3171_v49, %v3100_v14 }
0x21e1   : > { %6346 = vtanh.f32 %v3173_v18 }
0x21e7   : > { %v6347_v16 = vpop.eup %6346 }
0x21e8   : > { %3177 = vrot.lane.b32.xlu0 %v6347_v16, %s6754_s18 }
0x221b   : > { %v3129_v25 = vpop.permute.xlu2 %3128 }
0x221c   : > { %v3131_v41 = vadd.f32 %v3129_v25, %v3037_v3  ;;  %v8053_v3 = vld [vmem:[%s9035_s9 + $0x40] sm:$0xff] }
0x221d   : > { %3299 = vmatpush.msra.mxu1 %v8053_v3 }
0x221e   : > { %6348 = vtanh.f32 %v3131_v41  ;;  %3300 = vmatmul.f32.vlgmr.msra.gmra.mxu1 %v6751_v13 }
0x221f   : > { %6350 = vpow2.f32 %v6049_v30 }
0x2223   : > { %v3140_v52 = vpop.permute.xlu2 %3139 }
0x2224   : > { %v6349_v0 = vpop.eup %6348 }
0x2225   : > { %3135 = vrot.lane.b32.xlu1 %v6349_v0, %s6754_s18  ;;  %v6351_v12 = vpop.eup %6350 }
0x2226   : > { %v3148_v26 = vadd.f32 1.0, %v6351_v12 }
0x2228   : > { %6352 = vrcp.f32 %v3148_v26  ;;  %v3160_v47 = vand.u32 2147483648, %v3148_v26  ;;  %vm3154_vm4 = vweird.f32 %v3148_v26  ;;  %v3158_v39 = vand.u32 2147483647, %v3148_v26 }
0x222a   : > { %v3161_v2 = vor.u32 1.1754944e-38, %v3160_v47  ;;  %vm3159_vm3 = vcmp.eq.f32.partialorder %v3158_v39, 8.507059e+37 }
0x222e   : > { %v6353_v60 = vpop.eup %6352 }
0x222f   : > { %v3150_v35 = vmul.f32 %v6353_v60, %v3148_v26  ;;  %vm3155_vm7 = vweird.f32 %v6353_v60 }
0x2230   : > { %vm3156_vm0 = vmor %vm3154_vm4, %vm3155_vm7 }
0x2231   : > { %v3151_v45 = vsub.f32 1.0, %v3150_v35 }
0x2233   : > { %v3152_v28 = vmul.f32 %v6353_v60, %v3151_v45 }
0x2235   : > { %v3153_v61 = vadd.f32 %v6353_v60, %v3152_v28 }
0x2237   : > { %v3157_v10 = vsel %vm3156_vm0, %v6353_v60, %v3153_v61 }
0x2238   : > { %v3162_v55 = vsel %vm3159_vm3, %v3161_v2, %v3157_v10 }
0x2239   : > { %v3175_v23 = vsub.f32 1.0, %v3162_v55  ;;  %v3182_v5 = vmul.f32 %v3162_v55, %v7896_v21  ;;  %v8010_v21 = vld [vmem:[%s9035_s9 + $0x78] sm:$0xff] }
0x223a   : > { %3316 = vmatpush.msra.mxu2 %v8010_v21 }
0x223c   : > { %3317 = vmatpush.msra.mxu2 %v8015_v63 }
0x223e   : > { %3318 = vmatpush.msra.mxu2 %v8037_v4 }
0x2240   : > { %3319 = vmatpush.msra.mxu2 %v8066_v57 }
0x2241   : > { %3320 = vmatmul.f32.vlgmr.msra.gmra.mxu2 %v6751_v13  ;;  %v3142_v13 = vmul.f32 %v3140_v52, %v7983_v17  ;;  %v8140_v52 = vperm.slane %v6069_v59, 1 }
0x2242   : > { %3571 = vmatpush.msrb.mxu2 %v8031_v48 }
0x2244   : > { %3572 = vmatpush.msrb.mxu2 %v8048_v29 }
0x2246   : > { %3573 = vmatpush.msrb.mxu2 %v8074_v46 }
0x2248   : > { %3574 = vmatpush.msrb.mxu2 %v8088_v9 }
0x225a   : > { %v3178_v6 = vpop.permute.xlu0 %3177 }
0x225b   : > { %v3180_v7 = vmul.f32 %v3178_v6, %v3175_v23 }
0x225d   : > { %v3183_v22 = vadd.f32 %v3182_v5, %v3180_v7 }
0x225f   : > { %3185 = vrot.lane.b32.xlu0 %v3183_v22, %s6753_s6 }
0x2297   : > { %v3136_v56 = vpop.permute.xlu1 %3135 }
0x2298   : > { %v3138_v36 = vmul.f32 %v3136_v56, %v3133_v15  ;;  %v8136_v56 = vld [vmem:[%s9031_s5 + $0x2] sm:$0x3] }
0x2299   : > { %v3451_v15 = vrot.slane %v8136_v56, 7 }
0x229a   : > { %v3143_v8 = vadd.f32 %v3142_v13, %v3138_v36 }
0x229b   : > { %v3301_v1 = vpop.f32.mrf.mxu1 }
0x229c   : > { %v3302_v17 = vadd.f32 %v3301_v1, %v8110_v62 }
0x229e   : > { %3345 = vrot.lane.b32.xlu0 %v3302_v17, %s6752_s28 }
0x22c4   : > { %v3321_v36 = vpop.f32.mrf.mxu2 }
0x22c5   : > { %v3322_v13 = vadd.f32 %v3321_v36, %v8140_v52  ;;  %v8159_v36 = vld [vmem:[#allocation7 + $0x38] sm:$0xff] }
0x22c6   : > { %3427 = vmatpush.msra.mxu3 %v8159_v36  ;;  %3748 = vmatpush.msra.mxu2 %v8159_v36 }
0x22d1   : > { %v3186_v33 = vpop.permute.xlu0 %3185 }
0x22d2   : > { %v3188_v58 = vadd.f32 %v3186_v33, %v3143_v8 }
0x22d4   : > { %v3192_v37 = vperm.slane %v3188_v58, 0 }
0x22d6   : > { %v8103_v34 = vsel %vm3189_vm5, %v3192_v37, %v7918_v42  ;;  %v6068_v42 = vld [vmem:[%s9036_s10 + $0x2] sm:$0x3]  ;;  %v3438_v37 = vrot.slane %v8136_v56, 1 }
0x22d7   : > { %3230 = vrot.lane.b32.xlu1 %v8103_v34, %s6754_s18  ;;  %v8123_v11 = vperm.slane %v6068_v42, 1  ;;  %v8127_v18 = vperm.slane %v6068_v42, 0 }
0x2310   : > { %v3346_v47 = vpop.permute.xlu0 %3345 }
0x2349   : > { %v8114_v40 = vpop.permute.xlu1 %3230 }
0x234a   : > { %6070 = vmatmul.msk.f32.vlgmr.msrb.gmra.mxu3 %vm813_vm1, %v8114_v40  ;;  %6071 = vmatmul.msk.f32.vlgmr.msrb.gmra.mxu0 %vm813_vm1, %v8114_v40 }
0x23c7   : > { %v3276_v14 = vpop.f32.mrf.mxu0 }
0x23c8   : > { %v3277_v49 = vadd.f32 %v3276_v14, %v8123_v11 }
0x23ca   : > { %3384 = vrot.lane.b32.xlu2 %v3277_v49, %s6752_s28 }
0x23cd   : > { %v3256_v16 = vpop.f32.mrf.mxu3 }
0x23ce   : > { %v3257_v25 = vadd.f32 %v3256_v16, %v8127_v18 }
0x23d0   : > { %v3324_v41 = vadd.f32 %v3302_v17, %v3257_v25 }
0x23d2   : > { %v6072_v0 = vmul.f32 -1.442695, %v3324_v41  ;;  %v3363_v41 = vadd.f32 %v3322_v13, %v3277_v49 }
0x23d4   : > { %6354 = vpow2.f32 %v6072_v0  ;;  %v6073_v0 = vmul.f32 -1.442695, %v3363_v41 }
0x23da   : > { %v6355_v20 = vpop.eup %6354 }
0x23db   : > { %v3328_v30 = vadd.f32 1.0, %v6355_v20 }
0x23dd   : > { %6356 = vrcp.f32 %v3328_v30  ;;  %v3340_v35 = vand.u32 2147483648, %v3328_v30  ;;  %v3338_v28 = vand.u32 2147483647, %v3328_v30  ;;  %vm3334_vm4 = vweird.f32 %v3328_v30 }
0x23df   : > { %v3341_v39 = vor.u32 1.1754944e-38, %v3340_v35  ;;  %vm3339_vm3 = vcmp.eq.f32.partialorder %v3338_v28, 8.507059e+37 }
0x23e3   : > { %v6357_v12 = vpop.eup %6356 }
0x23e4   : > { %v3330_v26 = vmul.f32 %v6357_v12, %v3328_v30  ;;  %vm3335_vm7 = vweird.f32 %v6357_v12 }
0x23e5   : > { %vm3336_vm0 = vmor %vm3334_vm4, %vm3335_vm7 }
0x23e6   : > { %v3331_v60 = vsub.f32 1.0, %v3330_v26 }
0x23e8   : > { %v3332_v45 = vmul.f32 %v6357_v12, %v3331_v60 }
0x23ea   : > { %v3333_v61 = vadd.f32 %v6357_v12, %v3332_v45 }
0x23ec   : > { %v3337_v10 = vsel %vm3336_vm0, %v6357_v12, %v3333_v61 }
0x23ed   : > { %v3342_v2 = vsel %vm3339_vm3, %v3341_v39, %v3337_v10 }
0x23ee   : > { %v3348_v55 = vmul.f32 %v3346_v47, %v3342_v2  ;;  %v3355_v1 = vsub.f32 1.0, %v3342_v2  ;;  %v3361_v14 = vmul.f32 0.0, %v3342_v2 }
0x23f0   : > { %3350 = vrot.lane.b32.xlu2 %v3348_v55, %s6752_s28 }
0x2424   : > { %v3385_v23 = vpop.permute.xlu2 %3384 }
0x2425   : > { %v3387_v6 = vmul.f32 %v3385_v23, %v3342_v2 }
0x2427   : > { %3389 = vrot.lane.b32.xlu1 %v3387_v6, %s6752_s28 }
0x244a   : > { %v3351_v5 = vpop.permute.xlu2 %3350 }
0x244b   : > { %v3353_v7 = vadd.f32 %v3351_v5, %v3257_v25 }
0x244d   : > { %6358 = vtanh.f32 %v3353_v7 }
0x2453   : > { %v6359_v22 = vpop.eup %6358 }
0x2454   : > { %3357 = vrot.lane.b32.xlu1 %v6359_v22, %s6754_s18 }
0x245c   : > { %3452 = vrot.lane.b32.xlu1 %v3451_v15, %s6753_s6 }
0x2499   : > { %v3390_v8 = vpop.permute.xlu1 %3389 }
0x249a   : > { %v3392_v33 = vadd.f32 %v3390_v8, %v3322_v13  ;;  %v8161_v13 = vld [vmem:[#allocation7 + $0x30] sm:$0xff]  ;;  %v8165_v8 = vld [vmem:[#allocation7 + $0x28] sm:$0xff] }
0x249b   : > { %3428 = vmatpush.msra.mxu3 %v8161_v13  ;;  %3749 = vmatpush.msra.mxu2 %v8161_v13 }
0x249c   : > { %6360 = vtanh.f32 %v3392_v33  ;;  %v8169_v33 = vld [vmem:[#allocation7 + $0x20] sm:$0xff] }
0x249d   : > { %6362 = vpow2.f32 %v6073_v0  ;;  %3429 = vmatpush.msra.mxu3 %v8165_v8  ;;  %3750 = vmatpush.msra.mxu2 %v8165_v8 }
0x249f   : > { %3430 = vmatpush.msra.mxu3 %v8169_v33  ;;  %3751 = vmatpush.msra.mxu2 %v8169_v33 }
0x24a1   : > { %3591 = vmatpush.msrb.mxu3 %v8026_v50 }
0x24a2   : > { %v6361_v58 = vpop.eup %6360 }
0x24a3   : > { %3396 = vrot.lane.b32.xlu0 %v6361_v58, %s6754_s18  ;;  %v6363_v20 = vpop.eup %6362  ;;  %3592 = vmatpush.msrb.mxu3 %v8043_v44 }
0x24a4   : > { %v3367_v30 = vadd.f32 1.0, %v6363_v20 }
0x24a5   : > { %3593 = vmatpush.msrb.mxu3 %v8060_v19 }
0x24a6   : > { %6364 = vrcp.f32 %v3367_v30  ;;  %v3379_v28 = vand.u32 2147483648, %v3367_v30  ;;  %vm3373_vm4 = vweird.f32 %v3367_v30  ;;  %v3377_v61 = vand.u32 2147483647, %v3367_v30 }
0x24a7   : > { %3594 = vmatpush.msrb.mxu3 %v8081_v54 }
0x24a8   : > { %v3380_v39 = vor.u32 1.1754944e-38, %v3379_v28  ;;  %vm3378_vm3 = vcmp.eq.f32.partialorder %v3377_v61, 8.507059e+37 }
0x24ab   : > { %3439 = vrot.lane.b32.xlu0 %v3438_v37, %s6753_s6 }
0x24ac   : > { %v6365_v12 = vpop.eup %6364 }
0x24ad   : > { %v3369_v26 = vmul.f32 %v6365_v12, %v3367_v30  ;;  %vm3374_vm7 = vweird.f32 %v6365_v12 }
0x24ae   : > { %vm3375_vm0 = vmor %vm3373_vm4, %vm3374_vm7 }
0x24af   : > { %v3370_v60 = vsub.f32 1.0, %v3369_v26 }
0x24b1   : > { %v3371_v35 = vmul.f32 %v6365_v12, %v3370_v60 }
0x24b3   : > { %v3372_v45 = vadd.f32 %v6365_v12, %v3371_v35 }
0x24b5   : > { %v3376_v47 = vsel %vm3375_vm0, %v6365_v12, %v3372_v45 }
0x24b6   : > { %v3381_v10 = vsel %vm3378_vm3, %v3380_v39, %v3376_v47 }
0x24b7   : > { %v3394_v49 = vsub.f32 1.0, %v3381_v10  ;;  %v3401_v55 = vmul.f32 %v3381_v10, %v8114_v40 }
0x24c6   : > { %v3358_v17 = vpop.permute.xlu1 %3357 }
0x24c7   : > { %v3360_v42 = vmul.f32 %v3358_v17, %v3355_v1  ;;  %v6051_v1 = vld [vmem:[%s9116_s19 + $0x1] sm:$0x1] }
0x24c9   : > { %v3362_v16 = vadd.f32 %v3361_v14, %v3360_v42 }
0x24ce   : > { %v3453_v59 = vpop.permute.xlu1 %3452 }
0x24cf   : > { %v3455_v25 = vmul.f32 %v3453_v59, %v8103_v34 }
0x24d1   : > { %3457 = vrot.lane.b32.xlu1 %v3455_v25, %s6754_s18 }
0x24d9   : > { %3469 = vperm.xlu1 %6225, %v6051_v1  }
0x2515   : > { %v3397_v2 = vpop.permute.xlu0 %3396 }
0x2516   : > { %v3399_v23 = vmul.f32 %v3397_v2, %v3394_v49 }
0x2518   : > { %v3402_v6 = vadd.f32 %v3401_v55, %v3399_v23  ;;  %v3554_v23 = vrot.slane %v8103_v34, 1 }
0x251a   : > { %3404 = vrot.lane.b32.xlu2 %v3402_v6, %s6753_s6 }
0x251d   : > { %v8152_v22 = vpop.permute.xlu0 %3439 }
0x2543   : > { %v3458_v58 = vpop.permute.xlu1 %3457 }
0x2544   : > { %v3460_v37 = vsel %vm1039_vm10, %v3458_v58, 0.0 }
0x254b   : > { %v3470_v41 = vpop.permute.xlu1 %3469 }
0x254c   : > { %v8202_v12 = vperm.slane %v3470_v41, 0 }
0x2574   : > { %v3405_v5 = vpop.permute.xlu2 %3404 }
0x2575   : > { %v8150_v7 = vadd.f32 %v3405_v5, %v3362_v16 }
0x2577   : > { %3411 = vrot.lane.b32.xlu2 %v8150_v7, %s6754_s18  ;;  %v3442_v15 = vmul.f32 %v8152_v22, %v8150_v7 }
0x2579   : > { %3444 = vrot.lane.b32.xlu0 %v3442_v15, %s6754_s18 }
0x25a3   : > { %3461 = vadd.xlane.f32.xlu0 %v3460_v37 }
0x25d1   : > { %v3412_v17 = vpop.permute.xlu2 %3411 }
0x25d2   : > { %6074 = vmatmul.msk.f32.vlgmr.msra.gmra.mxu3 %vm813_vm1, %v3412_v17 }
0x25eb   : > { %v3445_v42 = vpop.permute.xlu0 %3444 }
0x25ec   : > { %v3447_v14 = vsel %vm1030_vm11, %v3445_v42, 0.0 }
0x25ed   : > { %3448 = vadd.xlane.f32.xlu2 %v3447_v14 }
0x2616   : > { %v3462_v26 = vpop.xlane.xlu0 %3461 }
0x2655   : > { %v3432_v16 = vpop.f32.mrf.mxu3 }
0x2656   : > { %v3435_v59 = vperm.slane %v3432_v16, 0 }
0x2658   : > { %6076 = vmatpush.msk.msrb.mxu1 %vm988_vm12, %v3435_v59  ;;  %v8189_v25 = vsel %vm988_vm12, %v3435_v59, 0.0 }
0x2659   : > { %3505 = vrot.lane.b32.xlu0 %v8189_v25, %s6754_s18 }
0x265a   : > { %3634 = vmatpush.msra.mxu1 %v8010_v21 }
0x265c   : > { %3635 = vmatpush.msra.mxu1 %v8015_v63 }
0x265e   : > { %3636 = vmatpush.msra.mxu1 %v8037_v4 }
0x2660   : > { %3637 = vmatpush.msra.mxu1 %v8066_v57  ;;  %v3449_v0 = vpop.xlane.xlu2 %3448 }
0x2661   : > { %v8199_v20 = vsel %vm1034_vm13, %v3449_v0, 0.0 }
0x2662   : > { %v3464_v30 = vrot.slane %v8199_v20, 7 }
0x2664   : > { %v3466_v60 = vadd.f32 %v3464_v30, %v3462_v26 }
0x2666   : > { %v3473_v35 = vadd.f32 %v8202_v12, %v3466_v60 }
0x2668   : > { %v3474_v45 = vsub.f32 %v3473_v35, %v7262_v43 }
0x266a   : > { %v3475_v28 = vsel %vm1057_vm14, %v3474_v45, -1e+38 }
0x266b   : > { %v3476_v61 = vsel %vm1059_vm15, %v3475_v28, -inf }
0x266c   : > { %3477 = vmax.xlane.f32.xlu1 %v3476_v61 }
0x26cb   : > { %v3506_v47 = vpop.permute.xlu0 %3505 }
0x26cc   : > { %3525 = vmatpush.msra.mxu0 %v3506_v47 }
0x26ce   : > { %3614 = vmatpush.msrb.mxu0 %v7999_v38 }
0x26d0   : > { %3615 = vmatpush.msrb.mxu0 %v8004_v51 }
0x26d2   : > { %3616 = vmatpush.msrb.mxu0 %v8020_v53 }
0x26d4   : > { %3617 = vmatpush.msrb.mxu0 %v8053_v3 }
0x26df   : > { %v3478_v39 = vpop.xlane.xlu1 %3477 }
0x26e0   : > { %v3479_v10 = vsub.f32 %v3475_v28, %v3478_v39 }
0x26e2   : > { %v3480_v49 = vmul.f32 1.442695, %v3479_v10 }
0x26e4   : > { %6366 = vpow2.f32 %v3480_v49 }
0x26ea   : > { %v6367_v2 = vpop.eup %6366 }
0x26eb   : > { %v3482_v55 = vsel %vm1059_vm15, %v6367_v2, 0.0 }
0x26ec   : > { %3483 = vadd.xlane.f32.xlu2 %v3482_v55 }
0x2704   : > { %3555 = vrot.lane.b32.xlu2 %v3554_v23, %s6754_s18 }
0x275f   : > { %v3484_v6 = vpop.xlane.xlu2 %3483 }
0x2760   : > { %6368 = vrcp.f32 %v3484_v6  ;;  %v3496_v1 = vand.u32 2147483648, %v3484_v6  ;;  %v3494_v42 = vand.u32 2147483647, %v3484_v6  ;;  %vm3490_vm13 = vweird.f32 %v3484_v6 }
0x2762   : > { %v3497_v16 = vor.u32 1.1754944e-38, %v3496_v1  ;;  %vm3495_vm15 = vcmp.eq.f32.partialorder %v3494_v42, 8.507059e+37 }
0x2766   : > { %v6369_v5 = vpop.eup %6368 }
0x2767   : > { %v3486_v15 = vmul.f32 %v6369_v5, %v3484_v6  ;;  %v8216_v58 = vpop.permute.xlu2 %3555  ;;  %vm3491_vm10 = vweird.f32 %v6369_v5 }
0x2768   : > { %6078 = vmatmul.msk.f32.vlgmr.msrb.gmra.mxu2 %vm813_vm1, %v8216_v58  ;;  %6079 = vmatmul.msk.f32.vlgmr.msrb.gmra.mxu3 %vm813_vm1, %v8216_v58  ;;  %vm3492_vm14 = vmor %vm3490_vm13, %vm3491_vm10 }
0x2769   : > { %v3487_v37 = vsub.f32 1.0, %v3486_v15  ;;  %3906 = vmatpush.msrb.mxu2 %v8026_v50 }
0x276b   : > { %v3488_v17 = vmul.f32 %v6369_v5, %v3487_v37  ;;  %3907 = vmatpush.msrb.mxu2 %v8043_v44 }
0x276d   : > { %v3489_v14 = vadd.f32 %v6369_v5, %v3488_v17  ;;  %3908 = vmatpush.msrb.mxu2 %v8060_v19 }
0x276f   : > { %v3493_v59 = vsel %vm3492_vm14, %v6369_v5, %v3489_v14  ;;  %3909 = vmatpush.msrb.mxu2 %v8081_v54 }
0x2770   : > { %v3498_v41 = vsel %vm3495_vm15, %v3497_v16, %v3493_v59 }
0x2771   : > { %v8226_v0 = vmul.f32 %v6367_v2, %v3498_v41 }
0x2773   : > { %v3500_v30 = vmul.f32 %v7963_v32, %v8226_v0 }
0x2775   : > { %v3531_v26 = vrot.slane %v3500_v30, 1  ;;  %v3501_v60 = vsub.f32 %v8226_v0, %v3500_v30 }
0x2777   : > { %6077 = vmatmul.msk.f32.vlgmr.msrb.gmra.mxu1 %vm1092_vm6, %v3531_v26  ;;  %v3503_v35 = vrot.slane %v3501_v60, 1 }
0x2778   : > { %3886 = vmatpush.msrb.mxu1 %v8031_v48 }
0x2779   : > { %6075 = vmatmul.msk.f32.vlgmr.msra.gmra.mxu0 %vm1092_vm6, %v3503_v35 }
0x277a   : > { %3887 = vmatpush.msrb.mxu1 %v8048_v29 }
0x277c   : > { %3888 = vmatpush.msrb.mxu1 %v8074_v46 }
0x277e   : > { %3889 = vmatpush.msrb.mxu1 %v8088_v9 }
0x27eb   : > { %v3596_v45 = vpop.f32.mrf.mxu3  ;;  %v3576_v10 = vpop.f32.mrf.mxu2 }
0x27ec   : > { %v3597_v28 = vadd.f32 %v3596_v45, %v8123_v11  ;;  %v3577_v2 = vadd.f32 %v3576_v10, %v8127_v18 }
0x27ee   : > { %3705 = vrot.lane.b32.xlu1 %v3597_v28, %s6752_s28 }
0x27f4   : > { %v3551_v61 = vpop.f32.mrf.mxu1 }
0x27f6   : > { %v3527_v47 = vpop.f32.mrf.mxu0 }
0x27f7   : > { %v3552_v39 = vadd.f32 %v3551_v61, %v3527_v47 }
0x27f9   : > { %6080 = vmatmul.msk.f32.vlgmr.msrb.gmra.mxu0 %vm813_vm1, %v3552_v39  ;;  %6081 = vmatmul.msk.f32.vlgmr.msra.gmra.mxu1 %vm813_vm1, %v3552_v39 }
0x27fa   : > { %4063 = vmatpush.msra.mxu1 %v8159_v36 }
0x27fc   : > { %4064 = vmatpush.msra.mxu1 %v8161_v13 }
0x27fe   : > { %4065 = vmatpush.msra.mxu1 %v8165_v8 }
0x2800   : > { %4066 = vmatpush.msra.mxu1 %v8169_v33 }
0x2860   : > { %v3706_v26 = vpop.permute.xlu1 %3705 }
0x2876   : > { %v3619_v49 = vpop.f32.mrf.mxu0  ;;  %v3639_v47 = vpop.f32.mrf.mxu1 }
0x2877   : > { %v3620_v55 = vadd.f32 %v3619_v49, %v8110_v62  ;;  %v3640_v10 = vadd.f32 %v3639_v47, %v8140_v52 }
0x2879   : > { %v3642_v23 = vadd.f32 %v3620_v55, %v3577_v2  ;;  %3663 = vrot.lane.b32.xlu0 %v3620_v55, %s6752_s28 }
0x287b   : > { %v6082_v6 = vmul.f32 -1.442695, %v3642_v23 }
0x287d   : > { %6370 = vpow2.f32 %v6082_v6 }
0x2883   : > { %v6371_v5 = vpop.eup %6370 }
0x2884   : > { %v3646_v15 = vadd.f32 1.0, %v6371_v5 }
0x2886   : > { %6372 = vrcp.f32 %v3646_v15  ;;  %v3658_v42 = vand.u32 2147483648, %v3646_v15  ;;  %v3656_v16 = vand.u32 2147483647, %v3646_v15  ;;  %vm3652_vm4 = vweird.f32 %v3646_v15 }
0x2888   : > { %v3659_v41 = vor.u32 1.1754944e-38, %v3658_v42  ;;  %vm3657_vm3 = vcmp.eq.f32.partialorder %v3656_v16, 8.507059e+37 }
0x288c   : > { %v6373_v37 = vpop.eup %6372 }
0x288d   : > { %v3648_v1 = vmul.f32 %v6373_v37, %v3646_v15  ;;  %vm3653_vm7 = vweird.f32 %v6373_v37 }
0x288e   : > { %vm3654_vm0 = vmor %vm3652_vm4, %vm3653_vm7 }
0x288f   : > { %v3649_v17 = vsub.f32 1.0, %v3648_v1 }
0x2891   : > { %v3650_v14 = vmul.f32 %v6373_v37, %v3649_v17  ;;  %v3772_v17 = vrot.slane %v8136_v56, 6 }
0x2893   : > { %v3651_v59 = vadd.f32 %v6373_v37, %v3650_v14 }
0x2895   : > { %v3655_v30 = vsel %vm3654_vm0, %v6373_v37, %v3651_v59  ;;  %v3684_v37 = vadd.f32 %v3640_v10, %v3597_v28 }
0x2896   : > { %v3660_v60 = vsel %vm3657_vm3, %v3659_v41, %v3655_v30 }
0x2897   : > { %v3708_v35 = vmul.f32 %v3706_v26, %v3660_v60  ;;  %v6083_v1 = vmul.f32 -1.442695, %v3684_v37 }
0x2899   : > { %3710 = vrot.lane.b32.xlu0 %v3708_v35, %s6752_s28 }
0x28eb   : > { %v3664_v45 = vpop.permute.xlu0 %3663 }
0x28ec   : > { %v3666_v61 = vmul.f32 %v3664_v45, %v3660_v60 }
0x28ee   : > { %3668 = vrot.lane.b32.xlu2 %v3666_v61, %s6752_s28 }
0x28f6   : > { %3679 = vrot.lane.b32.xlu2 %v3552_v39, %s6753_s6 }
0x290b   : > { %v3711_v49 = vpop.permute.xlu0 %3710 }
0x290c   : > { %v3713_v55 = vadd.f32 %v3711_v49, %v3640_v10 }
0x290e   : > { %6374 = vtanh.f32 %v3713_v55 }
0x2914   : > { %v6375_v23 = vpop.eup %6374 }
0x2915   : > { %3717 = vrot.lane.b32.xlu0 %v6375_v23, %s6754_s18 }
0x2948   : > { %v3669_v6 = vpop.permute.xlu2 %3668 }
0x2949   : > { %v3671_v5 = vadd.f32 %v3669_v6, %v3577_v2 }
0x294b   : > { %6376 = vtanh.f32 %v3671_v5 }
0x294c   : > { %6378 = vpow2.f32 %v6083_v1 }
0x2950   : > { %v3680_v37 = vpop.permute.xlu2 %3679 }
0x2951   : > { %v6377_v15 = vpop.eup %6376 }
0x2952   : > { %3675 = vrot.lane.b32.xlu1 %v6377_v15, %s6754_s18  ;;  %v6379_v39 = vpop.eup %6378  ;;  %v3673_v15 = vsub.f32 1.0, %v3660_v60 }
0x2953   : > { %v3688_v42 = vadd.f32 1.0, %v6379_v39 }
0x2955   : > { %6380 = vrcp.f32 %v3688_v42  ;;  %v3700_v2 = vand.u32 2147483648, %v3688_v42  ;;  %vm3694_vm13 = vweird.f32 %v3688_v42  ;;  %v3698_v28 = vand.u32 2147483647, %v3688_v42 }
0x2957   : > { %v3701_v35 = vor.u32 1.1754944e-38, %v3700_v2  ;;  %vm3699_vm15 = vcmp.eq.f32.partialorder %v3698_v28, 8.507059e+37 }
0x295a   : > { %3773 = vrot.lane.b32.xlu1 %v3772_v17, %s6753_s6  ;;  %v3682_v17 = vmul.f32 %v3680_v37, %v3660_v60 }
0x295b   : > { %v6381_v14 = vpop.eup %6380 }
0x295c   : > { %v3690_v16 = vmul.f32 %v6381_v14, %v3688_v42  ;;  %vm3695_vm10 = vweird.f32 %v6381_v14  ;;  %v3408_v42 = vperm.slane %v8150_v7, 0  ;;  %v3869_v7 = vrot.slane %v8103_v34, 2 }
0x295d   : > { %vm3696_vm14 = vmor %vm3694_vm13, %vm3695_vm10 }
0x295e   : > { %v3691_v59 = vsub.f32 1.0, %v3690_v16 }
0x2960   : > { %v3692_v41 = vmul.f32 %v6381_v14, %v3691_v59 }
0x2962   : > { %v3693_v30 = vadd.f32 %v6381_v14, %v3692_v41  ;;  %v3409_v41 = vsel %vm988_vm12, %v3408_v42, 0.0  ;;  %vm9118_vm12 = vcmp.lt.s32.totalorder %v7247_v31, 2 }
0x2964   : > { %v3697_v26 = vsel %vm3696_vm14, %v6381_v14, %v3693_v30 }
0x2965   : > { %v3702_v45 = vsel %vm3699_vm15, %v3701_v35, %v3697_v26 }
0x2966   : > { %v3715_v61 = vsub.f32 1.0, %v3702_v45  ;;  %v3722_v10 = vmul.f32 %v3702_v45, %v8216_v58 }
0x2987   : > { %v3718_v47 = vpop.permute.xlu0 %3717 }
0x2988   : > { %v3720_v49 = vmul.f32 %v3718_v47, %v3715_v61 }
0x298a   : > { %v3723_v55 = vadd.f32 %v3722_v10, %v3720_v49 }
0x298c   : > { %3725 = vrot.lane.b32.xlu0 %v3723_v55, %s6753_s6 }
0x29c4   : > { %v3676_v23 = vpop.permute.xlu1 %3675 }
0x29c5   : > { %v3678_v1 = vmul.f32 %v3676_v23, %v3673_v15 }
0x29c7   : > { %v3683_v39 = vadd.f32 %v3682_v17, %v3678_v1 }
0x29cc   : > { %v3774_v6 = vpop.permute.xlu1 %3773 }
0x29cd   : > { %v3776_v5 = vmul.f32 %v3774_v6, %v8103_v34 }
0x29cf   : > { %3778 = vrot.lane.b32.xlu1 %v3776_v5, %s6754_s18 }
0x29fe   : > { %v3726_v14 = vpop.permute.xlu0 %3725 }
0x29ff   : > { %v3728_v16 = vadd.f32 %v3726_v14, %v3683_v39 }
0x2a01   : > { %v3729_v58 = vperm.slane %v3728_v16, 0  ;;  %v3758_v59 = vmul.f32 %v3728_v16, %v8152_v22  ;;  %3732 = vrot.lane.b32.xlu2 %v3728_v16, %s6754_s18 }
0x2a03   : > { %v8267_v30 = vsel %vm1312_vm8, %v3729_v58, %v3409_v41  ;;  %3760 = vrot.lane.b32.xlu0 %v3758_v59, %s6754_s18  ;;  %v8317_v59 = vadd.s32 8, %v7235_v24 }
0x2a05   : > { %vm3768_vm3 = vcmp.eq.s32.totalorder %v8317_v59, 8  ;;  %vm4083_vm10 = vcmp.eq.s32.totalorder %v8317_v59, 9 }
0x2a41   : > { %v3779_v60 = vpop.permute.xlu1 %3778 }
0x2a42   : > { %v3781_v2 = vsel %vm1361_vm9, %v3779_v60, 0.0 }
0x2a43   : > { %3782 = vadd.xlane.f32.xlu0 %v3781_v2 }
0x2a57   : > { %3870 = vrot.lane.b32.xlu0 %v3869_v7, %s6754_s18 }
0x2a5b   : > { %v3733_v28 = vpop.permute.xlu2 %3732 }
0x2a5c   : > { %6084 = vmatmul.msk.f32.vlgmr.msra.gmra.mxu2 %vm813_vm1, %v3733_v28 }
0x2a75   : > { %v3761_v26 = vpop.permute.xlu0 %3760 }
0x2a76   : > { %v3763_v35 = vsel %vm1030_vm11, %v3761_v26, 0.0 }
0x2a77   : > { %3764 = vadd.xlane.f32.xlu2 %v3763_v35 }
0x2ab6   : > { %v3783_v45 = vpop.xlane.xlu0 %3782 }
0x2ac9   : > { %v8275_v61 = vpop.permute.xlu0 %3870 }
0x2aca   : > { %6087 = vmatmul.msk.f32.vlgmr.msrb.gmra.mxu1 %vm813_vm1, %v8275_v61  ;;  %6088 = vmatmul.msk.f32.vlgmr.msrb.gmra.mxu2 %vm813_vm1, %v8275_v61 }
0x2acb   : > { %4221 = vmatpush.msrb.mxu1 %v8026_v50 }
0x2acd   : > { %4222 = vmatpush.msrb.mxu1 %v8043_v44 }
0x2acf   : > { %4223 = vmatpush.msrb.mxu1 %v8060_v19 }
0x2ad1   : > { %4224 = vmatpush.msrb.mxu1 %v8081_v54 }
0x2adf   : > { %v3753_v47 = vpop.f32.mrf.mxu2 }
0x2ae0   : > { %v3756_v10 = vperm.slane %v3753_v47, 0 }
0x2ae2   : > { %v8288_v49 = vsel %vm1312_vm8, %v3756_v10, %v8189_v25  ;;  %vm9119_vm8 = vcmask 59394  }
0x2ae3   : > { %3864 = vmatpush.msra.mxu0 %v8288_v49  ;;  %vm9120_vm9 = vmmov %vm9119_vm8 }
0x2ae5   : > { %3949 = vmatpush.msrb.mxu0 %v8010_v21 }
0x2ae7   : > { %3950 = vmatpush.msrb.mxu0 %v8015_v63 }
0x2ae9   : > { %3951 = vmatpush.msrb.mxu0 %v8037_v4 }
0x2aea   : > { %v3765_v50 = vpop.xlane.xlu2 %3764 }
0x2aeb   : > { %3952 = vmatpush.msrb.mxu0 %v8066_v57  ;;  %v8298_v44 = vsel %vm1352_vm2, %v3765_v50, %v8199_v20 }
0x2aec   : > { %v3785_v19 = vrot.slane %v8298_v44, 6 }
0x2aee   : > { %v3787_v54 = vadd.f32 %v3785_v19, %v3783_v45 }
0x2af0   : > { %v3788_v25 = vadd.f32 %v3787_v54, %v8202_v12 }
0x2af2   : > { %v3789_v55 = vsub.f32 %v3788_v25, %v7262_v43 }
0x2af4   : > { %v3790_v21 = vsel %vm9118_vm12, %v3789_v55, -1e+38 }
0x2af5   : > { %v3791_v63 = vsel %vm9119_vm8, %v3790_v21, -inf }
0x2af6   : > { %3792 = vmax.xlane.f32.xlu1 %v3791_v63 }
0x2b4d   : > { %v3911_v4 = vpop.f32.mrf.mxu2 }
0x2b4e   : > { %v8307_v57 = vadd.f32 %v3911_v4, %v8123_v11 }
0x2b50   : > { %4020 = vrot.lane.b32.xlu1 %v8307_v57, %s6752_s28 }
0x2b69   : > { %v3793_v20 = vpop.xlane.xlu1 %3792 }
0x2b6a   : > { %v3794_v23 = vsub.f32 %v3790_v21, %v3793_v20 }
0x2b6c   : > { %v3795_v6 = vmul.f32 1.442695, %v3794_v23 }
0x2b6e   : > { %6382 = vpow2.f32 %v3795_v6 }
0x2b74   : > { %v6383_v5 = vpop.eup %6382 }
0x2b75   : > { %v3797_v15 = vsel %vm9120_vm9, %v6383_v5, 0.0 }
0x2b76   : > { %3798 = vadd.xlane.f32.xlu2 %v3797_v15 }
0x2b8e   : > { %3820 = vrot.lane.b32.xlu2 %v8288_v49, %s6754_s18 }
0x2be9   : > { %v3799_v37 = vpop.xlane.xlu2 %3798 }
0x2bea   : > { %6384 = vrcp.f32 %v3799_v37  ;;  %v3811_v14 = vand.u32 2147483648, %v3799_v37  ;;  %v3809_v58 = vand.u32 2147483647, %v3799_v37  ;;  %vm3805_vm7 = vweird.f32 %v3799_v37 }
0x2bec   : > { %v3812_v60 = vor.u32 1.1754944e-38, %v3811_v14  ;;  %vm3810_vm0 = vcmp.eq.f32.partialorder %v3809_v58, 8.507059e+37 }
0x2bf0   : > { %v6385_v1 = vpop.eup %6384 }
0x2bf1   : > { %v3801_v17 = vmul.f32 %v6385_v1, %v3799_v37  ;;  %v3821_v39 = vpop.permute.xlu2 %3820  ;;  %vm3806_vm2 = vweird.f32 %v6385_v1  ;;  %v4021_v37 = vpop.permute.xlu1 %4020 }
0x2bf2   : > { %3840 = vmatpush.msra.mxu3 %v3821_v39  ;;  %vm3807_vm4 = vmor %vm3805_vm7, %vm3806_vm2 }
0x2bf3   : > { %v3802_v42 = vsub.f32 1.0, %v3801_v17 }
0x2bf4   : > { %3929 = vmatpush.msrb.mxu3 %v7999_v38  ;;  %v3769_v38 = vperm.slane %v8226_v0, 1 }
0x2bf5   : > { %v3803_v16 = vmul.f32 %v6385_v1, %v3802_v42 }
0x2bf6   : > { %3930 = vmatpush.msrb.mxu3 %v8004_v51  ;;  %v3771_v35 = vsel %vm3768_vm3, %v3769_v38, 0.0  ;;  %vm9123_vm3 = vcmp.eq.s32.totalorder %v7247_v31, 2 }
0x2bf7   : > { %v3804_v41 = vadd.f32 %v6385_v1, %v3803_v16 }
0x2bf8   : > { %3931 = vmatpush.msrb.mxu3 %v8020_v53 }
0x2bf9   : > { %v3808_v2 = vsel %vm3807_vm4, %v6385_v1, %v3804_v41  ;;  %vm9121_vm4 = vcmp.eq.s32.totalorder %v7235_v24, 2 }
0x2bfa   : > { %3932 = vmatpush.msrb.mxu3 %v8053_v3  ;;  %v3813_v7 = vsel %vm3810_vm0, %v3812_v60, %v3808_v2  ;;  %vm9122_vm0 = vcmask 257027  }
0x2bfb   : > { %v3814_v28 = vmul.f32 %v6383_v5, %v3813_v7 }
0x2bfd   : > { %v4084_v51 = vperm.slane %v3814_v28, 2  ;;  %v3815_v26 = vmul.f32 %v7963_v32, %v3814_v28 }
0x2bff   : > { %v8325_v45 = vsel %vm4083_vm10, %v4084_v51, %v3771_v35  ;;  %v3846_v53 = vrot.slane %v3815_v26, 2  ;;  %v3816_v47 = vsub.f32 %v3814_v28, %v3815_v26  ;;  %vm9124_vm10 = vmmov %vm9121_vm4 }
0x2c01   : > { %6086 = vmatmul.msk.f32.vlgmr.msra.gmra.mxu0 %vm1092_vm6, %v3846_v53  ;;  %v3818_v10 = vrot.slane %v3816_v47, 2 }
0x2c02   : > { %4201 = vmatpush.msra.mxu0 %v8031_v48  ;;  %v3891_v48 = vpop.f32.mrf.mxu1 }
0x2c03   : > { %6085 = vmatmul.msk.f32.vlgmr.msra.gmra.mxu3 %vm1092_vm6, %v3818_v10 }
0x2c04   : > { %4202 = vmatpush.msra.mxu0 %v8048_v29 }
0x2c06   : > { %4203 = vmatpush.msra.mxu0 %v8074_v46  ;;  %v3892_v46 = vadd.f32 %v3891_v48, %v8127_v18 }
0x2c08   : > { %4204 = vmatpush.msra.mxu0 %v8088_v9 }
0x2c7e   : > { %v3866_v3 = vpop.f32.mrf.mxu0 }
0x2c86   : > { %v3842_v32 = vpop.f32.mrf.mxu3 }
0x2c87   : > { %v3867_v0 = vadd.f32 %v3866_v3, %v3842_v32 }
0x2c89   : > { %6089 = vmatmul.msk.f32.vlgmr.msrb.gmra.mxu3 %vm813_vm1, %v3867_v0  ;;  %6090 = vmatmul.msk.f32.vlgmr.msrb.gmra.mxu0 %vm813_vm1, %v3867_v0 }
0x2c8a   : > { %4378 = vmatpush.msrb.mxu0 %v8159_v36 }
0x2c8c   : > { %4379 = vmatpush.msrb.mxu0 %v8161_v13 }
0x2c8e   : > { %4380 = vmatpush.msrb.mxu0 %v8165_v8 }
0x2c90   : > { %4381 = vmatpush.msrb.mxu0 %v8169_v33 }
0x2d06   : > { %v3954_v14 = vpop.f32.mrf.mxu0 }
0x2d07   : > { %v3955_v16 = vadd.f32 %v3954_v14, %v8140_v52 }
0x2d09   : > { %v3999_v2 = vadd.f32 %v3955_v16, %v8307_v57 }
0x2d0b   : > { %v6092_v38 = vmul.f32 -1.442695, %v3999_v2 }
0x2d0c   : > { %v3934_v29 = vpop.f32.mrf.mxu3 }
0x2d0d   : > { %v3935_v9 = vadd.f32 %v3934_v29, %v8110_v62 }
0x2d0f   : > { %v3957_v50 = vadd.f32 %v3935_v9, %v3892_v46  ;;  %3978 = vrot.lane.b32.xlu0 %v3935_v9, %s6752_s28 }
0x2d11   : > { %v6091_v19 = vmul.f32 -1.442695, %v3957_v50 }
0x2d13   : > { %6386 = vpow2.f32 %v6091_v19  ;;  %v4087_v19 = vrot.slane %v8136_v56, 5 }
0x2d19   : > { %v6387_v54 = vpop.eup %6386 }
0x2d1a   : > { %v3961_v25 = vadd.f32 1.0, %v6387_v54 }
0x2d1c   : > { %6388 = vrcp.f32 %v3961_v25  ;;  %v3973_v4 = vand.u32 2147483648, %v3961_v25  ;;  %v3971_v23 = vand.u32 2147483647, %v3961_v25  ;;  %vm3967_vm14 = vweird.f32 %v3961_v25 }
0x2d1e   : > { %v3974_v5 = vor.u32 1.1754944e-38, %v3973_v4  ;;  %vm3972_vm12 = vcmp.eq.f32.partialorder %v3971_v23, 8.507059e+37 }
0x2d22   : > { %v6389_v55 = vpop.eup %6388 }
0x2d23   : > { %v3963_v21 = vmul.f32 %v6389_v55, %v3961_v25  ;;  %vm3968_vm13 = vweird.f32 %v6389_v55 }
0x2d24   : > { %vm3969_vm15 = vmor %vm3967_vm14, %vm3968_vm13  ;;  %vm9125_vm13 = vcmp.lt.s32.totalorder %v7247_v31, 3  ;;  %vm9126_vm14 = vcmask 60419  }
0x2d25   : > { %v3964_v63 = vsub.f32 1.0, %v3963_v21 }
0x2d27   : > { %v3965_v20 = vmul.f32 %v6389_v55, %v3964_v63 }
0x2d29   : > { %v3966_v6 = vadd.f32 %v6389_v55, %v3965_v20 }
0x2d2b   : > { %v3970_v15 = vsel %vm3969_vm15, %v6389_v55, %v3966_v6  ;;  %vm9127_vm15 = vmmov %vm9126_vm14 }
0x2d2c   : > { %v3975_v1 = vsel %vm3972_vm12, %v3974_v5, %v3970_v15 }
0x2d2d   : > { %v4023_v17 = vmul.f32 %v4021_v37, %v3975_v1  ;;  %v3988_v20 = vsub.f32 1.0, %v3975_v1 }
0x2d2f   : > { %4025 = vrot.lane.b32.xlu2 %v4023_v17, %s6752_s28 }
0x2d81   : > { %v3979_v39 = vpop.permute.xlu0 %3978 }
0x2d82   : > { %v3981_v42 = vmul.f32 %v3979_v39, %v3975_v1 }
0x2d84   : > { %3983 = vrot.lane.b32.xlu1 %v3981_v42, %s6752_s28 }
0x2d89   : > { %v4026_v58 = vpop.permute.xlu2 %4025 }
0x2d8a   : > { %v4028_v41 = vadd.f32 %v4026_v58, %v3955_v16 }
0x2d8c   : > { %6390 = vtanh.f32 %v4028_v41  ;;  %3994 = vrot.lane.b32.xlu1 %v3867_v0, %s6753_s6 }
0x2d8d   : > { %6392 = vpow2.f32 %v6092_v38 }
0x2d92   : > { %v6391_v60 = vpop.eup %6390 }
0x2d93   : > { %4032 = vrot.lane.b32.xlu0 %v6391_v60, %s6754_s18  ;;  %v6393_v7 = vpop.eup %6392 }
0x2d94   : > { %v4003_v28 = vadd.f32 1.0, %v6393_v7 }
0x2d96   : > { %6394 = vrcp.f32 %v4003_v28  ;;  %v4015_v32 = vand.u32 2147483648, %v4003_v28  ;;  %vm4009_vm9 = vweird.f32 %v4003_v28  ;;  %v4013_v0 = vand.u32 2147483647, %v4003_v28 }
0x2d98   : > { %v4016_v29 = vor.u32 1.1754944e-38, %v4015_v32  ;;  %vm4014_vm7 = vcmp.eq.f32.partialorder %v4013_v0, 8.507059e+37  ;;  %v4184_v32 = vrot.slane %v8103_v34, 3 }
0x2d9c   : > { %v6395_v51 = vpop.eup %6394 }
0x2d9d   : > { %v4005_v26 = vmul.f32 %v6395_v51, %v4003_v28  ;;  %vm4010_vm8 = vweird.f32 %v6395_v51 }
0x2d9e   : > { %vm4011_vm2 = vmor %vm4009_vm9, %vm4010_vm8 }
0x2d9f   : > { %v4006_v35 = vsub.f32 1.0, %v4005_v26 }
0x2da1   : > { %v4007_v47 = vmul.f32 %v6395_v51, %v4006_v35 }
0x2da3   : > { %v4008_v3 = vadd.f32 %v6395_v51, %v4007_v47  ;;  %v8388_v47 = vld [vmem:[%s9035_s9 + $0x78] sm:$0xff] }
0x2da5   : > { %v4012_v48 = vsel %vm4011_vm2, %v6395_v51, %v4008_v3  ;;  %v8406_v3 = vld [vmem:[%s9035_s9 + $0x48] sm:$0xff] }
0x2da6   : > { %v4017_v9 = vsel %vm4014_vm7, %v4016_v29, %v4012_v48  ;;  %vm4398_vm7 = vcmp.eq.s32.totalorder %v8317_v59, 10 }
0x2da7   : > { %v4030_v50 = vsub.f32 1.0, %v4017_v9 }
0x2df6   : > { %v3984_v53 = vpop.permute.xlu1 %3983 }
0x2df7   : > { %v3986_v10 = vadd.f32 %v3984_v53, %v3892_v46  ;;  %v4037_v46 = vmul.f32 %v4017_v9, %v8275_v61  ;;  %v8420_v9 = vld [vmem:[%s9035_s9 + $0x60] sm:$0xff] }
0x2df9   : > { %6396 = vtanh.f32 %v3986_v10  ;;  %v8400_v10 = vld [vmem:[%s9035_s9 + $0x58] sm:$0xff] }
0x2dfe   : > { %v3995_v23 = vpop.permute.xlu1 %3994 }
0x2dff   : > { %v6397_v57 = vpop.eup %6396  ;;  %v3997_v5 = vmul.f32 %v3995_v23, %v3975_v1 }
0x2e00   : > { %3990 = vrot.lane.b32.xlu2 %v6397_v57, %s6754_s18  ;;  %v8414_v57 = vld [vmem:[%s9035_s9 + $0x70] sm:$0xff] }
0x2e05   : > { %v4033_v54 = vpop.permute.xlu0 %4032 }
0x2e06   : > { %v4035_v25 = vmul.f32 %v4033_v54, %v4030_v50  ;;  %v8432_v54 = vld [vmem:[%s9035_s9 + $0x40] sm:$0xff] }
0x2e08   : > { %v4038_v55 = vadd.f32 %v4037_v46, %v4035_v25  ;;  %4088 = vrot.lane.b32.xlu2 %v4087_v19, %s6753_s6  ;;  %v8426_v19 = vld [vmem:[%s9035_s9 + $0x50] sm:$0xff]  ;;  %v8444_v25 = vld [vmem:[%s9034_s8 + $0x78] sm:$0xff] }
0x2e0a   : > { %4040 = vrot.lane.b32.xlu0 %v4038_v55, %s6753_s6 }
0x2e5a   : > { %v3991_v21 = vpop.permute.xlu2 %3990 }
0x2e5b   : > { %v3993_v6 = vmul.f32 %v3991_v21, %v3988_v20  ;;  %v8463_v20 = vld [vmem:[%s9034_s8 + $0x48] sm:$0xff] }
0x2e5d   : > { %v3998_v56 = vadd.f32 %v3997_v5, %v3993_v6 }
0x2e62   : > { %v4089_v63 = vpop.permute.xlu2 %4088 }
0x2e63   : > { %v4091_v4 = vmul.f32 %v4089_v63, %v8103_v34  ;;  %v8451_v63 = vld [vmem:[%s9034_s8 + $0x68] sm:$0xff] }
0x2e65   : > { %4093 = vrot.lane.b32.xlu2 %v4091_v4, %s6754_s18  ;;  %v8457_v4 = vld [vmem:[%s9034_s8 + $0x58] sm:$0xff] }
0x2e7c   : > { %v4041_v15 = vpop.permute.xlu0 %4040 }
0x2e7d   : > { %v4043_v37 = vadd.f32 %v4041_v15, %v3998_v56 }
0x2e7f   : > { %v4044_v61 = vperm.slane %v4043_v37, 0  ;;  %v4073_v17 = vmul.f32 %v4043_v37, %v8152_v22  ;;  %4047 = vrot.lane.b32.xlu1 %v4043_v37, %s6754_s18 }
0x2e81   : > { %v8360_v39 = vsel %vm9121_vm4, %v4044_v61, %v8267_v30  ;;  %4075 = vrot.lane.b32.xlu0 %v4073_v17, %s6754_s18 }
0x2ebf   : > { %v4094_v42 = vpop.permute.xlu2 %4093 }
0x2ec0   : > { %v4096_v14 = vsel %vm9122_vm0, %v4094_v42, 0.0 }
0x2ec1   : > { %4097 = vadd.xlane.f32.xlu0 %v4096_v14 }
0x2ef1   : > { %v4048_v1 = vpop.permute.xlu1 %4047 }
0x2ef2   : > { %6093 = vmatmul.msk.f32.vlgmr.msra.gmra.mxu1 %vm813_vm1, %v4048_v1 }
0x2ef3   : > { %v4076_v16 = vpop.permute.xlu0 %4075 }
0x2ef4   : > { %v4078_v58 = vsel %vm1030_vm11, %v4076_v16, 0.0 }
0x2ef5   : > { %4079 = vadd.xlane.f32.xlu1 %v4078_v58 }
0x2f34   : > { %v4098_v2 = vpop.xlane.xlu0 %4097 }
0x2f68   : > { %v4080_v41 = vpop.xlane.xlu1 %4079 }
0x2f69   : > { %v8369_v60 = vsel %vm9123_vm3, %v4080_v41, %v8298_v44 }
0x2f6a   : > { %v4100_v30 = vrot.slane %v8369_v60, 5 }
0x2f6c   : > { %v4102_v38 = vadd.f32 %v4100_v30, %v4098_v2  ;;  %v8473_v2 = vld [vmem:[%s7014_s22] sm:$0xff] }
0x2f6e   : > { %v4103_v7 = vadd.f32 %v4102_v38, %v8202_v12 }
0x2f6f   : > { %v4068_v28 = vpop.f32.mrf.mxu1 }
0x2f70   : > { %v4071_v51 = vperm.slane %v4068_v28, 0  ;;  %v4104_v26 = vsub.f32 %v4103_v7, %v7262_v43 }
0x2f72   : > { %v8377_v35 = vsel %vm9124_vm10, %v4071_v51, %v8288_v49  ;;  %v4105_v53 = vsel %vm9125_vm13, %v4104_v26, -1e+38  ;;  %v8394_v49 = vld [vmem:[%s9035_s9 + $0x68] sm:$0xff] }
0x2f73   : > { %4179 = vmatpush.msra.mxu3 %v8377_v35  ;;  %4135 = vrot.lane.b32.xlu0 %v8377_v35, %s6754_s18  ;;  %v4106_v44 = vsel %vm9126_vm14, %v4105_v53, -inf }
0x2f74   : > { %4107 = vmax.xlane.f32.xlu2 %v4106_v44  ;;  %v8490_v44 = vld [vmem:[%s9034_s8 + $0x60] sm:$0xff] }
0x2f75   : > { %4264 = vmatpush.msrb.mxu3 %v8388_v47 }
0x2f77   : > { %4265 = vmatpush.msrb.mxu3 %v8394_v49 }
0x2f79   : > { %4266 = vmatpush.msrb.mxu3 %v8400_v10 }
0x2f7b   : > { %4267 = vmatpush.msrb.mxu3 %v8406_v3 }
0x2f8c   : > { %4185 = vrot.lane.b32.xlu2 %v4184_v32, %s6754_s18  ;;  %v8502_v32 = vld [vmem:[%s9034_s8 + $0x40] sm:$0xff] }
0x2fe5   : > { %v4136_v0 = vpop.permute.xlu0 %4135 }
0x2fe6   : > { %4155 = vmatpush.msra.mxu2 %v4136_v0 }
0x2fe7   : > { %v4108_v48 = vpop.xlane.xlu2 %4107 }
0x2fe8   : > { %4244 = vmatpush.msrb.mxu2 %v8414_v57  ;;  %v4109_v29 = vsub.f32 %v4105_v53, %v4108_v48  ;;  %v8483_v53 = vld [vmem:[%s9034_s8 + $0x70] sm:$0xff] }
0x2fea   : > { %4245 = vmatpush.msrb.mxu2 %v8420_v9  ;;  %v4110_v50 = vmul.f32 1.442695, %v4109_v29 }
0x2fec   : > { %4246 = vmatpush.msrb.mxu2 %v8426_v19  ;;  %6398 = vpow2.f32 %v4110_v50 }
0x2fee   : > { %4247 = vmatpush.msrb.mxu2 %v8432_v54 }
0x2fef   : > { %v8435_v46 = vpop.permute.xlu2 %4185 }
0x2ff0   : > { %6096 = vmatmul.msk.f32.vlgmr.msra.gmra.mxu0 %vm813_vm1, %v8435_v46  ;;  %6097 = vmatmul.msk.f32.vlgmr.msrb.gmra.mxu1 %vm813_vm1, %v8435_v46 }
0x2ff1   : > { %4536 = vmatpush.msra.mxu0 %v8444_v25 }
0x2ff2   : > { %v6399_v55 = vpop.eup %6398 }
0x2ff3   : > { %v4112_v21 = vsel %vm9127_vm15, %v6399_v55, 0.0  ;;  %4537 = vmatpush.msra.mxu0 %v8451_v63 }
0x2ff4   : > { %4113 = vadd.xlane.f32.xlu1 %v4112_v21 }
0x2ff5   : > { %4538 = vmatpush.msra.mxu0 %v8457_v4 }
0x2ff7   : > { %4539 = vmatpush.msra.mxu0 %v8463_v20 }
0x3067   : > { %v4114_v23 = vpop.xlane.xlu1 %4113 }
0x3068   : > { %6400 = vrcp.f32 %v4114_v23  ;;  %v4126_v61 = vand.u32 2147483648, %v4114_v23  ;;  %v4124_v42 = vand.u32 2147483647, %v4114_v23  ;;  %vm4120_vm8 = vweird.f32 %v4114_v23 }
0x306a   : > { %v4127_v1 = vor.u32 1.1754944e-38, %v4126_v61  ;;  %vm4125_vm2 = vcmp.eq.f32.partialorder %v4124_v42, 8.507059e+37 }
0x306d   : > { %v4226_v6 = vpop.f32.mrf.mxu1  ;;  %v4206_v50 = vpop.f32.mrf.mxu0 }
0x306e   : > { %v6401_v5 = vpop.eup %6400  ;;  %v8467_v56 = vadd.f32 %v4226_v6, %v8123_v11  ;;  %v4207_v21 = vadd.f32 %v4206_v50, %v8127_v18 }
0x306f   : > { %v4116_v15 = vmul.f32 %v6401_v5, %v4114_v23  ;;  %vm4121_vm12 = vweird.f32 %v6401_v5 }
0x3070   : > { %4335 = vrot.lane.b32.xlu1 %v8467_v56, %s6752_s28  ;;  %vm4122_vm9 = vmor %vm4120_vm8, %vm4121_vm12  ;;  %vm9128_vm8 = vcmp.eq.s32.totalorder %v7235_v24, 3 }
0x3071   : > { %v4117_v37 = vsub.f32 1.0, %v4116_v15 }
0x3073   : > { %v4118_v17 = vmul.f32 %v6401_v5, %v4117_v37 }
0x3075   : > { %v4119_v14 = vadd.f32 %v6401_v5, %v4118_v17 }
0x3077   : > { %v4123_v16 = vsel %vm4122_vm9, %v6401_v5, %v4119_v14  ;;  %vm9129_vm9 = vcmask 258052  }
0x3078   : > { %v4128_v58 = vsel %vm4125_vm2, %v4127_v1, %v4123_v16  ;;  %vm9130_vm2 = vmmov %vm9128_vm8 }
0x3079   : > { %v4129_v41 = vmul.f32 %v6399_v55, %v4128_v58 }
0x307b   : > { %v4399_v30 = vperm.slane %v4129_v41, 3  ;;  %v4130_v38 = vmul.f32 %v8473_v2, %v4129_v41 }
0x307d   : > { %v8477_v7 = vsel %vm4398_vm7, %v4399_v30, %v8325_v45  ;;  %v4161_v28 = vrot.slane %v4130_v38, 3  ;;  %v4131_v51 = vsub.f32 %v4129_v41, %v4130_v38  ;;  %v8496_v45 = vld [vmem:[%s9034_s8 + $0x50] sm:$0xff]  ;;  %vm9131_vm7 = vcmp.eq.s32.totalorder %v7247_v31, 3 }
0x307f   : > { %6095 = vmatmul.msk.f32.vlgmr.msra.gmra.mxu3 %vm1092_vm6, %v4161_v28  ;;  %v4133_v26 = vrot.slane %v4131_v51, 3 }
0x3080   : > { %4516 = vmatpush.msra.mxu3 %v8483_v53 }
0x3081   : > { %6094 = vmatmul.msk.f32.vlgmr.msra.gmra.mxu2 %vm1092_vm6, %v4133_v26 }
0x3082   : > { %4517 = vmatpush.msra.mxu3 %v8490_v44 }
0x3084   : > { %4518 = vmatpush.msra.mxu3 %v8496_v45 }
0x3086   : > { %4519 = vmatpush.msra.mxu3 %v8502_v32 }
0x30e2   : > { %v4336_v16 = vpop.permute.xlu1 %4335 }
0x3102   : > { %v4181_v0 = vpop.f32.mrf.mxu3 }
0x3104   : > { %v4157_v48 = vpop.f32.mrf.mxu2 }
0x3105   : > { %v4182_v29 = vadd.f32 %v4181_v0, %v4157_v48 }
0x3107   : > { %6098 = vmatmul.msk.f32.vlgmr.msrb.gmra.mxu2 %vm813_vm1, %v4182_v29  ;;  %6099 = vmatmul.msk.f32.vlgmr.msrb.gmra.mxu3 %vm813_vm1, %v4182_v29 }
0x3108   : > { %4693 = vmatpush.msrb.mxu3 %v8159_v36 }
0x310a   : > { %4694 = vmatpush.msrb.mxu3 %v8161_v13 }
0x310c   : > { %4695 = vmatpush.msrb.mxu3 %v8165_v8 }
0x310e   : > { %4696 = vmatpush.msrb.mxu3 %v8169_v33 }
0x318a   : > { %v4249_v55 = vpop.f32.mrf.mxu2  ;;  %v4269_v28 = vpop.f32.mrf.mxu3 }
0x318b   : > { %v4250_v23 = vadd.f32 %v4249_v55, %v8110_v62  ;;  %v4270_v51 = vadd.f32 %v4269_v28, %v8140_v52 }
0x318d   : > { %v4272_v6 = vadd.f32 %v4250_v23, %v4207_v21  ;;  %4293 = vrot.lane.b32.xlu0 %v4250_v23, %s6752_s28  ;;  %v4314_v50 = vadd.f32 %v4270_v51, %v8467_v56 }
0x318f   : > { %v6100_v5 = vmul.f32 -1.442695, %v4272_v6  ;;  %v6101_v55 = vmul.f32 -1.442695, %v4314_v50 }
0x3191   : > { %6402 = vpow2.f32 %v6100_v5 }
0x3197   : > { %v6403_v15 = vpop.eup %6402 }
0x3198   : > { %v4276_v37 = vadd.f32 1.0, %v6403_v15 }
0x319a   : > { %6404 = vrcp.f32 %v4276_v37  ;;  %v4288_v8 = vand.u32 2147483648, %v4276_v37  ;;  %v4286_v33 = vand.u32 2147483647, %v4276_v37  ;;  %vm4282_vm0 = vweird.f32 %v4276_v37 }
0x319c   : > { %v4289_v14 = vor.u32 1.1754944e-38, %v4288_v8  ;;  %vm4287_vm10 = vcmp.eq.f32.partialorder %v4286_v33, 8.507059e+37 }
0x31a0   : > { %v6405_v36 = vpop.eup %6404 }
0x31a1   : > { %v4278_v13 = vmul.f32 %v6405_v36, %v4276_v37  ;;  %vm4283_vm4 = vweird.f32 %v6405_v36 }
0x31a2   : > { %vm4284_vm3 = vmor %vm4282_vm0, %vm4283_vm4  ;;  %vm9132_vm4 = vcmp.lt.s32.totalorder %v7247_v31, 4  ;;  %vm9133_vm0 = vcmask 61444  }
0x31a3   : > { %v4279_v61 = vsub.f32 1.0, %v4278_v13 }
0x31a5   : > { %v4280_v17 = vmul.f32 %v6405_v36, %v4279_v61 }
0x31a7   : > { %v4281_v42 = vadd.f32 %v6405_v36, %v4280_v17 }
0x31a9   : > { %v4285_v1 = vsel %vm4284_vm3, %v6405_v36, %v4281_v42  ;;  %vm9134_vm3 = vmmov %vm9133_vm0 }
0x31aa   : > { %v4290_v58 = vsel %vm4287_vm10, %v4289_v14, %v4285_v1 }
0x31ab   : > { %v4338_v41 = vmul.f32 %v4336_v16, %v4290_v58  ;;  %v8524_v16 = vld [vmem:[%s9031_s5 + $0x2] sm:$0x3] }
0x31ad   : > { %4340 = vrot.lane.b32.xlu2 %v4338_v41, %s6752_s28 }
0x31ff   : > { %v4294_v30 = vpop.permute.xlu0 %4293 }
0x3200   : > { %v4296_v38 = vmul.f32 %v4294_v30, %v4290_v58 }
0x3202   : > { %4298 = vrot.lane.b32.xlu0 %v4296_v38, %s6752_s28 }
0x3207   : > { %v4341_v26 = vpop.permute.xlu2 %4340 }
0x3208   : > { %v4343_v0 = vadd.f32 %v4341_v26, %v4270_v51 }
0x320a   : > { %6406 = vtanh.f32 %v4343_v0  ;;  %4309 = vrot.lane.b32.xlu0 %v4182_v29, %s6753_s6 }
0x320b   : > { %6408 = vpow2.f32 %v6101_v55 }
0x3210   : > { %v6407_v48 = vpop.eup %6406 }
0x3211   : > { %4347 = vrot.lane.b32.xlu1 %v6407_v48, %s6754_s18  ;;  %v6409_v23 = vpop.eup %6408  ;;  %v4303_v48 = vsub.f32 1.0, %v4290_v58 }
0x3212   : > { %v4318_v6 = vadd.f32 1.0, %v6409_v23 }
0x3214   : > { %6410 = vrcp.f32 %v4318_v6  ;;  %v4330_v29 = vand.u32 2147483648, %v4318_v6  ;;  %vm4324_vm14 = vweird.f32 %v4318_v6  ;;  %v4328_v17 = vand.u32 2147483647, %v4318_v6 }
0x3216   : > { %v4331_v42 = vor.u32 1.1754944e-38, %v4330_v29  ;;  %vm4329_vm12 = vcmp.eq.f32.partialorder %v4328_v17, 8.507059e+37 }
0x321a   : > { %v6411_v5 = vpop.eup %6410 }
0x321b   : > { %v4320_v15 = vmul.f32 %v6411_v5, %v4318_v6  ;;  %vm4325_vm13 = vweird.f32 %v6411_v5 }
0x321c   : > { %vm4326_vm15 = vmor %vm4324_vm14, %vm4325_vm13 }
0x321d   : > { %v4321_v37 = vsub.f32 1.0, %v4320_v15 }
0x321f   : > { %v4322_v13 = vmul.f32 %v6411_v5, %v4321_v37 }
0x3221   : > { %v4323_v8 = vadd.f32 %v6411_v5, %v4322_v13 }
0x3223   : > { %v4327_v33 = vsel %vm4326_vm15, %v6411_v5, %v4323_v8 }
0x3224   : > { %v4332_v14 = vsel %vm4329_vm12, %v4331_v42, %v4327_v33  ;;  %vm4713_vm12 = vcmp.eq.s32.totalorder %v8317_v59, 11 }
0x3225   : > { %v4345_v1 = vsub.f32 1.0, %v4332_v14  ;;  %v4352_v30 = vmul.f32 %v4332_v14, %v8435_v46 }
0x3274   : > { %v4299_v36 = vpop.permute.xlu0 %4298 }
0x3275   : > { %v4301_v61 = vadd.f32 %v4299_v36, %v4207_v21  ;;  %v4402_v21 = vrot.slane %v8524_v16, 4 }
0x3277   : > { %6412 = vtanh.f32 %v4301_v61 }
0x327c   : > { %v4310_v50 = vpop.permute.xlu0 %4309 }
0x327d   : > { %v6413_v56 = vpop.eup %6412  ;;  %v4312_v23 = vmul.f32 %v4310_v50, %v4290_v58 }
0x327e   : > { %4305 = vrot.lane.b32.xlu2 %v6413_v56, %s6754_s18 }
0x3283   : > { %v4348_v41 = vpop.permute.xlu1 %4347 }
0x3284   : > { %v4350_v38 = vmul.f32 %v4348_v41, %v4345_v1 }
0x3286   : > { %v4353_v28 = vadd.f32 %v4352_v30, %v4350_v38  ;;  %4403 = vrot.lane.b32.xlu2 %v4402_v21, %s6753_s6 }
0x3288   : > { %4355 = vrot.lane.b32.xlu1 %v4353_v28, %s6753_s6  ;;  %v4499_v28 = vrot.slane %v8103_v34, 4 }
0x32d8   : > { %v4306_v51 = vpop.permute.xlu2 %4305 }
0x32d9   : > { %v4308_v55 = vmul.f32 %v4306_v51, %v4303_v48 }
0x32db   : > { %v4313_v6 = vadd.f32 %v4312_v23, %v4308_v55 }
0x32e0   : > { %v4404_v26 = vpop.permute.xlu2 %4403 }
0x32e1   : > { %v4406_v0 = vmul.f32 %v4404_v26, %v8103_v34 }
0x32e3   : > { %4408 = vrot.lane.b32.xlu1 %v4406_v0, %s6754_s18 }
0x32fa   : > { %v4356_v5 = vpop.permute.xlu1 %4355 }
0x32fb   : > { %v4358_v15 = vadd.f32 %v4356_v5, %v4313_v6 }
0x32fd   : > { %v4359_v46 = vperm.slane %v4358_v15, 0  ;;  %v4388_v37 = vmul.f32 %v4358_v15, %v8152_v22  ;;  %4362 = vrot.lane.b32.xlu2 %v4358_v15, %s6754_s18 }
0x32ff   : > { %v8537_v36 = vsel %vm9128_vm8, %v4359_v46, %v8360_v39  ;;  %4390 = vrot.lane.b32.xlu0 %v4388_v37, %s6754_s18 }
0x3355   : > { %v4409_v13 = vpop.permute.xlu1 %4408 }
0x3356   : > { %v4411_v61 = vsel %vm9129_vm9, %v4409_v13, 0.0 }
0x3357   : > { %4412 = vadd.xlane.f32.xlu1 %v4411_v61  ;;  %v4363_v58 = vpop.permute.xlu2 %4362 }
0x3358   : > { %6102 = vmatmul.msk.f32.vlgmr.msrb.gmra.mxu0 %vm813_vm1, %v4363_v58 }
0x3371   : > { %v4391_v8 = vpop.permute.xlu0 %4390 }
0x3372   : > { %v4393_v29 = vsel %vm1030_vm11, %v4391_v8, 0.0 }
0x3373   : > { %4394 = vadd.xlane.f32.xlu0 %v4393_v29 }
0x33ca   : > { %v4413_v14 = vpop.xlane.xlu1 %4412 }
0x33d5   : > { %v4383_v17 = vpop.f32.mrf.mxu0 }
0x33d6   : > { %v4386_v33 = vperm.slane %v4383_v17, 0 }
0x33d8   : > { %v8546_v39 = vsel %vm9130_vm2, %v4386_v33, %v8377_v35 }
0x33d9   : > { %4450 = vrot.lane.b32.xlu1 %v8546_v39, %s6754_s18  ;;  %4494 = vmatpush.msra.mxu2 %v8546_v39 }
0x33db   : > { %4579 = vmatpush.msrb.mxu2 %v8388_v47 }
0x33dd   : > { %4580 = vmatpush.msrb.mxu2 %v8394_v49 }
0x33df   : > { %4581 = vmatpush.msrb.mxu2 %v8400_v10 }
0x33e1   : > { %4582 = vmatpush.msrb.mxu2 %v8406_v3 }
0x33e6   : > { %v4395_v56 = vpop.xlane.xlu0 %4394 }
0x33e7   : > { %v8558_v42 = vsel %vm9131_vm7, %v4395_v56, %v8369_v60 }
0x33e8   : > { %v4415_v35 = vrot.slane %v8558_v42, 4 }
0x33ea   : > { %v4417_v1 = vadd.f32 %v4415_v35, %v4413_v14 }
0x33ec   : > { %v4418_v21 = vadd.f32 %v4417_v1, %v8202_v12 }
0x33ee   : > { %v4419_v41 = vsub.f32 %v4418_v21, %v7262_v43 }
0x33f0   : > { %v4420_v30 = vsel %vm9132_vm4, %v4419_v41, -1e+38 }
0x33f1   : > { %v4421_v38 = vsel %vm9133_vm0, %v4420_v30, -inf }
0x33f2   : > { %4422 = vmax.xlane.f32.xlu2 %v4421_v38 }
0x340a   : > { %4500 = vrot.lane.b32.xlu2 %v4499_v28, %s6754_s18 }
0x344b   : > { %v4451_v60 = vpop.permute.xlu1 %4450 }
0x344c   : > { %4470 = vmatpush.msra.mxu1 %v4451_v60 }
0x344e   : > { %4559 = vmatpush.msrb.mxu1 %v8414_v57 }
0x3450   : > { %4560 = vmatpush.msrb.mxu1 %v8420_v9 }
0x3452   : > { %4561 = vmatpush.msrb.mxu1 %v8426_v19 }
0x3454   : > { %4562 = vmatpush.msrb.mxu1 %v8432_v54 }
0x3465   : > { %v4423_v51 = vpop.xlane.xlu2 %4422 }
0x3466   : > { %v4424_v26 = vsub.f32 %v4420_v30, %v4423_v51  ;;  %v8604_v51 = vld [vmem:[#allocation7 + $0x30] sm:$0xff] }
0x3468   : > { %v4425_v0 = vmul.f32 1.442695, %v4424_v26  ;;  %v8607_v26 = vld [vmem:[#allocation7 + $0x28] sm:$0xff] }
0x346a   : > { %6414 = vpow2.f32 %v4425_v0  ;;  %v8610_v0 = vld [vmem:[#allocation7 + $0x20] sm:$0xff] }
0x346d   : > { %v8572_v48 = vpop.permute.xlu2 %4500 }
0x346e   : > { %6105 = vmatmul.msk.f32.vlgmr.msra.gmra.mxu3 %vm813_vm1, %v8572_v48  ;;  %6106 = vmatmul.msk.f32.vlgmr.msra.gmra.mxu0 %vm813_vm1, %v8572_v48 }
0x346f   : > { %4851 = vmatpush.msra.mxu3 %v8444_v25 }
0x3470   : > { %v6415_v50 = vpop.eup %6414 }
0x3471   : > { %v4427_v55 = vsel %vm9134_vm3, %v6415_v50, 0.0  ;;  %4852 = vmatpush.msra.mxu3 %v8451_v63 }
0x3472   : > { %4428 = vadd.xlane.f32.xlu0 %v4427_v55 }
0x3473   : > { %4853 = vmatpush.msra.mxu3 %v8457_v4 }
0x3475   : > { %4854 = vmatpush.msra.mxu3 %v8463_v20 }
0x34e5   : > { %v4429_v23 = vpop.xlane.xlu0 %4428 }
0x34e6   : > { %6416 = vrcp.f32 %v4429_v23  ;;  %v4441_v13 = vand.u32 2147483648, %v4429_v23  ;;  %v4439_v58 = vand.u32 2147483647, %v4429_v23  ;;  %vm4435_vm13 = vweird.f32 %v4429_v23 }
0x34e8   : > { %v4442_v29 = vor.u32 1.1754944e-38, %v4441_v13  ;;  %vm4440_vm15 = vcmp.eq.f32.partialorder %v4439_v58, 8.507059e+37 }
0x34eb   : > { %v4541_v6 = vpop.f32.mrf.mxu0 }
0x34ec   : > { %v6417_v5 = vpop.eup %6416  ;;  %v8584_v15 = vadd.f32 %v4541_v6, %v8123_v11 }
0x34ed   : > { %v4431_v46 = vmul.f32 %v6417_v5, %v4429_v23  ;;  %vm4436_vm10 = vweird.f32 %v6417_v5 }
0x34ee   : > { %4650 = vrot.lane.b32.xlu0 %v8584_v15, %s6752_s28  ;;  %vm4437_vm14 = vmor %vm4435_vm13, %vm4436_vm10  ;;  %vm9135_vm13 = vcmp.eq.s32.totalorder %v7235_v24, 4 }
0x34ef   : > { %v4432_v37 = vsub.f32 1.0, %v4431_v46 }
0x34f1   : > { %v4433_v61 = vmul.f32 %v6417_v5, %v4432_v37 }
0x34f3   : > { %v4434_v8 = vadd.f32 %v6417_v5, %v4433_v61 }
0x34f5   : > { %v4438_v17 = vsel %vm4437_vm14, %v6417_v5, %v4434_v8  ;;  %vm9136_vm14 = vcmask 259077  }
0x34f6   : > { %v4443_v33 = vsel %vm4440_vm15, %v4442_v29, %v4438_v17  ;;  %vm9137_vm15 = vmmov %vm9135_vm13 }
0x34f7   : > { %v4444_v56 = vmul.f32 %v6415_v50, %v4443_v33  ;;  %v4521_v50 = vpop.f32.mrf.mxu3 }
0x34f8   : > { %v4522_v23 = vadd.f32 %v4521_v50, %v8127_v18 }
0x34f9   : > { %v4714_v35 = vperm.slane %v4444_v56, 4  ;;  %v4445_v14 = vmul.f32 %v8473_v2, %v4444_v56 }
0x34fb   : > { %v8591_v1 = vsel %vm4713_vm12, %v4714_v35, %v8477_v7  ;;  %v4476_v21 = vrot.slane %v4445_v14, 4  ;;  %v4446_v41 = vsub.f32 %v4444_v56, %v4445_v14  ;;  %v8601_v7 = vld [vmem:[#allocation7 + $0x38] sm:$0xff]  ;;  %vm9138_vm12 = vcmp.eq.s32.totalorder %v7247_v31, 4 }
0x34fd   : > { %6104 = vmatmul.msk.f32.vlgmr.msra.gmra.mxu2 %vm1092_vm6, %v4476_v21  ;;  %v4448_v30 = vrot.slane %v4446_v41, 4 }
0x34fe   : > { %4831 = vmatpush.msra.mxu2 %v8483_v53 }
0x34ff   : > { %6103 = vmatmul.msk.f32.vlgmr.msra.gmra.mxu1 %vm1092_vm6, %v4448_v30 }
0x3500   : > { %4832 = vmatpush.msra.mxu2 %v8490_v44 }
0x3502   : > { %4833 = vmatpush.msra.mxu2 %v8496_v45 }
0x3504   : > { %4834 = vmatpush.msra.mxu2 %v8502_v32 }
0x3560   : > { %v4651_v21 = vpop.permute.xlu0 %4650 }
0x357c   : > { %v4472_v38 = vpop.f32.mrf.mxu1 }
0x3580   : > { %v4496_v28 = vpop.f32.mrf.mxu2 }
0x3581   : > { %v4497_v60 = vadd.f32 %v4496_v28, %v4472_v38 }
0x3583   : > { %6107 = vmatmul.msk.f32.vlgmr.msrb.gmra.mxu1 %vm813_vm1, %v4497_v60  ;;  %6108 = vmatmul.msk.f32.vlgmr.msrb.gmra.mxu2 %vm813_vm1, %v4497_v60 }
0x3584   : > { %5008 = vmatpush.msrb.mxu2 %v8601_v7 }
0x3586   : > { %5009 = vmatpush.msrb.mxu2 %v8604_v51 }
0x3588   : > { %5010 = vmatpush.msrb.mxu2 %v8607_v26 }
0x358a   : > { %5011 = vmatpush.msrb.mxu2 %v8610_v0 }
0x3600   : > { %v4564_v55 = vpop.f32.mrf.mxu1 }
0x3601   : > { %v4565_v6 = vadd.f32 %v4564_v55, %v8110_v62 }
0x3603   : > { %v4587_v5 = vadd.f32 %v4565_v6, %v4522_v23  ;;  %4608 = vrot.lane.b32.xlu1 %v4565_v6, %s6752_s28 }
0x3605   : > { %v6109_v46 = vmul.f32 -1.442695, %v4587_v5 }
0x3606   : > { %v4584_v50 = vpop.f32.mrf.mxu2 }
0x3607   : > { %6418 = vpow2.f32 %v6109_v46  ;;  %v4585_v55 = vadd.f32 %v4584_v50, %v8140_v52 }
0x360d   : > { %v6419_v37 = vpop.eup %6418 }
0x360e   : > { %v4591_v13 = vadd.f32 1.0, %v6419_v37 }
0x3610   : > { %6420 = vrcp.f32 %v4591_v13  ;;  %v4603_v29 = vand.u32 2147483648, %v4591_v13  ;;  %v4601_v33 = vand.u32 2147483647, %v4591_v13  ;;  %vm4597_vm9 = vweird.f32 %v4591_v13 }
0x3612   : > { %v4604_v35 = vor.u32 1.1754944e-38, %v4603_v29  ;;  %vm4602_vm7 = vcmp.eq.f32.partialorder %v4601_v33, 8.507059e+37 }
0x3616   : > { %v6421_v61 = vpop.eup %6420 }
0x3617   : > { %v4593_v58 = vmul.f32 %v6421_v61, %v4591_v13  ;;  %vm4598_vm8 = vweird.f32 %v6421_v61 }
0x3618   : > { %vm4599_vm2 = vmor %vm4597_vm9, %vm4598_vm8  ;;  %vm9139_vm8 = vcmp.lt.s32.totalorder %v7247_v31, 5  ;;  %vm9140_vm9 = vcmask 62469  }
0x3619   : > { %v4594_v8 = vsub.f32 1.0, %v4593_v58  ;;  %v4629_v58 = vadd.f32 %v4585_v55, %v8584_v15 }
0x361b   : > { %v4595_v17 = vmul.f32 %v6421_v61, %v4594_v8  ;;  %v6110_v8 = vmul.f32 -1.442695, %v4629_v58 }
0x361d   : > { %v4596_v56 = vadd.f32 %v6421_v61, %v4595_v17 }
0x361f   : > { %v4600_v14 = vsel %vm4599_vm2, %v6421_v61, %v4596_v56  ;;  %vm9141_vm2 = vmmov %vm9140_vm9 }
0x3620   : > { %v4605_v41 = vsel %vm4602_vm7, %v4604_v35, %v4600_v14 }
0x3621   : > { %v4653_v30 = vmul.f32 %v4651_v21, %v4605_v41  ;;  %v4618_v58 = vsub.f32 1.0, %v4605_v41 }
0x3623   : > { %4655 = vrot.lane.b32.xlu0 %v4653_v30, %s6752_s28 }
0x3675   : > { %v4609_v38 = vpop.permute.xlu1 %4608 }
0x3676   : > { %v4611_v28 = vmul.f32 %v4609_v38, %v4605_v41 }
0x3678   : > { %4613 = vrot.lane.b32.xlu2 %v4611_v28, %s6752_s28 }
0x3680   : > { %4624 = vrot.lane.b32.xlu2 %v4497_v60, %s6753_s6  ;;  %v4717_v60 = vrot.slane %v8524_v16, 3 }
0x3695   : > { %v4656_v6 = vpop.permute.xlu0 %4655 }
0x3696   : > { %v4658_v5 = vadd.f32 %v4656_v6, %v4585_v55 }
0x3698   : > { %6422 = vtanh.f32 %v4658_v5 }
0x369e   : > { %v6423_v46 = vpop.eup %6422 }
0x369f   : > { %4662 = vrot.lane.b32.xlu1 %v6423_v46, %s6754_s18 }
0x36d2   : > { %v4614_v37 = vpop.permute.xlu2 %4613 }
0x36d3   : > { %v4616_v13 = vadd.f32 %v4614_v37, %v4522_v23 }
0x36d5   : > { %6424 = vtanh.f32 %v4616_v13 }
0x36d6   : > { %6426 = vpow2.f32 %v6110_v8 }
0x36da   : > { %v4625_v8 = vpop.permute.xlu2 %4624 }
0x36db   : > { %v6425_v61 = vpop.eup %6424 }
0x36dc   : > { %4620 = vrot.lane.b32.xlu0 %v6425_v61, %s6754_s18  ;;  %v6427_v29 = vpop.eup %6426 }
0x36dd   : > { %v4633_v17 = vadd.f32 1.0, %v6427_v29  ;;  %v4627_v29 = vmul.f32 %v4625_v8, %v4605_v41 }
0x36df   : > { %6428 = vrcp.f32 %v4633_v17  ;;  %v4645_v21 = vand.u32 2147483648, %v4633_v17  ;;  %vm4639_vm0 = vweird.f32 %v4633_v17  ;;  %v4643_v15 = vand.u32 2147483647, %v4633_v17 }
0x36e1   : > { %v4646_v38 = vor.u32 1.1754944e-38, %v4645_v21  ;;  %vm4644_vm10 = vcmp.eq.f32.partialorder %v4643_v15, 8.507059e+37 }
0x36e4   : > { %4718 = vrot.lane.b32.xlu0 %v4717_v60, %s6753_s6 }
0x36e5   : > { %v6429_v33 = vpop.eup %6428 }
0x36e6   : > { %v4635_v56 = vmul.f32 %v6429_v33, %v4633_v17  ;;  %vm4640_vm4 = vweird.f32 %v6429_v33 }
0x36e7   : > { %vm4641_vm3 = vmor %vm4639_vm0, %vm4640_vm4 }
0x36e8   : > { %v4636_v35 = vsub.f32 1.0, %v4635_v56 }
0x36ea   : > { %v4637_v14 = vmul.f32 %v6429_v33, %v4636_v35 }
0x36ec   : > { %v4638_v23 = vadd.f32 %v6429_v33, %v4637_v14 }
0x36ee   : > { %v4642_v30 = vsel %vm4641_vm3, %v6429_v33, %v4638_v23 }
0x36ef   : > { %v4647_v28 = vsel %vm4644_vm10, %v4646_v38, %v4642_v30  ;;  %vm5028_vm10 = vcmp.eq.s32.totalorder %v8317_v59, 12 }
0x36f0   : > { %v4660_v50 = vsub.f32 1.0, %v4647_v28  ;;  %v4667_v6 = vmul.f32 %v4647_v28, %v8572_v48 }
0x3711   : > { %v4663_v55 = vpop.permute.xlu1 %4662 }
0x3712   : > { %v4665_v5 = vmul.f32 %v4663_v55, %v4660_v50 }
0x3714   : > { %v4668_v46 = vadd.f32 %v4667_v6, %v4665_v5 }
0x3716   : > { %4670 = vrot.lane.b32.xlu1 %v4668_v46, %s6753_s6 }
0x374e   : > { %v4621_v37 = vpop.permute.xlu0 %4620 }
0x374f   : > { %v4623_v60 = vmul.f32 %v4621_v37, %v4618_v58 }
0x3751   : > { %v4628_v17 = vadd.f32 %v4627_v29, %v4623_v60 }
0x3756   : > { %v4719_v13 = vpop.permute.xlu0 %4718 }
0x3757   : > { %v4721_v61 = vmul.f32 %v4719_v13, %v8103_v34 }
0x3759   : > { %4723 = vrot.lane.b32.xlu0 %v4721_v61, %s6754_s18 }
0x3788   : > { %v4671_v33 = vpop.permute.xlu1 %4670 }
0x3789   : > { %v4673_v56 = vadd.f32 %v4671_v33, %v4628_v17 }
0x378b   : > { %v4674_v35 = vperm.slane %v4673_v56, 0  ;;  %v4703_v48 = vmul.f32 %v4673_v56, %v8152_v22  ;;  %4677 = vrot.lane.b32.xlu2 %v4673_v56, %s6754_s18 }
0x378d   : > { %v8634_v14 = vsel %vm9135_vm13, %v4674_v35, %v8537_v36  ;;  %4705 = vrot.lane.b32.xlu1 %v4703_v48, %s6754_s18 }
0x37cb   : > { %v4724_v23 = vpop.permute.xlu0 %4723 }
0x37cc   : > { %v4726_v21 = vsel %vm9136_vm14, %v4724_v23, 0.0 }
0x37cd   : > { %4727 = vadd.xlane.f32.xlu1 %v4726_v21 }
0x37e5   : > { %v4678_v41 = vpop.permute.xlu2 %4677 }
0x37e6   : > { %6111 = vmatmul.msk.f32.vlgmr.msrb.gmra.mxu3 %vm813_vm1, %v4678_v41 }
0x37ff   : > { %v4706_v15 = vpop.permute.xlu1 %4705 }
0x3800   : > { %v4708_v30 = vsel %vm1030_vm11, %v4706_v15, 0.0 }
0x3801   : > { %4709 = vadd.xlane.f32.xlu2 %v4708_v30 }
0x3840   : > { %v4728_v6 = vpop.xlane.xlu1 %4727 }
0x3869   : > { %v4698_v38 = vpop.f32.mrf.mxu3 }
0x386a   : > { %v4701_v28 = vperm.slane %v4698_v38, 0 }
0x386c   : > { %v8643_v36 = vsel %vm9137_vm15, %v4701_v28, %v8546_v39 }
0x386d   : > { %4809 = vmatpush.msra.mxu1 %v8643_v36  ;;  %4765 = vrot.lane.b32.xlu1 %v8643_v36, %s6754_s18 }
0x386f   : > { %4894 = vmatpush.msrb.mxu1 %v8388_v47 }
0x3871   : > { %4895 = vmatpush.msrb.mxu1 %v8394_v49 }
0x3873   : > { %4896 = vmatpush.msrb.mxu1 %v8400_v10 }
0x3874   : > { %v4710_v50 = vpop.xlane.xlu2 %4709 }
0x3875   : > { %4897 = vmatpush.msrb.mxu1 %v8406_v3  ;;  %v8655_v55 = vsel %vm9138_vm12, %v4710_v50, %v8558_v42  ;;  %v4814_v3 = vrot.slane %v8103_v34, 5 }
0x3876   : > { %v4730_v39 = vrot.slane %v8655_v55, 3 }
0x3878   : > { %v4732_v5 = vadd.f32 %v4730_v39, %v4728_v6 }
0x387a   : > { %v4733_v46 = vadd.f32 %v4732_v5, %v8202_v12 }
0x387c   : > { %v4734_v47 = vsub.f32 %v4733_v46, %v7262_v43 }
0x387e   : > { %v4735_v49 = vsel %vm9139_vm8, %v4734_v47, -1e+38 }
0x387f   : > { %v4736_v10 = vsel %vm9140_vm9, %v4735_v49, -inf }
0x3880   : > { %4737 = vmax.xlane.f32.xlu0 %v4736_v10 }
0x3894   : > { %4815 = vrot.lane.b32.xlu0 %v4814_v3, %s6754_s18 }
0x38df   : > { %v4766_v42 = vpop.permute.xlu1 %4765 }
0x38e0   : > { %4785 = vmatpush.msrb.mxu0 %v4766_v42 }
0x38e2   : > { %4874 = vmatpush.msra.mxu0 %v8414_v57 }
0x38e4   : > { %4875 = vmatpush.msra.mxu0 %v8420_v9 }
0x38e6   : > { %4876 = vmatpush.msra.mxu0 %v8426_v19 }
0x38e8   : > { %4877 = vmatpush.msra.mxu0 %v8432_v54 }
0x38f3   : > { %v4738_v37 = vpop.xlane.xlu0 %4737 }
0x38f4   : > { %v4739_v13 = vsub.f32 %v4735_v49, %v4738_v37 }
0x38f6   : > { %v4740_v61 = vmul.f32 1.442695, %v4739_v13 }
0x38f8   : > { %6430 = vpow2.f32 %v4740_v61 }
0x38fe   : > { %v6431_v58 = vpop.eup %6430 }
0x38ff   : > { %v4742_v8 = vsel %vm9141_vm2, %v6431_v58, 0.0 }
0x3900   : > { %4743 = vadd.xlane.f32.xlu2 %v4742_v8 }
0x3906   : > { %v8670_v60 = vpop.permute.xlu0 %4815 }
0x3907   : > { %6114 = vmatmul.msk.f32.vlgmr.msra.gmra.mxu2 %vm813_vm1, %v8670_v60  ;;  %6115 = vmatmul.msk.f32.vlgmr.msra.gmra.mxu3 %vm813_vm1, %v8670_v60 }
0x3908   : > { %5166 = vmatpush.msra.mxu2 %v8444_v25 }
0x390a   : > { %5167 = vmatpush.msra.mxu2 %v8451_v63 }
0x390c   : > { %5168 = vmatpush.msra.mxu2 %v8457_v4 }
0x390e   : > { %5169 = vmatpush.msra.mxu2 %v8463_v20 }
0x3973   : > { %v4744_v57 = vpop.xlane.xlu2 %4743 }
0x3974   : > { %6432 = vrcp.f32 %v4744_v57  ;;  %v4756_v29 = vand.u32 2147483648, %v4744_v57  ;;  %v4754_v33 = vand.u32 2147483647, %v4744_v57  ;;  %vm4750_vm4 = vweird.f32 %v4744_v57 }
0x3976   : > { %v4757_v35 = vor.u32 1.1754944e-38, %v4756_v29  ;;  %vm4755_vm3 = vcmp.eq.f32.partialorder %v4754_v33, 8.507059e+37 }
0x397a   : > { %v6433_v9 = vpop.eup %6432 }
0x397b   : > { %v4746_v19 = vmul.f32 %v6433_v9, %v4744_v57  ;;  %vm4751_vm7 = vweird.f32 %v6433_v9 }
0x397c   : > { %vm4752_vm0 = vmor %vm4750_vm4, %vm4751_vm7  ;;  %vm9142_vm4 = vcmp.eq.s32.totalorder %v7235_v24, 5 }
0x397d   : > { %v4747_v54 = vsub.f32 1.0, %v4746_v19 }
0x397f   : > { %v4748_v17 = vmul.f32 %v6433_v9, %v4747_v54 }
0x3981   : > { %v4749_v56 = vadd.f32 %v6433_v9, %v4748_v17 }
0x3983   : > { %v4753_v25 = vsel %vm4752_vm0, %v6433_v9, %v4749_v56  ;;  %vm9143_vm0 = vcmask 260102  }
0x3984   : > { %v4758_v63 = vsel %vm4755_vm3, %v4757_v35, %v4753_v25  ;;  %v5032_v25 = vrot.slane %v8524_v16, 2  ;;  %vm9144_vm3 = vmmov %vm9142_vm4 }
0x3985   : > { %v4759_v48 = vmul.f32 %v6431_v58, %v4758_v63 }
0x3987   : > { %v5029_v4 = vperm.slane %v4759_v48, 5  ;;  %v4760_v20 = vmul.f32 %v8473_v2, %v4759_v48 }
0x3989   : > { %v8683_v23 = vsel %vm5028_vm10, %v5029_v4, %v8591_v1  ;;  %v4791_v21 = vrot.slane %v4760_v20, 5  ;;  %v4761_v41 = vsub.f32 %v4759_v48, %v4760_v20  ;;  %vm9145_vm10 = vcmp.eq.s32.totalorder %v7247_v31, 5 }
0x398a   : > { %v4856_v15 = vpop.f32.mrf.mxu3 }
0x398b   : > { %v4857_v30 = vadd.f32 %v4856_v15, %v8123_v11  ;;  %6113 = vmatmul.msk.f32.vlgmr.msra.gmra.mxu1 %vm1092_vm6, %v4791_v21  ;;  %v4763_v38 = vrot.slane %v4761_v41, 5 }
0x398c   : > { %5146 = vmatpush.msra.mxu1 %v8483_v53  ;;  %v4836_v53 = vpop.f32.mrf.mxu2 }
0x398d   : > { %4965 = vrot.lane.b32.xlu2 %v4857_v30, %s6752_s28  ;;  %6112 = vmatmul.msk.f32.vlgmr.msrb.gmra.mxu0 %vm1092_vm6, %v4763_v38 }
0x398e   : > { %5147 = vmatpush.msra.mxu1 %v8490_v44 }
0x3990   : > { %5148 = vmatpush.msra.mxu1 %v8496_v45  ;;  %v4837_v45 = vadd.f32 %v4836_v53, %v8127_v18 }
0x3992   : > { %5149 = vmatpush.msra.mxu1 %v8502_v32 }
0x39e7   : > { %v4966_v42 = vpop.permute.xlu2 %4965 }
0x3a08   : > { %v4811_v2 = vpop.f32.mrf.mxu1 }
0x3a0a   : > { %v4787_v1 = vpop.f32.mrf.mxu0 }
0x3a0b   : > { %v4812_v28 = vadd.f32 %v4811_v2, %v4787_v1 }
0x3a0d   : > { %6116 = vmatmul.msk.f32.vlgmr.msra.gmra.mxu0 %vm813_vm1, %v4812_v28  ;;  %6117 = vmatmul.msk.f32.vlgmr.msrb.gmra.mxu1 %vm813_vm1, %v4812_v28 }
0x3a0e   : > { %5323 = vmatpush.msrb.mxu1 %v8601_v7 }
0x3a10   : > { %5324 = vmatpush.msrb.mxu1 %v8604_v51 }
0x3a12   : > { %5325 = vmatpush.msrb.mxu1 %v8607_v26 }
0x3a14   : > { %5326 = vmatpush.msrb.mxu1 %v8610_v0 }
0x3a8a   : > { %v4879_v44 = vpop.f32.mrf.mxu0  ;;  %v4899_v8 = vpop.f32.mrf.mxu1 }
0x3a8b   : > { %v4880_v32 = vadd.f32 %v4879_v44, %v8110_v62  ;;  %v4900_v57 = vadd.f32 %v4899_v8, %v8140_v52 }
0x3a8d   : > { %v4902_v50 = vadd.f32 %v4880_v32, %v4837_v45  ;;  %4923 = vrot.lane.b32.xlu0 %v4880_v32, %s6752_s28  ;;  %v4944_v56 = vadd.f32 %v4900_v57, %v4857_v30 }
0x3a8f   : > { %v6118_v39 = vmul.f32 -1.442695, %v4902_v50  ;;  %v6119_v35 = vmul.f32 -1.442695, %v4944_v56 }
0x3a91   : > { %6434 = vpow2.f32 %v6118_v39 }
0x3a97   : > { %v6435_v6 = vpop.eup %6434 }
0x3a98   : > { %v4906_v5 = vadd.f32 1.0, %v6435_v6 }
0x3a9a   : > { %6436 = vrcp.f32 %v4906_v5  ;;  %v4918_v26 = vand.u32 2147483648, %v4906_v5  ;;  %v4916_v0 = vand.u32 2147483647, %v4906_v5  ;;  %vm4912_vm14 = vweird.f32 %v4906_v5 }
0x3a9c   : > { %v4919_v10 = vor.u32 1.1754944e-38, %v4918_v26  ;;  %vm4917_vm12 = vcmp.eq.f32.partialorder %v4916_v0, 8.507059e+37 }
0x3aa0   : > { %v6437_v7 = vpop.eup %6436 }
0x3aa1   : > { %v4908_v51 = vmul.f32 %v6437_v7, %v4906_v5  ;;  %vm4913_vm13 = vweird.f32 %v6437_v7 }
0x3aa2   : > { %vm4914_vm15 = vmor %vm4912_vm14, %vm4913_vm13  ;;  %vm9146_vm13 = vcmp.lt.s32.totalorder %v7247_v31, 6  ;;  %vm9147_vm14 = vcmask 63494  }
0x3aa3   : > { %v4909_v46 = vsub.f32 1.0, %v4908_v51 }
0x3aa5   : > { %v4910_v47 = vmul.f32 %v6437_v7, %v4909_v46 }
0x3aa7   : > { %v4911_v49 = vadd.f32 %v6437_v7, %v4910_v47 }
0x3aa9   : > { %v4915_v3 = vsel %vm4914_vm15, %v6437_v7, %v4911_v49  ;;  %vm9148_vm15 = vmmov %vm9147_vm14 }
0x3aaa   : > { %v4920_v37 = vsel %vm4917_vm12, %v4919_v10, %v4915_v3 }
0x3aab   : > { %v4968_v13 = vmul.f32 %v4966_v42, %v4920_v37  ;;  %v4933_v5 = vsub.f32 1.0, %v4920_v37 }
0x3aad   : > { %4970 = vrot.lane.b32.xlu1 %v4968_v13, %s6752_s28 }
0x3aff   : > { %v4924_v61 = vpop.permute.xlu0 %4923 }
0x3b00   : > { %v4926_v58 = vmul.f32 %v4924_v61, %v4920_v37 }
0x3b02   : > { %4928 = vrot.lane.b32.xlu2 %v4926_v58, %s6752_s28 }
0x3b0a   : > { %4939 = vrot.lane.b32.xlu2 %v4812_v28, %s6753_s6 }
0x3b1f   : > { %v4971_v9 = vpop.permute.xlu1 %4970 }
0x3b20   : > { %v4973_v19 = vadd.f32 %v4971_v9, %v4900_v57  ;;  %v8742_v9 = vld [vmem:[%s9035_s9 + $0x68] sm:$0xff] }
0x3b22   : > { %6438 = vtanh.f32 %v4973_v19 }
0x3b28   : > { %v6439_v54 = vpop.eup %6438 }
0x3b29   : > { %4977 = vrot.lane.b32.xlu0 %v6439_v54, %s6754_s18  ;;  %v8754_v54 = vld [vmem:[%s9035_s9 + $0x48] sm:$0xff] }
0x3b5c   : > { %v4929_v29 = vpop.permute.xlu2 %4928 }
0x3b5d   : > { %v4931_v17 = vadd.f32 %v4929_v29, %v4837_v45 }
0x3b5f   : > { %6440 = vtanh.f32 %v4931_v17 }
0x3b60   : > { %6442 = vpow2.f32 %v6119_v35 }
0x3b64   : > { %v4940_v7 = vpop.permute.xlu2 %4939 }
0x3b65   : > { %v6441_v33 = vpop.eup %6440  ;;  %v4942_v46 = vmul.f32 %v4940_v7, %v4920_v37  ;;  %v6544_v7 = vld [vmem:[%s9034_s8 + $0x68] sm:$0xff] }
0x3b66   : > { %4935 = vrot.lane.b32.xlu1 %v6441_v33, %s6754_s18  ;;  %v6443_v63 = vpop.eup %6442 }
0x3b67   : > { %v4948_v48 = vadd.f32 1.0, %v6443_v63 }
0x3b69   : > { %6444 = vrcp.f32 %v4948_v48  ;;  %v4960_v38 = vand.u32 2147483648, %v4948_v48  ;;  %vm4954_vm9 = vweird.f32 %v4948_v48  ;;  %v4958_v30 = vand.u32 2147483647, %v4948_v48 }
0x3b6b   : > { %v4961_v1 = vor.u32 1.1754944e-38, %v4960_v38  ;;  %vm4959_vm7 = vcmp.eq.f32.partialorder %v4958_v30, 8.507059e+37 }
0x3b6e   : > { %5033 = vrot.lane.b32.xlu1 %v5032_v25, %s6753_s6 }
0x3b6f   : > { %v6445_v4 = vpop.eup %6444 }
0x3b70   : > { %v4950_v20 = vmul.f32 %v6445_v4, %v4948_v48  ;;  %vm4955_vm8 = vweird.f32 %v6445_v4 }
0x3b71   : > { %vm4956_vm2 = vmor %vm4954_vm9, %vm4955_vm8 }
0x3b72   : > { %v4951_v21 = vsub.f32 1.0, %v4950_v20  ;;  %v8777_v20 = vld [vmem:[%s9035_s9 + $0x60] sm:$0xff] }
0x3b74   : > { %v4952_v41 = vmul.f32 %v6445_v4, %v4951_v21  ;;  %v8783_v21 = vld [vmem:[%s9035_s9 + $0x50] sm:$0xff] }
0x3b76   : > { %v4953_v15 = vadd.f32 %v6445_v4, %v4952_v41  ;;  %v8789_v41 = vld [vmem:[%s9035_s9 + $0x40] sm:$0xff] }
0x3b78   : > { %v4957_v2 = vsel %vm4956_vm2, %v6445_v4, %v4953_v15 }
0x3b79   : > { %v4962_v16 = vsel %vm4959_vm7, %v4961_v1, %v4957_v2  ;;  %vm5343_vm7 = vcmp.eq.s32.totalorder %v8317_v59, 13 }
0x3b7a   : > { %v4975_v28 = vsub.f32 1.0, %v4962_v16  ;;  %v4982_v44 = vmul.f32 %v4962_v16, %v8670_v60  ;;  %v5129_v16 = vrot.slane %v8103_v34, 6 }
0x3b9b   : > { %v4978_v53 = vpop.permute.xlu0 %4977 }
0x3b9c   : > { %v4980_v45 = vmul.f32 %v4978_v53, %v4975_v28 }
0x3b9e   : > { %v4983_v32 = vadd.f32 %v4982_v44, %v4980_v45 }
0x3ba0   : > { %4985 = vrot.lane.b32.xlu0 %v4983_v32, %s6753_s6 }
0x3bd8   : > { %v4936_v50 = vpop.permute.xlu1 %4935 }
0x3bd9   : > { %v4938_v51 = vmul.f32 %v4936_v50, %v4933_v5  ;;  %v6543_v50 = vld [vmem:[%s9034_s8 + $0x78] sm:$0xff] }
0x3bdb   : > { %v4943_v26 = vadd.f32 %v4942_v46, %v4938_v51  ;;  %v6545_v46 = vld [vmem:[%s9034_s8 + $0x58] sm:$0xff] }
0x3be0   : > { %v5034_v39 = vpop.permute.xlu1 %5033 }
0x3be1   : > { %v5036_v6 = vmul.f32 %v5034_v39, %v8103_v34 }
0x3be3   : > { %5038 = vrot.lane.b32.xlu1 %v5036_v6, %s6754_s18 }
0x3c12   : > { %v4986_v47 = vpop.permute.xlu0 %4985 }
0x3c13   : > { %v4988_v0 = vadd.f32 %v4986_v47, %v4943_v26 }
0x3c15   : > { %v4989_v49 = vperm.slane %v4988_v0, 0  ;;  %v5018_v60 = vmul.f32 %v4988_v0, %v8152_v22  ;;  %4992 = vrot.lane.b32.xlu2 %v4988_v0, %s6754_s18  ;;  %v6546_v0 = vld [vmem:[%s9034_s8 + $0x48] sm:$0xff] }
0x3c17   : > { %5020 = vrot.lane.b32.xlu0 %v5018_v60, %s6754_s18  ;;  %v8720_v10 = vsel %vm9142_vm4, %v4989_v49, %v8634_v14  ;;  %v8736_v14 = vld [vmem:[%s9035_s9 + $0x78] sm:$0xff] }
0x3c55   : > { %v5039_v3 = vpop.permute.xlu1 %5038 }
0x3c56   : > { %v5041_v42 = vsel %vm9143_vm0, %v5039_v3, 0.0 }
0x3c57   : > { %5042 = vadd.xlane.f32.xlu0 %v5041_v42  ;;  %v8815_v42 = vld [vmem:[%s7014_s22] sm:$0xff]  ;;  %s9160_s22 = sld [smem:[#allocation24_spill]] }
0x3c6f   : > { %v4993_v37 = vpop.permute.xlu2 %4992 }
0x3c70   : > { %6120 = vmatmul.msk.f32.vlgmr.msrb.gmra.mxu2 %vm813_vm1, %v4993_v37 }
0x3c89   : > { %v5021_v13 = vpop.permute.xlu0 %5020 }
0x3c8a   : > { %v5023_v61 = vsel %vm1030_vm11, %v5021_v13, 0.0 }
0x3c8b   : > { %5024 = vadd.xlane.f32.xlu2 %v5023_v61 }
0x3cca   : > { %v5043_v33 = vpop.xlane.xlu0 %5042 }
0x3cf3   : > { %v5013_v58 = vpop.f32.mrf.mxu2 }
0x3cf4   : > { %v5016_v8 = vperm.slane %v5013_v58, 0 }
0x3cf6   : > { %v8728_v57 = vsel %vm9144_vm3, %v5016_v8, %v8643_v36  ;;  %v8748_v36 = vld [vmem:[%s9035_s9 + $0x58] sm:$0xff] }
0x3cf7   : > { %5124 = vmatpush.msrb.mxu0 %v8728_v57  ;;  %5080 = vrot.lane.b32.xlu0 %v8728_v57, %s6754_s18 }
0x3cf9   : > { %5209 = vmatpush.msra.mxu0 %v8736_v14 }
0x3cfb   : > { %5210 = vmatpush.msra.mxu0 %v8742_v9 }
0x3cfd   : > { %5211 = vmatpush.msra.mxu0 %v8748_v36 }
0x3cfe   : > { %v5025_v19 = vpop.xlane.xlu2 %5024 }
0x3cff   : > { %5212 = vmatpush.msra.mxu0 %v8754_v54  ;;  %v8760_v29 = vsel %vm9145_vm10, %v5025_v19, %v8655_v55  ;;  %v8771_v55 = vld [vmem:[%s9035_s9 + $0x70] sm:$0xff] }
0x3d00   : > { %v5045_v17 = vrot.slane %v8760_v29, 2  ;;  %v6548_v19 = vld [vmem:[%s9034_s8 + $0x70] sm:$0xff] }
0x3d02   : > { %v5047_v56 = vadd.f32 %v5045_v17, %v5043_v33  ;;  %v6549_v17 = vld [vmem:[%s9034_s8 + $0x60] sm:$0xff] }
0x3d03   : > { %v6551_v33 = vld [vmem:[%s9034_s8 + $0x40] sm:$0xff] }
0x3d04   : > { %v5048_v35 = vadd.f32 %v5047_v56, %v8202_v12 }
0x3d06   : > { %v5049_v25 = vsub.f32 %v5048_v35, %v7262_v43 }
0x3d08   : > { %v5050_v63 = vsel %vm9146_vm13, %v5049_v25, -1e+38 }
0x3d09   : > { %v5051_v48 = vsel %vm9147_vm14, %v5050_v63, -inf }
0x3d0a   : > { %5052 = vmax.xlane.f32.xlu1 %v5051_v48 }
0x3d69   : > { %v5081_v4 = vpop.permute.xlu0 %5080 }
0x3d6a   : > { %5100 = vmatpush.msrb.mxu3 %v5081_v4 }
0x3d6c   : > { %5189 = vmatpush.msra.mxu3 %v8771_v55 }
0x3d6e   : > { %5190 = vmatpush.msra.mxu3 %v8777_v20 }
0x3d70   : > { %5191 = vmatpush.msra.mxu3 %v8783_v21 }
0x3d72   : > { %5192 = vmatpush.msra.mxu3 %v8789_v41 }
0x3d7d   : > { %v5053_v15 = vpop.xlane.xlu1 %5052 }
0x3d7e   : > { %v5054_v38 = vsub.f32 %v5050_v63, %v5053_v15 }
0x3d80   : > { %v5055_v30 = vmul.f32 1.442695, %v5054_v38 }
0x3d82   : > { %6446 = vpow2.f32 %v5055_v30 }
0x3d88   : > { %v6447_v2 = vpop.eup %6446 }
0x3d89   : > { %v5057_v1 = vsel %vm9148_vm15, %v6447_v2, 0.0 }
0x3d8a   : > { %5058 = vadd.xlane.f32.xlu2 %v5057_v1 }
0x3da2   : > { %5130 = vrot.lane.b32.xlu2 %v5129_v16, %s6754_s18 }
0x3dfd   : > { %v5059_v28 = vpop.xlane.xlu2 %5058 }
0x3dfe   : > { %6448 = vrcp.f32 %v5059_v28  ;;  %v5071_v39 = vand.u32 2147483648, %v5059_v28  ;;  %v5069_v5 = vand.u32 2147483647, %v5059_v28  ;;  %vm5065_vm8 = vweird.f32 %v5059_v28 }
0x3e00   : > { %v5072_v26 = vor.u32 1.1754944e-38, %v5071_v39  ;;  %vm5070_vm2 = vcmp.eq.f32.partialorder %v5069_v5, 8.507059e+37 }
0x3e04   : > { %v6449_v53 = vpop.eup %6448 }
0x3e05   : > { %v5061_v44 = vmul.f32 %v6449_v53, %v5059_v28  ;;  %v8795_v45 = vpop.permute.xlu2 %5130  ;;  %vm5066_vm12 = vweird.f32 %v6449_v53 }
0x3e06   : > { %6123 = vmatmul.msk.f32.vlgmr.msra.gmra.mxu1 %vm813_vm1, %v8795_v45  ;;  %6124 = vmatmul.msk.f32.vlgmr.msra.gmra.mxu2 %vm813_vm1, %v8795_v45  ;;  %vm5067_vm9 = vmor %vm5065_vm8, %vm5066_vm12  ;;  %vm9149_vm8 = vcmp.eq.s32.totalorder %v7235_v24, 6  ;;  %v5736_v24 = vld [vmem:[#allocation9] sm:$0xff] }
0x3e07   : > { %v5062_v32 = vsub.f32 1.0, %v5061_v44  ;;  %5477 = vmatpush.msra.mxu1 %v6543_v50 }
0x3e09   : > { %v5063_v6 = vmul.f32 %v6449_v53, %v5062_v32  ;;  %5478 = vmatpush.msra.mxu1 %v6544_v7 }
0x3e0b   : > { %v5064_v51 = vadd.f32 %v6449_v53, %v5063_v6  ;;  %5479 = vmatpush.msra.mxu1 %v6545_v46 }
0x3e0d   : > { %v5068_v47 = vsel %vm5067_vm9, %v6449_v53, %v5064_v51  ;;  %5480 = vmatpush.msra.mxu1 %v6546_v0  ;;  %vm9150_vm9 = vcmask 261127  }
0x3e0e   : > { %v5073_v49 = vsel %vm5070_vm2, %v5072_v26, %v5068_v47  ;;  %vm9151_vm2 = vmmov %vm9149_vm8 }
0x3e0f   : > { %v5074_v60 = vmul.f32 %v6447_v2, %v5073_v49 }
0x3e11   : > { %v5344_v3 = vperm.slane %v5074_v60, 6  ;;  %v5075_v37 = vmul.f32 %v8815_v42, %v5074_v60 }
0x3e13   : > { %v8819_v13 = vsel %vm5343_vm7, %v5344_v3, %v8683_v23  ;;  %v5106_v61 = vrot.slane %v5075_v37, 6  ;;  %v5076_v58 = vsub.f32 %v5074_v60, %v5075_v37  ;;  %v6550_v23 = vld [vmem:[%s9034_s8 + $0x50] sm:$0xff]  ;;  %vm9153_vm7 = vcmp.lt.s32.totalorder %v7247_v31, 7 }
0x3e15   : > { %6122 = vmatmul.msk.f32.vlgmr.msrb.gmra.mxu0 %vm1092_vm6, %v5106_v61  ;;  %v5078_v8 = vrot.slane %v5076_v58, 6 }
0x3e16   : > { %5457 = vmatpush.msrb.mxu0 %v6548_v19 }
0x3e17   : > { %6121 = vmatmul.msk.f32.vlgmr.msrb.gmra.mxu3 %vm1092_vm6, %v5078_v8 }
0x3e18   : > { %5458 = vmatpush.msrb.mxu0 %v6549_v17 }
0x3e1a   : > { %5459 = vmatpush.msrb.mxu0 %v6550_v23 }
0x3e1c   : > { %5460 = vmatpush.msrb.mxu0 %v6551_v33 }
0x3e83   : > { %v5151_v4 = vpop.f32.mrf.mxu1 }
0x3e84   : > { %v5152_v38 = vadd.f32 %v5151_v4, %v8127_v18 }
0x3e89   : > { %v5171_v56 = vpop.f32.mrf.mxu2 }
0x3e8a   : > { %v5172_v35 = vadd.f32 %v5171_v56, %v8123_v11 }
0x3e8c   : > { %5280 = vrot.lane.b32.xlu1 %v5172_v35, %s6752_s28 }
0x3e92   : > { %v5126_v25 = vpop.f32.mrf.mxu0 }
0x3e9a   : > { %v5102_v63 = vpop.f32.mrf.mxu3 }
0x3e9b   : > { %v5127_v48 = vadd.f32 %v5126_v25, %v5102_v63 }
0x3e9d   : > { %6125 = vmatmul.msk.f32.vlgmr.msra.gmra.mxu3 %vm813_vm1, %v5127_v48  ;;  %6126 = vmatmul.msk.f32.vlgmr.msra.gmra.mxu0 %vm813_vm1, %v5127_v48 }
0x3efe   : > { %v5281_v46 = vpop.permute.xlu1 %5280 }
0x3f1a   : > { %v5214_v60 = vpop.f32.mrf.mxu0 }
0x3f1b   : > { %v5215_v3 = vadd.f32 %v5214_v60, %v8140_v52 }
0x3f1d   : > { %v5259_v8 = vadd.f32 %v5215_v3, %v5172_v35 }
0x3f1f   : > { %v6128_v19 = vmul.f32 -1.442695, %v5259_v8 }
0x3f20   : > { %v5194_v15 = vpop.f32.mrf.mxu3 }
0x3f21   : > { %v5195_v30 = vadd.f32 %v5194_v15, %v8110_v62 }
0x3f23   : > { %v5217_v2 = vadd.f32 %v5195_v30, %v5152_v38  ;;  %5238 = vrot.lane.b32.xlu0 %v5195_v30, %s6752_s28 }
0x3f25   : > { %v6127_v1 = vmul.f32 -1.442695, %v5217_v2 }
0x3f27   : > { %6450 = vpow2.f32 %v6127_v1 }
0x3f2d   : > { %v6451_v16 = vpop.eup %6450 }
0x3f2e   : > { %v5221_v28 = vadd.f32 1.0, %v6451_v16 }
0x3f30   : > { %6452 = vrcp.f32 %v5221_v28  ;;  %v5233_v50 = vand.u32 2147483648, %v5221_v28  ;;  %v5231_v6 = vand.u32 2147483647, %v5221_v28  ;;  %vm5227_vm0 = vweird.f32 %v5221_v28 }
0x3f32   : > { %v5234_v7 = vor.u32 1.1754944e-38, %v5233_v50  ;;  %vm5232_vm10 = vcmp.eq.f32.partialorder %v5231_v6, 8.507059e+37 }
0x3f36   : > { %v6453_v53 = vpop.eup %6452 }
0x3f37   : > { %v5223_v44 = vmul.f32 %v6453_v53, %v5221_v28  ;;  %vm5228_vm4 = vweird.f32 %v6453_v53 }
0x3f38   : > { %vm5229_vm3 = vmor %vm5227_vm0, %vm5228_vm4  ;;  %vm9154_vm4 = vcmask 64519  }
0x3f39   : > { %v5224_v32 = vsub.f32 1.0, %v5223_v44  ;;  %vm9156_vm0 = vmmov %vm9154_vm4 }
0x3f3b   : > { %v5225_v39 = vmul.f32 %v6453_v53, %v5224_v32 }
0x3f3d   : > { %v5226_v5 = vadd.f32 %v6453_v53, %v5225_v39  ;;  %v5347_v39 = vmul.f32 %v8152_v22, %v8103_v34 }
0x3f3f   : > { %v5230_v51 = vsel %vm5229_vm3, %v6453_v53, %v5226_v5 }
0x3f40   : > { %v5235_v26 = vsel %vm5232_vm10, %v5234_v7, %v5230_v51 }
0x3f41   : > { %v5283_v47 = vmul.f32 %v5281_v46, %v5235_v26  ;;  %v5248_v5 = vsub.f32 1.0, %v5235_v26 }
0x3f43   : > { %5285 = vrot.lane.b32.xlu2 %v5283_v47, %s6752_s28 }
0x3f95   : > { %v5239_v0 = vpop.permute.xlu0 %5238 }
0x3f96   : > { %v5241_v49 = vmul.f32 %v5239_v0, %v5235_v26 }
0x3f98   : > { %5243 = vrot.lane.b32.xlu0 %v5241_v49, %s6752_s28 }
0x3f9d   : > { %v5286_v37 = vpop.permute.xlu2 %5285 }
0x3f9e   : > { %v5288_v61 = vadd.f32 %v5286_v37, %v5215_v3 }
0x3fa0   : > { %6454 = vtanh.f32 %v5288_v61  ;;  %5254 = vrot.lane.b32.xlu0 %v5127_v48, %s6753_s6 }
0x3fa1   : > { %6456 = vpow2.f32 %v6128_v19 }
0x3fa6   : > { %v6455_v58 = vpop.eup %6454 }
0x3fa7   : > { %5292 = vrot.lane.b32.xlu1 %v6455_v58, %s6754_s18  ;;  %v6457_v17 = vpop.eup %6456 }
0x3fa8   : > { %v5263_v23 = vadd.f32 1.0, %v6457_v17 }
0x3faa   : > { %6458 = vrcp.f32 %v5263_v23  ;;  %v5275_v2 = vand.u32 2147483648, %v5263_v23  ;;  %vm5269_vm14 = vweird.f32 %v5263_v23  ;;  %v5273_v48 = vand.u32 2147483647, %v5263_v23 }
0x3fac   : > { %v5276_v16 = vor.u32 1.1754944e-38, %v5275_v2  ;;  %vm5274_vm12 = vcmp.eq.f32.partialorder %v5273_v48, 8.507059e+37 }
0x3fb0   : > { %v6459_v33 = vpop.eup %6458 }
0x3fb1   : > { %v5265_v56 = vmul.f32 %v6459_v33, %v5263_v23  ;;  %vm5270_vm13 = vweird.f32 %v6459_v33 }
0x3fb2   : > { %vm5271_vm15 = vmor %vm5269_vm14, %vm5270_vm13 }
0x3fb3   : > { %v5266_v25 = vsub.f32 1.0, %v5265_v56 }
0x3fb5   : > { %v5267_v4 = vmul.f32 %v6459_v33, %v5266_v25 }
0x3fb7   : > { %v5268_v30 = vadd.f32 %v6459_v33, %v5267_v4 }
0x3fb9   : > { %v5272_v1 = vsel %vm5271_vm15, %v6459_v33, %v5268_v30  ;;  %vm5618_vm15 = vcmp.eq.s32.totalorder %v8317_v59, 14 }
0x3fba   : > { %v5277_v28 = vsel %vm5274_vm12, %v5276_v16, %v5272_v1  ;;  %vm5623_vm12 = vcmask 63488  }
0x3fbb   : > { %v5290_v53 = vsub.f32 1.0, %v5277_v28  ;;  %v5297_v32 = vmul.f32 %v5277_v28, %v8795_v45 }
0x400a   : > { %v5244_v63 = vpop.permute.xlu0 %5243 }
0x400b   : > { %v5246_v15 = vadd.f32 %v5244_v63, %v5152_v38 }
0x400d   : > { %6460 = vtanh.f32 %v5246_v15 }
0x4012   : > { %v5255_v7 = vpop.permute.xlu0 %5254 }
0x4013   : > { %v6461_v35 = vpop.eup %6460  ;;  %v5257_v46 = vmul.f32 %v5255_v7, %v5235_v26 }
0x4014   : > { %5250 = vrot.lane.b32.xlu2 %v6461_v35, %s6754_s18 }
0x4019   : > { %v5293_v44 = vpop.permute.xlu1 %5292 }
0x401a   : > { %v5295_v50 = vmul.f32 %v5293_v44, %v5290_v53 }
0x401c   : > { %v5298_v38 = vadd.f32 %v5297_v32, %v5295_v50 }
0x401e   : > { %5300 = vrot.lane.b32.xlu1 %v5298_v38, %s6753_s6 }
0x4026   : > { %5349 = vrot.lane.b32.xlu1 %v5347_v39, %s6754_s18 }
0x406e   : > { %v5251_v6 = vpop.permute.xlu2 %5250 }
0x406f   : > { %v5253_v51 = vmul.f32 %v5251_v6, %v5248_v5 }
0x4071   : > { %v5258_v47 = vadd.f32 %v5257_v46, %v5253_v51 }
0x4090   : > { %v5301_v0 = vpop.permute.xlu1 %5300 }
0x4091   : > { %v5303_v49 = vadd.f32 %v5301_v0, %v5258_v47 }
0x4093   : > { %v5304_v60 = vperm.slane %v5303_v49, 0  ;;  %v5333_v45 = vmul.f32 %v5303_v49, %v8152_v22  ;;  %5307 = vrot.lane.b32.xlu2 %v5303_v49, %s6754_s18 }
0x4095   : > { %5335 = vrot.lane.b32.xlu0 %v5333_v45, %s6754_s18  ;;  %v8859_v3 = vsel %vm9149_vm8, %v5304_v60, %v8720_v10 }
0x4098   : > { %v5350_v37 = vpop.permute.xlu1 %5349 }
0x4099   : > { %v5352_v61 = vsel %vm9150_vm9, %v5350_v37, 0.0 }
0x40bf   : > { %5353 = vadd.xlane.f32.xlu0 %v5352_v61 }
0x40ed   : > { %v5308_v26 = vpop.permute.xlu2 %5307 }
0x40ee   : > { %6129 = vmatmul.msk.f32.vlgmr.msrb.gmra.mxu1 %vm813_vm1, %v5308_v26 }
0x4107   : > { %v5336_v58 = vpop.permute.xlu0 %5335 }
0x4108   : > { %v5338_v8 = vsel %vm1030_vm11, %v5336_v58, 0.0  ;;  %vm9152_vm11 = vcmp.eq.s32.totalorder %v7247_v31, 6  ;;  %v5632_v31 = vld [vmem:[%s9155_s27 + $0x38] sm:$0xff] }
0x4109   : > { %5339 = vadd.xlane.f32.xlu2 %v5338_v8  ;;  %5655 = vmatpush.msra.mxu0 %v5632_v31 }
0x4132   : > { %v5354_v56 = vpop.xlane.xlu0 %5353 }
0x416b   : > { %v5328_v22 = vpop.f32.mrf.mxu1 }
0x416c   : > { %v5331_v19 = vperm.slane %v5328_v22, 0 }
0x416e   : > { %v5332_v17 = vsel %vm9151_vm2, %v5331_v19, %v8728_v57 }
0x416f   : > { %5435 = vmatpush.msrb.mxu3 %v5332_v17  ;;  %5391 = vrot.lane.b32.xlu0 %v5332_v17, %s6754_s18 }
0x4171   : > { %5520 = vmatpush.msra.mxu3 %v8736_v14 }
0x4173   : > { %5521 = vmatpush.msra.mxu3 %v8742_v9 }
0x4175   : > { %5522 = vmatpush.msra.mxu3 %v8748_v36  ;;  %v5440_v36 = vrot.slane %v8103_v34, 7  ;;  %v5631_v34 = vld [vmem:[%s9155_s27 + $0x30] sm:$0xff] }
0x4176   : > { %5656 = vmatpush.msra.mxu0 %v5631_v34 }
0x4177   : > { %5523 = vmatpush.msra.mxu3 %v8754_v54 }
0x417c   : > { %v5340_v10 = vpop.xlane.xlu2 %5339 }
0x417d   : > { %v5341_v23 = vsel %vm9152_vm11, %v5340_v10, %v8760_v29  ;;  %v5630_v29 = vld [vmem:[%s9155_s27 + $0x28] sm:$0xff] }
0x417e   : > { %v5356_v33 = vrot.slane %v5341_v23, 1  ;;  %5657 = vmatpush.msra.mxu0 %v5630_v29 }
0x4180   : > { %v5358_v25 = vadd.f32 %v5356_v33, %v5354_v56 }
0x4182   : > { %v5359_v57 = vadd.f32 %v5358_v25, %v8202_v12  ;;  %v5627_v12 = vld [vmem:[%s9155_s27 + $0x10] sm:$0xff] }
0x4184   : > { %v5360_v63 = vsub.f32 %v5359_v57, %v7262_v43  ;;  %v5628_v43 = vld [vmem:[%s9155_s27 + $0x18] sm:$0xff] }
0x4185   : > { %5675 = vmatpush.msrb.mxu1 %v5628_v43 }
0x4186   : > { %v5361_v14 = vsel %vm9153_vm7, %v5360_v63, -1e+38 }
0x4187   : > { %v5362_v9 = vsel %vm9154_vm4, %v5361_v14, -inf  ;;  %5676 = vmatpush.msrb.mxu1 %v5627_v12 }
0x4188   : > { %5363 = vmax.xlane.f32.xlu1 %v5362_v9 }
0x41a1   : > { %5441 = vrot.lane.b32.xlu1 %v5440_v36, %s6754_s18 }
0x41e1   : > { %v5392_v54 = vpop.permute.xlu0 %5391 }
0x41e2   : > { %5411 = vmatpush.msrb.mxu2 %v5392_v54 }
0x41e4   : > { %5500 = vmatpush.msra.mxu2 %v8771_v55  ;;  %v5626_v55 = vld [vmem:[%s9155_s27 + $0x8] sm:$0xff] }
0x41e5   : > { %5677 = vmatpush.msrb.mxu1 %v5626_v55 }
0x41e6   : > { %5501 = vmatpush.msra.mxu2 %v8777_v20  ;;  %v5629_v20 = vld [vmem:[%s9155_s27 + $0x20] sm:$0xff] }
0x41e7   : > { %5658 = vmatpush.msra.mxu0 %v5629_v20 }
0x41e8   : > { %5502 = vmatpush.msra.mxu2 %v8783_v21  ;;  %v5625_v21 = vld [vmem:[%s9155_s27] sm:$0xff] }
0x41e9   : > { %5678 = vmatpush.msrb.mxu1 %v5625_v21 }
0x41ea   : > { %5503 = vmatpush.msra.mxu2 %v8789_v41 }
0x41fb   : > { %v5364_v41 = vpop.xlane.xlu1 %5363 }
0x41fc   : > { %v5365_v4 = vsub.f32 %v5361_v14, %v5364_v41 }
0x41fe   : > { %v5366_v15 = vmul.f32 1.442695, %v5365_v4 }
0x4200   : > { %6462 = vpow2.f32 %v5366_v15 }
0x4206   : > { %v6463_v30 = vpop.eup %6462 }
0x4207   : > { %v5368_v2 = vsel %vm9156_vm0, %v6463_v30, 0.0 }
0x4208   : > { %5369 = vadd.xlane.f32.xlu2 %v5368_v2 }
0x4213   : > { %v8911_v48 = vpop.permute.xlu1 %5441 }
0x4214   : > { %6132 = vmatmul.msk.f32.vlgmr.msrb.gmra.mxu0 %vm813_vm1, %v8911_v48  ;;  %6133 = vmatmul.msk.f32.vlgmr.msra.gmra.mxu1 %vm813_vm1, %v8911_v48 }
0x421c   : > { %6138 = vmatmul.msk.f32.vlgmr.msra.gmra.mxu0 %vm813_vm1, %v8114_v40  ;;  %6139 = vmatmul.msk.f32.vlgmr.msrb.gmra.mxu1 %vm813_vm1, %v7141_v27 }
0x427b   : > { %v5370_v1 = vpop.xlane.xlu2 %5369 }
0x427c   : > { %6464 = vrcp.f32 %v5370_v1  ;;  %v5382_v53 = vand.u32 2147483648, %v5370_v1  ;;  %v5380_v32 = vand.u32 2147483647, %v5370_v1  ;;  %vm5376_vm10 = vweird.f32 %v5370_v1 }
0x427e   : > { %v5383_v38 = vor.u32 1.1754944e-38, %v5382_v53  ;;  %vm5381_vm14 = vcmp.eq.f32.partialorder %v5380_v32, 8.507059e+37 }
0x4282   : > { %v6465_v35 = vpop.eup %6464 }
0x4283   : > { %v5372_v16 = vmul.f32 %v6465_v35, %v5370_v1  ;;  %vm5377_vm3 = vweird.f32 %v6465_v35 }
0x4284   : > { %vm5378_vm13 = vmor %vm5376_vm10, %vm5377_vm3  ;;  %vm9157_vm3 = vcmask 392192  }
0x4285   : > { %v5373_v28 = vsub.f32 1.0, %v5372_v16 }
0x4287   : > { %v5374_v44 = vmul.f32 %v6465_v35, %v5373_v28 }
0x4289   : > { %v5375_v50 = vadd.f32 %v6465_v35, %v5374_v44 }
0x428b   : > { %v5379_v39 = vsel %vm5378_vm13, %v6465_v35, %v5375_v50 }
0x428c   : > { %v5384_v40 = vsel %vm5381_vm14, %v5383_v38, %v5379_v39 }
0x428d   : > { %v5385_v6 = vmul.f32 %v6463_v30, %v5384_v40 }
0x428f   : > { %v5386_v27 = vmul.f32 %v8815_v42, %v5385_v6  ;;  %v5619_v5 = vperm.slane %v5385_v6, 7 }
0x4291   : > { %v5387_v7 = vsub.f32 %v5385_v6, %v5386_v27  ;;  %v5621_v51 = vsel %vm5618_vm15, %v5619_v5, %v8819_v13  ;;  %v5482_v46 = vpop.f32.mrf.mxu1  ;;  %v5417_v47 = vrot.slane %v5386_v27, 7  ;;  %v5462_v42 = vpop.f32.mrf.mxu0  ;;  %v5642_v6 = vld [vmem:[%s9155_s27 + $0x88] sm:$0xff]  ;;  %v5636_v27 = vld [vmem:[%s9155_s27 + $0x58] sm:$0xff]  ;;  %v5641_v5 = vld [vmem:[%s9155_s27 + $0x80] sm:$0xff] }
0x4292   : > { %5624 = vst.msk [vmem:[%s7969_s1 + $0x8] sm:$0x7f] %vm5623_vm12, %v5621_v51  ;;  %v5483_v0 = vadd.f32 %v5482_v46, %v8123_v11  ;;  %v5463_v37 = vadd.f32 %v5462_v42, %v8127_v18  ;;  %v5634_v51 = vld [vmem:[%s9155_s27 + $0x48] sm:$0xff]  ;;  %v5639_v46 = vld [vmem:[%s9155_s27 + $0x70] sm:$0xff] }
0x4293   : > { %v5389_v49 = vrot.slane %v5387_v7, 7  ;;  %6131 = vmatmul.msk.f32.vlgmr.msrb.gmra.mxu3 %vm1092_vm6, %v5417_v47  ;;  %v5640_v7 = vld [vmem:[%s9155_s27 + $0x78] sm:$0xff]  ;;  %v5633_v47 = vld [vmem:[%s9155_s27 + $0x40] sm:$0xff] }
0x4294   : > { %5591 = vrot.lane.b32.xlu2 %v5483_v0, %s6752_s28  ;;  %5719 = vmatpush.msrb.mxu3 %v5642_v6 }
0x4295   : > { %6130 = vmatmul.msk.f32.vlgmr.msrb.gmra.mxu2 %vm1092_vm6, %v5389_v49 }
0x4296   : > { %5700 = vmatpush.msrb.mxu2 %v5636_v27  ;;  %5720 = vmatpush.msrb.mxu3 %v5641_v5 }
0x4298   : > { %5721 = vmatpush.msrb.mxu3 %v5640_v7 }
0x429a   : > { %5722 = vmatpush.msrb.mxu3 %v5639_v46 }
0x42ee   : > { %v5592_v25 = vpop.permute.xlu2 %5591 }
0x4316   : > { %v5437_v59 = vpop.f32.mrf.mxu3 }
0x4318   : > { %v5413_v60 = vpop.f32.mrf.mxu2 }
0x4319   : > { %v5438_v45 = vadd.f32 %v5437_v59, %v5413_v60 }
0x431b   : > { %6134 = vmatmul.msk.f32.vlgmr.msra.gmra.mxu2 %vm813_vm1, %v5438_v45  ;;  %6135 = vmatmul.msk.f32.vlgmr.msra.gmra.mxu3 %vm813_vm1, %v5438_v45 }
0x439e   : > { %v5505_v13 = vpop.f32.mrf.mxu2  ;;  %v5525_v36 = vpop.f32.mrf.mxu3 }
0x439f   : > { %v5506_v11 = vadd.f32 %v5505_v13, %v8110_v62  ;;  %v5526_v54 = vadd.f32 %v5525_v36, %v8140_v52 }
0x43a1   : > { %v5528_v61 = vadd.f32 %v5506_v11, %v5463_v37  ;;  %5549 = vrot.lane.b32.xlu0 %v5506_v11, %s6752_s28  ;;  %v5570_v12 = vadd.f32 %v5526_v54, %v5483_v0  ;;  %v5638_v0 = vld [vmem:[%s9155_s27 + $0x68] sm:$0xff] }
0x43a2   : > { %5723 = vmatpush.msrb.mxu3 %v5638_v0 }
0x43a3   : > { %v6136_v26 = vmul.f32 -1.442695, %v5528_v61  ;;  %v6137_v29 = vmul.f32 -1.442695, %v5570_v12 }
0x43a5   : > { %6466 = vpow2.f32 %v6136_v26 }
0x43ab   : > { %v6467_v58 = vpop.eup %6466 }
0x43ac   : > { %v5532_v8 = vadd.f32 1.0, %v6467_v58  ;;  %v5637_v58 = vld [vmem:[%s9155_s27 + $0x60] sm:$0xff] }
0x43ad   : > { %5724 = vmatpush.msrb.mxu3 %v5637_v58 }
0x43ae   : > { %6468 = vrcp.f32 %v5532_v8  ;;  %v5544_v10 = vand.u32 2147483648, %v5532_v8  ;;  %v5542_v33 = vand.u32 2147483647, %v5532_v8  ;;  %vm5538_vm8 = vweird.f32 %v5532_v8 }
0x43b0   : > { %v5545_v18 = vor.u32 1.1754944e-38, %v5544_v10  ;;  %vm5543_vm2 = vcmp.eq.f32.partialorder %v5542_v33, 8.507059e+37  ;;  %v5737_v10 = vld [vmem:[#allocation9 + $0x8] sm:$0xff]  ;;  %v5660_v33 = vpop.f32.mrf.mxu0 }
0x43b4   : > { %v6469_v22 = vpop.eup %6468 }
0x43b5   : > { %v5534_v19 = vmul.f32 %v6469_v22, %v5532_v8  ;;  %vm5539_vm6 = vweird.f32 %v6469_v22  ;;  %v6552_v8 = vld [vmem:[%s632_s29] sm:$0xff]  ;;  %s735_s29 = scalar_lea.vmem %s9162_s3, %s5978_s21 }
0x43b6   : > { %vm5540_vm9 = vmor %vm5538_vm8, %vm5539_vm6  ;;  %6141 = vmatmul.msk.f32.vlgmr.msrb.gmra.mxu3 %vm9157_vm3, %v6552_v8 }
0x43b7   : > { %v5535_v17 = vsub.f32 1.0, %v5534_v19  ;;  %v5739_v19 = vld [vmem:[#allocation9 + $0x18] sm:$0xff] }
0x43b8   : > { %5759 = vmatpush.msrb.mxu0 %v5739_v19 }
0x43b9   : > { %v5536_v23 = vmul.f32 %v6469_v22, %v5535_v17  ;;  %v5738_v17 = vld [vmem:[#allocation9 + $0x10] sm:$0xff] }
0x43ba   : > { %5760 = vmatpush.msrb.mxu0 %v5738_v17 }
0x43bb   : > { %v5537_v56 = vadd.f32 %v6469_v22, %v5536_v23  ;;  %v5770_v23 = vld [vmem:[%s9158_s13 + $0x10] sm:$0xff] }
0x43bc   : > { %5761 = vmatpush.msrb.mxu0 %v5737_v10 }
0x43bd   : > { %v5541_v62 = vsel %vm5540_vm9, %v6469_v22, %v5537_v56  ;;  %v5680_v56 = vpop.f32.mrf.mxu1 }
0x43be   : > { %v8934_v57 = vsel %vm5543_vm2, %v5545_v18, %v5541_v62  ;;  %5762 = vmatpush.msrb.mxu0 %v5736_v24  ;;  %v5681_v18 = vadd.f32 %v5680_v56, %v5660_v33 }
0x43bf   : > { %v5594_v63 = vmul.f32 %v5592_v25, %v8934_v57  ;;  %v5559_v59 = vsub.f32 1.0, %v8934_v57 }
0x43c1   : > { %5596 = vrot.lane.b32.xlu1 %v5594_v63, %s6752_s28  ;;  %v6227_v63 = vld [vmem:[%s9159_s0] ss:$0 sm:$0xff] }
0x4413   : > { %v5550_v14 = vpop.permute.xlu0 %5549 }
0x4414   : > { %v5552_v9 = vmul.f32 %v5550_v14, %v8934_v57 }
0x4416   : > { %5554 = vrot.lane.b32.xlu0 %v5552_v9, %s6752_s28 }
0x441e   : > { %5565 = vrot.lane.b32.xlu0 %v5438_v45, %s6753_s6 }
0x4433   : > { %v5597_v31 = vpop.permute.xlu1 %5596 }
0x4434   : > { %v5599_v43 = vadd.f32 %v5597_v31, %v5526_v54  ;;  %v5769_v54 = vld [vmem:[%s9158_s13 + $0x8] sm:$0xff]  ;;  %v5768_v31 = vld [vmem:[%s9158_s13] sm:$0xff] }
0x4436   : > { %6470 = vtanh.f32 %v5599_v43  ;;  %v6228_v43 = vld [vmem:[%s9160_s22] ss:$0 sm:$0xff] }
0x4437   : > { %6472 = vpow2.f32 %v6137_v29 }
0x4439   : > { %v5726_v25 = vpop.f32.mrf.mxu3 }
0x443c   : > { %v6471_v34 = vpop.eup %6470 }
0x443d   : > { %5603 = vrot.lane.b32.xlu2 %v6471_v34, %s6754_s18  ;;  %v6473_v55 = vpop.eup %6472 }
0x443e   : > { %v5574_v20 = vadd.f32 1.0, %v6473_v55 }
0x4440   : > { %6474 = vrcp.f32 %v5574_v20  ;;  %v5586_v1 = vand.u32 2147483648, %v5574_v20  ;;  %vm5580_vm7 = vweird.f32 %v5574_v20  ;;  %v5584_v35 = vand.u32 2147483647, %v5574_v20 }
0x4442   : > { %v5587_v53 = vor.u32 1.1754944e-38, %v5586_v1  ;;  %vm5585_vm0 = vcmp.eq.f32.partialorder %v5584_v35, 8.507059e+37 }
0x4446   : > { %v6475_v21 = vpop.eup %6474 }
0x4447   : > { %v5576_v41 = vmul.f32 %v6475_v21, %v5574_v20  ;;  %vm5581_vm11 = vweird.f32 %v6475_v21 }
0x4448   : > { %vm5582_vm4 = vmor %vm5580_vm7, %vm5581_vm11 }
0x4449   : > { %v5577_v4 = vsub.f32 1.0, %v5576_v41 }
0x444b   : > { %v5578_v30 = vmul.f32 %v6475_v21, %v5577_v4 }
0x444d   : > { %v5579_v52 = vadd.f32 %v6475_v21, %v5578_v30 }
0x444f   : > { %v5583_v16 = vsel %vm5582_vm4, %v6475_v21, %v5579_v52 }
0x4450   : > { %v5588_v44 = vsel %vm5585_vm0, %v5587_v53, %v5583_v16 }
0x4451   : > { %v5601_v32 = vsub.f32 1.0, %v5588_v44  ;;  %v5608_v38 = vmul.f32 %v5588_v44, %v8911_v48  ;;  %v5635_v48 = vld [vmem:[%s9155_s27 + $0x50] sm:$0xff] }
0x4452   : > { %5701 = vmatpush.msrb.mxu2 %v5635_v48 }
0x4454   : > { %5702 = vmatpush.msrb.mxu2 %v5634_v51 }
0x4456   : > { %5703 = vmatpush.msrb.mxu2 %v5633_v47 }
0x4488   : > { %v5555_v15 = vpop.permute.xlu0 %5554 }
0x4489   : > { %v5557_v2 = vadd.f32 %v5555_v15, %v5463_v37 }
0x448b   : > { %6476 = vtanh.f32 %v5557_v2 }
0x4490   : > { %v5566_v49 = vpop.permute.xlu0 %5565 }
0x4491   : > { %v6477_v28 = vpop.eup %6476  ;;  %v5568_v45 = vmul.f32 %v5566_v49, %v8934_v57 }
0x4492   : > { %5561 = vrot.lane.b32.xlu1 %v6477_v28, %s6754_s18 }
0x4497   : > { %v5604_v50 = vpop.permute.xlu2 %5603 }
0x4498   : > { %v5606_v39 = vmul.f32 %v5604_v50, %v5601_v32 }
0x449a   : > { %v5609_v40 = vadd.f32 %v5608_v38, %v5606_v39 }
0x449c   : > { %5611 = vrot.lane.b32.xlu2 %v5609_v40, %s6753_s6 }
0x44f6   : > { %v5612_v37 = vpop.permute.xlu2 %5611 }
0x4504   : > { %v5562_v60 = vpop.permute.xlu1 %5561 }
0x4505   : > { %v5564_v42 = vmul.f32 %v5562_v60, %v5559_v59 }
0x4507   : > { %v5569_v13 = vadd.f32 %v5568_v45, %v5564_v42 }
0x4509   : > { %v5614_v11 = vadd.f32 %v5612_v37, %v5569_v13 }
0x450b   : > { %v5615_v61 = vperm.slane %v5614_v11, 0 }
0x450d   : > { %v5616_v26 = vsel %vm3189_vm5, %v5615_v61, %v8859_v3  ;;  %v5771_v3 = vld [vmem:[%s9158_s13 + $0x18] sm:$0xff]  ;;  %vm5799_vm5 = vcmask 48128  }
0x450e   : > { %5684 = vrot.lane.b32.xlu1 %v5616_v26, %s6754_s18  ;;  %5791 = vmatpush.msra.mxu1 %v5771_v3  ;;  %s9161_s18 = sld [smem:[#allocation26_spill]] }
0x4510   : > { %5792 = vmatpush.msra.mxu1 %v5770_v23 }
0x4512   : > { %5793 = vmatpush.msra.mxu1 %v5769_v54 }
0x4514   : > { %5794 = vmatpush.msra.mxu1 %v5768_v31  ;;  %v6229_v55 = vld [vmem:[%s9161_s18] ss:$0 sm:$0xff] }
0x4580   : > { %v5685_v22 = vpop.permute.xlu1 %5684 }
0x4581   : > { %6140 = vmatmul.msk.f32.vlgmr.msrb.gmra.mxu2 %vm813_vm1, %v5685_v22 }
0x4604   : > { %v5705_v62 = vpop.f32.mrf.mxu2 }
0x4605   : > { %v5708_v57 = vadd.f32 %v5705_v62, %v5681_v18 }
0x4607   : > { %v5729_v14 = vadd.f32 %v5726_v25, %v5708_v57 }
0x4609   : > { %v5734_v9 = vadd.f32 %v6227_v63, %v5729_v14 }
0x460b   : > { %v5735_v36 = vmax.f32 %v5734_v9, 0.0 }
0x460d   : > { %6142 = vmatmul.msk.f32.vlgmr.msrb.gmra.mxu0 %vm813_vm1, %v5735_v36 }
0x468a   : > { %v5764_v34 = vpop.f32.mrf.mxu0 }
0x468b   : > { %v5765_v12 = vadd.f32 %v6228_v43, %v5764_v34 }
0x468d   : > { %v5767_v29 = vmax.f32 %v5765_v12, 0.0 }
0x468f   : > { %6143 = vmatmul.msk.f32.vlgmr.msra.gmra.mxu1 %vm813_vm1, %v5767_v29 }
0x470c   : > { %v5796_v20 = vpop.f32.mrf.mxu1 }
0x470d   : > { %v5797_v21 = vadd.f32 %v6229_v55, %v5796_v20 }
0x470f   : > { %5800 = vst.msk [vmem:[%s735_s29] sm:$0xff] %vm5799_vm5, %v5797_v21 }
0x4710 PF: > { %s9163_s21 = sld [smem:[#allocation13_spill]]  ;;  %s9165_s0 = smov %s6737_s30 }
0x4711   : > { %s9164_s24 = sld [smem:[#allocation14_spill]]  ;;  %s9166_s30 = smov %s6741_s20 }
0x4716   : > { %p34_p3 = scmp.ge.s32.totalorder %s9163_s21, 4  }
0x4717   : > { %s9167_s20 = smov %s9164_s24 }
0x4718   :  { %36 = sbr.rel (!%p34_p3) target bundleno = 21 (0x15), region = 183 }
0x471d   :  { %5836 = vsyncpa [#allocation3], 1 }
0x471e   :  { %5838 = vsyncpa [#allocation3 + $0x1], 1 }
0x471f   :  { %5839 = vsyncpa [#allocation5], 1 }
0x4720   :  { %5841 = vsyncpa [#allocation5 + $0x1], 1 }
0x4721   :  { %5842 = vsyncpa [#allocation8], 1 }

</bundles_post_ra>
